<compile_context>
chip_gen: v6e
topology: v6e:2x2x1
jax: 0.10.0
libtpu: 0.0.40
codegen_flags: <defaults>
</compile_context>

<pallas_src>
import functools

import jax
import jax.numpy as jnp
from jax import lax
from jax.experimental import pallas as pl
from jax.experimental.pallas import tpu as pltpu

BN_EPS = 1e-5


def _vgg_block_kernel(x_ref, w1_ref, b1_ref, w2_ref, b2_ref, o_ref, *,
                      H, W, We, Cin, Cmid, Cout):
    """Fused conv1+BN1+ReLU -> conv2+BN2+ReLU for one batch image (NHWC).

    x_ref : (1, H+4, We+2, Cin) bf16 -- input zero-padded by 2 rows and (2, We-W) cols.
    w*_ref: (9*Cin, Cmid) / (9*Cmid, Cout) bf16 -- BN-folded im2col weights.
    b*_ref: (1, Cmid) / (1, Cout) f32 -- BN-folded biases.
    o_ref : (1, H, W, Cout) f32.
    """
    He = H + 2  # extended stage-1 height (interior H rows + 1-pixel halo ring)

    # ---------------- stage 1: conv1 (+folded BN1) + ReLU on (He, We) ------------
    # Slicing is done in f32 (same op class as the previously-validated kernel);
    # the MXU operands are cast to bf16 just before the dot.
    xp = x_ref[0].astype(jnp.float32)                       # (He+2, We+2, Cin)
    cols = []
    for dy in range(3):
        for dx in range(3):
            cols.append(xp[dy:dy + He, dx:dx + We, :].reshape(He * We, Cin))
    patches1 = jnp.concatenate(cols, axis=1).astype(jnp.bfloat16)  # (He*We, 9*Cin)
    acc1 = jnp.dot(patches1, w1_ref[...], preferred_element_type=jnp.float32)
    y1 = jnp.maximum(acc1 + b1_ref[...], 0.0)               # (He*We, Cmid) f32

    # Zero everything outside the true HxW interior.  The result equals conv1's
    # output zero-padded by one pixel -- exactly what conv2 (padding=1) consumes.
    y1 = y1.reshape(He, We, Cmid)
    row = lax.broadcasted_iota(jnp.int32, (He, We, 1), 0)
    col = lax.broadcasted_iota(jnp.int32, (He, We, 1), 1)
    interior = (row >= 1) & (row <= H) & (col >= 1) & (col <= W)
    y1p = jnp.where(interior, y1, 0.0)                      # (He, We, Cmid)

    # ---------------- stage 2: conv2 (+folded BN2) + ReLU on (H, W) --------------
    cols2 = []
    for dy in range(3):
        for dx in range(3):
            cols2.append(y1p[dy:dy + H, dx:dx + W, :].reshape(H * W, Cmid))
    patches2 = jnp.concatenate(cols2, axis=1).astype(jnp.bfloat16)  # (H*W, 9*Cmid)
    acc2 = jnp.dot(patches2, w2_ref[...], preferred_element_type=jnp.float32)
    y2 = jnp.maximum(acc2 + b2_ref[...], 0.0)               # (H*W, Cout) f32

    # TODO(synk): Dropout reproduced as inference-mode identity (training-mode
    # stochastic masking has no deterministic equivalent here).
    o_ref[0] = y2.reshape(H, W, Cout).astype(o_ref.dtype)


def _fold_conv_bn(w_oihw, b, gamma, beta, mean, var):
    """Fold eval-mode BatchNorm into the conv: returns bf16 (9*Cin, Cout) weight
    and f32 (1, Cout) bias such that relu(im2col @ w + b) == relu(BN(conv(x)+b0))."""
    scale = gamma / jnp.sqrt(var + BN_EPS)                  # (Cout,)
    w_hwio = jnp.transpose(w_oihw, (2, 3, 1, 0)) * scale    # (3, 3, Cin, Cout)
    kh, kw, cin, cout = w_hwio.shape
    w_mat = w_hwio.reshape(kh * kw * cin, cout).astype(jnp.bfloat16)
    b_fold = ((b - mean) * scale + beta).reshape(1, cout).astype(jnp.float32)
    return w_mat, b_fold


def vgg_block_forward_nhwc(x_nhwc, params):
    """VGGBlock forward, NHWC in / NHWC out (no layout transposes)."""
    N, H, W, Cin = x_nhwc.shape
    w1, b1 = _fold_conv_bn(params["conv1_w"], params["conv1_b"],
                           params["bn1_gamma"], params["bn1_beta"],
                           params["bn1_mean"], params["bn1_var"])
    w2, b2 = _fold_conv_bn(params["conv2_w"], params["conv2_b"],
                           params["bn2_gamma"], params["bn2_beta"],
                           params["bn2_mean"], params["bn2_var"])
    Cmid, Cout = w1.shape[1], w2.shape[1]

    # Extended stage-1 width, rounded up to a multiple of 8 so every in-kernel
    # reshape keeps the lane dim and collapses fully-dense sublane pages only.
    We = ((W + 2 + 7) // 8) * 8
    # Single pad pass of the (cheap, bf16) input: 2 rows top/bottom, 2 cols left,
    # (We - W) cols right.  No other HBM pass of activations happens outside the
    # kernel.
    xpad = jnp.pad(x_nhwc.astype(jnp.bfloat16),
                   ((0, 0), (2, 2), (2, We - W), (0, 0)))

    kern = functools.partial(_vgg_block_kernel, H=H, W=W, We=We,
                             Cin=Cin, Cmid=Cmid, Cout=Cout)
    return pl.pallas_call(
        kern,
        out_shape=jax.ShapeDtypeStruct((N, H, W, Cout), jnp.float32),
        grid=(N,),
        in_specs=[
            pl.BlockSpec((1, H + 4, We + 2, Cin), lambda n: (n, 0, 0, 0)),
            pl.BlockSpec((9 * Cin, Cmid), lambda n: (0, 0)),
            pl.BlockSpec((1, Cmid), lambda n: (0, 0)),
            pl.BlockSpec((9 * Cmid, Cout), lambda n: (0, 0)),
            pl.BlockSpec((1, Cout), lambda n: (0, 0)),
        ],
        out_specs=pl.BlockSpec((1, H, W, Cout), lambda n: (n, 0, 0, 0)),
        compiler_params=pltpu.CompilerParams(
            dimension_semantics=("parallel",),
            vmem_limit_bytes=48 * 1024 * 1024,   # fits v7x 64 MiB, > v6e 32 MiB default
        ),
    )(xpad, w1, b1, w2, b2)


def vgg_block_forward(x_nchw, params):
    """PyTorch-layout wrapper: NCHW in / NCHW out (transposes only at the boundary)."""
    x = jnp.transpose(x_nchw, (0, 2, 3, 1))                 # NCHW -> NHWC
    y = vgg_block_forward_nhwc(x, params)
    return jnp.transpose(y, (0, 3, 1, 2))                   # NHWC -> NCHW


def _reference(x_nchw, params):
    """Pure-JAX f32 reference (same eval-mode semantics) for validation."""
    out = x_nchw
    for i in (1, 2):
        w, b = params[f"conv{i}_w"], params[f"conv{i}_b"]
        out = lax.conv_general_dilated(
            out, w, window_strides=(1, 1), padding=((1, 1), (1, 1)),
            dimension_numbers=("NCHW", "OIHW", "NCHW"))
        out = out + b[None, :, None, None]
        scale = params[f"bn{i}_gamma"] / jnp.sqrt(params[f"bn{i}_var"] + BN_EPS)
        shift = params[f"bn{i}_beta"] - params[f"bn{i}_mean"] * scale
        out = out * scale[None, :, None, None] + shift[None, :, None, None]
        out = jnp.maximum(out, 0.0)
    return out


def make_params(key, in_channels, middle_channels, out_channels):
    ks = jax.random.split(key, 12)
    p = {}
    p["conv1_w"] = 0.1 * jax.random.normal(
        ks[0], (middle_channels, in_channels, 3, 3), jnp.float32)
    p["conv1_b"] = 0.1 * jax.random.normal(ks[1], (middle_channels,), jnp.float32)
    p["bn1_gamma"] = 1.0 + 0.1 * jax.random.normal(ks[2], (middle_channels,), jnp.float32)
    p["bn1_beta"] = 0.1 * jax.random.normal(ks[3], (middle_channels,), jnp.float32)
    p["bn1_mean"] = 0.1 * jax.random.normal(ks[4], (middle_channels,), jnp.float32)
    p["bn1_var"] = jax.random.uniform(ks[5], (middle_channels,), jnp.float32, 0.5, 1.5)
    p["conv2_w"] = 0.1 * jax.random.normal(
        ks[6], (out_channels, middle_channels, 3, 3), jnp.float32)
    p["conv2_b"] = 0.1 * jax.random.normal(ks[7], (out_channels,), jnp.float32)
    p["bn2_gamma"] = 1.0 + 0.1 * jax.random.normal(ks[8], (out_channels,), jnp.float32)
    p["bn2_beta"] = 0.1 * jax.random.normal(ks[9], (out_channels,), jnp.float32)
    p["bn2_mean"] = 0.1 * jax.random.normal(ks[10], (out_channels,), jnp.float32)
    p["bn2_var"] = jax.random.uniform(ks[11], (out_channels,), jnp.float32, 0.5, 1.5)
    return p


if __name__ == "__main__":
    key = jax.random.PRNGKey(0)
    k_x, k_p = jax.random.split(key)

    N, Cin, Cmid, Cout, H, W = 2, 4, 8, 8, 16, 16
    x = jax.random.normal(k_x, (N, Cin, H, W), jnp.float32)   # NCHW like PyTorch
    params = make_params(k_p, Cin, Cmid, Cout)

    out = jax.block_until_ready(vgg_block_forward(x, params))
    ref = jax.block_until_ready(_reference(x, params))

    assert out.shape == (N, Cout, H, W), out.shape
    # bf16 matmul operands (f32 accumulation) -> slightly looser tolerance.
    assert jnp.allclose(out, ref, rtol=2e-2, atol=2e-2), float(
        jnp.max(jnp.abs(out - ref)))

    print("KERNEL_OK")
</pallas_src>

<mosaic_0001>
module attributes {stable_mosaic.version = 11 : i64} {
  func.func @_vgg_block_kernel(%arg0: i32, %arg1: memref<1x20x26x4xbf16, #tpu.memory_space<vmem>>, %arg2: memref<36x8xbf16, #tpu.memory_space<vmem>>, %arg3: memref<1x8xf32, #tpu.memory_space<vmem>>, %arg4: memref<72x8xbf16, #tpu.memory_space<vmem>>, %arg5: memref<1x8xf32, #tpu.memory_space<vmem>>, %arg6: memref<1x16x16x8xf32, #tpu.memory_space<vmem>>) attributes {dimension_semantics = [#tpu.dimension_semantics<parallel>], iteration_bounds = array<i64: 2>, scalar_prefetch = 0 : i64, scratch_operands = 0 : i64, tpu.core_type = #tpu.core_type<tc>, window_params = [{transform_indices = @transform_0, window_bounds = array<i64: 1, 20, 26, 4>}, {pipeline_mode = #tpu.pipeline_mode<synchronous>, transform_indices = @transform_1, window_bounds = array<i64: 36, 8>}, {pipeline_mode = #tpu.pipeline_mode<synchronous>, transform_indices = @transform_2, window_bounds = array<i64: 1, 8>}, {pipeline_mode = #tpu.pipeline_mode<synchronous>, transform_indices = @transform_3, window_bounds = array<i64: 72, 8>}, {pipeline_mode = #tpu.pipeline_mode<synchronous>, transform_indices = @transform_4, window_bounds = array<i64: 1, 8>}, {transform_indices = @transform_5, window_bounds = array<i64: 1, 16, 16, 8>}]} {
    %c0 = arith.constant 0 : index
    %c0_0 = arith.constant 0 : index
    %c0_1 = arith.constant 0 : index
    %c0_2 = arith.constant 0 : index
    %0 = vector.load %arg1[%c0, %c0_0, %c0_1, %c0_2] : memref<1x20x26x4xbf16, #tpu.memory_space<vmem>>, vector<1x20x26x4xbf16>
    %1 = vector.shape_cast %0 : vector<1x20x26x4xbf16> to vector<20x26x4xbf16>
    %2 = arith.extf %1 : vector<20x26x4xbf16> to vector<20x26x4xf32>
    %3 = vector.extract_strided_slice %2 {offsets = [0, 0, 0], sizes = [18, 24, 4], strides = [1, 1, 1]} : vector<20x26x4xf32> to vector<18x24x4xf32>
    %4 = vector.shape_cast %3 : vector<18x24x4xf32> to vector<432x4xf32>
    %5 = vector.extract_strided_slice %2 {offsets = [0, 1, 0], sizes = [18, 24, 4], strides = [1, 1, 1]} : vector<20x26x4xf32> to vector<18x24x4xf32>
    %6 = vector.shape_cast %5 : vector<18x24x4xf32> to vector<432x4xf32>
    %7 = vector.extract_strided_slice %2 {offsets = [0, 2, 0], sizes = [18, 24, 4], strides = [1, 1, 1]} : vector<20x26x4xf32> to vector<18x24x4xf32>
    %8 = vector.shape_cast %7 : vector<18x24x4xf32> to vector<432x4xf32>
    %9 = vector.extract_strided_slice %2 {offsets = [1, 0, 0], sizes = [18, 24, 4], strides = [1, 1, 1]} : vector<20x26x4xf32> to vector<18x24x4xf32>
    %10 = vector.shape_cast %9 : vector<18x24x4xf32> to vector<432x4xf32>
    %11 = vector.extract_strided_slice %2 {offsets = [1, 1, 0], sizes = [18, 24, 4], strides = [1, 1, 1]} : vector<20x26x4xf32> to vector<18x24x4xf32>
    %12 = vector.shape_cast %11 : vector<18x24x4xf32> to vector<432x4xf32>
    %13 = vector.extract_strided_slice %2 {offsets = [1, 2, 0], sizes = [18, 24, 4], strides = [1, 1, 1]} : vector<20x26x4xf32> to vector<18x24x4xf32>
    %14 = vector.shape_cast %13 : vector<18x24x4xf32> to vector<432x4xf32>
    %15 = vector.extract_strided_slice %2 {offsets = [2, 0, 0], sizes = [18, 24, 4], strides = [1, 1, 1]} : vector<20x26x4xf32> to vector<18x24x4xf32>
    %16 = vector.shape_cast %15 : vector<18x24x4xf32> to vector<432x4xf32>
    %17 = vector.extract_strided_slice %2 {offsets = [2, 1, 0], sizes = [18, 24, 4], strides = [1, 1, 1]} : vector<20x26x4xf32> to vector<18x24x4xf32>
    %18 = vector.shape_cast %17 : vector<18x24x4xf32> to vector<432x4xf32>
    %19 = vector.extract_strided_slice %2 {offsets = [2, 2, 0], sizes = [18, 24, 4], strides = [1, 1, 1]} : vector<20x26x4xf32> to vector<18x24x4xf32>
    %20 = vector.shape_cast %19 : vector<18x24x4xf32> to vector<432x4xf32>
    %21 = tpu.concatenate %4, %6, %8, %10, %12, %14, %16, %18, %20 in 1 : vector<432x4xf32>, vector<432x4xf32>, vector<432x4xf32>, vector<432x4xf32>, vector<432x4xf32>, vector<432x4xf32>, vector<432x4xf32>, vector<432x4xf32>, vector<432x4xf32> -> vector<432x36xf32>
    %22 = arith.truncf %21 : vector<432x36xf32> to vector<432x36xbf16>
    %c0_3 = arith.constant 0 : index
    %c0_4 = arith.constant 0 : index
    %23 = vector.load %arg2[%c0_3, %c0_4] : memref<36x8xbf16, #tpu.memory_space<vmem>>, vector<36x8xbf16>
    %cst = arith.constant dense<0.000000e+00> : vector<432x8xf32>
    %24 = tpu.matmul %22, %23, %cst {dimension_numbers = #tpu.dot_dimension_numbers<[1], [0], [0], [1], [0, 0, 1, 1], [], []>} : vector<432x36xbf16>, vector<36x8xbf16>, vector<432x8xf32> -> vector<432x8xf32>
    %c0_5 = arith.constant 0 : index
    %c0_6 = arith.constant 0 : index
    %25 = vector.load %arg3[%c0_5, %c0_6] : memref<1x8xf32, #tpu.memory_space<vmem>>, vector<1x8xf32>
    %26 = vector.broadcast %25 : vector<1x8xf32> to vector<432x8xf32>
    %27 = arith.addf %24, %26 : vector<432x8xf32>
    %cst_7 = arith.constant 0.000000e+00 : f32
    %28 = vector.broadcast %cst_7 : f32 to vector<432x8xf32>
    %29 = arith.maximumf %27, %28 : vector<432x8xf32>
    %30 = vector.shape_cast %29 : vector<432x8xf32> to vector<18x24x8xf32>
    %31 = tpu.iota {dimensions = array<i32: 0>} : vector<18x24x1xi32>
    %32 = tpu.iota {dimensions = array<i32: 1>} : vector<18x24x1xi32>
    %c1_i32 = arith.constant 1 : i32
    %33 = vector.broadcast %c1_i32 : i32 to vector<18x24x1xi32>
    %34 = arith.cmpi sge, %31, %33 : vector<18x24x1xi32>
    %c16_i32 = arith.constant 16 : i32
    %35 = vector.broadcast %c16_i32 : i32 to vector<18x24x1xi32>
    %36 = arith.cmpi sle, %31, %35 : vector<18x24x1xi32>
    %37 = arith.andi %34, %36 : vector<18x24x1xi1>
    %c1_i32_8 = arith.constant 1 : i32
    %38 = vector.broadcast %c1_i32_8 : i32 to vector<18x24x1xi32>
    %39 = arith.cmpi sge, %32, %38 : vector<18x24x1xi32>
    %40 = arith.andi %37, %39 : vector<18x24x1xi1>
    %c16_i32_9 = arith.constant 16 : i32
    %41 = vector.broadcast %c16_i32_9 : i32 to vector<18x24x1xi32>
    %42 = arith.cmpi sle, %32, %41 : vector<18x24x1xi32>
    %43 = arith.andi %40, %42 : vector<18x24x1xi1>
    %cst_10 = arith.constant 0.000000e+00 : f32
    %44 = vector.shape_cast %43 : vector<18x24x1xi1> to vector<18x24x1xi1>
    %45 = vector.broadcast %44 : vector<18x24x1xi1> to vector<18x24x8xi1>
    %46 = vector.broadcast %cst_10 : f32 to vector<18x24x8xf32>
    %47 = arith.select %45, %30, %46 : vector<18x24x8xi1>, vector<18x24x8xf32>
    %48 = vector.extract_strided_slice %47 {offsets = [0, 0, 0], sizes = [16, 16, 8], strides = [1, 1, 1]} : vector<18x24x8xf32> to vector<16x16x8xf32>
    %49 = vector.shape_cast %48 : vector<16x16x8xf32> to vector<256x8xf32>
    %50 = vector.extract_strided_slice %47 {offsets = [0, 1, 0], sizes = [16, 16, 8], strides = [1, 1, 1]} : vector<18x24x8xf32> to vector<16x16x8xf32>
    %51 = vector.shape_cast %50 : vector<16x16x8xf32> to vector<256x8xf32>
    %52 = vector.extract_strided_slice %47 {offsets = [0, 2, 0], sizes = [16, 16, 8], strides = [1, 1, 1]} : vector<18x24x8xf32> to vector<16x16x8xf32>
    %53 = vector.shape_cast %52 : vector<16x16x8xf32> to vector<256x8xf32>
    %54 = vector.extract_strided_slice %47 {offsets = [1, 0, 0], sizes = [16, 16, 8], strides = [1, 1, 1]} : vector<18x24x8xf32> to vector<16x16x8xf32>
    %55 = vector.shape_cast %54 : vector<16x16x8xf32> to vector<256x8xf32>
    %56 = vector.extract_strided_slice %47 {offsets = [1, 1, 0], sizes = [16, 16, 8], strides = [1, 1, 1]} : vector<18x24x8xf32> to vector<16x16x8xf32>
    %57 = vector.shape_cast %56 : vector<16x16x8xf32> to vector<256x8xf32>
    %58 = vector.extract_strided_slice %47 {offsets = [1, 2, 0], sizes = [16, 16, 8], strides = [1, 1, 1]} : vector<18x24x8xf32> to vector<16x16x8xf32>
    %59 = vector.shape_cast %58 : vector<16x16x8xf32> to vector<256x8xf32>
    %60 = vector.extract_strided_slice %47 {offsets = [2, 0, 0], sizes = [16, 16, 8], strides = [1, 1, 1]} : vector<18x24x8xf32> to vector<16x16x8xf32>
    %61 = vector.shape_cast %60 : vector<16x16x8xf32> to vector<256x8xf32>
    %62 = vector.extract_strided_slice %47 {offsets = [2, 1, 0], sizes = [16, 16, 8], strides = [1, 1, 1]} : vector<18x24x8xf32> to vector<16x16x8xf32>
    %63 = vector.shape_cast %62 : vector<16x16x8xf32> to vector<256x8xf32>
    %64 = vector.extract_strided_slice %47 {offsets = [2, 2, 0], sizes = [16, 16, 8], strides = [1, 1, 1]} : vector<18x24x8xf32> to vector<16x16x8xf32>
    %65 = vector.shape_cast %64 : vector<16x16x8xf32> to vector<256x8xf32>
    %66 = tpu.concatenate %49, %51, %53, %55, %57, %59, %61, %63, %65 in 1 : vector<256x8xf32>, vector<256x8xf32>, vector<256x8xf32>, vector<256x8xf32>, vector<256x8xf32>, vector<256x8xf32>, vector<256x8xf32>, vector<256x8xf32>, vector<256x8xf32> -> vector<256x72xf32>
    %67 = arith.truncf %66 : vector<256x72xf32> to vector<256x72xbf16>
    %c0_11 = arith.constant 0 : index
    %c0_12 = arith.constant 0 : index
    %68 = vector.load %arg4[%c0_11, %c0_12] : memref<72x8xbf16, #tpu.memory_space<vmem>>, vector<72x8xbf16>
    %cst_13 = arith.constant dense<0.000000e+00> : vector<256x8xf32>
    %69 = tpu.matmul %67, %68, %cst_13 {dimension_numbers = #tpu.dot_dimension_numbers<[1], [0], [0], [1], [0, 0, 1, 1], [], []>} : vector<256x72xbf16>, vector<72x8xbf16>, vector<256x8xf32> -> vector<256x8xf32>
    %c0_14 = arith.constant 0 : index
    %c0_15 = arith.constant 0 : index
    %70 = vector.load %arg5[%c0_14, %c0_15] : memref<1x8xf32, #tpu.memory_space<vmem>>, vector<1x8xf32>
    %71 = vector.broadcast %70 : vector<1x8xf32> to vector<256x8xf32>
    %72 = arith.addf %69, %71 : vector<256x8xf32>
    %cst_16 = arith.constant 0.000000e+00 : f32
    %73 = vector.broadcast %cst_16 : f32 to vector<256x8xf32>
    %74 = arith.maximumf %72, %73 : vector<256x8xf32>
    %75 = vector.shape_cast %74 : vector<256x8xf32> to vector<16x16x8xf32>
    %c0_17 = arith.constant 0 : index
    %c0_18 = arith.constant 0 : index
    %c0_19 = arith.constant 0 : index
    %c0_20 = arith.constant 0 : index
    %76 = vector.load %arg6[%c0_17, %c0_18, %c0_19, %c0_20] : memref<1x16x16x8xf32, #tpu.memory_space<vmem>>, vector<1x16x16x8xf32>
    %77 = vector.shape_cast %76 : vector<1x16x16x8xf32> to vector<16x16x8xf32>
    %78 = vector.shape_cast %75 : vector<16x16x8xf32> to vector<1x16x16x8xf32>
    tpu.vector_store %arg6[%c0_17, %c0_18, %c0_19, %c0_20], %78 {strides = array<i32>} : memref<1x16x16x8xf32, #tpu.memory_space<vmem>>, vector<1x16x16x8xf32>,
    return
  }
  func.func @transform_0(%arg0: i32) -> (i32, i32, i32, i32) {
    %c0_i32 = arith.constant 0 : i32
    %c0_i32_0 = arith.constant 0 : i32
    %c0_i32_1 = arith.constant 0 : i32
    %c0_i32_2 = arith.constant 0 : i32
    return %arg0, %c0_i32, %c0_i32_0, %c0_i32_1 : i32, i32, i32, i32
  }
  func.func @transform_1(%arg0: i32) -> (i32, i32) {
    %c0_i32 = arith.constant 0 : i32
    %c0_i32_0 = arith.constant 0 : i32
    %c0_i32_1 = arith.constant 0 : i32
    return %c0_i32, %c0_i32_0 : i32, i32
  }
  func.func @transform_2(%arg0: i32) -> (i32, i32) {
    %c0_i32 = arith.constant 0 : i32
    %c0_i32_0 = arith.constant 0 : i32
    %c0_i32_1 = arith.constant 0 : i32
    return %c0_i32, %c0_i32_0 : i32, i32
  }
  func.func @transform_3(%arg0: i32) -> (i32, i32) {
    %c0_i32 = arith.constant 0 : i32
    %c0_i32_0 = arith.constant 0 : i32
    %c0_i32_1 = arith.constant 0 : i32
    return %c0_i32, %c0_i32_0 : i32, i32
  }
  func.func @transform_4(%arg0: i32) -> (i32, i32) {
    %c0_i32 = arith.constant 0 : i32
    %c0_i32_0 = arith.constant 0 : i32
    %c0_i32_1 = arith.constant 0 : i32
    return %c0_i32, %c0_i32_0 : i32, i32
  }
  func.func @transform_5(%arg0: i32) -> (i32, i32, i32, i32) {
    %c0_i32 = arith.constant 0 : i32
    %c0_i32_0 = arith.constant 0 : i32
    %c0_i32_1 = arith.constant 0 : i32
    %c0_i32_2 = arith.constant 0 : i32
    return %arg0, %c0_i32, %c0_i32_0, %c0_i32_1 : i32, i32, i32, i32
  }
}

</mosaic_0001>

<bundles_post_ra>
// kernel: tpu_custom_call.1
= control target key start
LH: loop header
LB: loop body
LE: loop exit
PB: predicated region body
PF: predicated region fallthrough
CT: control target
= control target key end

     0   :  { %s6849_s18 = smov 0   ;;  %s11587_s0 = inlined_call_operand.vmem [shape: bf16[2,20,26,4], index: 0, kind: input, shape index: {}]   ;;  %s11588_s1 = inlined_call_operand.vmem [shape: bf16[36,8], index: 1, kind: input, shape index: {}]   ;;  %s11589_s2 = inlined_call_operand.vmem [shape: f32[1,8], index: 2, kind: input, shape index: {}]   ;;  %s11590_s3 = inlined_call_operand.vmem [shape: bf16[72,8], index: 3, kind: input, shape index: {}]   ;;  %s11591_s4 = inlined_call_operand.vmem [shape: f32[1,8], index: 4, kind: input, shape index: {}]   ;;  %s11592_s5 = inlined_call_operand.vmem [shape: f32[2,16,16,8], index: 5, kind: output, shape index: {}]  }
   0x1 LB: > { %s4669_s19 = sadd.s32 4294967295, %s6803_s18   ;;  %p4673_p0 = scmp.ge.s32.totalorder %s6803_s18, 1  ;;  %s6803_s18 = sphi %s6849_s18, %s15_s18  }
   0x2   : > { %p187_p1 = scmp.lt.s32.totalorder %s6803_s18, 3 }
   0x4   : > { %p188_p2 = pnand %p4673_p0, %p187_p1 }
   0x6   : > { %191 = sbr.rel (%p188_p2) target bundleno = 1385 (0x569), region = 40 }
   0xb   : > { %p215_p3 = scmp.lt.s32.totalorder %s4669_s19, 1  ;;  %vm458_vm0 = vcmask 1046528   ;;  %s6805_s24 = smov 4   ;;  %vm585_vm1 = vcmask 1045504   ;;  %vm2044_vm2 = vcmask 31744   ;;  %vm2099_vm3 = vcmask 64512  }
   0xc   : > { %s6806_s25 = smov 8   ;;  %s6807_s26 = smov 12   ;;  %vm2154_vm4 = vcmask 97280   ;;  %vm2620_vm5 = vcmask 1041408   ;;  %vm6813_vm6 = vmmov 0   ;;  %vm2209_vm7 = vcmask 130048  }
   0xd   : > { %s12988_s19 = smov (!%p215_p3, %s4669_s19), 1  ;;  %s6808_s27 = smov 16   ;;  %vm2264_vm8 = vcmask 162816   ;;  %vm2319_vm9 = vcmask 195584   ;;  %vm2374_vm10 = vcmask 228352   ;;  %vm2429_vm11 = vcmask 261120  }
   0xe   : > { %s5046_s20 = smul.u32 320, %s12988_s19  ;;  %s6809_s28 = smov 20   ;;  %vm2538_vm12 = vcmask 293888   ;;  %vm4385_vm15 = vcmask 1043456  }
   0xf   : > { %s6810_s29 = smov 24   ;;  %s6811_s30 = smov 28  }
  0x10   : > { %s6863_s23 = scalar_lea.vmem %s11587_s0, %s5046_s20  ;;  %s6814_s12 = smov 32  }
  0x11   : > { %v232_v0 = vld [vmem:[%s6863_s23 + $0x8] ss:$16 sps:$4 sm:$0xff]   ;;  %v6867_v1 = vld [vmem:[%s6863_s23 + $0x1c] sm:$0x1]  ;;  %v4814_v2 = vld [vmem:[%s6863_s23 + $0x20] sm:$0xff]   ;;  %s6818_s6 = smov 64  }
  0x12   : > { %v6870_v3 = vunpack.c.l.bf16 %v4814_v2  ;;  %v6872_v4 = vunpack.c.h.bf16 %v4814_v2  ;;  %v6874_v5 = vunpack.c.h.bf16 %v232_v0  ;;  %v11597_v6 = vunpack.c.l.bf16 %v6867_v1  ;;  %v4813_v7 = vld [vmem:[%s6863_s23 + $0x10] sm:$0xff]   ;;  %v4734_v8 = vld [vmem:[%s6863_s23] sm:$0xff]   ;;  %v236_v13 = vld [vmem:[%s6863_s23 + $0x28] ss:$16 sps:$4 sm:$0xff]   ;;  %s4732_s8 = sshll.u32 %s12988_s19, 8 }
  0x13   : > { %v6879_v9 = vunpack.c.h.bf16 %v4813_v7  ;;  %v6881_v10 = vunpack.c.l.bf16 %v4813_v7  ;;  %v6883_v11 = vunpack.c.l.bf16 %v4734_v8  ;;  %v6885_v12 = vunpack.c.h.bf16 %v4734_v8  ;;  %v6905_v25 = vld [vmem:[%s6863_s23 + $0xc] sm:$0x1]  ;;  %v4815_v26 = vld [vmem:[%s6863_s23 + $0x30] sm:$0xff]   ;;  %v6919_v31 = vld [vmem:[%s6863_s23 + $0x3c] sm:$0x1]  ;;  %s11487_s11 = scalar_lea.vmem %s11592_s5, %s4732_s8 }
  0x14   : > { %12055 = vst [vmem:[#allocation2_spill] sm:$0xff] %v6870_v3  ;;  %12056 = vst [vmem:[#allocation3_spill] sm:$0xff] %v6872_v4  ;;  %v469_v14 = vrot.slane %v6874_v5, 1  ;;  %v471_v15 = vrot.slane %v11597_v6, 1  ;;  %v473_v16 = vrot.slane %v6870_v3, 1  ;;  %v474_v17 = vrot.slane %v6872_v4, 1 }
  0x15   : > { %12057 = vst [vmem:[#allocation4_spill] sm:$0xff] %v6874_v5  ;;  %12058 = vst [vmem:[#allocation5_spill] sm:$0xff] %v6879_v9  ;;  %v467_v18 = vrot.slane %v6879_v9, 1  ;;  %v466_v19 = vrot.slane %v6881_v10, 1  ;;  %v6895_v20 = vunpack.c.l.bf16 %v232_v0  ;;  %v459_v21 = vrot.slane %v6883_v11, 1  ;;  %v4817_v41 = vld [vmem:[%s6863_s23 + $0x50] sm:$0xff]  }
  0x16   : > { %12059 = vst [vmem:[#allocation6_spill] sm:$0xff] %v6881_v10  ;;  %12060 = vst [vmem:[#allocation7_spill] sm:$0xff] %v6883_v11  ;;  %v6899_v22 = vsel %vm458_vm0, %v469_v14, %v471_v15  ;;  %v460_v23 = vrot.slane %v6885_v12, 1  ;;  %v6902_v24 = vunpack.c.l.bf16 %v236_v13  ;;  %v6909_v27 = vsel %vm458_vm0, %v473_v16, %v474_v17  ;;  %v6934_v40 = vld [vmem:[%s6863_s23 + $0x2c] sm:$0x1]  ;;  %v4816_v60 = vld [vmem:[%s6863_s23 + $0x40] sm:$0xff]  }
  0x17   : > { %12061 = vst [vmem:[#allocation8_spill] sm:$0xff] %v6885_v12  ;;  %12062 = vst [vmem:[#allocation9_spill] sm:$0xff] %v6895_v20  ;;  %v6912_v28 = vsel %vm458_vm0, %v467_v18, %v469_v14  ;;  %v6915_v29 = vsel %vm458_vm0, %v466_v19, %v467_v18  ;;  %v462_v30 = vrot.slane %v6895_v20, 1  ;;  %v11596_v37 = vunpack.c.l.bf16 %v6905_v25  ;;  %v244_v46 = vld [vmem:[%s6863_s23 + $0x48] ss:$16 sps:$4 sm:$0xff]   ;;  %v4818_v2 = vld [vmem:[%s6863_s23 + $0x60] sm:$0xff]  }
  0x18   : > { %12063 = vst [vmem:[#allocation10_spill] sm:$0xff] %v6899_v22  ;;  %12064 = vst [vmem:[#allocation11_spill] sm:$0xff] %v6902_v24  ;;  %v5079_v32 = vpack.i.bf16 %v6899_v22, %v6912_v28  ;;  %v461_v34 = vsel %vm458_vm0, %v459_v21, %v460_v23  ;;  %v476_v35 = vrot.slane %v6902_v24, 1  ;;  %v6929_v38 = vunpack.c.h.bf16 %v4815_v26  ;;  %v6959_v54 = vld [vmem:[%s6863_s23 + $0x4c] sm:$0x1] }
  0x19   : > { %12065 = vst [vmem:[#allocation12_spill] sm:$0xff] %v6909_v27  ;;  %12066 = vst [vmem:[#allocation13_spill] sm:$0xff] %v6912_v28  ;;  %v463_v36 = vsel %vm458_vm0, %v460_v23, %v462_v30  ;;  %v6931_v39 = vunpack.c.h.bf16 %v236_v13  ;;  %v11594_v44 = vunpack.c.l.bf16 %v6919_v31  ;;  %v6942_v45 = vunpack.c.l.bf16 %v4815_v26  ;;  %v252_v15 = vld [vmem:[%s6863_s23 + $0x68] ss:$16 sps:$4 sm:$0xff]   ;;  %v7057_v33 = vld [vmem:[%s6863_s23 + $0x6c] sm:$0x1] }
  0x1a   : > { %12067 = vst [vmem:[#allocation14_spill] sm:$0xff] %v6915_v29  ;;  %12068 = vst [vmem:[#allocation15_spill] sm:$0xff] %v6929_v38  ;;  %5080 = vrot.lane.b32.xlu1 %v5079_v32, %s6805_s24  ;;  %v5069_v42 = vpack.i.bf16 %v463_v36, %v461_v34  ;;  %v6939_v43 = vsel %vm458_vm0, %v474_v17, %v476_v35  ;;  %v464_v48 = vrot.slane %v11596_v37, 1  ;;  %v481_v49 = vrot.slane %v6929_v38, 1  ;;  %v260_v6 = vld [vmem:[%s6863_s23 + $0x88] ss:$16 sps:$4 sm:$0xff]  }
  0x1b   : > { %12069 = vst [vmem:[#allocation16_spill] sm:$0xff] %v6931_v39  ;;  %12070 = vst [vmem:[#allocation17_spill] sm:$0xff] %v6939_v43  ;;  %v6947_v47 = vpack.i.bf16 %v6939_v43, %v6909_v27  ;;  %v483_v50 = vrot.slane %v6931_v39, 1  ;;  %v485_v51 = vrot.slane %v11594_v44, 1  ;;  %v11595_v52 = vunpack.c.l.bf16 %v6934_v40 }
  0x1c   : > { %12071 = vst [vmem:[#allocation18_spill] sm:$0xff] %v6942_v45  ;;  %5070 = vrot.lane.b32.xlu0 %v5069_v42, %s6805_s24  ;;  %v480_v53 = vrot.slane %v6942_v45, 1  ;;  %v6961_v55 = vunpack.c.l.bf16 %v4817_v41  ;;  %v465_v56 = vsel %vm458_vm0, %v462_v30, %v464_v48  ;;  %v6967_v58 = vunpack.c.h.bf16 %v4817_v41  ;;  %v7021_v41 = vld [vmem:[%s6863_s23 + $0x5c] sm:$0x1] }
  0x1d   : > { %12072 = vst [vmem:[#allocation19_spill] sm:$0xff] %v6947_v47  ;;  %v6965_v57 = vsel %vm458_vm0, %v481_v49, %v483_v50  ;;  %v6969_v59 = vunpack.c.l.bf16 %v244_v46  ;;  %v5074_v61 = vpack.i.bf16 %v6915_v29, %v465_v56  ;;  %v6976_v62 = vsel %vm458_vm0, %v483_v50, %v485_v51  ;;  %v4819_v51 = vld [vmem:[%s6863_s23 + $0x70] sm:$0xff]  }
  0x1e   : > { %12073 = vst [vmem:[#allocation20_spill] sm:$0xff] %v6961_v55  ;;  %12074 = vst [vmem:[#allocation21_spill] sm:$0xff] %v6965_v57  ;;  %5085 = vrot.lane.b32.xlu1 %v6947_v47, %s6805_s24  ;;  %v478_v63 = vrot.slane %v11595_v52, 1  ;;  %v6981_v0 = vsel %vm458_vm0, %v480_v53, %v481_v49  ;;  %v6986_v7 = vpack.i.bf16 %v6976_v62, %v6965_v57  ;;  %v11593_v8 = vunpack.c.l.bf16 %v6959_v54  ;;  %v7032_v53 = vld [vmem:[%s6863_s23 + $0x7c] sm:$0x1] }
  0x1f   : > { %12075 = vst [vmem:[#allocation22_spill] sm:$0xff] %v6967_v58  ;;  %12076 = vst [vmem:[#allocation23_spill] sm:$0xff] %v6969_v59  ;;  %v490_v13 = vrot.slane %v6969_v59, 1  ;;  %v494_v14 = vrot.slane %v6961_v55, 1  ;;  %v495_v17 = vrot.slane %v6967_v58, 1  ;;  %v6997_v18 = vunpack.c.l.bf16 %v4816_v60 }
  0x20   : > { %12077 = vst [vmem:[#allocation24_spill] sm:$0xff] %v6976_v62  ;;  %12078 = vst [vmem:[#allocation25_spill] sm:$0xff] %v6981_v0  ;;  %5075 = vrot.lane.b32.xlu0 %v5074_v61, %s6805_s24  ;;  %v6994_v16 = vsel %vm458_vm0, %v476_v35, %v478_v63  ;;  %v6999_v19 = vunpack.c.h.bf16 %v4816_v60  ;;  %v492_v23 = vrot.slane %v11593_v8, 1  ;;  %v7007_v26 = vunpack.c.l.bf16 %v4818_v2  ;;  %v4821_v8 = vld [vmem:[%s6863_s23 + $0x90] sm:$0xff]   ;;  %v7177_v62 = vld [vmem:[%s6863_s23 + $0xbc] sm:$0x1] }
  0x21   : > { %12079 = vst [vmem:[#allocation26_spill] sm:$0xff] %v6986_v7  ;;  %12080 = vst [vmem:[#allocation27_spill] sm:$0xff] %v6994_v16  ;;  %v7003_v21 = vpack.i.bf16 %v6981_v0, %v6994_v16  ;;  %v7009_v30 = vunpack.c.h.bf16 %v4818_v2  ;;  %v7014_v32 = vsel %vm458_vm0, %v494_v14, %v495_v17  ;;  %v487_v34 = vrot.slane %v6997_v18, 1 }
  0x22   : > { %12081 = vst [vmem:[#allocation28_spill] sm:$0xff] %v6997_v18  ;;  %12082 = vst [vmem:[#allocation29_spill] sm:$0xff] %v6999_v19  ;;  %5095 = vrot.lane.b32.xlu1 %v6986_v7, %s6805_s24  ;;  %v488_v35 = vrot.slane %v6999_v19, 1  ;;  %v7018_v36 = vunpack.c.l.bf16 %v252_v15  ;;  %v7024_v42 = vsel %vm458_vm0, %v490_v13, %v492_v23  ;;  %v501_v48 = vrot.slane %v7007_v26, 1 }
  0x23   : > { %12083 = vst [vmem:[#allocation30_spill] sm:$0xff] %v7003_v21  ;;  %12084 = vst [vmem:[#allocation31_spill] sm:$0xff] %v7007_v26  ;;  %v502_v49 = vrot.slane %v7009_v30, 1  ;;  %v7028_v50 = vunpack.c.h.bf16 %v244_v46  ;;  %v7038_v56 = vpack.i.bf16 %v7014_v32, %v7024_v42  ;;  %v11601_v14 = vunpack.c.l.bf16 %v7021_v41 }
  0x24   : > { %12085 = vst [vmem:[#allocation32_spill] sm:$0xff] %v7009_v30  ;;  %12086 = vst [vmem:[#allocation33_spill] sm:$0xff] %v7014_v32  ;;  %5090 = vrot.lane.b32.xlu0 %v7003_v21, %s6805_s24  ;;  %v7041_v60 = vsel %vm458_vm0, %v487_v34, %v488_v35  ;;  %v7044_v61 = vsel %vm458_vm0, %v488_v35, %v490_v13  ;;  %v504_v46 = vrot.slane %v7018_v36, 1  ;;  %v7064_v34 = vunpack.c.h.bf16 %v4819_v51 }
  0x25   : > { %12087 = vst [vmem:[#allocation34_spill] sm:$0xff] %v7018_v36  ;;  %12088 = vst [vmem:[#allocation35_spill] sm:$0xff] %v7024_v42  ;;  %v7049_v63 = vpack.i.bf16 %v7044_v61, %v7041_v60  ;;  %v7052_v2 = vsel %vm458_vm0, %v501_v48, %v502_v49  ;;  %v497_v23 = vrot.slane %v7028_v50, 1  ;;  %v7066_v35 = vunpack.c.h.bf16 %v252_v15 }
  0x26   : > { %12089 = vst [vmem:[#allocation36_spill] sm:$0xff] %v7028_v50  ;;  %12090 = vst [vmem:[#allocation37_spill] sm:$0xff] %v7038_v56  ;;  %5105 = vrot.lane.b32.xlu1 %v7038_v56, %s6805_s24  ;;  %v7062_v13 = vsel %vm458_vm0, %v502_v49, %v504_v46  ;;  %v499_v37 = vrot.slane %v11601_v14, 1  ;;  %v7079_v49 = vunpack.c.l.bf16 %v4819_v51  ;;  %v509_v15 = vrot.slane %v7064_v34, 1 }
  0x27   : > { %12091 = vst [vmem:[#allocation38_spill] sm:$0xff] %v7041_v60  ;;  %12092 = vst [vmem:[#allocation39_spill] sm:$0xff] %v7044_v61  ;;  %v7072_v44 = vpack.i.bf16 %v7062_v13, %v7052_v2  ;;  %v7075_v52 = vsel %vm458_vm0, %v495_v17, %v497_v23  ;;  %v511_v48 = vrot.slane %v7066_v35, 1  ;;  %v12101_v56 = vunpack.c.l.bf16 %v7032_v53  ;;  %v7090_v17 = vld [vmem:[%s6863_s23 + $0x8c] sm:$0x1]  ;;  %v4822_v61 = vld [vmem:[%s6863_s23 + $0xa0] sm:$0xff]  }
  0x28   : > { %12093 = vst [vmem:[#allocation40_spill] sm:$0xff] %v7049_v63  ;;  %12094 = vst [vmem:[#allocation41_spill] sm:$0xff] %v7052_v2  ;;  %5100 = vrot.lane.b32.xlu0 %v7049_v63, %s6805_s24  ;;  %v7093_v14 = vsel %vm458_vm0, %v497_v23, %v499_v37  ;;  %v508_v51 = vrot.slane %v7079_v49, 1  ;;  %v7096_v21 = vunpack.c.l.bf16 %v4821_v8  ;;  %v7098_v63 = vunpack.c.h.bf16 %v4821_v8  ;;  %v4820_v2 = vld [vmem:[%s6863_s23 + $0x80] sm:$0xff]   ;;  %v4823_v60 = vld [vmem:[%s6863_s23 + $0xb0] sm:$0xff]  }
  0x29   : > { %12095 = vst [vmem:[#allocation42_spill] sm:$0xff] %v7062_v13  ;;  %12096 = vst [vmem:[#allocation43_spill] sm:$0xff] %v7064_v34  ;;  %v513_v7 = vrot.slane %v12101_v56, 1  ;;  %v7105_v56 = vpack.i.bf16 %v7093_v14, %v7075_v52  ;;  %v7108_v47 = vsel %vm458_vm0, %v509_v15, %v511_v48  ;;  %v12108_v23 = vunpack.c.l.bf16 %v7057_v33 }
  0x2a   : > { %12097 = vst [vmem:[#allocation44_spill] sm:$0xff] %v7066_v35  ;;  %12098 = vst [vmem:[#allocation45_spill] sm:$0xff] %v7072_v44  ;;  %5115 = vrot.lane.b32.xlu1 %v7072_v44, %s6805_s24  ;;  %v7120_v44 = vsel %vm458_vm0, %v508_v51, %v509_v15  ;;  %v7122_v42 = vunpack.c.l.bf16 %v260_v6  ;;  %v268_v15 = vld [vmem:[%s6863_s23 + $0xa8] ss:$16 sps:$4 sm:$0xff]   ;;  %v7164_v0 = vunpack.c.h.bf16 %v260_v6  ;;  %v7224_v29 = vunpack.c.l.bf16 %v4823_v60 }
  0x2b   : > { %12099 = vst [vmem:[#allocation46_spill] sm:$0xff] %v7075_v52  ;;  %12100 = vst [vmem:[#allocation47_spill] sm:$0xff] %v7079_v49  ;;  %v7111_v37 = vsel %vm458_vm0, %v511_v48, %v513_v7  ;;  %v506_v13 = vrot.slane %v12108_v23, 1  ;;  %v522_v48 = vrot.slane %v7096_v21, 1  ;;  %v523_v23 = vrot.slane %v7098_v63, 1 }
  0x2c   : > { %12102 = vst [vmem:[#allocation48_spill] sm:$0xff] %v7093_v14  ;;  %12103 = vst [vmem:[#allocation49_spill] sm:$0xff] %v7096_v21  ;;  %v7117_v8 = vpack.i.bf16 %v7111_v37, %v7108_v47  ;;  %5110 = vrot.lane.b32.xlu0 %v7105_v56, %s6805_s24  ;;  %v518_v14 = vrot.slane %v7122_v42, 1  ;;  %v7143_v52 = vunpack.c.h.bf16 %v4820_v2  ;;  %v7209_v43 = vunpack.c.h.bf16 %v268_v15 }
  0x2d   : > { %12104 = vst [vmem:[#allocation50_spill] sm:$0xff] %v7098_v63  ;;  %12105 = vst [vmem:[#allocation51_spill] sm:$0xff] %v7105_v56  ;;  %v7129_v7 = vsel %vm458_vm0, %v504_v46, %v506_v13  ;;  %v7146_v46 = vld [vmem:[%s6863_s23 + $0x9c] sm:$0x1]  ;;  %v7151_v13 = vsel %vm458_vm0, %v522_v48, %v523_v23  ;;  %v12140_v28 = vunpack.c.l.bf16 %v7177_v62 }
  0x2e   : > { %12106 = vst [vmem:[#allocation52_spill] sm:$0xff] %v7108_v47  ;;  %12107 = vst [vmem:[#allocation53_spill] sm:$0xff] %v7111_v37  ;;  %v7133_v47 = vunpack.c.l.bf16 %v4820_v2  ;;  %v7138_v51 = vpack.i.bf16 %v7120_v44, %v7129_v7  ;;  %v12115_v37 = vunpack.c.l.bf16 %v7090_v17  ;;  %5125 = vrot.lane.b32.xlu1 %v7117_v8, %s6805_s24  ;;  %v516_v2 = vrot.slane %v7143_v52, 1 }
  0x2f   : > { %12109 = vst [vmem:[#allocation54_spill] sm:$0xff] %v7117_v8  ;;  %12110 = vst [vmem:[#allocation55_spill] sm:$0xff] %v7120_v44  ;;  %v7154_v44 = vunpack.c.l.bf16 %v4822_v61 }
  0x30   : > { %12111 = vst [vmem:[#allocation56_spill] sm:$0xff] %v7122_v42  ;;  %12112 = vst [vmem:[#allocation57_spill] sm:$0xff] %v7129_v7  ;;  %v520_v56 = vrot.slane %v12115_v37, 1  ;;  %v515_v32 = vrot.slane %v7133_v47, 1  ;;  %v7156_v7 = vunpack.c.h.bf16 %v4822_v61  ;;  %v7162_v37 = vunpack.c.l.bf16 %v268_v15  ;;  %5120 = vrot.lane.b32.xlu0 %v7138_v51, %s6805_s24  ;;  %v7227_v15 = vld [vmem:[%s6863_s23 + $0xcc] sm:$0x1] }
  0x31   : > { %12113 = vst [vmem:[#allocation58_spill] sm:$0xff] %v7133_v47  ;;  %12114 = vst [vmem:[#allocation59_spill] sm:$0xff] %v7138_v51  ;;  %v529_v61 = vrot.slane %v7154_v44, 1  ;;  %v7183_v27 = vsel %vm458_vm0, %v516_v2, %v518_v14 }
  0x32   : > { %12116 = vst [vmem:[#allocation60_spill] sm:$0xff] %v7143_v52  ;;  %12117 = vst [vmem:[#allocation61_spill] sm:$0xff] %v7151_v13  ;;  %v7159_v57 = vsel %vm458_vm0, %v518_v14, %v520_v56  ;;  %v530_v56 = vrot.slane %v7156_v7, 1  ;;  %v7180_v6 = vsel %vm458_vm0, %v515_v32, %v516_v2  ;;  %v532_v51 = vrot.slane %v7162_v37, 1  ;;  %v7201_v2 = vld [vmem:[%s6863_s23 + $0xac] sm:$0x1] }
  0x33   : > { %12118 = vst [vmem:[#allocation62_spill] sm:$0xff] %v7154_v44  ;;  %12119 = vst [vmem:[#allocation63_spill] sm:$0xff] %v7156_v7  ;;  %v7171_v48 = vpack.i.bf16 %v7151_v13, %v7159_v57  ;;  %v7191_v8 = vpack.i.bf16 %v7183_v27, %v7180_v6  ;;  %v12129_v32 = vunpack.c.l.bf16 %v7146_v46  ;;  %v7198_v14 = vunpack.c.h.bf16 %v4823_v60 }
  0x34   : > { %12120 = vst [vmem:[#allocation64_spill] sm:$0xff] %v7159_v57  ;;  %12121 = vst [vmem:[#allocation65_spill] sm:$0xff] %v7162_v37  ;;  %v525_v57 = vrot.slane %v7164_v0, 1  ;;  %v7194_v13 = vsel %vm458_vm0, %v529_v61, %v530_v56  ;;  %v7204_v16 = vsel %vm458_vm0, %v530_v56, %v532_v51  ;;  %v4825_v61 = vld [vmem:[%s6863_s23 + $0xd0] sm:$0xff]  }
  0x35   : > { %12122 = vst [vmem:[#allocation66_spill] sm:$0xff] %v7164_v0  ;;  %12123 = vst [vmem:[#allocation67_spill] sm:$0xff] %v7171_v48  ;;  %5135 = vrot.lane.b32.xlu1 %v7171_v48, %s6805_s24  ;;  %v527_v22 = vrot.slane %v12129_v32, 1  ;;  %5130 = vrot.lane.b32.xlu0 %v7191_v8, %s6805_s24  ;;  %v7218_v32 = vpack.i.bf16 %v7204_v16, %v7194_v13  ;;  %v7242_v60 = vunpack.c.h.bf16 %v4825_v61 }
  0x36   : > { %12124 = vst [vmem:[#allocation68_spill] sm:$0xff] %v7177_v62  ;;  %12125 = vst [vmem:[#allocation69_spill] sm:$0xff] %v7180_v6  ;;  %v7207_v48 = vsel %vm458_vm0, %v523_v23, %v525_v57  ;;  %v276_v6 = vld [vmem:[%s6863_s23 + $0xc8] ss:$16 sps:$4 sm:$0xff]   ;;  %v537_v23 = vrot.slane %v7198_v14, 1 }
  0x37   : > { %12126 = vst [vmem:[#allocation70_spill] sm:$0xff] %v7183_v27  ;;  %12127 = vst [vmem:[#allocation71_spill] sm:$0xff] %v7191_v8  ;;  %v7221_v56 = vsel %vm458_vm0, %v525_v57, %v527_v22  ;;  %v539_v8 = vrot.slane %v7209_v43, 1  ;;  %v536_v22 = vrot.slane %v7224_v29, 1  ;;  %v7240_v57 = vunpack.c.l.bf16 %v4825_v61 }
  0x38   : > { %12128 = vst [vmem:[#allocation72_spill] sm:$0xff] %v7194_v13  ;;  %12130 = vst [vmem:[#allocation73_spill] sm:$0xff] %v7198_v14  ;;  %v7231_v27 = vpack.i.bf16 %v7221_v56, %v7207_v48  ;;  %v541_v13 = vrot.slane %v12140_v28, 1  ;;  %v7244_v7 = vunpack.c.l.bf16 %v276_v6  ;;  %v12149_v14 = vunpack.c.l.bf16 %v7227_v15 }
  0x39   : > { %12131 = vst [vmem:[#allocation74_spill] sm:$0xff] %v7201_v2  ;;  %12132 = vst [vmem:[#allocation75_spill] sm:$0xff] %v7204_v16  ;;  %v11647_v16 = vunpack.c.l.bf16 %v7201_v2  ;;  %5145 = vrot.lane.b32.xlu1 %v7218_v32, %s6805_s24  ;;  %v7264_v44 = vsel %vm458_vm0, %v536_v22, %v537_v23 }
  0x3a   : > { %12133 = vst [vmem:[#allocation76_spill] sm:$0xff] %v7207_v48  ;;  %12134 = vst [vmem:[#allocation77_spill] sm:$0xff] %v7209_v43  ;;  %v7248_v48 = vsel %vm458_vm0, %v537_v23, %v539_v8  ;;  %v7251_v28 = vsel %vm458_vm0, %v539_v8, %v541_v13  ;;  %v4826_v43 = vld [vmem:[%s6863_s23 + $0xe0] sm:$0xff]   ;;  %5140 = vrot.lane.b32.xlu0 %v7231_v27, %s6805_s24  ;;  %v546_v8 = vrot.slane %v7244_v7, 1  ;;  %v550_v13 = vrot.slane %v7240_v57, 1 }
  0x3b   : > { %12135 = vst [vmem:[#allocation78_spill] sm:$0xff] %v7218_v32  ;;  %12136 = vst [vmem:[#allocation79_spill] sm:$0xff] %v7221_v56  ;;  %v4824_v56 = vld [vmem:[%s6863_s23 + $0xc0] sm:$0xff]   ;;  %v534_v62 = vrot.slane %v11647_v16, 1  ;;  %v7261_v61 = vpack.i.bf16 %v7251_v28, %v7248_v48  ;;  %v284_v16 = vld [vmem:[%s6863_s23 + $0xe8] ss:$16 sps:$4 sm:$0xff]  }
  0x3c   : > { %12137 = vst [vmem:[#allocation80_spill] sm:$0xff] %v7224_v29  ;;  %12138 = vst [vmem:[#allocation81_spill] sm:$0xff] %v7227_v15  ;;  %v548_v29 = vrot.slane %v12149_v14, 1  ;;  %v7275_v2 = vunpack.c.l.bf16 %v4824_v56  ;;  %v7283_v22 = vunpack.c.h.bf16 %v4824_v56  ;;  %v4827_v14 = vld [vmem:[%s6863_s23 + $0xf0] sm:$0xff]   ;;  %v7312_v15 = vunpack.c.h.bf16 %v276_v6 }
  0x3d   : > { %12139 = vst [vmem:[#allocation82_spill] sm:$0xff] %v7231_v27  ;;  %12141 = vst [vmem:[#allocation83_spill] sm:$0xff] %v7240_v57  ;;  %v7270_v32 = vsel %vm458_vm0, %v532_v51, %v534_v62  ;;  %v551_v27 = vrot.slane %v7242_v60, 1  ;;  %5155 = vrot.lane.b32.xlu1 %v7261_v61, %s6805_s24  ;;  %v7287_v62 = vunpack.c.h.bf16 %v4826_v43  ;;  %v7290_v51 = vld [vmem:[%s6863_s23 + $0xdc] sm:$0x1]  ;;  %v7331_v6 = vunpack.c.h.bf16 %v284_v16 }
  0x3e   : > { %12142 = vst [vmem:[#allocation84_spill] sm:$0xff] %v7242_v60  ;;  %12143 = vst [vmem:[#allocation85_spill] sm:$0xff] %v7244_v7  ;;  %v7281_v23 = vpack.i.bf16 %v7264_v44, %v7270_v32  ;;  %v544_v56 = vrot.slane %v7283_v22, 1  ;;  %v7315_v7 = vunpack.c.h.bf16 %v4827_v14  ;;  %v7334_v60 = vld [vmem:[%s6863_s23 + $0xec] sm:$0x1] }
  0x3f   : > { %12144 = vst [vmem:[#allocation86_spill] sm:$0xff] %v7248_v48  ;;  %12145 = vst [vmem:[#allocation87_spill] sm:$0xff] %v7251_v28  ;;  %v7285_v48 = vunpack.c.l.bf16 %v4826_v43  ;;  %v7294_v28 = vsel %vm458_vm0, %v546_v8, %v548_v29  ;;  %v7297_v57 = vsel %vm458_vm0, %v550_v13, %v551_v27 }
  0x40   : > { %12146 = vst [vmem:[#allocation88_spill] sm:$0xff] %v7261_v61  ;;  %12147 = vst [vmem:[#allocation89_spill] sm:$0xff] %v7264_v44  ;;  %v543_v61 = vrot.slane %v7275_v2, 1  ;;  %v7300_v44 = vunpack.c.l.bf16 %v284_v16  ;;  %5150 = vrot.lane.b32.xlu0 %v7281_v23, %s6805_s24  ;;  %v7306_v43 = vpack.i.bf16 %v7297_v57, %v7294_v28 }
  0x41   : > { %12148 = vst [vmem:[#allocation90_spill] sm:$0xff] %v7270_v32  ;;  %12150 = vst [vmem:[#allocation91_spill] sm:$0xff] %v7275_v2  ;;  %v557_v29 = vrot.slane %v7285_v48, 1  ;;  %v558_v32 = vrot.slane %v7287_v62, 1 }
  0x42   : > { %12151 = vst [vmem:[#allocation92_spill] sm:$0xff] %v7281_v23  ;;  %12152 = vst [vmem:[#allocation93_spill] sm:$0xff] %v7283_v22  ;;  %v560_v13 = vrot.slane %v7300_v44, 1  ;;  %v7318_v23 = vld [vmem:[%s6863_s23 + $0xfc] sm:$0x1]  ;;  %5165 = vrot.lane.b32.xlu1 %v7306_v43, %s6805_s24  ;;  %v565_v22 = vrot.slane %v7315_v7, 1 }
  0x43   : > { %12153 = vst [vmem:[#allocation94_spill] sm:$0xff] %v7285_v48  ;;  %12154 = vst [vmem:[#allocation95_spill] sm:$0xff] %v7287_v62  ;;  %v7329_v62 = vsel %vm458_vm0, %v557_v29, %v558_v32 }
  0x44   : > { %12155 = vst [vmem:[#allocation96_spill] sm:$0xff] %v7290_v51  ;;  %12156 = vst [vmem:[#allocation97_spill] sm:$0xff] %v7294_v28  ;;  %v7323_v28 = vsel %vm458_vm0, %v543_v61, %v544_v56  ;;  %v7341_v61 = vsel %vm458_vm0, %v558_v32, %v560_v13 }
  0x45   : > { %12157 = vst [vmem:[#allocation98_spill] sm:$0xff] %v7297_v57  ;;  %12158 = vst [vmem:[#allocation99_spill] sm:$0xff] %v7300_v44  ;;  %v7326_v57 = vsel %vm458_vm0, %v544_v56, %v546_v8  ;;  %v553_v8 = vrot.slane %v7312_v15, 1  ;;  %v12170_v56 = vunpack.c.l.bf16 %v7290_v51  ;;  %v7349_v16 = vpack.i.bf16 %v7341_v61, %v7329_v62  ;;  %v4828_v44 = vld [vmem:[%s6863_s23 + $0x100] sm:$0xff]  }
  0x46   : > { %12159 = vst [vmem:[#allocation100_spill] sm:$0xff] %v7306_v43  ;;  %12160 = vst [vmem:[#allocation101_spill] sm:$0xff] %v7312_v15  ;;  %v7338_v48 = vpack.i.bf16 %v7326_v57, %v7323_v28  ;;  %v4829_v43 = vld [vmem:[%s6863_s23 + $0x110] sm:$0xff]   ;;  %v7363_v51 = vunpack.c.l.bf16 %v4827_v14 }
  0x47   : > { %12161 = vst [vmem:[#allocation102_spill] sm:$0xff] %v7315_v7  ;;  %12162 = vst [vmem:[#allocation103_spill] sm:$0xff] %v7318_v23  ;;  %v555_v29 = vrot.slane %v12170_v56, 1  ;;  %v7358_v32 = vsel %vm458_vm0, %v551_v27, %v553_v8  ;;  %5175 = vrot.lane.b32.xlu1 %v7349_v16, %s6805_s24  ;;  %v7381_v14 = vunpack.c.l.bf16 %v4829_v43  ;;  %v7386_v15 = vunpack.c.h.bf16 %v4829_v43 }
  0x48   : > { %12163 = vst [vmem:[#allocation104_spill] sm:$0xff] %v7323_v28  ;;  %12164 = vst [vmem:[#allocation105_spill] sm:$0xff] %v7326_v57  ;;  %v567_v57 = vrot.slane %v7331_v6, 1  ;;  %v292_v28 = vld [vmem:[%s6863_s23 + $0x108] ss:$16 sps:$4 sm:$0xff]   ;;  %5160 = vrot.lane.b32.xlu0 %v7338_v48, %s6805_s24  ;;  %v564_v7 = vrot.slane %v7363_v51, 1 }
  0x49   : > { %12165 = vst [vmem:[#allocation106_spill] sm:$0xff] %v7329_v62  ;;  %12166 = vst [vmem:[#allocation107_spill] sm:$0xff] %v7331_v6  ;;  %v7361_v56 = vsel %vm458_vm0, %v553_v8, %v555_v29  ;;  %v11694_v62 = vunpack.c.l.bf16 %v7334_v60  ;;  %v12177_v8 = vunpack.c.l.bf16 %v7318_v23  ;;  %v578_v23 = vrot.slane %v7381_v14, 1 }
  0x4a   : > { %12167 = vst [vmem:[#allocation108_spill] sm:$0xff] %v7334_v60  ;;  %12168 = vst [vmem:[#allocation109_spill] sm:$0xff] %v7338_v48  ;;  %v7374_v6 = vpack.i.bf16 %v7361_v56, %v7358_v32  ;;  %v7377_v27 = vsel %vm458_vm0, %v565_v22, %v567_v57  ;;  %v7417_v60 = vunpack.c.h.bf16 %v4828_v44 }
  0x4b   : > { %12169 = vst [vmem:[#allocation110_spill] sm:$0xff] %v7341_v61  ;;  %12171 = vst [vmem:[#allocation111_spill] sm:$0xff] %v7349_v16  ;;  %v7367_v61 = vld [vmem:[%s6863_s23 + $0x10c] sm:$0x1]  ;;  %v569_v29 = vrot.slane %v12177_v8, 1  ;;  %v562_v48 = vrot.slane %v11694_v62, 1  ;;  %v7388_v16 = vunpack.c.l.bf16 %v292_v28  ;;  %v7395_v8 = vunpack.c.l.bf16 %v4828_v44 }
  0x4c   : > { %12172 = vst [vmem:[#allocation112_spill] sm:$0xff] %v7358_v32  ;;  %12173 = vst [vmem:[#allocation113_spill] sm:$0xff] %v7361_v56  ;;  %v11703_v32 = vunpack.c.l.bf16 %v7367_v61  ;;  %5170 = vrot.lane.b32.xlu0 %v7374_v6, %s6805_s24  ;;  %v572_v44 = vrot.slane %v7417_v60, 1 }
  0x4d   : > { %12174 = vst [vmem:[#allocation114_spill] sm:$0xff] %v7363_v51  ;;  %12175 = vst [vmem:[#allocation115_spill] sm:$0xff] %v7374_v6  ;;  %v7391_v56 = vsel %vm458_vm0, %v567_v57, %v569_v29  ;;  %v7404_v43 = vsel %vm458_vm0, %v560_v13, %v562_v48  ;;  %v7407_v51 = vsel %vm458_vm0, %v564_v7, %v565_v22  ;;  %v574_v57 = vrot.slane %v7388_v16, 1 }
  0x4e   : > { %12176 = vst [vmem:[#allocation116_spill] sm:$0xff] %v7377_v27  ;;  %12178 = vst [vmem:[#allocation117_spill] sm:$0xff] %v7381_v14  ;;  %v7401_v62 = vpack.i.bf16 %v7391_v56, %v7377_v27  ;;  %v7412_v29 = vpack.i.bf16 %v7407_v51, %v7404_v43  ;;  %v576_v14 = vrot.slane %v11703_v32, 1  ;;  %v579_v6 = vrot.slane %v7386_v15, 1  ;;  %v7420_v27 = vld [vmem:[%s6863_s23 + $0x11c] sm:$0x1] }
  0x4f   : > { %12179 = vst [vmem:[#allocation118_spill] sm:$0xff] %v7386_v15  ;;  %12180 = vst [vmem:[#allocation119_spill] sm:$0xff] %v7388_v16  ;;  %v571_v7 = vrot.slane %v7395_v8, 1  ;;  %v586_v48 = vrot.slane %v6883_v11, 2  ;;  %v587_v22 = vrot.slane %v6885_v12, 2  ;;  %v589_v13 = vrot.slane %v6895_v20, 2 }
  0x50   : > { %12181 = vst [vmem:[#allocation120_spill] sm:$0xff] %v7391_v56  ;;  %12182 = vst [vmem:[#allocation121_spill] sm:$0xff] %v7395_v8  ;;  %5185 = vrot.lane.b32.xlu1 %v7401_v62, %s6805_s24  ;;  %v7432_v32 = vsel %vm458_vm0, %v578_v23, %v579_v6  ;;  %v7435_v56 = vunpack.c.h.bf16 %v292_v28  ;;  %5180 = vrot.lane.b32.xlu0 %v7412_v29, %s6805_s24 }
  0x51   : > { %12183 = vst [vmem:[#allocation122_spill] sm:$0xff] %v7401_v62  ;;  %12184 = vst [vmem:[#allocation123_spill] sm:$0xff] %v7404_v43  ;;  %v588_v12 = vsel %vm585_vm1, %v586_v48, %v587_v22  ;;  %v590_v20 = vsel %vm585_vm1, %v587_v22, %v589_v13  ;;  %v7447_v23 = vsel %vm458_vm0, %v571_v7, %v572_v44  ;;  %v596_v22 = vrot.slane %v6874_v5, 2 }
  0x52   : > { %12185 = vst [vmem:[#allocation124_spill] sm:$0xff] %v7407_v51  ;;  %12186 = vst [vmem:[#allocation125_spill] sm:$0xff] %v7412_v29  ;;  %v7429_v51 = vsel %vm458_vm0, %v574_v57, %v576_v14  ;;  %v11713_v14 = vunpack.c.l.bf16 %v7420_v27  ;;  %v7450_v62 = vsel %vm458_vm0, %v572_v44, %v574_v57  ;;  %v5204_v28 = vpack.i.bf16 %v590_v20, %v588_v12 }
  0x53   : > { %12187 = vst [vmem:[#allocation126_spill] sm:$0xff] %v7417_v60  ;;  %12188 = vst [vmem:[#allocation127_spill] sm:$0xff] %v7429_v51  ;;  %v7441_v11 = vpack.i.bf16 %v7432_v32, %v7429_v51  ;;  %v581_v43 = vrot.slane %v7435_v56, 1  ;;  %v7457_v29 = vpack.i.bf16 %v7450_v62, %v7447_v23  ;;  %v12195_v7 = vunpack.c.l.bf16 %v6867_v1 }
  0x54   : > { %12189 = vst [vmem:[#allocation128_spill] sm:$0xff] %v7432_v32  ;;  %12190 = vst [vmem:[#allocation129_spill] sm:$0xff] %v7435_v56  ;;  %v583_v48 = vrot.slane %v11713_v14, 1  ;;  %v600_v12 = vrot.slane %v6870_v3, 2  ;;  %v601_v20 = vrot.slane %v6872_v4, 2  ;;  %v594_v44 = vrot.slane %v6879_v9, 2 }
  0x55   : > { %12191 = vst [vmem:[#allocation130_spill] sm:$0xff] %v7441_v11  ;;  %12192 = vst [vmem:[#allocation131_spill] sm:$0xff] %v7447_v23  ;;  %5195 = vrot.lane.b32.xlu1 %v7441_v11, %s6805_s24  ;;  %v598_v51 = vrot.slane %v12195_v7, 2  ;;  %v7465_v57 = vsel %vm458_vm0, %v579_v6, %v581_v43  ;;  %5190 = vrot.lane.b32.xlu0 %v7457_v29, %s6805_s24  ;;  %v593_v1 = vrot.slane %v6881_v10, 2  ;;  %v12199_v6 = vunpack.c.l.bf16 %v6905_v25 }
  0x56   : > { %12193 = vst [vmem:[#allocation132_spill] sm:$0xff] %v7450_v62  ;;  %12194 = vst [vmem:[#allocation133_spill] sm:$0xff] %v7457_v29  ;;  %v7473_v11 = vsel %vm458_vm0, %v581_v43, %v583_v48  ;;  %v7486_v32 = vsel %vm585_vm1, %v594_v44, %v596_v22  ;;  %v603_v29 = vrot.slane %v6902_v24, 2  ;;  %v7497_v48 = vsel %vm585_vm1, %v600_v12, %v601_v20 }
  0x57   : > { %12196 = vst [vmem:[#allocation134_spill] sm:$0xff] %v7465_v57  ;;  %12197 = vst [vmem:[#allocation135_spill] sm:$0xff] %v7473_v11  ;;  %v7476_v14 = vsel %vm585_vm1, %v596_v22, %v598_v51  ;;  %v591_v7 = vrot.slane %v12199_v6, 2  ;;  %v7483_v62 = vpack.i.bf16 %v7473_v11, %v7465_v57  ;;  %v7493_v43 = vsel %vm585_vm1, %v593_v1, %v594_v44 }
  0x58   : > { %12198 = vst [vmem:[#allocation136_spill] sm:$0xff] %v7476_v14  ;;  %12201 = vst [vmem:[#allocation138_spill] sm:$0xff] %v7486_v32  ;;  %v5214_v51 = vpack.i.bf16 %v7476_v14, %v7486_v32  ;;  %v12204_v6 = vunpack.c.l.bf16 %v6934_v40  ;;  %v607_v57 = vrot.slane %v6942_v45, 2  ;;  %v608_v44 = vrot.slane %v6929_v38, 2 }
  0x59   : > { %12200 = vst [vmem:[#allocation137_spill] sm:$0xff] %v7483_v62  ;;  %5205 = vrot.lane.b32.xlu1 %v5204_v28, %s6806_s25  ;;  %12202 = vst [vmem:[#allocation139_spill] sm:$0xff] %v7493_v43  ;;  %v592_v25 = vsel %vm585_vm1, %v589_v13, %v591_v7  ;;  %5200 = vrot.lane.b32.xlu0 %v7483_v62, %s6805_s24  ;;  %v614_v13 = vrot.slane %v6997_v18, 2  ;;  %v615_v12 = vrot.slane %v6999_v19, 2  ;;  %v617_v40 = vrot.slane %v6969_v59, 2 }
  0x5a   : > { %12203 = vst [vmem:[#allocation140_spill] sm:$0xff] %v7497_v48  ;;  %v605_v11 = vrot.slane %v12204_v6, 2  ;;  %v5209_v28 = vpack.i.bf16 %v7493_v43, %v592_v25  ;;  %v7514_v7 = vsel %vm585_vm1, %v601_v20, %v603_v29  ;;  %v610_v6 = vrot.slane %v6931_v39, 2 }
  0x5b   : > { %12206 = vst [vmem:[#allocation142_spill] sm:$0xff] %v7514_v7  ;;  %v7520_v25 = vsel %vm585_vm1, %v607_v57, %v608_v44  ;;  %v7523_v22 = vsel %vm585_vm1, %v614_v13, %v615_v12  ;;  %v12209_v62 = vunpack.c.l.bf16 %v6919_v31  ;;  %v622_v20 = vrot.slane %v6967_v58, 2 }
  0x5c   : > { %v7511_v1 = vsel %vm585_vm1, %v603_v29, %v605_v11  ;;  %12207 = vst [vmem:[#allocation143_spill] sm:$0xff] %v7520_v25  ;;  %12208 = vst [vmem:[#allocation144_spill] sm:$0xff] %v7523_v22  ;;  %v7532_v29 = vsel %vm585_vm1, %v615_v12, %v617_v40  ;;  %v7539_v57 = vpack.i.bf16 %v7514_v7, %v7497_v48  ;;  %v12213_v31 = vunpack.c.l.bf16 %v7021_v41  ;;  %v12260_v48 = vld [vmem:[#allocation68_spill] sm:$0xff] }
  0x5d   : > { %12205 = vst [vmem:[#allocation141_spill] sm:$0xff] %v7511_v1  ;;  %5215 = vrot.lane.b32.xlu1 %v5214_v51, %s6806_s25  ;;  %v612_v43 = vrot.slane %v12209_v62, 2  ;;  %v7529_v11 = vpack.i.bf16 %v7520_v25, %v7511_v1  ;;  %12211 = vst [vmem:[#allocation146_spill] sm:$0xff] %v7532_v29  ;;  %v624_v51 = vrot.slane %v7028_v50, 2  ;;  %5210 = vrot.lane.b32.xlu0 %v5209_v28, %s6806_s25  ;;  %v12216_v12 = vunpack.c.l.bf16 %v6959_v54 }
  0x5e   : > { %12212 = vst [vmem:[#allocation147_spill] sm:$0xff] %v7539_v57  ;;  %v626_v62 = vrot.slane %v12213_v31, 2  ;;  %v7544_v13 = vsel %vm585_vm1, %v608_v44, %v610_v6  ;;  %v621_v25 = vrot.slane %v6961_v55, 2  ;;  %v7556_v28 = vpack.i.bf16 %v7532_v29, %v7523_v22 }
  0x5f   : > { %12210 = vst [vmem:[#allocation145_spill] sm:$0xff] %v7529_v11  ;;  %12214 = vst [vmem:[#allocation148_spill] sm:$0xff] %v7544_v13  ;;  %v7547_v32 = vsel %vm585_vm1, %v610_v6, %v612_v43  ;;  %v619_v1 = vrot.slane %v12216_v12, 2  ;;  %v631_v41 = vrot.slane %v7018_v36, 2  ;;  %v12218_v44 = vunpack.c.l.bf16 %v7057_v33 }
  0x60   : > { %12215 = vst [vmem:[#allocation149_spill] sm:$0xff] %v7547_v32  ;;  %12217 = vst [vmem:[#allocation150_spill] sm:$0xff] %v7556_v28  ;;  %v7562_v43 = vsel %vm585_vm1, %v622_v20, %v624_v51  ;;  %v7565_v54 = vsel %vm585_vm1, %v624_v51, %v626_v62  ;;  %v635_v6 = vrot.slane %v7079_v49, 2  ;;  %v636_v12 = vrot.slane %v7064_v34, 2 }
  0x61   : > { %5225 = vrot.lane.b32.xlu1 %v7529_v11, %s6806_s25  ;;  %v633_v31 = vrot.slane %v12218_v44, 2  ;;  %12219 = vst [vmem:[#allocation151_spill] sm:$0xff] %v7562_v43  ;;  %12220 = vst [vmem:[#allocation152_spill] sm:$0xff] %v7565_v54  ;;  %5220 = vrot.lane.b32.xlu0 %v7539_v57, %s6806_s25  ;;  %v7573_v11 = vpack.i.bf16 %v7547_v32, %v7544_v13  ;;  %v7576_v33 = vsel %vm585_vm1, %v617_v40, %v619_v1 }
  0x62   : > { %12222 = vst [vmem:[#allocation154_spill] sm:$0xff] %v7576_v33  ;;  %v7579_v44 = vsel %vm585_vm1, %v621_v25, %v622_v20  ;;  %v628_v51 = vrot.slane %v7007_v26, 2  ;;  %v629_v62 = vrot.slane %v7009_v30, 2  ;;  %v7587_v57 = vpack.i.bf16 %v7565_v54, %v7562_v43 }
  0x63   : > { %12221 = vst [vmem:[#allocation153_spill] sm:$0xff] %v7573_v11  ;;  %12223 = vst [vmem:[#allocation155_spill] sm:$0xff] %v7579_v44  ;;  %v7590_v22 = vsel %vm585_vm1, %v631_v41, %v633_v31  ;;  %v7593_v1 = vsel %vm585_vm1, %v635_v6, %v636_v12  ;;  %v642_v40 = vrot.slane %v7133_v47, 2  ;;  %v643_v25 = vrot.slane %v7143_v52, 2 }
  0x64   : > { %12224 = vst [vmem:[#allocation156_spill] sm:$0xff] %v7587_v57  ;;  %12225 = vst [vmem:[#allocation157_spill] sm:$0xff] %v7590_v22  ;;  %v645_v20 = vrot.slane %v7122_v42, 2  ;;  %v7605_v43 = vsel %vm585_vm1, %v628_v51, %v629_v62  ;;  %v7608_v31 = vsel %vm585_vm1, %v629_v62, %v631_v41  ;;  %v638_v6 = vrot.slane %v7066_v35, 2 }
  0x65   : > { %5235 = vrot.lane.b32.xlu1 %v7556_v28, %s6806_s25  ;;  %12226 = vst [vmem:[#allocation158_spill] sm:$0xff] %v7593_v1  ;;  %5230 = vrot.lane.b32.xlu0 %v7573_v11, %s6806_s25  ;;  %v7602_v28 = vpack.i.bf16 %v7579_v44, %v7576_v33  ;;  %12228 = vst [vmem:[#allocation160_spill] sm:$0xff] %v7605_v43  ;;  %v12230_v54 = vunpack.c.l.bf16 %v7032_v53  ;;  %v7617_v11 = vpack.i.bf16 %v7593_v1, %v7590_v22 }
  0x66   : > { %12229 = vst [vmem:[#allocation161_spill] sm:$0xff] %v7608_v31  ;;  %v650_v44 = vrot.slane %v7098_v63, 2  ;;  %v652_v51 = vrot.slane %v7164_v0, 2  ;;  %v7622_v33 = vsel %vm585_vm1, %v642_v40, %v643_v25  ;;  %v7625_v41 = vsel %vm585_vm1, %v643_v25, %v645_v20 }
  0x67   : > { %12227 = vst [vmem:[#allocation159_spill] sm:$0xff] %v7602_v28  ;;  %v640_v32 = vrot.slane %v12230_v54, 2  ;;  %12231 = vst [vmem:[#allocation162_spill] sm:$0xff] %v7617_v11  ;;  %v12234_v53 = vunpack.c.l.bf16 %v7146_v46  ;;  %v7633_v62 = vpack.i.bf16 %v7608_v31, %v7605_v43  ;;  %v12238_v40 = vunpack.c.l.bf16 %v7090_v17  ;;  %v12245_v43 = vld [vmem:[#allocation73_spill] sm:$0xff] }
  0x68   : > { %12232 = vst [vmem:[#allocation163_spill] sm:$0xff] %v7622_v33  ;;  %12233 = vst [vmem:[#allocation164_spill] sm:$0xff] %v7625_v41  ;;  %v649_v1 = vrot.slane %v7096_v21, 2  ;;  %v7648_v46 = vpack.i.bf16 %v7625_v41, %v7622_v33  ;;  %v664_v29 = vrot.slane %v12245_v43, 2 }
  0x69   : > { %5245 = vrot.lane.b32.xlu1 %v7587_v57, %s6806_s25  ;;  %v654_v54 = vrot.slane %v12234_v53, 2  ;;  %5240 = vrot.lane.b32.xlu0 %v7602_v28, %s6806_s25  ;;  %12235 = vst [vmem:[#allocation165_spill] sm:$0xff] %v7633_v62  ;;  %v7636_v57 = vsel %vm585_vm1, %v636_v12, %v638_v6  ;;  %v7639_v22 = vsel %vm585_vm1, %v638_v6, %v640_v32  ;;  %v647_v25 = vrot.slane %v12238_v40, 2  ;;  %v12242_v6 = vld [vmem:[#allocation74_spill] sm:$0xff]  ;;  %v12244_v28 = vld [vmem:[#allocation80_spill] sm:$0xff] }
  0x6a   : > { %12236 = vst [vmem:[#allocation166_spill] sm:$0xff] %v7636_v57  ;;  %12237 = vst [vmem:[#allocation167_spill] sm:$0xff] %v7639_v22  ;;  %v7651_v53 = vsel %vm585_vm1, %v650_v44, %v652_v51  ;;  %v659_v12 = vrot.slane %v7162_v37, 2  ;;  %v12243_v17 = vunpack.c.l.bf16 %v12242_v6  ;;  %v663_v31 = vrot.slane %v12244_v28, 2 }
  0x6b   : > { %12239 = vst [vmem:[#allocation168_spill] sm:$0xff] %v7648_v46  ;;  %12240 = vst [vmem:[#allocation169_spill] sm:$0xff] %v7651_v53  ;;  %v7655_v32 = vsel %vm585_vm1, %v652_v51, %v654_v54  ;;  %v7668_v33 = vsel %vm585_vm1, %v645_v20, %v647_v25  ;;  %v7671_v51 = vsel %vm585_vm1, %v649_v1, %v650_v44  ;;  %v12249_v54 = vld [vmem:[#allocation62_spill] sm:$0xff]  ;;  %v12255_v1 = vld [vmem:[#allocation85_spill] sm:$0xff] }
  0x6c   : > { %12241 = vst [vmem:[#allocation170_spill] sm:$0xff] %v7655_v32  ;;  %v661_v40 = vrot.slane %v12243_v17, 2  ;;  %12247 = vst [vmem:[#allocation171_spill] sm:$0xff] %v7668_v33  ;;  %v656_v6 = vrot.slane %v12249_v54, 2  ;;  %v12250_v17 = vld [vmem:[#allocation63_spill] sm:$0xff]  ;;  %v7687_v44 = vsel %vm585_vm1, %v663_v31, %v664_v29  ;;  %v673_v25 = vrot.slane %v12255_v1, 2 }
  0x6d   : > { %5255 = vrot.lane.b32.xlu1 %v7617_v11, %s6806_s25  ;;  %5250 = vrot.lane.b32.xlu0 %v7633_v62, %s6806_s25  ;;  %v7665_v11 = vpack.i.bf16 %v7639_v22, %v7636_v57  ;;  %12248 = vst [vmem:[#allocation172_spill] sm:$0xff] %v7671_v51  ;;  %v657_v41 = vrot.slane %v12250_v17, 2  ;;  %v7679_v62 = vpack.i.bf16 %v7655_v32, %v7651_v53  ;;  %v670_v22 = vrot.slane %v7275_v2, 2  ;;  %v12252_v57 = vld [vmem:[#allocation93_spill] sm:$0xff]  ;;  %v12267_v2 = vld [vmem:[#allocation96_spill] sm:$0xff] }
  0x6e   : > { %v671_v7 = vrot.slane %v12252_v57, 2  ;;  %v7684_v20 = vsel %vm585_vm1, %v659_v12, %v661_v40  ;;  %12254 = vst [vmem:[#allocation175_spill] sm:$0xff] %v7687_v44  ;;  %v12259_v40 = vld [vmem:[#allocation77_spill] sm:$0xff]  ;;  %v12261_v31 = vunpack.c.l.bf16 %v12260_v48  ;;  %v12268_v48 = vunpack.c.l.bf16 %v12267_v2 }
  0x6f   : > { %12246 = vst [vmem:[#allocation74_spill] sm:$0xff] %v7665_v11  ;;  %12251 = vst [vmem:[#allocation173_spill] sm:$0xff] %v7679_v62  ;;  %v7697_v53 = vsel %vm585_vm1, %v656_v6, %v657_v41  ;;  %v7700_v32 = vsel %vm585_vm1, %v657_v41, %v659_v12  ;;  %v666_v13 = vrot.slane %v12259_v40, 2  ;;  %v12265_v41 = vld [vmem:[#allocation84_spill] sm:$0xff] }
  0x70   : > { %12253 = vst [vmem:[#allocation174_spill] sm:$0xff] %v7684_v20  ;;  %12257 = vst [vmem:[#allocation177_spill] sm:$0xff] %v7697_v53  ;;  %v668_v14 = vrot.slane %v12261_v31, 2  ;;  %v7715_v6 = vsel %vm585_vm1, %v671_v7, %v673_v25  ;;  %v678_v12 = vrot.slane %v12265_v41, 2  ;;  %v682_v31 = vrot.slane %v12268_v48, 2  ;;  %v12276_v48 = vld [vmem:[#allocation99_spill] sm:$0xff] }
  0x71   : > { %5265 = vrot.lane.b32.xlu1 %v7648_v46, %s6806_s25  ;;  %5260 = vrot.lane.b32.xlu0 %v7665_v11, %s6806_s25  ;;  %v7694_v46 = vpack.i.bf16 %v7671_v51, %v7668_v33  ;;  %12258 = vst [vmem:[#allocation178_spill] sm:$0xff] %v7700_v32  ;;  %v7709_v11 = vpack.i.bf16 %v7687_v44, %v7684_v20  ;;  %12264 = vst [vmem:[#allocation180_spill] sm:$0xff] %v7715_v6  ;;  %v12266_v33 = vld [vmem:[#allocation101_spill] sm:$0xff] }
  0x72   : > { %v7712_v51 = vsel %vm585_vm1, %v670_v22, %v671_v7  ;;  %v680_v23 = vrot.slane %v12266_v33, 2  ;;  %v7728_v22 = vsel %vm585_vm1, %v664_v29, %v666_v13  ;;  %v7731_v7 = vsel %vm585_vm1, %v666_v13, %v668_v14  ;;  %v12272_v20 = vld [vmem:[#allocation81_spill] sm:$0xff]  ;;  %v12274_v33 = vld [vmem:[#allocation83_spill] sm:$0xff] }
  0x73   : > { %12256 = vst [vmem:[#allocation176_spill] sm:$0xff] %v7694_v46  ;;  %12262 = vst [vmem:[#allocation68_spill] sm:$0xff] %v7709_v11  ;;  %v12273_v44 = vunpack.c.l.bf16 %v12272_v20  ;;  %v677_v40 = vrot.slane %v12274_v33, 2  ;;  %v7740_v2 = vpack.i.bf16 %v7715_v6, %v7712_v51  ;;  %v12281_v20 = vld [vmem:[#allocation114_spill] sm:$0xff] }
  0x74   : > { %12263 = vst [vmem:[#allocation179_spill] sm:$0xff] %v7712_v51  ;;  %12270 = vst [vmem:[#allocation181_spill] sm:$0xff] %v7728_v22  ;;  %v7746_v14 = vsel %vm585_vm1, %v678_v12, %v680_v23  ;;  %v7749_v13 = vsel %vm585_vm1, %v680_v23, %v682_v31  ;;  %v12282_v33 = vld [vmem:[#allocation102_spill] sm:$0xff]  ;;  %v12287_v31 = vld [vmem:[#allocation95_spill] sm:$0xff] }
  0x75   : > { %5275 = vrot.lane.b32.xlu1 %v7679_v62, %s6806_s25  ;;  %5270 = vrot.lane.b32.xlu0 %v7694_v46, %s6806_s25  ;;  %v7725_v62 = vpack.i.bf16 %v7700_v32, %v7697_v53  ;;  %12271 = vst [vmem:[#allocation182_spill] sm:$0xff] %v7731_v7  ;;  %v675_v41 = vrot.slane %v12273_v44, 2  ;;  %12275 = vst [vmem:[#allocation81_spill] sm:$0xff] %v7740_v2  ;;  %v687_v46 = vrot.slane %v12276_v48, 2  ;;  %v12277_v32 = vld [vmem:[#allocation108_spill] sm:$0xff]  ;;  %v691_v44 = vrot.slane %v12281_v20, 2 }
  0x76   : > { %v12278_v29 = vunpack.c.l.bf16 %v12277_v32  ;;  %12279 = vst [vmem:[#allocation108_spill] sm:$0xff] %v7746_v14  ;;  %12280 = vst [vmem:[#allocation183_spill] sm:$0xff] %v7749_v13  ;;  %v692_v1 = vrot.slane %v12282_v33, 2  ;;  %v12286_v51 = vld [vmem:[#allocation94_spill] sm:$0xff]  ;;  %v685_v6 = vrot.slane %v12287_v31, 2 }
  0x77   : > { %12269 = vst [vmem:[#allocation96_spill] sm:$0xff] %v7725_v62  ;;  %v7760_v32 = vsel %vm585_vm1, %v673_v25, %v675_v41  ;;  %v684_v23 = vrot.slane %v12286_v51, 2  ;;  %v701_v41 = vrot.slane %v7388_v16, 2 }
  0x78   : > { %v689_v53 = vrot.slane %v12278_v29, 2  ;;  %12284 = vst [vmem:[#allocation185_spill] sm:$0xff] %v7760_v32  ;;  %v7763_v29 = vsel %vm585_vm1, %v677_v40, %v678_v12  ;;  %v7779_v40 = vsel %vm585_vm1, %v691_v44, %v692_v1 }
  0x79   : > { %5285 = vrot.lane.b32.xlu1 %v7709_v11, %s6806_s25  ;;  %5280 = vrot.lane.b32.xlu0 %v7725_v62, %s6806_s25  ;;  %v7757_v11 = vpack.i.bf16 %v7731_v7, %v7728_v22  ;;  %12285 = vst [vmem:[#allocation186_spill] sm:$0xff] %v7763_v29  ;;  %v7771_v62 = vpack.i.bf16 %v7749_v13, %v7746_v14  ;;  %v698_v7 = vrot.slane %v7395_v8, 2  ;;  %v699_v22 = vrot.slane %v7417_v60, 2  ;;  %v12293_v8 = vld [vmem:[#allocation103_spill] sm:$0xff] }
  0x7a   : > { %v7776_v25 = vsel %vm585_vm1, %v687_v46, %v689_v53  ;;  %12290 = vst [vmem:[#allocation189_spill] sm:$0xff] %v7779_v40  ;;  %v7786_v12 = vpack.i.bf16 %v7763_v29, %v7760_v32  ;;  %v7792_v14 = vsel %vm585_vm1, %v685_v6, %v687_v46  ;;  %v12292_v53 = vld [vmem:[#allocation107_spill] sm:$0xff]  ;;  %v12294_v44 = vunpack.c.l.bf16 %v12293_v8  ;;  %v12300_v32 = vld [vmem:[#allocation117_spill] sm:$0xff] }
  0x7b   : > { %12283 = vst [vmem:[#allocation184_spill] sm:$0xff] %v7757_v11  ;;  %12288 = vst [vmem:[#allocation187_spill] sm:$0xff] %v7771_v62  ;;  %v694_v13 = vrot.slane %v12292_v53, 2  ;;  %v7804_v29 = vsel %vm585_vm1, %v698_v7, %v699_v22  ;;  %v706_v46 = vrot.slane %v7386_v15, 2  ;;  %v12296_v8 = vunpack.c.l.bf16 %v7420_v27 }
  0x7c   : > { %12289 = vst [vmem:[#allocation188_spill] sm:$0xff] %v7776_v25  ;;  %12291 = vst [vmem:[#allocation190_spill] sm:$0xff] %v7786_v12  ;;  %v696_v60 = vrot.slane %v12294_v44, 2  ;;  %v705_v15 = vrot.slane %v12300_v32, 2 }
  0x7d   : > { %5295 = vrot.lane.b32.xlu1 %v7740_v2, %s6806_s25  ;;  %5290 = vrot.lane.b32.xlu0 %v7757_v11, %s6806_s25  ;;  %v7789_v2 = vsel %vm585_vm1, %v684_v23, %v685_v6  ;;  %v7801_v11 = vpack.i.bf16 %v7779_v40, %v7776_v25  ;;  %v7807_v23 = vsel %vm585_vm1, %v699_v22, %v701_v41  ;;  %v708_v6 = vrot.slane %v7435_v56, 2 }
  0x7e   : > { %v710_v44 = vrot.slane %v12296_v8, 2  ;;  %v7820_v7 = vsel %vm585_vm1, %v692_v1, %v694_v13  ;;  %v7823_v22 = vsel %vm585_vm1, %v694_v13, %v696_v60  ;;  %v12299_v25 = vunpack.c.l.bf16 %v7367_v61 }
  0x7f   : > { %12295 = vst [vmem:[#allocation103_spill] sm:$0xff] %v7801_v11  ;;  %12298 = vst [vmem:[#allocation192_spill] sm:$0xff] %v7820_v7  ;;  %v7832_v27 = vpack.i.bf16 %v7807_v23, %v7804_v29  ;;  %v7835_v8 = vsel %vm585_vm1, %v706_v46, %v708_v6  ;;  %v7844_v60 = vpack.i.bf16 %v7823_v22, %v7820_v7 }
  0x80   : > { %v703_v40 = vrot.slane %v12299_v25, 2  ;;  %v7838_v1 = vsel %vm585_vm1, %v708_v6, %v710_v44  ;;  %v7850_v13 = vsel %vm585_vm1, %v705_v15, %v706_v46  ;;  %v5344_v15 = vpack.i.bf16 %v6870_v3, %v6874_v5 }
  0x81   : > { %5305 = vrot.lane.b32.xlu1 %v7771_v62, %s6806_s25  ;;  %5300 = vrot.lane.b32.xlu0 %v7786_v12, %s6806_s25  ;;  %v7817_v62 = vpack.i.bf16 %v7792_v14, %v7789_v2  ;;  %12301 = vst [vmem:[#allocation193_spill] sm:$0xff] %v7832_v27  ;;  %12302 = vst [vmem:[#allocation194_spill] sm:$0xff] %v7844_v60  ;;  %v7856_v25 = vpack.i.bf16 %v7838_v1, %v7835_v8 }
  0x82   : > { %v7847_v61 = vsel %vm585_vm1, %v701_v41, %v703_v40  ;;  %v5339_v40 = vpack.i.bf16 %v6879_v9, %v6881_v10  ;;  %v5354_v41 = vpack.i.bf16 %v6929_v38, %v6942_v45  ;;  %v5349_v46 = vpack.i.bf16 %v6902_v24, %v6872_v4  ;;  %v12455_v38 = vld [vmem:[#allocation186_spill] sm:$0xff]  ;;  %v12456_v24 = vld [vmem:[#allocation108_spill] sm:$0xff] }
  0x83   : > { %12297 = vst [vmem:[#allocation191_spill] sm:$0xff] %v7817_v62  ;;  %12303 = vst [vmem:[#allocation195_spill] sm:$0xff] %v7856_v25  ;;  %v7862_v6 = vpack.i.bf16 %v7850_v13, %v7847_v61  ;;  %v5364_v44 = vpack.i.bf16 %v6969_v59, %v6999_v19 }
  0x85   : > { %5315 = vrot.lane.b32.xlu1 %v7801_v11, %s6806_s25  ;;  %5310 = vrot.lane.b32.xlu0 %v7817_v62, %s6806_s25  ;;  %12304 = vst [vmem:[#allocation196_spill] sm:$0xff] %v7862_v6 }
  0x89   : > { %5325 = vrot.lane.b32.xlu1 %v7832_v27, %s6806_s25  ;;  %5320 = vrot.lane.b32.xlu0 %v7844_v60, %s6806_s25 }
  0x8d   : > { %5335 = vrot.lane.b32.xlu1 %v7856_v25, %s6806_s25  ;;  %5330 = vrot.lane.b32.xlu0 %v7862_v6, %s6806_s25  ;;  %v7881_v25 = vpop.permute.xlu1 %5080 }
  0x8e   : > { %12305 = vst [vmem:[#allocation197_spill] sm:$0xff] %v7881_v25  ;;  %v7886_v6 = vpop.permute.xlu0 %5070 }
  0x8f   : > { %12306 = vst [vmem:[#allocation198_spill] sm:$0xff] %v7886_v6 }
  0x91   : > { %5345 = vrot.lane.b32.xlu1 %v5344_v15, %s6807_s26  ;;  %5340 = vrot.lane.b32.xlu0 %v5339_v40, %s6807_s26  ;;  %v5359_v15 = vpack.i.bf16 %v6997_v18, %v6931_v39  ;;  %v5374_v40 = vpack.i.bf16 %v7007_v26, %v7028_v50  ;;  %v7891_v12 = vpop.permute.xlu1 %5085  ;;  %v12341_v18 = vld [vmem:[#allocation38_spill] sm:$0xff] }
  0x92   : > { %12307 = vst [vmem:[#allocation199_spill] sm:$0xff] %v7891_v12  ;;  %v7896_v27 = vpop.permute.xlu0 %5075  ;;  %v12315_v12 = vld [vmem:[#allocation91_spill] sm:$0xff] }
  0x93   : > { %12308 = vst [vmem:[#allocation200_spill] sm:$0xff] %v7896_v27 }
  0x95   : > { %5355 = vrot.lane.b32.xlu1 %v5354_v41, %s6807_s26  ;;  %5350 = vrot.lane.b32.xlu0 %v5349_v46, %s6807_s26  ;;  %v5369_v41 = vpack.i.bf16 %v6967_v58, %v6961_v55  ;;  %v5384_v46 = vpack.i.bf16 %v7064_v34, %v7079_v49  ;;  %v7901_v60 = vpop.permute.xlu1 %5095 }
  0x96   : > { %12309 = vst [vmem:[#allocation201_spill] sm:$0xff] %v7901_v60  ;;  %v7906_v10 = vpop.permute.xlu0 %5090 }
  0x97   : > { %12310 = vst [vmem:[#allocation202_spill] sm:$0xff] %v7906_v10 }
  0x99   : > { %5365 = vrot.lane.b32.xlu1 %v5364_v44, %s6807_s26  ;;  %5360 = vrot.lane.b32.xlu0 %v5359_v15, %s6807_s26  ;;  %v5379_v44 = vpack.i.bf16 %v7018_v36, %v7009_v30  ;;  %v5394_v15 = vpack.i.bf16 %v7122_v42, %v7143_v52  ;;  %v7911_v9 = vpop.permute.xlu1 %5105 }
  0x9a   : > { %12311 = vst [vmem:[#allocation203_spill] sm:$0xff] %v7911_v9  ;;  %v7916_v60 = vpop.permute.xlu0 %5100 }
  0x9b   : > { %12312 = vst [vmem:[#allocation204_spill] sm:$0xff] %v7916_v60 }
  0x9d   : > { %5375 = vrot.lane.b32.xlu1 %v5374_v40, %s6807_s26  ;;  %5370 = vrot.lane.b32.xlu0 %v5369_v41, %s6807_s26  ;;  %v5389_v40 = vpack.i.bf16 %v7133_v47, %v7066_v35  ;;  %v5404_v41 = vpack.i.bf16 %v12249_v54, %v7164_v0  ;;  %v7921_v10 = vpop.permute.xlu1 %5115  ;;  %v12431_v0 = vld [vmem:[#allocation151_spill] sm:$0xff]  ;;  %v12446_v54 = vld [vmem:[#allocation181_spill] sm:$0xff] }
  0x9e   : > { %v7926_v9 = vpop.permute.xlu0 %5110 }
  0xa1   : > { %5385 = vrot.lane.b32.xlu1 %v5384_v46, %s6807_s26  ;;  %5380 = vrot.lane.b32.xlu0 %v5379_v44, %s6807_s26  ;;  %v5399_v46 = vpack.i.bf16 %v7098_v63, %v7096_v21  ;;  %v5414_v44 = vpack.i.bf16 %v12245_v43, %v12244_v28  ;;  %v7931_v60 = vpop.permute.xlu1 %5125  ;;  %v12429_v63 = vld [vmem:[#allocation160_spill] sm:$0xff] }
  0xa2   : > { %v7936_v5 = vpop.permute.xlu0 %5120 }
  0xa3   : > { %v5122_v7 = vunpack.i.l.bf16 %v7936_v5 }
  0xa5   : > { %5395 = vrot.lane.b32.xlu1 %v5394_v15, %s6807_s26  ;;  %5390 = vrot.lane.b32.xlu0 %v5389_v40, %s6807_s26  ;;  %v5409_v15 = vpack.i.bf16 %v7162_v37, %v12250_v17  ;;  %v12313_v40 = vld [vmem:[#allocation85_spill] sm:$0xff]  ;;  %v5113_v17 = vunpack.i.h.bf16 %v7926_v9 }
  0xa6   : > { %v5424_v11 = vpack.i.bf16 %v12313_v40, %v12252_v57  ;;  %v12318_v57 = vld [vmem:[#allocation84_spill] sm:$0xff] }
  0xa7   : > { %v7941_v27 = vpop.permute.xlu1 %5135  ;;  %v7946_v25 = vpop.permute.xlu0 %5130 }
  0xa9   : > { %5405 = vrot.lane.b32.xlu1 %v5404_v41, %s6807_s26  ;;  %5400 = vrot.lane.b32.xlu0 %v5399_v46, %s6807_s26  ;;  %v12314_v41 = vld [vmem:[#allocation77_spill] sm:$0xff] }
  0xaa   : > { %v5419_v6 = vpack.i.bf16 %v12315_v12, %v12314_v41  ;;  %v12316_v46 = vld [vmem:[#allocation101_spill] sm:$0xff]  ;;  %v12428_v41 = vld [vmem:[#allocation152_spill] sm:$0xff] }
  0xab   : > { %v5434_v62 = vpack.i.bf16 %v12286_v51, %v12316_v46  ;;  %v7951_v37 = vpop.permute.xlu1 %5145  ;;  %v5439_v46 = vpack.i.bf16 %v12276_v48, %v12287_v31 }
  0xac   : > { %v7956_v28 = vpop.permute.xlu0 %5140 }
  0xad   : > { %5415 = vrot.lane.b32.xlu1 %v5414_v44, %s6807_s26  ;;  %5410 = vrot.lane.b32.xlu0 %v5409_v15, %s6807_s26  ;;  %v12317_v44 = vld [vmem:[#allocation83_spill] sm:$0xff]  ;;  %v5444_v15 = vpack.i.bf16 %v12282_v33, %v12281_v20  ;;  %v12322_v20 = vld [vmem:[#allocation121_spill] sm:$0xff] }
  0xae   : > { %v5429_v40 = vpack.i.bf16 %v12318_v57, %v12317_v44  ;;  %v12319_v44 = vld [vmem:[#allocation126_spill] sm:$0xff]  ;;  %v5449_v33 = vpack.i.bf16 %v12322_v20, %v12292_v53 }
  0xaf   : > { %v7961_v12 = vpop.permute.xlu1 %5155  ;;  %v5454_v57 = vpack.i.bf16 %v7388_v16, %v12319_v44  ;;  %v12325_v44 = vld [vmem:[#allocation118_spill] sm:$0xff] }
  0xb1   : > { %5425 = vrot.lane.b32.xlu1 %v5424_v11, %s6807_s26  ;;  %5420 = vrot.lane.b32.xlu0 %v5419_v6, %s6807_s26  ;;  %v4830_v11 = vld [vmem:[%s6863_s23 + $0x120] sm:$0xff]  }
  0xb2   : > { %v7967_v6 = vpop.permute.xlu0 %5150  ;;  %v7972_v51 = vunpack.c.l.bf16 %v4830_v11  ;;  %v7990_v16 = vunpack.c.h.bf16 %v4830_v11  ;;  %v12332_v11 = vld [vmem:[#allocation14_spill] sm:$0xff] }
  0xb4   : > { %12320 = vst [vmem:[#allocation205_spill] sm:$0xff] %v7972_v51  ;;  %12326 = vst [vmem:[#allocation209_spill] sm:$0xff] %v7990_v16  ;;  %v724_v39 = vrot.slane %v7990_v16, 2 }
  0xb5   : > { %5435 = vrot.lane.b32.xlu1 %v5434_v62, %s6807_s26  ;;  %5430 = vrot.lane.b32.xlu0 %v5429_v40, %s6807_s26  ;;  %v7974_v62 = vpop.permute.xlu1 %5165  ;;  %v300_v40 = vld [vmem:[%s6863_s23 + $0x128] sm:$0xf] }
  0xb6   : > { %12321 = vst [vmem:[#allocation206_spill] sm:$0xff] %v7974_v62  ;;  %v5459_v62 = vpack.i.bf16 %v12325_v44, %v12300_v32  ;;  %v12335_v32 = vld [vmem:[#allocation27_spill] sm:$0xff] }
  0xb9   : > { %5445 = vrot.lane.b32.xlu1 %v5444_v15, %s6807_s26  ;;  %5440 = vrot.lane.b32.xlu0 %v5439_v46, %s6807_s26  ;;  %v5464_v15 = vpack.i.bf16 %v7972_v51, %v7435_v56  ;;  %v7985_v48 = vpop.permute.xlu1 %5175  ;;  %v7992_v46 = vunpack.c.l.bf16 %v300_v40  ;;  %v12334_v40 = vld [vmem:[#allocation17_spill] sm:$0xff] }
  0xba   : > { %v7980_v19 = vpop.permute.xlu0 %5160  ;;  %12324 = vst [vmem:[#allocation208_spill] sm:$0xff] %v7985_v48  ;;  %v5484_v53 = vpack.i.bf16 %v12335_v32, %v12334_v40  ;;  %v12344_v32 = vld [vmem:[#allocation21_spill] sm:$0xff] }
  0xbb   : > { %12323 = vst [vmem:[#allocation207_spill] sm:$0xff] %v7980_v19  ;;  %12327 = vst [vmem:[#allocation210_spill] sm:$0xff] %v7992_v46  ;;  %v5469_v19 = vpack.i.bf16 %v7992_v46, %v7990_v16 }
  0xbd   : > { %5455 = vrot.lane.b32.xlu1 %v5454_v57, %s6807_s26  ;;  %5450 = vrot.lane.b32.xlu0 %v5449_v33, %s6807_s26  ;;  %v12331_v33 = vld [vmem:[#allocation13_spill] sm:$0xff] }
  0xbe   : > { %v7994_v20 = vpop.permute.xlu0 %5170  ;;  %v12333_v44 = vpack.i.bf16 %v12331_v33, %v12332_v11  ;;  %v12343_v33 = vld [vmem:[#allocation25_spill] sm:$0xff] }
  0xbf   : > { %12328 = vst [vmem:[#allocation211_spill] sm:$0xff] %v7994_v20  ;;  %v12336_v20 = vld [vmem:[#allocation10_spill] sm:$0xff]  ;;  %v5489_v11 = vpack.i.bf16 %v12344_v32, %v12343_v33  ;;  %v12353_v33 = vld [vmem:[#allocation57_spill] sm:$0xff] }
  0xc1   : > { %5465 = vrot.lane.b32.xlu1 %v5464_v15, %s6807_s26  ;;  %5460 = vrot.lane.b32.xlu0 %v5459_v62, %s6807_s26  ;;  %v12337_v15 = vld [vmem:[#allocation12_spill] sm:$0xff] }
  0xc2   : > { %v7998_v57 = vpop.permute.xlu1 %5185  ;;  %v8002_v56 = vpop.permute.xlu0 %5180  ;;  %v5479_v31 = vpack.i.bf16 %v12337_v15, %v12336_v20  ;;  %v12347_v20 = vld [vmem:[#allocation46_spill] sm:$0xff] }
  0xc3   : > { %12329 = vst [vmem:[#allocation212_spill] sm:$0xff] %v7998_v57  ;;  %12330 = vst [vmem:[#allocation213_spill] sm:$0xff] %v8002_v56  ;;  %v12340_v56 = vld [vmem:[#allocation24_spill] sm:$0xff] }
  0xc4   : > { %v5494_v55 = vpack.i.bf16 %v12341_v18, %v12340_v56  ;;  %v12350_v18 = vld [vmem:[#allocation35_spill] sm:$0xff] }
  0xc5   : > { %5475 = vrot.lane.b32.xlu1 %v12333_v44, %s6808_s27  ;;  %5470 = vrot.lane.b32.xlu0 %v5469_v19, %s6807_s26  ;;  %v12346_v19 = vld [vmem:[#allocation33_spill] sm:$0xff]  ;;  %s6816_s26 = smov 48  }
  0xc6   : > { %v5504_v15 = vpack.i.bf16 %v12347_v20, %v12346_v19  ;;  %v12356_v19 = vld [vmem:[#allocation41_spill] sm:$0xff] }
  0xc7   : > { %v8013_v62 = vpop.permute.xlu1 %5195  ;;  %v8015_v57 = vpop.permute.xlu0 %5190 }
  0xc8   : > { %12338 = vst [vmem:[#allocation13_spill] sm:$0xff] %v8013_v62  ;;  %12339 = vst [vmem:[#allocation14_spill] sm:$0xff] %v8015_v57  ;;  %v12349_v57 = vld [vmem:[#allocation39_spill] sm:$0xff] }
  0xc9   : > { %5485 = vrot.lane.b32.xlu1 %v5484_v53, %s6808_s27  ;;  %5480 = vrot.lane.b32.xlu0 %v5479_v31, %s6808_s27  ;;  %v5499_v56 = vpack.i.bf16 %v12350_v18, %v12349_v57  ;;  %v12359_v57 = vld [vmem:[#allocation69_spill] sm:$0xff] }
  0xcb   : > { %v8021_v44 = vpop.permute.xlu1 %5205  ;;  %v8025_v40 = vpop.permute.xlu0 %5200 }
  0xcc   : > { %12342 = vst [vmem:[#allocation17_spill] sm:$0xff] %v8021_v44  ;;  %12345 = vst [vmem:[#allocation27_spill] sm:$0xff] %v8025_v40  ;;  %v12352_v44 = vld [vmem:[#allocation42_spill] sm:$0xff]  ;;  %v12355_v40 = vld [vmem:[#allocation48_spill] sm:$0xff] }
  0xcd   : > { %5495 = vrot.lane.b32.xlu1 %v5494_v55, %s6808_s27  ;;  %5490 = vrot.lane.b32.xlu0 %v5489_v11, %s6808_s27  ;;  %v5514_v32 = vpack.i.bf16 %v12353_v33, %v12352_v44  ;;  %v5509_v20 = vpack.i.bf16 %v12356_v19, %v12355_v40  ;;  %v12362_v44 = vld [vmem:[#allocation52_spill] sm:$0xff] }
  0xce   : > { %v12365_v40 = vld [vmem:[#allocation76_spill] sm:$0xff] }
  0xcf   : > { %v8031_v53 = vpop.permute.xlu1 %5215  ;;  %v8035_v31 = vpop.permute.xlu0 %5210 }
  0xd0   : > { %12348 = vst [vmem:[#allocation10_spill] sm:$0xff] %v8031_v53  ;;  %12351 = vst [vmem:[#allocation12_spill] sm:$0xff] %v8035_v31  ;;  %v12358_v53 = vld [vmem:[#allocation53_spill] sm:$0xff]  ;;  %v12361_v31 = vld [vmem:[#allocation55_spill] sm:$0xff] }
  0xd1   : > { %5505 = vrot.lane.b32.xlu1 %v5504_v15, %s6808_s27  ;;  %5500 = vrot.lane.b32.xlu0 %v5499_v56, %s6808_s27  ;;  %v5524_v18 = vpack.i.bf16 %v12359_v57, %v12358_v53  ;;  %v5519_v33 = vpack.i.bf16 %v12362_v44, %v12361_v31  ;;  %v12368_v53 = vld [vmem:[#allocation64_spill] sm:$0xff]  ;;  %v12371_v31 = vld [vmem:[#allocation90_spill] sm:$0xff] }
  0xd3   : > { %v8041_v55 = vpop.permute.xlu1 %5225  ;;  %v8045_v11 = vpop.permute.xlu0 %5220 }
  0xd4   : > { %12354 = vst [vmem:[#allocation24_spill] sm:$0xff] %v8041_v55  ;;  %12357 = vst [vmem:[#allocation38_spill] sm:$0xff] %v8045_v11  ;;  %v12364_v55 = vld [vmem:[#allocation61_spill] sm:$0xff]  ;;  %v12367_v11 = vld [vmem:[#allocation70_spill] sm:$0xff] }
  0xd5   : > { %5515 = vrot.lane.b32.xlu1 %v5514_v32, %s6808_s27  ;;  %5510 = vrot.lane.b32.xlu0 %v5509_v20, %s6808_s27  ;;  %v5534_v19 = vpack.i.bf16 %v12365_v40, %v12364_v55  ;;  %v5529_v57 = vpack.i.bf16 %v12368_v53, %v12367_v11  ;;  %v12373_v55 = vld [vmem:[#allocation79_spill] sm:$0xff]  ;;  %v12374_v40 = vld [vmem:[#allocation72_spill] sm:$0xff] }
  0xd6   : > { %v12376_v11 = vld [vmem:[#allocation87_spill] sm:$0xff]  ;;  %v12377_v53 = vld [vmem:[#allocation104_spill] sm:$0xff] }
  0xd7   : > { %v8051_v15 = vpop.permute.xlu1 %5235  ;;  %v8055_v56 = vpop.permute.xlu0 %5230 }
  0xd8   : > { %12360 = vst [vmem:[#allocation25_spill] sm:$0xff] %v8051_v15  ;;  %12363 = vst [vmem:[#allocation21_spill] sm:$0xff] %v8055_v56  ;;  %v12370_v15 = vld [vmem:[#allocation75_spill] sm:$0xff] }
  0xd9   : > { %5525 = vrot.lane.b32.xlu1 %v5524_v18, %s6808_s27  ;;  %5520 = vrot.lane.b32.xlu0 %v5519_v33, %s6808_s27  ;;  %v5544_v44 = vpack.i.bf16 %v12371_v31, %v12370_v15  ;;  %v5539_v33 = vpack.i.bf16 %v12374_v40, %v12373_v55  ;;  %v12379_v15 = vld [vmem:[#allocation89_spill] sm:$0xff]  ;;  %v12380_v31 = vld [vmem:[#allocation86_spill] sm:$0xff]  ;;  %v12383_v55 = vld [vmem:[#allocation112_spill] sm:$0xff] }
  0xda   : > { %v5549_v62 = vpack.i.bf16 %v12380_v31, %v12379_v15  ;;  %v12388_v15 = vld [vmem:[#allocation110_spill] sm:$0xff]  ;;  %v12389_v31 = vld [vmem:[#allocation123_spill] sm:$0xff] }
  0xdb   : > { %v8061_v32 = vpop.permute.xlu1 %5245  ;;  %v8065_v20 = vpop.permute.xlu0 %5240 }
  0xdc   : > { %12366 = vst [vmem:[#allocation33_spill] sm:$0xff] %v8061_v32  ;;  %12369 = vst [vmem:[#allocation46_spill] sm:$0xff] %v8065_v20  ;;  %v5554_v20 = vpack.i.bf16 %v12377_v53, %v12376_v11  ;;  %v12385_v32 = vld [vmem:[#allocation105_spill] sm:$0xff] }
  0xdd   : > { %5535 = vrot.lane.b32.xlu1 %v5534_v19, %s6808_s27  ;;  %5530 = vrot.lane.b32.xlu0 %v5529_v57, %s6808_s27  ;;  %v12386_v11 = vld [vmem:[#allocation97_spill] sm:$0xff] }
  0xde   : > { %v5559_v53 = vpack.i.bf16 %v12386_v11, %v12385_v32  ;;  %v12394_v32 = vld [vmem:[#allocation120_spill] sm:$0xff]  ;;  %v12395_v11 = vld [vmem:[#allocation131_spill] sm:$0xff] }
  0xdf   : > { %v8071_v18 = vpop.permute.xlu1 %5255  ;;  %v8075_v56 = vpop.permute.xlu0 %5250 }
  0xe0   : > { %12372 = vst [vmem:[#allocation39_spill] sm:$0xff] %v8071_v18  ;;  %12375 = vst [vmem:[#allocation35_spill] sm:$0xff] %v8075_v56  ;;  %v12382_v18 = vld [vmem:[#allocation98_spill] sm:$0xff] }
  0xe1   : > { %5545 = vrot.lane.b32.xlu1 %v5544_v44, %s6808_s27  ;;  %5540 = vrot.lane.b32.xlu0 %v5539_v33, %s6808_s27  ;;  %v5564_v40 = vpack.i.bf16 %v12383_v55, %v12382_v18  ;;  %v8096_v33 = vld [vmem:[%s6863_s23 + $0x12c] sm:$0x1]  ;;  %v12392_v55 = vld [vmem:[#allocation106_spill] sm:$0xff] }
  0xe3   : > { %v8081_v19 = vpop.permute.xlu1 %5265  ;;  %v8085_v57 = vpop.permute.xlu0 %5260 }
  0xe4   : > { %12378 = vst [vmem:[#allocation42_spill] sm:$0xff] %v8081_v19  ;;  %12381 = vst [vmem:[#allocation57_spill] sm:$0xff] %v8085_v57  ;;  %v5574_v57 = vpack.i.bf16 %v12389_v31, %v12388_v15  ;;  %v719_v15 = vrot.slane %v7992_v46, 1 }
  0xe5   : > { %5555 = vrot.lane.b32.xlu1 %v5554_v20, %s6808_s27  ;;  %5550 = vrot.lane.b32.xlu0 %v5549_v62, %s6808_s27  ;;  %v11879_v20 = vunpack.c.l.bf16 %v8096_v33  ;;  %v12391_v62 = vld [vmem:[#allocation113_spill] sm:$0xff] }
  0xe7   : > { %v8091_v44 = vpop.permute.xlu1 %5275  ;;  %v8098_v19 = vpop.permute.xlu0 %5270  ;;  %v721_v31 = vrot.slane %v11879_v20, 1 }
  0xe8   : > { %12384 = vst [vmem:[#allocation48_spill] sm:$0xff] %v8091_v44  ;;  %12387 = vst [vmem:[#allocation41_spill] sm:$0xff] %v8098_v19  ;;  %v5569_v44 = vpack.i.bf16 %v12392_v55, %v12391_v62  ;;  %v5584_v19 = vpack.i.bf16 %v12395_v11, %v12394_v32  ;;  %v12398_v62 = vld [vmem:[#allocation116_spill] sm:$0xff]  ;;  %v12401_v11 = vld [vmem:[#allocation134_spill] sm:$0xff] }
  0xe9   : > { %5565 = vrot.lane.b32.xlu1 %v5564_v40, %s6808_s27  ;;  %5560 = vrot.lane.b32.xlu0 %v5559_v53, %s6808_s27  ;;  %v717_v40 = vrot.slane %v7990_v16, 1  ;;  %v12400_v32 = vld [vmem:[#allocation128_spill] sm:$0xff]  ;;  %v8133_v20 = vsel %vm458_vm0, %v719_v15, %v721_v31  ;;  %v12410_v31 = vld [vmem:[#allocation135_spill] sm:$0xff] }
  0xea   : > { %v5594_v56 = vpack.i.bf16 %v12401_v11, %v12400_v32  ;;  %12403 = vst [vmem:[#allocation76_spill] sm:$0xff] %v8133_v20  ;;  %v12411_v11 = vld [vmem:[#allocation136_spill] sm:$0xff]  ;;  %v12454_v16 = vld [vmem:[#allocation183_spill] sm:$0xff] }
  0xeb   : > { %v8105_v18 = vpop.permute.xlu1 %5285  ;;  %v8109_v59 = vpop.permute.xlu0 %5280  ;;  %v8130_v43 = vsel %vm458_vm0, %v717_v40, %v719_v15 }
  0xec   : > { %12390 = vst [vmem:[#allocation53_spill] sm:$0xff] %v8105_v18  ;;  %12393 = vst [vmem:[#allocation69_spill] sm:$0xff] %v8109_v59  ;;  %v12397_v18 = vld [vmem:[#allocation124_spill] sm:$0xff]  ;;  %v716_v59 = vrot.slane %v7972_v51, 1  ;;  %v5604_v32 = vpack.i.bf16 %v8133_v20, %v8130_v43 }
  0xed   : > { %5575 = vrot.lane.b32.xlu1 %v5574_v57, %s6808_s27  ;;  %5570 = vrot.lane.b32.xlu0 %v5569_v44, %s6808_s27  ;;  %v5579_v55 = vpack.i.bf16 %v12398_v62, %v12397_v18  ;;  %12402 = vst [vmem:[#allocation61_spill] sm:$0xff] %v8130_v43  ;;  %v12405_v18 = vld [vmem:[#allocation132_spill] sm:$0xff]  ;;  %v12406_v62 = vld [vmem:[#allocation127_spill] sm:$0xff]  ;;  %v12421_v43 = vld [vmem:[#allocation154_spill] sm:$0xff] }
  0xef   : > { %v8119_v53 = vpop.permute.xlu1 %5295  ;;  %v8124_v57 = vpop.permute.xlu0 %5290 }
  0xf0   : > { %12396 = vst [vmem:[#allocation55_spill] sm:$0xff] %v8119_v53  ;;  %12399 = vst [vmem:[#allocation52_spill] sm:$0xff] %v8124_v57  ;;  %v5589_v53 = vpack.i.bf16 %v12406_v62, %v12405_v18  ;;  %v8141_v57 = vsel %vm458_vm0, %v716_v59, %v717_v40  ;;  %v12416_v40 = vld [vmem:[#allocation143_spill] sm:$0xff] }
  0xf1   : > { %5585 = vrot.lane.b32.xlu1 %v5584_v19, %s6808_s27  ;;  %5580 = vrot.lane.b32.xlu0 %v5579_v55, %s6808_s27  ;;  %12407 = vst [vmem:[#allocation64_spill] sm:$0xff] %v8141_v57  ;;  %v5599_v55 = vpack.i.bf16 %v8141_v57, %v12410_v31  ;;  %v12418_v31 = vld [vmem:[#allocation142_spill] sm:$0xff] }
  0xf3   : > { %v8136_v44 = vpop.permute.xlu1 %5305  ;;  %v8143_v19 = vpop.permute.xlu0 %5300 }
  0xf4   : > { %12404 = vst [vmem:[#allocation70_spill] sm:$0xff] %v8136_v44  ;;  %12408 = vst [vmem:[#allocation75_spill] sm:$0xff] %v8143_v19  ;;  %v12412_v44 = vld [vmem:[#allocation140_spill] sm:$0xff]  ;;  %v12419_v19 = vld [vmem:[#allocation141_spill] sm:$0xff] }
  0xf5   : > { %5595 = vrot.lane.b32.xlu1 %v5594_v56, %s6808_s27  ;;  %5590 = vrot.lane.b32.xlu0 %v5589_v53, %s6808_s27  ;;  %v5614_v18 = vpack.i.bf16 %v12412_v44, %v12411_v11  ;;  %v12417_v53 = vld [vmem:[#allocation148_spill] sm:$0xff]  ;;  %v5619_v44 = vpack.i.bf16 %v12419_v19, %v12418_v31  ;;  %v12420_v11 = vld [vmem:[#allocation146_spill] sm:$0xff] }
  0xf6   : > { %v5624_v20 = vpack.i.bf16 %v12417_v53, %v12416_v40  ;;  %v5634_v57 = vpack.i.bf16 %v12421_v43, %v12420_v11  ;;  %v5644_v40 = vpack.i.bf16 %v12429_v63, %v12428_v41  ;;  %v12430_v53 = vld [vmem:[#allocation155_spill] sm:$0xff]  ;;  %v12432_v19 = vld [vmem:[#allocation158_spill] sm:$0xff]  ;;  %v5118_v63 = vunpack.i.h.bf16 %v7921_v10  ;;  %v12450_v43 = vld [vmem:[#allocation185_spill] sm:$0xff] }
  0xf7   : > { %v8149_v15 = vpop.permute.xlu1 %5315  ;;  %v8155_v62 = vpop.permute.xlu0 %5310  ;;  %v5639_v45 = vpack.i.bf16 %v12431_v0, %v12430_v53  ;;  %v12433_v31 = vld [vmem:[#allocation166_spill] sm:$0xff]  ;;  %v5117_v41 = vunpack.i.l.bf16 %v7921_v10  ;;  %v723_v53 = vrot.slane %v7972_v51, 2  ;;  %v12453_v51 = vld [vmem:[#allocation179_spill] sm:$0xff]  ;;  %v5112_v10 = vunpack.i.l.bf16 %v7926_v9 }
  0xf8   : > { %12409 = vst [vmem:[#allocation90_spill] sm:$0xff] %v8149_v15  ;;  %12413 = vst [vmem:[#allocation79_spill] sm:$0xff] %v8155_v62  ;;  %v12427_v62 = vld [vmem:[#allocation144_spill] sm:$0xff]  ;;  %v8224_v11 = vsel %vm2044_vm2, %v7009_v30, %v5118_v63  ;;  %v726_v63 = vrot.slane %v7992_v46, 2  ;;  %v12461_v30 = vunpack.c.l.bf16 %v8096_v33 }
  0xf9   : > { %5605 = vrot.lane.b32.xlu1 %v5604_v32, %s6808_s27  ;;  %5600 = vrot.lane.b32.xlu0 %v5599_v55, %s6808_s27  ;;  %v12422_v32 = vld [vmem:[#allocation138_spill] sm:$0xff]  ;;  %v12423_v55 = vld [vmem:[#allocation139_spill] sm:$0xff]  ;;  %v8228_v48 = vsel %vm2044_vm2, %v7007_v26, %v5117_v41  ;;  %v8236_v9 = vsel %vm585_vm1, %v723_v53, %v724_v39  ;;  %v5138_v26 = vunpack.i.h.bf16 %v7941_v27 }
  0xfa   : > { %v12424_v15 = vpack.i.bf16 %v12422_v32, %v12423_v55  ;;  %v12459_v32 = vld [vmem:[#allocation188_spill] sm:$0xff]  ;;  %12460 = vst [vmem:[#allocation112_spill] sm:$0xff] %v8236_v9  ;;  %v728_v41 = vrot.slane %v12461_v30, 2  ;;  %v8258_v30 = vsel %vm2044_vm2, %v6967_v58, %v5112_v10  ;;  %v5132_v55 = vunpack.i.l.bf16 %v7946_v25 }
  0xfb   : > { %v8159_v59 = vpop.permute.xlu1 %5325  ;;  %v8161_v56 = vpop.permute.xlu0 %5320 }
  0xfc   : > { %12414 = vst [vmem:[#allocation72_spill] sm:$0xff] %v8159_v59  ;;  %12415 = vst [vmem:[#allocation87_spill] sm:$0xff] %v8161_v56  ;;  %v12426_v56 = vld [vmem:[#allocation149_spill] sm:$0xff] }
  0xfd   : > { %5615 = vrot.lane.b32.xlu1 %v5614_v18, %s6809_s28  ;;  %5610 = vrot.lane.b32.xlu0 %v12424_v15, %s6809_s28  ;;  %v5629_v18 = vpack.i.bf16 %v12427_v62, %v12426_v56  ;;  %v12448_v56 = vld [vmem:[#allocation174_spill] sm:$0xff]  ;;  %v12449_v62 = vld [vmem:[#allocation180_spill] sm:$0xff] }
  0xff   : > { %v8174_v59 = vpop.permute.xlu1 %5335  ;;  %v8194_v0 = vpop.permute.xlu0 %5330 }
 0x100   : > { %12425 = vst [vmem:[#allocation104_spill] sm:$0xff] %v8174_v59  ;;  %12442 = vst [vmem:[#allocation89_spill] sm:$0xff] %v8194_v0  ;;  %v12447_v59 = vld [vmem:[#allocation178_spill] sm:$0xff] }
 0x101   : > { %5625 = vrot.lane.b32.xlu1 %v5624_v20, %s6809_s28  ;;  %5620 = vrot.lane.b32.xlu0 %v5619_v44, %s6809_s28  ;;  %v12452_v20 = vld [vmem:[#allocation182_spill] sm:$0xff]  ;;  %v5128_v44 = vunpack.i.h.bf16 %v7931_v60 }
 0x103   : > { %v8208_v0 = vpop.permute.xlu1 %5345  ;;  %v8230_v15 = vpop.permute.xlu0 %5340 }
 0x104   : > { %12451 = vst [vmem:[#allocation86_spill] sm:$0xff] %v8208_v0  ;;  %v5127_v0 = vunpack.i.l.bf16 %v7931_v60  ;;  %12458 = vst [vmem:[#allocation98_spill] sm:$0xff] %v8230_v15  ;;  %v5123_v60 = vunpack.i.h.bf16 %v7936_v5  ;;  %v5137_v15 = vunpack.i.l.bf16 %v7941_v27  ;;  %v8254_v5 = vsel %vm2044_vm2, %v7028_v50, %v5113_v17 }
 0x105   : > { %5635 = vrot.lane.b32.xlu1 %v5634_v57, %s6809_s28  ;;  %5630 = vrot.lane.b32.xlu0 %v5629_v18, %s6809_s28  ;;  %v8262_v27 = vsel %vm2044_vm2, %v7066_v35, %v5128_v44  ;;  %v5133_v18 = vunpack.i.h.bf16 %v7946_v25  ;;  %v8286_v25 = vsel %vm585_vm1, %v724_v39, %v726_v63  ;;  %v5147_v17 = vunpack.i.l.bf16 %v7951_v37 }
 0x106   : > { %v8266_v33 = vsel %vm2044_vm2, %v7064_v34, %v5127_v0  ;;  %v8279_v44 = vsel %vm2044_vm2, %v7079_v49, %v5123_v60  ;;  %v8283_v0 = vsel %vm2044_vm2, %v7018_v36, %v5122_v7  ;;  %12464 = vst [vmem:[#allocation110_spill] sm:$0xff] %v8286_v25  ;;  %v8297_v10 = vsel %vm2044_vm2, %v7122_v42, %v5137_v15  ;;  %v12480_v34 = vld [vmem:[#allocation66_spill] sm:$0xff]  ;;  %v12484_v49 = vld [vmem:[#allocation35_spill] sm:$0xff]  ;;  %v12503_v25 = vld [vmem:[#allocation57_spill] sm:$0xff] }
 0x107   : > { %v8246_v57 = vpop.permute.xlu1 %5355  ;;  %v8270_v53 = vpop.permute.xlu0 %5350  ;;  %v5148_v60 = vunpack.i.h.bf16 %v7951_v37  ;;  %v5143_v39 = vunpack.i.h.bf16 %v7956_v28  ;;  %v8310_v15 = vsel %vm2044_vm2, %v7143_v52, %v5133_v18  ;;  %v8314_v37 = vsel %vm2044_vm2, %v7133_v47, %v5132_v55  ;;  %v12469_v55 = vld [vmem:[#allocation208_spill] sm:$0xff] }
 0x108   : > { %12462 = vst [vmem:[#allocation105_spill] sm:$0xff] %v8246_v57  ;;  %12463 = vst [vmem:[#allocation97_spill] sm:$0xff] %v8270_v53  ;;  %v8289_v53 = vsel %vm585_vm1, %v726_v63, %v728_v41  ;;  %v5142_v63 = vunpack.i.l.bf16 %v7956_v28  ;;  %v5158_v41 = vunpack.i.h.bf16 %v7961_v12  ;;  %v12468_v28 = vpack.i.bf16 %v12433_v31, %v12432_v19  ;;  %v12471_v19 = vld [vmem:[#allocation62_spill] sm:$0xff] }
 0x109   : > { %5645 = vrot.lane.b32.xlu1 %v5644_v40, %s6809_s28  ;;  %12465 = vst [vmem:[#allocation123_spill] sm:$0xff] %v8289_v53  ;;  %v8293_v40 = vsel %vm2044_vm2, %v7096_v21, %v5138_v26  ;;  %5640 = vrot.lane.b32.xlu0 %v5639_v45, %s6809_s28  ;;  %v5157_v26 = vunpack.i.l.bf16 %v7961_v12  ;;  %v5153_v18 = vunpack.i.h.bf16 %v7967_v6  ;;  %v5152_v57 = vunpack.i.l.bf16 %v7967_v6  ;;  %v12473_v12 = vld [vmem:[#allocation161_spill] sm:$0xff]  ;;  %v12493_v6 = vld [vmem:[#allocation80_spill] sm:$0xff] }
 0x10a   : > { %v5178_v46 = vunpack.i.h.bf16 %v12469_v55  ;;  %v5177_v52 = vunpack.i.l.bf16 %v12469_v55  ;;  %v8336_v31 = vsel %vm2044_vm2, %v12471_v19, %v5147_v17  ;;  %v12482_v19 = vld [vmem:[#allocation77_spill] sm:$0xff]  ;;  %v5252_v35 = vunpack.i.l.bf16 %v12484_v49 }
 0x10b   : > { %v8302_v7 = vpop.permute.xlu1 %5365  ;;  %v8316_v45 = vpop.permute.xlu0 %5360  ;;  %v5262_v53 = vunpack.i.l.bf16 %v12503_v25 }
 0x10c   : > { %12466 = vst [vmem:[#allocation113_spill] sm:$0xff] %v8302_v7  ;;  %12467 = vst [vmem:[#allocation106_spill] sm:$0xff] %v8316_v45  ;;  %v12470_v45 = vld [vmem:[#allocation63_spill] sm:$0xff]  ;;  %v2118_v55 = vsel %vm2099_vm3, %v8228_v48, %v5252_v35 }
 0x10d   : > { %5655 = vrot.lane.b32.xlu1 %v12468_v28, %s6809_s28  ;;  %v8332_v47 = vsel %vm2044_vm2, %v12470_v45, %v5148_v60  ;;  %v12472_v28 = vld [vmem:[#allocation157_spill] sm:$0xff]  ;;  %v8350_v60 = vsel %vm2044_vm2, %v12480_v34, %v5143_v39  ;;  %v12481_v45 = vld [vmem:[#allocation50_spill] sm:$0xff]  ;;  %v12486_v39 = vld [vmem:[#allocation171_spill] sm:$0xff] }
 0x10e   : > { %v12474_v7 = vpack.i.bf16 %v12472_v28, %v12473_v12  ;;  %v8354_v17 = vsel %vm2044_vm2, %v12481_v45, %v5142_v63  ;;  %v8358_v12 = vsel %vm2044_vm2, %v12482_v19, %v5158_v41  ;;  %v12487_v34 = vld [vmem:[#allocation164_spill] sm:$0xff]  ;;  %v12498_v41 = vld [vmem:[#allocation33_spill] sm:$0xff] }
 0x10f   : > { %v8342_v21 = vpop.permute.xlu1 %5375  ;;  %v8366_v50 = vpop.permute.xlu0 %5370  ;;  %v12488_v58 = vpack.i.bf16 %v12486_v39, %v12487_v34  ;;  %v12496_v34 = vld [vmem:[#allocation94_spill] sm:$0xff]  ;;  %v12497_v39 = vld [vmem:[#allocation211_spill] sm:$0xff]  ;;  %v5248_v19 = vunpack.i.h.bf16 %v12498_v41 }
 0x110   : > { %5650 = vrot.lane.b32.xlu0 %v12474_v7, %s6809_s28  ;;  %12475 = vst [vmem:[#allocation120_spill] sm:$0xff] %v8342_v21  ;;  %v12483_v7 = vld [vmem:[#allocation73_spill] sm:$0xff]  ;;  %v5253_v21 = vunpack.i.h.bf16 %v12484_v49  ;;  %12485 = vst [vmem:[#allocation131_spill] sm:$0xff] %v8366_v50  ;;  %v12495_v50 = vld [vmem:[#allocation95_spill] sm:$0xff] }
 0x111   : > { %v8362_v28 = vsel %vm2044_vm2, %v12483_v7, %v5157_v26  ;;  %5665 = vrot.lane.b32.xlu1 %v12488_v58, %s6809_s28  ;;  %v8378_v26 = vsel %vm2044_vm2, %v12493_v6, %v5153_v18  ;;  %v12494_v7 = vld [vmem:[#allocation65_spill] sm:$0xff]  ;;  %v8386_v42 = vsel %vm2044_vm2, %v12495_v50, %v5178_v46  ;;  %v8390_v58 = vsel %vm2044_vm2, %v12496_v34, %v5177_v52  ;;  %v12499_v6 = vld [vmem:[#allocation163_spill] sm:$0xff]  ;;  %v12502_v46 = vld [vmem:[#allocation212_spill] sm:$0xff] }
 0x112   : > { %v8382_v49 = vsel %vm2044_vm2, %v12494_v7, %v5152_v57  ;;  %v5247_v18 = vunpack.i.l.bf16 %v12498_v41  ;;  %v12500_v57 = vld [vmem:[#allocation167_spill] sm:$0xff]  ;;  %v2119_v36 = vsel %vm2099_vm3, %v8224_v11, %v5253_v21  ;;  %v5263_v41 = vunpack.i.h.bf16 %v12503_v25 }
 0x113   : > { %v12501_v7 = vpack.i.bf16 %v12499_v6, %v12500_v57  ;;  %v5386_v63 = vpop.permute.xlu1 %5385  ;;  %v5381_v3 = vpop.permute.xlu0 %5380  ;;  %v12504_v6 = vld [vmem:[#allocation177_spill] sm:$0xff]  ;;  %v2117_v48 = vsel %vm2099_vm3, %v8254_v5, %v5248_v19  ;;  %v12507_v25 = vld [vmem:[#allocation39_spill] sm:$0xff]  ;;  %v2122_v19 = vsel %vm2099_vm3, %v8266_v33, %v5262_v53 }
 0x114   : > { %v5388_v52 = vunpack.i.h.bf16 %v5386_v63  ;;  %v5387_v34 = vunpack.i.l.bf16 %v5386_v63  ;;  %v5383_v21 = vunpack.i.h.bf16 %v5381_v3  ;;  %v5382_v11 = vunpack.i.l.bf16 %v5381_v3 }
 0x115   : > { %5660 = vrot.lane.b32.xlu0 %v12501_v7, %s6809_s28  ;;  %v12505_v7 = vld [vmem:[#allocation170_spill] sm:$0xff]  ;;  %v2116_v35 = vsel %vm2099_vm3, %v8258_v30, %v5247_v18  ;;  %v5258_v50 = vunpack.i.h.bf16 %v12507_v25  ;;  %v5257_v4 = vunpack.i.l.bf16 %v12507_v25  ;;  %v2123_v5 = vsel %vm2099_vm3, %v8262_v27, %v5263_v41 }
 0x116   : > { %v12506_v57 = vpack.i.bf16 %v12504_v6, %v12505_v7  ;;  %v8413_v45 = vsel %vm2154_vm4, %v2118_v55, %v5387_v34  ;;  %v8416_v63 = vsel %vm2154_vm4, %v2119_v36, %v5388_v52  ;;  %v12508_v6 = vld [vmem:[#allocation169_spill] sm:$0xff]  ;;  %v12509_v7 = vld [vmem:[#allocation172_spill] sm:$0xff]  ;;  %v8429_v36 = vsel %vm2154_vm4, %v2116_v35, %v5382_v11  ;;  %v12512_v11 = vld [vmem:[#allocation175_spill] sm:$0xff] }
 0x117   : > { %v12510_v55 = vpack.i.bf16 %v12508_v6, %v12509_v7  ;;  %v5396_v34 = vpop.permute.xlu1 %5395  ;;  %v8432_v3 = vsel %vm2154_vm4, %v2117_v48, %v5383_v21  ;;  %v12511_v52 = vld [vmem:[#allocation41_spill] sm:$0xff]  ;;  %v5391_v6 = vpop.permute.xlu0 %5390  ;;  %v12513_v35 = vpack.i.bf16 %v12446_v54, %v12512_v11  ;;  %v2120_v53 = vsel %vm2099_vm3, %v8283_v0, %v5257_v4  ;;  %v12514_v7 = vld [vmem:[#allocation42_spill] sm:$0xff] }
 0x118   : > { %5675 = vrot.lane.b32.xlu1 %v12506_v57, %s6809_s28  ;;  %v5398_v30 = vunpack.i.h.bf16 %v5396_v34  ;;  %v5397_v18 = vunpack.i.l.bf16 %v5396_v34  ;;  %v5273_v57 = vunpack.i.h.bf16 %v12511_v52  ;;  %v5272_v25 = vunpack.i.l.bf16 %v12511_v52 }
 0x119   : > { %5670 = vrot.lane.b32.xlu0 %v12510_v55, %s6809_s28  ;;  %v5393_v27 = vunpack.i.h.bf16 %v5391_v6  ;;  %v5392_v41 = vunpack.i.l.bf16 %v5391_v6  ;;  %v2121_v33 = vsel %vm2099_vm3, %v8279_v44, %v5258_v50  ;;  %v5268_v55 = vunpack.i.h.bf16 %v12514_v7 }
 0x11a   : > { %v8445_v21 = vsel %vm2154_vm4, %v2122_v19, %v5397_v18  ;;  %v8448_v48 = vsel %vm2154_vm4, %v2123_v5, %v5398_v30  ;;  %v5267_v34 = vunpack.i.l.bf16 %v12514_v7  ;;  %v12515_v54 = vpack.i.bf16 %v12448_v56, %v12447_v59  ;;  %v12516_v19 = vld [vmem:[#allocation69_spill] sm:$0xff] }
 0x11b   : > { %v5406_v18 = vpop.permute.xlu1 %5405  ;;  %v8461_v30 = vsel %vm2154_vm4, %v2120_v53, %v5392_v41  ;;  %v8464_v5 = vsel %vm2154_vm4, %v2121_v33, %v5393_v27  ;;  %v2127_v50 = vsel %vm2099_vm3, %v8293_v40, %v5273_v57  ;;  %v2126_v44 = vsel %vm2099_vm3, %v8297_v10, %v5272_v25  ;;  %v5401_v56 = vpop.permute.xlu0 %5400  ;;  %v12518_v27 = vld [vmem:[#allocation48_spill] sm:$0xff] }
 0x11c   : > { %5685 = vrot.lane.b32.xlu1 %v12513_v35, %s6809_s28  ;;  %v5408_v4 = vunpack.i.h.bf16 %v5406_v18  ;;  %v5407_v0 = vunpack.i.l.bf16 %v5406_v18  ;;  %v5283_v52 = vunpack.i.h.bf16 %v12516_v19  ;;  %v5282_v59 = vunpack.i.l.bf16 %v12516_v19 }
 0x11d   : > { %5680 = vrot.lane.b32.xlu0 %v12515_v54, %s6809_s28  ;;  %v12517_v6 = vpack.i.bf16 %v12450_v43, %v12449_v62  ;;  %v5403_v40 = vunpack.i.h.bf16 %v5401_v56  ;;  %v5402_v57 = vunpack.i.l.bf16 %v5401_v56  ;;  %v2124_v10 = vsel %vm2099_vm3, %v8314_v37, %v5267_v34  ;;  %v12520_v54 = vld [vmem:[#allocation52_spill] sm:$0xff] }
 0x11e   : > { %v8477_v11 = vsel %vm2154_vm4, %v2126_v44, %v5407_v0  ;;  %v8480_v35 = vsel %vm2154_vm4, %v2127_v50, %v5408_v4  ;;  %v2125_v25 = vsel %vm2099_vm3, %v8310_v15, %v5268_v55  ;;  %v5278_v41 = vunpack.i.h.bf16 %v12518_v27 }
 0x11f   : > { %v5277_v53 = vunpack.i.l.bf16 %v12518_v27  ;;  %v12519_v43 = vpack.i.bf16 %v12453_v51, %v12452_v20  ;;  %v5416_v62 = vpop.permute.xlu1 %5415  ;;  %v8493_v33 = vsel %vm2154_vm4, %v2124_v10, %v5402_v57  ;;  %v8496_v7 = vsel %vm2154_vm4, %v2125_v25, %v5403_v40  ;;  %v5411_v20 = vpop.permute.xlu0 %5410  ;;  %v12524_v10 = vld [vmem:[#allocation213_spill] sm:$0xff] }
 0x120   : > { %5695 = vrot.lane.b32.xlu1 %v12517_v6, %s6809_s28  ;;  %v5418_v37 = vunpack.i.h.bf16 %v5416_v62  ;;  %v5417_v34 = vunpack.i.l.bf16 %v5416_v62  ;;  %v2131_v15 = vsel %vm2099_vm3, %v8332_v47, %v5283_v52  ;;  %v2130_v55 = vsel %vm2099_vm3, %v8336_v31, %v5282_v59  ;;  %v12522_v52 = vld [vmem:[#allocation53_spill] sm:$0xff] }
 0x121   : > { %5690 = vrot.lane.b32.xlu0 %v12519_v43, %s6809_s28  ;;  %v5293_v18 = vunpack.i.h.bf16 %v12520_v54  ;;  %v5292_v51 = vunpack.i.l.bf16 %v12520_v54  ;;  %v12521_v4 = vpack.i.bf16 %v7789_v2, %v12454_v16  ;;  %v5413_v47 = vunpack.i.h.bf16 %v5411_v20 }
 0x122   : > { %v8509_v0 = vsel %vm2154_vm4, %v2130_v55, %v5417_v34  ;;  %v8512_v50 = vsel %vm2154_vm4, %v2131_v15, %v5418_v37  ;;  %v5412_v44 = vunpack.i.l.bf16 %v5411_v20  ;;  %v2128_v31 = vsel %vm2099_vm3, %v8354_v17, %v5277_v53  ;;  %v12526_v53 = vld [vmem:[#allocation189_spill] sm:$0xff] }
 0x123   : > { %v2129_v19 = vsel %vm2099_vm3, %v8350_v60, %v5278_v41  ;;  %v5288_v59 = vunpack.i.h.bf16 %v12522_v52  ;;  %v5287_v56 = vunpack.i.l.bf16 %v12522_v52  ;;  %v12523_v16 = vpack.i.bf16 %v12456_v24, %v12455_v38  ;;  %v5426_v2 = vpop.permute.xlu1 %5425  ;;  %v5421_v38 = vpop.permute.xlu0 %5420  ;;  %v12525_v41 = vld [vmem:[#allocation192_spill] sm:$0xff]  ;;  %v12528_v55 = vld [vmem:[#allocation13_spill] sm:$0xff] }
 0x124   : > { %5705 = vrot.lane.b32.xlu1 %v12521_v4, %s6809_s28  ;;  %v8525_v6 = vsel %vm2154_vm4, %v2128_v31, %v5412_v44  ;;  %v8528_v40 = vsel %vm2154_vm4, %v2129_v19, %v5413_v47  ;;  %v5428_v17 = vunpack.i.h.bf16 %v5426_v2  ;;  %v5427_v57 = vunpack.i.l.bf16 %v5426_v2  ;;  %v12531_v4 = vld [vmem:[#allocation14_spill] sm:$0xff] }
 0x125   : > { %5700 = vrot.lane.b32.xlu0 %v12523_v16, %s6809_s28  ;;  %v5183_v60 = vunpack.i.h.bf16 %v12524_v10  ;;  %v5182_v25 = vunpack.i.l.bf16 %v12524_v10  ;;  %v2135_v27 = vsel %vm2099_vm3, %v8358_v12, %v5293_v18  ;;  %v2134_v24 = vsel %vm2099_vm3, %v8362_v28, %v5292_v51 }
 0x126   : > { %v12527_v43 = vpack.i.bf16 %v12525_v41, %v12526_v53  ;;  %v8541_v62 = vsel %vm2154_vm4, %v2134_v24, %v5427_v57  ;;  %v8544_v37 = vsel %vm2154_vm4, %v2135_v27, %v5428_v17  ;;  %v5423_v34 = vunpack.i.h.bf16 %v5421_v38  ;;  %v12540_v27 = vld [vmem:[#allocation107_spill] sm:$0xff]  ;;  %v12543_v53 = vld [vmem:[#allocation114_spill] sm:$0xff] }
 0x127   : > { %v5422_v15 = vunpack.i.l.bf16 %v5421_v38  ;;  %v5198_v54 = vunpack.i.h.bf16 %v12528_v55  ;;  %v5197_v12 = vunpack.i.l.bf16 %v12528_v55  ;;  %v2132_v28 = vsel %vm2099_vm3, %v8382_v49, %v5287_v56  ;;  %v8556_v20 = vpop.permute.xlu1 %5435  ;;  %v12536_v56 = vld [vmem:[#allocation79_spill] sm:$0xff]  ;;  %v8576_v17 = vpop.permute.xlu0 %5430  ;;  %v12542_v38 = vld [vmem:[#allocation102_spill] sm:$0xff]  ;;  %v12545_v55 = vld [vmem:[#allocation117_spill] sm:$0xff] }
 0x128   : > { %5715 = vrot.lane.b32.xlu1 %v12527_v43, %s6809_s28  ;;  %v2133_v18 = vsel %vm2099_vm3, %v8378_v26, %v5288_v59  ;;  %v12529_v51 = vpack.i.bf16 %v12459_v32, %v7792_v14  ;;  %12530 = vst [vmem:[#allocation124_spill] sm:$0xff] %v8556_v20  ;;  %v5193_v47 = vunpack.i.h.bf16 %v12531_v4  ;;  %v5192_v44 = vunpack.i.l.bf16 %v12531_v4  ;;  %v12533_v26 = vld [vmem:[#allocation101_spill] sm:$0xff]  ;;  %v12535_v32 = vld [vmem:[#allocation84_spill] sm:$0xff]  ;;  %12537 = vst [vmem:[#allocation116_spill] sm:$0xff] %v8576_v17 }
 0x129   : > { %v8561_v31 = vsel %vm2154_vm4, %v2132_v28, %v5422_v15  ;;  %v8564_v19 = vsel %vm2154_vm4, %v2133_v18, %v5423_v34  ;;  %v12532_v49 = vunpack.i.h.bf16 %v12497_v39  ;;  %v12534_v14 = vunpack.i.l.bf16 %v12497_v39  ;;  %v12544_v34 = vld [vmem:[#allocation99_spill] sm:$0xff]  ;;  %v12547_v18 = vld [vmem:[#allocation70_spill] sm:$0xff] }
 0x12a   : > { %5710 = vrot.lane.b32.xlu0 %v12529_v51, %s6809_s28  ;;  %v5313_v16 = vunpack.i.h.bf16 %v12536_v56  ;;  %v5312_v2 = vunpack.i.l.bf16 %v12536_v56  ;;  %v12538_v57 = vpack.i.bf16 %v7847_v61, %v7807_v23  ;;  %v12539_v10 = vunpack.i.h.bf16 %v12502_v46  ;;  %v12546_v61 = vld [vmem:[#allocation119_spill] sm:$0xff]  ;;  %v12561_v20 = vld [vmem:[#allocation110_spill] sm:$0xff] }
 0x12b   : > { %v2086_v52 = vsel %vm2044_vm2, %v12533_v26, %v12532_v49  ;;  %v2085_v59 = vsel %vm2044_vm2, %v12535_v32, %v12534_v14  ;;  %v12541_v39 = vunpack.i.l.bf16 %v12502_v46  ;;  %v2090_v43 = vsel %vm2044_vm2, %v12543_v53, %v5183_v60  ;;  %v5446_v49 = vpop.permute.xlu1 %5445  ;;  %v12549_v60 = vld [vmem:[#allocation126_spill] sm:$0xff] }
 0x12c   : > { %5725 = vrot.lane.b32.xlu1 %v12538_v57, %s6809_s28  ;;  %v2092_v24 = vsel %vm2044_vm2, %v12540_v27, %v12539_v10  ;;  %v2089_v15 = vsel %vm2044_vm2, %v12544_v34, %v5182_v25  ;;  %v2096_v23 = vsel %vm2044_vm2, %v12545_v55, %v5198_v54  ;;  %v2095_v28 = vsel %vm2044_vm2, %v12546_v61, %v5197_v12  ;;  %v12550_v25 = vld [vmem:[#allocation121_spill] sm:$0xff] }
 0x12d   : > { %v2091_v41 = vsel %vm2044_vm2, %v12542_v38, %v12541_v39  ;;  %v5308_v51 = vunpack.i.h.bf16 %v12547_v18  ;;  %v5307_v4 = vunpack.i.l.bf16 %v12547_v18  ;;  %v12548_v46 = vpack.i.bf16 %v7804_v29, %v7823_v22  ;;  %v12551_v39 = vld [vmem:[#allocation87_spill] sm:$0xff]  ;;  %v5441_v22 = vpop.permute.xlu0 %5440 }
 0x12e   : > { %v2094_v14 = vsel %vm2044_vm2, %v12549_v60, %v5193_v47  ;;  %v2093_v56 = vsel %vm2044_vm2, %v12550_v25, %v5192_v44  ;;  %v5448_v54 = vunpack.i.h.bf16 %v5446_v49  ;;  %v5447_v57 = vunpack.i.l.bf16 %v5446_v49  ;;  %v12553_v49 = vld [vmem:[#allocation90_spill] sm:$0xff] }
 0x12f   : > { %5720 = vrot.lane.b32.xlu0 %v12548_v46, %s6809_s28  ;;  %v2143_v12 = vsel %vm2099_vm3, %v8386_v42, %v5313_v16  ;;  %v2142_v10 = vsel %vm2099_vm3, %v8390_v58, %v5312_v2  ;;  %v5323_v18 = vunpack.i.h.bf16 %v12551_v39  ;;  %v5322_v29 = vunpack.i.l.bf16 %v12551_v39 }
 0x130   : > { %v12552_v47 = vpack.i.bf16 %v8236_v9, %v7838_v1  ;;  %v8619_v44 = vsel %vm2154_vm4, %v2142_v10, %v5447_v57  ;;  %v8622_v46 = vsel %vm2154_vm4, %v2143_v12, %v5448_v54  ;;  %v5443_v42 = vunpack.i.h.bf16 %v5441_v22  ;;  %v5456_v57 = vpop.permute.xlu1 %5455 }
 0x131   : > { %v5442_v16 = vunpack.i.l.bf16 %v5441_v22  ;;  %v2140_v58 = vsel %vm2099_vm3, %v2085_v59, %v5307_v4  ;;  %v2141_v2 = vsel %vm2099_vm3, %v2086_v52, %v5308_v51  ;;  %v5318_v39 = vunpack.i.h.bf16 %v12553_v49  ;;  %v12555_v4 = vld [vmem:[#allocation89_spill] sm:$0xff] }
 0x132   : > { %5735 = vrot.lane.b32.xlu1 %v12552_v47, %s6809_s28  ;;  %v5317_v17 = vunpack.i.l.bf16 %v12553_v49  ;;  %v12554_v1 = vpack.i.bf16 %v7835_v8, %v7850_v13  ;;  %v8636_v54 = vsel %vm2154_vm4, %v2141_v2, %v5443_v42  ;;  %v5458_v12 = vunpack.i.h.bf16 %v5456_v57  ;;  %v5451_v49 = vpop.permute.xlu0 %5450  ;;  %v12556_v8 = vld [vmem:[#allocation3_spill] sm:$0xff]  ;;  %v12557_v13 = vld [vmem:[#allocation2_spill] sm:$0xff]  ;;  %v12559_v2 = vld [vmem:[#allocation72_spill] sm:$0xff] }
 0x133   : > { %v8633_v10 = vsel %vm2154_vm4, %v2140_v58, %v5442_v16  ;;  %v5457_v59 = vunpack.i.l.bf16 %v5456_v57  ;;  %v2147_v52 = vsel %vm2099_vm3, %v2092_v24, %v5323_v18  ;;  %v2146_v51 = vsel %vm2099_vm3, %v2091_v41, %v5322_v29 }
 0x134   : > { %5730 = vrot.lane.b32.xlu0 %v12554_v1, %s6809_s28  ;;  %v5333_v22 = vunpack.i.h.bf16 %v12555_v4  ;;  %v5332_v47 = vunpack.i.l.bf16 %v12555_v4  ;;  %v12558_v16 = vpack.i.bf16 %v12556_v8, %v12557_v13  ;;  %v8650_v58 = vsel %vm2154_vm4, %v2147_v52, %v5458_v12  ;;  %v12560_v4 = vld [vmem:[#allocation123_spill] sm:$0xff]  ;;  %v12580_v13 = vld [vmem:[#allocation28_spill] sm:$0xff] }
 0x135   : > { %v8647_v42 = vsel %vm2154_vm4, %v2146_v51, %v5457_v59  ;;  %v5453_v24 = vunpack.i.h.bf16 %v5451_v49  ;;  %v5452_v18 = vunpack.i.l.bf16 %v5451_v49  ;;  %v2144_v41 = vsel %vm2099_vm3, %v2089_v15, %v5317_v17  ;;  %v5466_v59 = vpop.permute.xlu1 %5465  ;;  %v12563_v15 = vld [vmem:[#allocation27_spill] sm:$0xff] }
 0x136   : > { %5745 = vrot.lane.b32.xlu1 %v12558_v16, %s6810_s29  ;;  %v2145_v29 = vsel %vm2099_vm3, %v2090_v43, %v5318_v39  ;;  %v5328_v1 = vunpack.i.h.bf16 %v12559_v2  ;;  %v5327_v57 = vunpack.i.l.bf16 %v12559_v2  ;;  %v12562_v16 = vpack.i.bf16 %v12560_v4, %v12561_v20  ;;  %v5461_v9 = vpop.permute.xlu0 %5460  ;;  %v12565_v4 = vld [vmem:[#allocation15_spill] sm:$0xff] }
 0x137   : > { %v8661_v51 = vsel %vm2154_vm4, %v2144_v41, %v5452_v18  ;;  %v8664_v12 = vsel %vm2154_vm4, %v2145_v29, %v5453_v24  ;;  %v5468_v52 = vunpack.i.h.bf16 %v5466_v59  ;;  %v5467_v17 = vunpack.i.l.bf16 %v5466_v59 }
 0x138   : > { %5740 = vrot.lane.b32.xlu0 %v12562_v16, %s6809_s28  ;;  %v5203_v43 = vunpack.i.h.bf16 %v12563_v15  ;;  %v5202_v39 = vunpack.i.l.bf16 %v12563_v15  ;;  %v2151_v49 = vsel %vm2099_vm3, %v2096_v23, %v5333_v22  ;;  %v2150_v2 = vsel %vm2099_vm3, %v2095_v28, %v5332_v47  ;;  %v12564_v16 = vld [vmem:[#allocation16_spill] sm:$0xff]  ;;  %v12568_v15 = vld [vmem:[#allocation18_spill] sm:$0xff] }
 0x139   : > { %v12566_v20 = vpack.i.bf16 %v12564_v16, %v12565_v4  ;;  %v8675_v18 = vsel %vm2154_vm4, %v2150_v2, %v5467_v17  ;;  %v8678_v24 = vsel %vm2154_vm4, %v2151_v49, %v5468_v52  ;;  %v5463_v41 = vunpack.i.h.bf16 %v5461_v9  ;;  %v12567_v22 = vld [vmem:[#allocation104_spill] sm:$0xff]  ;;  %v12569_v4 = vld [vmem:[#allocation11_spill] sm:$0xff]  ;;  %v8688_v17 = vpop.permute.xlu1 %5475  ;;  %v12577_v16 = vld [vmem:[#allocation129_spill] sm:$0xff] }
 0x13a   : > { %v5462_v29 = vunpack.i.l.bf16 %v5461_v9  ;;  %v2148_v59 = vsel %vm2099_vm3, %v2093_v56, %v5327_v57  ;;  %v2149_v23 = vsel %vm2099_vm3, %v2094_v14, %v5328_v1  ;;  %v5338_v28 = vunpack.i.h.bf16 %v12567_v22  ;;  %12571 = vst [vmem:[#allocation128_spill] sm:$0xff] %v8688_v17  ;;  %v5471_v56 = vpop.permute.xlu0 %5470  ;;  %v12572_v14 = vld [vmem:[#allocation20_spill] sm:$0xff]  ;;  %v12573_v1 = vld [vmem:[#allocation23_spill] sm:$0xff] }
 0x13b   : > { %5755 = vrot.lane.b32.xlu1 %v12566_v20, %s6810_s29  ;;  %v5337_v47 = vunpack.i.l.bf16 %v12567_v22  ;;  %v12570_v20 = vpack.i.bf16 %v12568_v15, %v12569_v4  ;;  %v8694_v9 = vsel %vm2154_vm4, %v2149_v23, %v5463_v41  ;;  %v12574_v57 = vpack.i.bf16 %v12572_v14, %v12573_v1  ;;  %v12575_v49 = vld [vmem:[#allocation31_spill] sm:$0xff]  ;;  %v12576_v2 = vld [vmem:[#allocation32_spill] sm:$0xff]  ;;  %v12578_v4 = vld [vmem:[#allocation118_spill] sm:$0xff] }
 0x13c   : > { %v8691_v52 = vsel %vm2154_vm4, %v2148_v59, %v5462_v29  ;;  %v5774_v22 = vpack.i.bf16 %v12576_v2, %v12575_v49  ;;  %v2097_v17 = vsel %vm2044_vm2, %v12578_v4, %v5202_v39  ;;  %v5473_v29 = vunpack.i.h.bf16 %v5471_v56  ;;  %v12579_v15 = vld [vmem:[#allocation29_spill] sm:$0xff]  ;;  %v12583_v49 = vld [vmem:[#allocation22_spill] sm:$0xff]  ;;  %v12584_v2 = vld [vmem:[#allocation36_spill] sm:$0xff] }
 0x13d   : > { %5750 = vrot.lane.b32.xlu0 %v12570_v20, %s6810_s29  ;;  %v2098_v20 = vsel %vm2044_vm2, %v12577_v16, %v5203_v43  ;;  %v5472_v59 = vunpack.i.l.bf16 %v5471_v56  ;;  %v2152_v41 = vsel %vm2099_vm3, %v2097_v17, %v5337_v47  ;;  %v12581_v1 = vpack.i.bf16 %v12579_v15, %v12580_v13  ;;  %v12588_v47 = vld [vmem:[#allocation44_spill] sm:$0xff] }
 0x13e   : > { %v2153_v23 = vsel %vm2099_vm3, %v2098_v20, %v5338_v28  ;;  %v5769_v14 = vpack.i.bf16 %v12584_v2, %v12583_v49  ;;  %v8722_v56 = vpop.permute.xlu0 %5480  ;;  %v12587_v28 = vld [vmem:[#allocation43_spill] sm:$0xff]  ;;  %v12590_v20 = vld [vmem:[#allocation34_spill] sm:$0xff] }
 0x13f   : > { %5765 = vrot.lane.b32.xlu1 %v12574_v57, %s6810_s29  ;;  %v8712_v57 = vpop.permute.xlu1 %5485  ;;  %v8717_v43 = vsel %vm2154_vm4, %v2152_v41, %v5472_v59  ;;  %v8720_v39 = vsel %vm2154_vm4, %v2153_v23, %v5473_v29  ;;  %12586 = vst [vmem:[#allocation127_spill] sm:$0xff] %v8722_v56  ;;  %v5784_v17 = vpack.i.bf16 %v12588_v47, %v12587_v28  ;;  %v12593_v29 = vld [vmem:[#allocation56_spill] sm:$0xff]  ;;  %v12594_v59 = vld [vmem:[#allocation49_spill] sm:$0xff]  ;;  %v12596_v23 = vld [vmem:[#allocation58_spill] sm:$0xff] }
 0x140   : > { %12582 = vst [vmem:[#allocation134_spill] sm:$0xff] %v8712_v57  ;;  %12585 = vst [vmem:[#allocation132_spill] sm:$0xff] %v8720_v39  ;;  %v12591_v57 = vld [vmem:[#allocation47_spill] sm:$0xff]  ;;  %v5794_v41 = vpack.i.bf16 %v12594_v59, %v12593_v29  ;;  %v12597_v28 = vld [vmem:[#allocation60_spill] sm:$0xff] }
 0x141   : > { %5760 = vrot.lane.b32.xlu0 %v12581_v1, %s6810_s29  ;;  %v5779_v49 = vpack.i.bf16 %v12591_v57, %v12590_v20  ;;  %v5789_v47 = vpack.i.bf16 %v12597_v28, %v12596_v23  ;;  %v12600_v57 = vld [vmem:[#allocation63_spill] sm:$0xff]  ;;  %v12602_v29 = vld [vmem:[#allocation66_spill] sm:$0xff]  ;;  %v12605_v23 = vld [vmem:[#allocation77_spill] sm:$0xff] }
 0x142   : > { %v8732_v2 = vpop.permute.xlu0 %5490  ;;  %v12608_v56 = vld [vmem:[#allocation85_spill] sm:$0xff] }
 0x143   : > { %5775 = vrot.lane.b32.xlu1 %v5774_v22, %s6810_s29  ;;  %v8728_v1 = vpop.permute.xlu1 %5495  ;;  %12592 = vst [vmem:[#allocation136_spill] sm:$0xff] %v8732_v2  ;;  %v12601_v2 = vld [vmem:[#allocation50_spill] sm:$0xff] }
 0x144   : > { %12589 = vst [vmem:[#allocation135_spill] sm:$0xff] %v8728_v1  ;;  %v12599_v1 = vld [vmem:[#allocation62_spill] sm:$0xff]  ;;  %v5799_v59 = vpack.i.bf16 %v12602_v29, %v12601_v2  ;;  %v12609_v2 = vld [vmem:[#allocation83_spill] sm:$0xff] }
 0x145   : > { %5770 = vrot.lane.b32.xlu0 %v5769_v14, %s6810_s29  ;;  %v5804_v20 = vpack.i.bf16 %v12600_v57, %v12599_v1  ;;  %v12607_v1 = vld [vmem:[#allocation80_spill] sm:$0xff]  ;;  %v5824_v29 = vpack.i.bf16 %v12609_v2, %v12608_v56 }
 0x146   : > { %v8742_v14 = vpop.permute.xlu0 %5500 }
 0x147   : > { %5785 = vrot.lane.b32.xlu1 %v5784_v17, %s6810_s29  ;;  %v8738_v22 = vpop.permute.xlu1 %5505  ;;  %12598 = vst [vmem:[#allocation143_spill] sm:$0xff] %v8742_v14  ;;  %v12606_v14 = vld [vmem:[#allocation65_spill] sm:$0xff] }
 0x148   : > { %12595 = vst [vmem:[#allocation140_spill] sm:$0xff] %v8738_v22  ;;  %v12604_v22 = vld [vmem:[#allocation73_spill] sm:$0xff]  ;;  %v5809_v57 = vpack.i.bf16 %v12607_v1, %v12606_v14  ;;  %v12612_v14 = vld [vmem:[#allocation94_spill] sm:$0xff]  ;;  %v12613_v1 = vld [vmem:[#allocation95_spill] sm:$0xff] }
 0x149   : > { %5780 = vrot.lane.b32.xlu0 %v5779_v49, %s6810_s29  ;;  %v5814_v28 = vpack.i.bf16 %v12605_v23, %v12604_v22  ;;  %v12611_v22 = vld [vmem:[#allocation93_spill] sm:$0xff]  ;;  %v5834_v13 = vpack.i.bf16 %v12613_v1, %v12612_v14  ;;  %v5839_v14 = vpack.i.bf16 %v12543_v53, %v12544_v34 }
 0x14a   : > { %v8752_v49 = vpop.permute.xlu0 %5510  ;;  %v304_v1 = vld [vmem:[%s6863_s23 + $0x138] sm:$0xf] }
 0x14b   : > { %5795 = vrot.lane.b32.xlu1 %v5794_v41, %s6810_s29  ;;  %v8748_v17 = vpop.permute.xlu1 %5515  ;;  %12603 = vst [vmem:[#allocation148_spill] sm:$0xff] %v8752_v49  ;;  %v12610_v49 = vld [vmem:[#allocation91_spill] sm:$0xff]  ;;  %v12615_v53 = vld [vmem:[#allocation205_spill] sm:$0xff] }
 0x14c   : > { %v5819_v23 = vpack.i.bf16 %v12611_v22, %v12610_v49  ;;  %v5844_v49 = vpack.i.bf16 %v12540_v27, %v12542_v38  ;;  %v5849_v27 = vpack.i.bf16 %v12549_v60, %v12550_v25  ;;  %v12616_v34 = vld [vmem:[#allocation209_spill] sm:$0xff]  ;;  %v8811_v22 = vunpack.c.l.bf16 %v304_v1  ;;  %v12621_v1 = vld [vmem:[#allocation210_spill] sm:$0xff] }
 0x14d   : > { %5790 = vrot.lane.b32.xlu0 %v5789_v47, %s6810_s29 }
 0x14e   : > { %v8762_v47 = vpop.permute.xlu0 %5520  ;;  %12618 = vst [vmem:[#allocation146_spill] sm:$0xff] %v8811_v22 }
 0x14f   : > { %5805 = vrot.lane.b32.xlu1 %v5804_v20, %s6810_s29  ;;  %v8758_v41 = vpop.permute.xlu1 %5525 }
 0x151   : > { %5800 = vrot.lane.b32.xlu0 %v5799_v59, %s6810_s29 }
 0x152   : > { %v8772_v59 = vpop.permute.xlu0 %5530 }
 0x153   : > { %5815 = vrot.lane.b32.xlu1 %v5814_v28, %s6810_s29  ;;  %v8768_v20 = vpop.permute.xlu1 %5535 }
 0x155   : > { %5810 = vrot.lane.b32.xlu0 %v5809_v57, %s6810_s29  ;;  %v5829_v57 = vpack.i.bf16 %v12533_v26, %v12535_v32  ;;  %v5854_v26 = vpack.i.bf16 %v12545_v55, %v12546_v61  ;;  %v4831_v32 = vld [vmem:[%s6863_s23 + $0x130] sm:$0xff]   ;;  %v5859_v61 = vpack.i.bf16 %v12577_v16, %v12578_v4 }
 0x156   : > { %v8782_v56 = vpop.permute.xlu0 %5540 }
 0x157   : > { %5825 = vrot.lane.b32.xlu1 %v5824_v29, %s6810_s29  ;;  %v8778_v28 = vpop.permute.xlu1 %5545 }
 0x159   : > { %5820 = vrot.lane.b32.xlu0 %v5819_v23, %s6810_s29 }
 0x15a   : > { %v8792_v23 = vpop.permute.xlu0 %5550 }
 0x15b   : > { %5835 = vrot.lane.b32.xlu1 %v5834_v13, %s6810_s29  ;;  %v8788_v29 = vpop.permute.xlu1 %5555 }
 0x15d   : > { %5830 = vrot.lane.b32.xlu0 %v5829_v57, %s6810_s29  ;;  %v5864_v57 = vpack.i.bf16 %v12616_v34, %v12615_v53  ;;  %v6789_v34 = vld [vmem:[%s11588_s1 + $0x10] ss:$0 sps:$4 sm:$0x33]  }
 0x15e   : > { %v8804_v38 = vpop.permute.xlu0 %5560 }
 0x15f   : > { %5845 = vrot.lane.b32.xlu1 %v5844_v49, %s6810_s29  ;;  %v8800_v13 = vpop.permute.xlu1 %5565  ;;  %v8809_v49 = vunpack.c.h.bf16 %v4831_v32 }
 0x160   : > { %12614 = vst [vmem:[#allocation142_spill] sm:$0xff] %v8800_v13 }
 0x161   : > { %5840 = vrot.lane.b32.xlu0 %v5839_v14, %s6810_s29  ;;  %12617 = vst [vmem:[#allocation141_spill] sm:$0xff] %v8809_v49  ;;  %v8818_v14 = vunpack.c.l.bf16 %v4831_v32  ;;  %v5874_v25 = vpack.i.bf16 %v8811_v22, %v8809_v49  ;;  %v12622_v32 = vld [vmem:[#allocation30_spill] sm:$0xff] }
 0x162   : > { %v8820_v60 = vpop.permute.xlu0 %5570 }
 0x163   : > { %5855 = vrot.lane.b32.xlu1 %v5854_v26, %s6810_s29  ;;  %v8814_v55 = vpop.permute.xlu1 %5575  ;;  %12619 = vst [vmem:[#allocation154_spill] sm:$0xff] %v8818_v14  ;;  %12620 = vst [vmem:[#allocation138_spill] sm:$0xff] %v8820_v60  ;;  %v6790_v60 = vld [vmem:[%s11588_s1 + $0x8] sm:$0xff]  }
 0x165   : > { %5850 = vrot.lane.b32.xlu0 %v5849_v27, %s6810_s29  ;;  %v5869_v27 = vpack.i.bf16 %v8818_v14, %v12621_v1 }
 0x166   : > { %v8830_v53 = vpop.permute.xlu0 %5580 }
 0x167   : > { %5865 = vrot.lane.b32.xlu1 %v5864_v57, %s6810_s29  ;;  %v8826_v26 = vpop.permute.xlu1 %5585  ;;  %v12623_v57 = vld [vmem:[#allocation19_spill] sm:$0xff] }
 0x169   : > { %5860 = vrot.lane.b32.xlu0 %v5859_v61, %s6810_s29 }
 0x16a   : > { %v8836_v16 = vpop.permute.xlu0 %5590 }
 0x16b   : > { %5875 = vrot.lane.b32.xlu1 %v5874_v25, %s6810_s29  ;;  %v8834_v4 = vpop.permute.xlu1 %5595  ;;  %v11960_v25 = vmov 0.0  }
 0x16c   : > { %4883 = vmatprep.subr.bf16.mxu0 %v11960_v25  ;;  %5039 = vmatprep.subr.bf16.mxu1 %v11960_v25 }
 0x16d   : > { %5870 = vrot.lane.b32.xlu0 %v5869_v27, %s6810_s29  ;;  %v12624_v27 = vld [vmem:[#allocation40_spill] sm:$0xff]  ;;  %4889 = vmatprep.mubr.msk.bf16.mxu0 %vm6813_vm6, %v11960_v25 }
 0x16e   : > { %v8849_v1 = vpop.permute.xlu0 %5600  ;;  %4961 = vmatprep.mubr.msk.bf16.mxu1 %vm6813_vm6, %v11960_v25 }
 0x16f   : > { %5885 = vrot.lane.b32.xlu1 %v12622_v32, %s6811_s30  ;;  %v8845_v61 = vpop.permute.xlu1 %5605  ;;  %v2622_v32 = vsel %vm2620_vm5, %v6789_v34, 0  ;;  %v6791_v34 = vld [vmem:[%s11588_s1] sm:$0xff]   ;;  %vm4336_vm5 = vcmask 588800  }
 0x170   : > { %4884 = vmatpush3.bf16.msra.mxu0 %v2622_v32  ;;  %5042 = vmatpush3.bf16.msra.mxu1 %v2622_v32  ;;  %v12629_v32 = vld [vmem:[#allocation37_spill] sm:$0xff] }
 0x171   : > { %5880 = vrot.lane.b32.xlu0 %v12623_v57, %s6811_s30  ;;  %v12625_v57 = vld [vmem:[#allocation26_spill] sm:$0xff]  ;;  %4885 = vmatprep.subr.bf16.mxu0 %v11960_v25 }
 0x172   : > { %5040 = vmatprep.subr.bf16.mxu1 %v11960_v25  ;;  %v8862_v22 = vpop.permute.xlu0 %5610 }
 0x173   : > { %5895 = vrot.lane.b32.xlu1 %v12624_v27, %s6811_s30  ;;  %v8858_v13 = vpop.permute.xlu1 %5615  ;;  %12627 = vst [vmem:[#allocation149_spill] sm:$0xff] %v8862_v22  ;;  %v12628_v27 = vld [vmem:[#allocation51_spill] sm:$0xff] }
 0x174   : > { %12626 = vst [vmem:[#allocation139_spill] sm:$0xff] %v8858_v13  ;;  %4886 = vmatpush3.bf16.msra.mxu0 %v6790_v60  ;;  %5043 = vmatpush3.bf16.msra.mxu1 %v6790_v60  ;;  %v12632_v22 = vld [vmem:[#allocation59_spill] sm:$0xff]  ;;  %v12633_v60 = vld [vmem:[#allocation45_spill] sm:$0xff] }
 0x175   : > { %5890 = vrot.lane.b32.xlu0 %v12625_v57, %s6811_s30  ;;  %4887 = vmatprep.subr.bf16.mxu0 %v11960_v25 }
 0x176   : > { %5041 = vmatprep.subr.bf16.mxu1 %v11960_v25  ;;  %v8875_v13 = vpop.permute.xlu0 %5620  ;;  %v12640_v25 = vld [vmem:[#allocation67_spill] sm:$0xff] }
 0x177   : > { %5905 = vrot.lane.b32.xlu1 %v12628_v27, %s6811_s30  ;;  %v8871_v57 = vpop.permute.xlu1 %5625  ;;  %12631 = vst [vmem:[#allocation152_spill] sm:$0xff] %v8875_v13  ;;  %v12636_v13 = vld [vmem:[#allocation71_spill] sm:$0xff] }
 0x178   : > { %12630 = vst [vmem:[#allocation144_spill] sm:$0xff] %v8871_v57  ;;  %4888 = vmatpush3.bf16.msra.mxu0 %v6791_v34  ;;  %5044 = vmatpush3.bf16.msra.mxu1 %v6791_v34 }
 0x179   : > { %5900 = vrot.lane.b32.xlu0 %v12629_v32, %s6811_s30 }
 0x17a   : > { %v8887_v32 = vpop.permute.xlu0 %5630 }
 0x17b   : > { %5915 = vrot.lane.b32.xlu1 %v12632_v22, %s6811_s30  ;;  %v8883_v27 = vpop.permute.xlu1 %5635  ;;  %12635 = vst [vmem:[#allocation155_spill] sm:$0xff] %v8887_v32  ;;  %v12637_v22 = vld [vmem:[#allocation54_spill] sm:$0xff]  ;;  %v5518_v32 = vunpack.i.h.bf16 %v8748_v17 }
 0x17c   : > { %12634 = vst [vmem:[#allocation160_spill] sm:$0xff] %v8883_v27  ;;  %v5522_v27 = vunpack.i.l.bf16 %v8762_v47 }
 0x17d   : > { %5910 = vrot.lane.b32.xlu0 %v12633_v60, %s6811_s30  ;;  %v5523_v60 = vunpack.i.h.bf16 %v8762_v47 }
 0x17e   : > { %v8897_v34 = vpop.permute.xlu0 %5640  ;;  %v2228_v2 = vsel %vm2209_vm7, %v8413_v45, %v5522_v27  ;;  %v5527_v27 = vunpack.i.l.bf16 %v8758_v41 }
 0x17f   : > { %5925 = vrot.lane.b32.xlu1 %v12636_v13, %s6811_s30  ;;  %v8893_v57 = vpop.permute.xlu1 %5645  ;;  %12639 = vst [vmem:[#allocation158_spill] sm:$0xff] %v8897_v34  ;;  %v5517_v13 = vunpack.i.l.bf16 %v8748_v17  ;;  %v2229_v47 = vsel %vm2209_vm7, %v8416_v63, %v5523_v60  ;;  %v5533_v34 = vunpack.i.h.bf16 %v8772_v59  ;;  %v12642_v17 = vld [vmem:[#allocation82_spill] sm:$0xff]  ;;  %v2227_v63 = vsel %vm2209_vm7, %v8432_v3, %v5518_v32  ;;  %v12645_v60 = vld [vmem:[#allocation145_spill] sm:$0xff] }
 0x180   : > { %12638 = vst [vmem:[#allocation151_spill] sm:$0xff] %v8893_v57  ;;  %v5542_v32 = vunpack.i.l.bf16 %v8782_v56 }
 0x181   : > { %5920 = vrot.lane.b32.xlu0 %v12637_v22, %s6811_s30  ;;  %v12641_v22 = vld [vmem:[#allocation147_spill] sm:$0xff]  ;;  %v2226_v45 = vsel %vm2209_vm7, %v8429_v36, %v5517_v13  ;;  %v2233_v3 = vsel %vm2209_vm7, %v8448_v48, %v5533_v34  ;;  %v5537_v34 = vunpack.i.l.bf16 %v8768_v20 }
 0x182   : > { %v5651_v15 = vpop.permute.xlu0 %5650 }
 0x183   : > { %5935 = vrot.lane.b32.xlu1 %v12640_v25, %s6811_s30  ;;  %v5656_v57 = vpop.permute.xlu1 %5655  ;;  %v5532_v25 = vunpack.i.l.bf16 %v8772_v59  ;;  %v5652_v39 = vunpack.i.l.bf16 %v5651_v15  ;;  %v5528_v59 = vunpack.i.h.bf16 %v8758_v41  ;;  %v5543_v41 = vunpack.i.h.bf16 %v8782_v56 }
 0x184   : > { %v5658_v49 = vunpack.i.h.bf16 %v5656_v57  ;;  %v5657_v14 = vunpack.i.l.bf16 %v5656_v57  ;;  %v5653_v57 = vunpack.i.h.bf16 %v5651_v15  ;;  %v5538_v56 = vunpack.i.h.bf16 %v8768_v20 }
 0x185   : > { %5930 = vrot.lane.b32.xlu0 %v12641_v22, %s6814_s12  ;;  %v2232_v36 = vsel %vm2209_vm7, %v8445_v21, %v5532_v25  ;;  %v2230_v21 = vsel %vm2209_vm7, %v8461_v30, %v5527_v27  ;;  %v2231_v48 = vsel %vm2209_vm7, %v8464_v5, %v5528_v59  ;;  %v12649_v25 = vld [vmem:[#allocation153_spill] sm:$0xff]  ;;  %v2236_v30 = vsel %vm2209_vm7, %v8477_v11, %v5542_v32  ;;  %v12655_v32 = vld [vmem:[#allocation150_spill] sm:$0xff] }
 0x186   : > { %v8914_v8 = vsel %vm2264_vm8, %v2228_v2, %v5657_v14  ;;  %v8917_v22 = vsel %vm2264_vm8, %v2229_v47, %v5658_v49  ;;  %v8928_v14 = vsel %vm2264_vm8, %v2226_v45, %v5652_v39  ;;  %v8931_v49 = vsel %vm2264_vm8, %v2227_v63, %v5653_v57 }
 0x187   : > { %5945 = vrot.lane.b32.xlu1 %v12642_v17, %s6811_s30  ;;  %12643 = vst [vmem:[#allocation166_spill] sm:$0xff] %v8914_v8  ;;  %12644 = vst [vmem:[#allocation181_spill] sm:$0xff] %v8917_v22  ;;  %v5666_v2 = vpop.permute.xlu1 %5665  ;;  %v5661_v13 = vpop.permute.xlu0 %5660  ;;  %v12646_v17 = vld [vmem:[#allocation78_spill] sm:$0xff]  ;;  %v2237_v5 = vsel %vm2209_vm7, %v8480_v35, %v5543_v41  ;;  %v5553_v20 = vunpack.i.h.bf16 %v8792_v23  ;;  %v5552_v59 = vunpack.i.l.bf16 %v8792_v23  ;;  %v2234_v11 = vsel %vm2209_vm7, %v8493_v33, %v5537_v34  ;;  %v12761_v22 = vld [vmem:[#allocation21_spill] sm:$0xff] }
 0x188   : > { %v5668_v15 = vunpack.i.h.bf16 %v5666_v2  ;;  %v5667_v47 = vunpack.i.l.bf16 %v5666_v2  ;;  %v5663_v45 = vunpack.i.h.bf16 %v5661_v13  ;;  %v5662_v63 = vunpack.i.l.bf16 %v5661_v13  ;;  %v12762_v8 = vld [vmem:[#allocation46_spill] sm:$0xff] }
 0x189   : > { %5940 = vrot.lane.b32.xlu0 %v12645_v60, %s6814_s12  ;;  %v2235_v35 = vsel %vm2209_vm7, %v8496_v7, %v5538_v56  ;;  %v5548_v23 = vunpack.i.h.bf16 %v8778_v28  ;;  %v5547_v41 = vunpack.i.l.bf16 %v8778_v28  ;;  %v2240_v33 = vsel %vm2209_vm7, %v8509_v0, %v5552_v59  ;;  %v12661_v59 = vld [vmem:[#allocation159_spill] sm:$0xff] }
 0x18a   : > { %v8942_v39 = vsel %vm2264_vm8, %v2232_v36, %v5667_v47  ;;  %v8945_v57 = vsel %vm2264_vm8, %v2233_v3, %v5668_v15  ;;  %v8956_v2 = vsel %vm2264_vm8, %v2230_v21, %v5662_v63  ;;  %v8959_v15 = vsel %vm2264_vm8, %v2231_v48, %v5663_v45  ;;  %v12652_v3 = vld [vmem:[#allocation92_spill] sm:$0xff] }
 0x18b   : > { %5955 = vrot.lane.b32.xlu1 %v12646_v17, %s6811_s30  ;;  %12647 = vst [vmem:[#allocation178_spill] sm:$0xff] %v8942_v39  ;;  %12648 = vst [vmem:[#allocation174_spill] sm:$0xff] %v8945_v57  ;;  %v5676_v60 = vpop.permute.xlu1 %5675  ;;  %v5671_v27 = vpop.permute.xlu0 %5670  ;;  %v2241_v7 = vsel %vm2209_vm7, %v8512_v50, %v5553_v20  ;;  %v5563_v28 = vunpack.i.h.bf16 %v8804_v38  ;;  %v5562_v56 = vunpack.i.l.bf16 %v8804_v38  ;;  %v2238_v0 = vsel %vm2209_vm7, %v8525_v6, %v5547_v41  ;;  %v12748_v57 = vld [vmem:[#allocation38_spill] sm:$0xff] }
 0x18c   : > { %12650 = vst [vmem:[#allocation180_spill] sm:$0xff] %v8956_v2  ;;  %12651 = vst [vmem:[#allocation185_spill] sm:$0xff] %v8959_v15  ;;  %v5678_v47 = vunpack.i.h.bf16 %v5676_v60  ;;  %v5677_v36 = vunpack.i.l.bf16 %v5676_v60  ;;  %v5673_v45 = vunpack.i.h.bf16 %v5671_v27  ;;  %v5672_v63 = vunpack.i.l.bf16 %v5671_v27 }
 0x18d   : > { %5950 = vrot.lane.b32.xlu0 %v12649_v25, %s6814_s12  ;;  %v2239_v50 = vsel %vm2209_vm7, %v8528_v40, %v5548_v23  ;;  %v5558_v38 = vunpack.i.h.bf16 %v8788_v29  ;;  %v5557_v20 = vunpack.i.l.bf16 %v8788_v29  ;;  %v2244_v6 = vsel %vm2209_vm7, %v8541_v62, %v5562_v56  ;;  %v12664_v29 = vld [vmem:[#allocation109_spill] sm:$0xff] }
 0x18e   : > { %v8970_v13 = vsel %vm2264_vm8, %v2236_v30, %v5677_v36  ;;  %v8973_v17 = vsel %vm2264_vm8, %v2237_v5, %v5678_v47  ;;  %v8984_v48 = vsel %vm2264_vm8, %v2234_v11, %v5672_v63  ;;  %v8987_v25 = vsel %vm2264_vm8, %v2235_v35, %v5673_v45  ;;  %v12658_v36 = vld [vmem:[#allocation88_spill] sm:$0xff] }
 0x18f   : > { %5965 = vrot.lane.b32.xlu1 %v12652_v3, %s6811_s30  ;;  %12653 = vst [vmem:[#allocation182_spill] sm:$0xff] %v8970_v13  ;;  %12654 = vst [vmem:[#allocation179_spill] sm:$0xff] %v8973_v17  ;;  %v5686_v21 = vpop.permute.xlu1 %5685  ;;  %v5681_v34 = vpop.permute.xlu0 %5680  ;;  %v2245_v40 = vsel %vm2209_vm7, %v8544_v37, %v5563_v28  ;;  %v2243_v62 = vsel %vm2209_vm7, %v8564_v19, %v5558_v38  ;;  %v12667_v37 = vld [vmem:[#allocation156_spill] sm:$0xff]  ;;  %v5578_v19 = vunpack.i.h.bf16 %v8814_v55  ;;  %v5223_v39 = vunpack.i.h.bf16 %v12748_v57 }
 0x190   : > { %12656 = vst [vmem:[#allocation183_spill] sm:$0xff] %v8984_v48  ;;  %12657 = vst [vmem:[#allocation186_spill] sm:$0xff] %v8987_v25  ;;  %v5688_v60 = vunpack.i.h.bf16 %v5686_v21  ;;  %v5687_v47 = vunpack.i.l.bf16 %v5686_v21  ;;  %v5683_v27 = vunpack.i.h.bf16 %v5681_v34  ;;  %v5682_v3 = vunpack.i.l.bf16 %v5681_v34  ;;  %v12745_v13 = vld [vmem:[#allocation196_spill] sm:$0xff]  ;;  %v12749_v25 = vld [vmem:[#allocation187_spill] sm:$0xff] }
 0x191   : > { %5960 = vrot.lane.b32.xlu0 %v12655_v32, %s6814_s12  ;;  %v5583_v34 = vunpack.i.h.bf16 %v8830_v53  ;;  %v5243_v15 = vunpack.i.h.bf16 %v12762_v8 }
 0x192   : > { %v8998_v30 = vsel %vm2264_vm8, %v2240_v33, %v5687_v47  ;;  %v9001_v5 = vsel %vm2264_vm8, %v2241_v7, %v5688_v60  ;;  %v9012_v63 = vsel %vm2264_vm8, %v2238_v0, %v5682_v3  ;;  %v9015_v11 = vsel %vm2264_vm8, %v2239_v50, %v5683_v27  ;;  %v12671_v0 = vld [vmem:[#allocation165_spill] sm:$0xff] }
 0x193   : > { %5975 = vrot.lane.b32.xlu1 %v12658_v36, %s6811_s30  ;;  %12659 = vst [vmem:[#allocation108_spill] sm:$0xff] %v8998_v30  ;;  %12660 = vst [vmem:[#allocation188_spill] sm:$0xff] %v9001_v5  ;;  %v5696_v45 = vpop.permute.xlu1 %5695  ;;  %v5691_v23 = vpop.permute.xlu0 %5690  ;;  %v2242_v33 = vsel %vm2209_vm7, %v8561_v31, %v5557_v20  ;;  %v5582_v36 = vunpack.i.l.bf16 %v8830_v53  ;;  %v12670_v31 = vld [vmem:[#allocation100_spill] sm:$0xff]  ;;  %v5577_v3 = vunpack.i.l.bf16 %v8814_v55  ;;  %v2253_v53 = vsel %vm2209_vm7, %v8622_v46, %v5583_v34 }
 0x194   : > { %12662 = vst [vmem:[#allocation208_spill] sm:$0xff] %v9012_v63  ;;  %12663 = vst [vmem:[#allocation157_spill] sm:$0xff] %v9015_v11  ;;  %v5698_v35 = vunpack.i.h.bf16 %v5696_v45  ;;  %v5697_v32 = vunpack.i.l.bf16 %v5696_v45  ;;  %v5693_v60 = vunpack.i.h.bf16 %v5691_v23  ;;  %v5692_v47 = vunpack.i.l.bf16 %v5691_v23 }
 0x195   : > { %5970 = vrot.lane.b32.xlu0 %v12661_v59, %s6814_s12  ;;  %v2252_v59 = vsel %vm2209_vm7, %v8619_v44, %v5582_v36  ;;  %v5593_v45 = vunpack.i.h.bf16 %v8836_v16  ;;  %v2250_v44 = vsel %vm2209_vm7, %v8633_v10, %v5577_v3  ;;  %v2251_v46 = vsel %vm2209_vm7, %v8636_v54, %v5578_v19  ;;  %v12678_v3 = vld [vmem:[#allocation111_spill] sm:$0xff] }
 0x196   : > { %v9024_v41 = vsel %vm2264_vm8, %v2244_v6, %v5697_v32  ;;  %v9027_v21 = vsel %vm2264_vm8, %v2245_v40, %v5698_v35  ;;  %v9038_v28 = vsel %vm2264_vm8, %v2242_v33, %v5692_v47  ;;  %v9041_v56 = vsel %vm2264_vm8, %v2243_v62, %v5693_v60  ;;  %v12672_v6 = vld [vmem:[#allocation115_spill] sm:$0xff]  ;;  %v12675_v47 = vld [vmem:[#allocation162_spill] sm:$0xff] }
 0x197   : > { %5985 = vrot.lane.b32.xlu1 %v12664_v29, %s6811_s30  ;;  %12665 = vst [vmem:[#allocation161_spill] sm:$0xff] %v9024_v41  ;;  %12666 = vst [vmem:[#allocation35_spill] sm:$0xff] %v9027_v21  ;;  %v9035_v7 = vpop.permute.xlu1 %5705  ;;  %v9045_v27 = vpop.permute.xlu0 %5700  ;;  %v5592_v35 = vunpack.i.l.bf16 %v8836_v16  ;;  %v5588_v16 = vunpack.i.h.bf16 %v8826_v26  ;;  %v5587_v60 = vunpack.i.l.bf16 %v8826_v26  ;;  %v2257_v54 = vsel %vm2209_vm7, %v8650_v58, %v5593_v45  ;;  %v12728_v21 = vld [vmem:[#allocation11_spill] sm:$0xff]  ;;  %v12729_v41 = vld [vmem:[#allocation20_spill] sm:$0xff] }
 0x198   : > { %12668 = vst [vmem:[#allocation171_spill] sm:$0xff] %v9038_v28  ;;  %12669 = vst [vmem:[#allocation164_spill] sm:$0xff] %v9041_v56  ;;  %v5603_v26 = vunpack.i.h.bf16 %v8849_v1  ;;  %v12743_v28 = vld [vmem:[#allocation24_spill] sm:$0xff] }
 0x199   : > { %5980 = vrot.lane.b32.xlu0 %v12667_v37, %s6814_s12  ;;  %v2256_v10 = vsel %vm2209_vm7, %v8647_v42, %v5592_v35  ;;  %v2254_v42 = vsel %vm2209_vm7, %v8661_v51, %v5587_v60  ;;  %v2255_v58 = vsel %vm2209_vm7, %v8664_v12, %v5588_v16 }
 0x19a   : > { %v2261_v12 = vsel %vm2209_vm7, %v8678_v24, %v5603_v26  ;;  %v5608_v24 = vunpack.i.h.bf16 %v8845_v61 }
 0x19b   : > { %5995 = vrot.lane.b32.xlu1 %v12670_v31, %s6811_s30  ;;  %v5716_v50 = vpop.permute.xlu1 %5715  ;;  %v5602_v31 = vunpack.i.l.bf16 %v8849_v1  ;;  %v5598_v1 = vunpack.i.h.bf16 %v8834_v4 }
 0x19c   : > { %v5718_v38 = vunpack.i.h.bf16 %v5716_v50  ;;  %v5717_v20 = vunpack.i.l.bf16 %v5716_v50  ;;  %v5711_v32 = vpop.permute.xlu0 %5710 }
 0x19d   : > { %5990 = vrot.lane.b32.xlu0 %v12671_v0, %s6814_s12  ;;  %v5713_v23 = vunpack.i.h.bf16 %v5711_v32  ;;  %v5712_v29 = vunpack.i.l.bf16 %v5711_v32  ;;  %v2260_v51 = vsel %vm2209_vm7, %v8675_v18, %v5602_v31  ;;  %v2259_v18 = vsel %vm2209_vm7, %v8694_v9, %v5598_v1 }
 0x19e   : > { %v9062_v55 = vsel %vm2264_vm8, %v2252_v59, %v5717_v20  ;;  %v9065_v40 = vsel %vm2264_vm8, %v2253_v53, %v5718_v38  ;;  %v5597_v59 = vunpack.i.l.bf16 %v8834_v4  ;;  %v12681_v53 = vld [vmem:[#allocation74_spill] sm:$0xff]  ;;  %v12684_v4 = vld [vmem:[#allocation125_spill] sm:$0xff] }
 0x19f   : > { %6005 = vrot.lane.b32.xlu1 %v12672_v6, %s6811_s30  ;;  %12673 = vst [vmem:[#allocation211_spill] sm:$0xff] %v9062_v55  ;;  %12674 = vst [vmem:[#allocation33_spill] sm:$0xff] %v9065_v40  ;;  %v5726_v33 = vpop.permute.xlu1 %5725  ;;  %v9076_v62 = vsel %vm2264_vm8, %v2250_v44, %v5712_v29  ;;  %v9079_v37 = vsel %vm2264_vm8, %v2251_v46, %v5713_v23  ;;  %v12722_v55 = vld [vmem:[#allocation81_spill] sm:$0xff] }
 0x1a0   : > { %12676 = vst [vmem:[#allocation163_spill] sm:$0xff] %v9076_v62  ;;  %12677 = vst [vmem:[#allocation167_spill] sm:$0xff] %v9079_v37  ;;  %v5728_v34 = vunpack.i.h.bf16 %v5726_v33  ;;  %v5727_v36 = vunpack.i.l.bf16 %v5726_v33  ;;  %v5607_v33 = vunpack.i.l.bf16 %v8845_v61 }
 0x1a1   : > { %6000 = vrot.lane.b32.xlu0 %v12675_v47, %s6814_s12  ;;  %v5721_v19 = vpop.permute.xlu0 %5720  ;;  %v2258_v47 = vsel %vm2209_vm7, %v8691_v52, %v5597_v59  ;;  %v12690_v52 = vld [vmem:[#allocation122_spill] sm:$0xff]  ;;  %v12695_v59 = vld [vmem:[#allocation133_spill] sm:$0xff] }
 0x1a2   : > { %v9090_v0 = vsel %vm2264_vm8, %v2256_v10, %v5727_v36  ;;  %v9093_v50 = vsel %vm2264_vm8, %v2257_v54, %v5728_v34  ;;  %v5723_v38 = vunpack.i.h.bf16 %v5721_v19  ;;  %v5722_v20 = vunpack.i.l.bf16 %v5721_v19  ;;  %v12687_v34 = vld [vmem:[#allocation168_spill] sm:$0xff] }
 0x1a3   : > { %6015 = vrot.lane.b32.xlu1 %v12678_v3, %s6811_s30  ;;  %12679 = vst [vmem:[#allocation212_spill] sm:$0xff] %v9090_v0  ;;  %12680 = vst [vmem:[#allocation57_spill] sm:$0xff] %v9093_v50  ;;  %v2262_v61 = vsel %vm2209_vm7, %v8717_v43, %v5607_v33  ;;  %v12691_v19 = vld [vmem:[#allocation132_spill] sm:$0xff]  ;;  %v12696_v43 = vld [vmem:[#allocation173_spill] sm:$0xff] }
 0x1a4   : > { %v5736_v45 = vpop.permute.xlu1 %5735  ;;  %v9104_v35 = vsel %vm2264_vm8, %v2254_v42, %v5722_v20  ;;  %v9107_v32 = vsel %vm2264_vm8, %v2255_v58, %v5723_v38  ;;  %v2263_v3 = vsel %vm2209_vm7, %v12691_v19, %v5608_v24  ;;  %v12692_v38 = vld [vmem:[#allocation176_spill] sm:$0xff]  ;;  %v12702_v33 = vld [vmem:[#allocation199_spill] sm:$0xff] }
 0x1a5   : > { %6010 = vrot.lane.b32.xlu0 %v12681_v53, %s6814_s12  ;;  %12682 = vst [vmem:[#allocation177_spill] sm:$0xff] %v9104_v35  ;;  %12683 = vst [vmem:[#allocation170_spill] sm:$0xff] %v9107_v32  ;;  %v5738_v6 = vunpack.i.h.bf16 %v5736_v45  ;;  %v5737_v23 = vunpack.i.l.bf16 %v5736_v45  ;;  %v12721_v0 = vld [vmem:[#allocation207_spill] sm:$0xff] }
 0x1a6   : > { %v5731_v29 = vpop.permute.xlu0 %5730  ;;  %v5163_v40 = vunpack.i.h.bf16 %v12721_v0  ;;  %v12725_v35 = vld [vmem:[#allocation15_spill] sm:$0xff]  ;;  %v5162_v37 = vunpack.i.l.bf16 %v12721_v0 }
 0x1a7   : > { %6025 = vrot.lane.b32.xlu1 %v12684_v4, %s6811_s30  ;;  %v9116_v44 = vsel %vm2264_vm8, %v2260_v51, %v5737_v23  ;;  %v9119_v46 = vsel %vm2264_vm8, %v2261_v12, %v5738_v6  ;;  %v5733_v16 = vunpack.i.h.bf16 %v5731_v29  ;;  %v5732_v60 = vunpack.i.l.bf16 %v5731_v29  ;;  %v12697_v6 = vld [vmem:[#allocation130_spill] sm:$0xff]  ;;  %v12698_v23 = vld [vmem:[#allocation96_spill] sm:$0xff]  ;;  %v12699_v29 = vld [vmem:[#allocation191_spill] sm:$0xff] }
 0x1a8   : > { %12685 = vst [vmem:[#allocation39_spill] sm:$0xff] %v9116_v44  ;;  %12686 = vst [vmem:[#allocation169_spill] sm:$0xff] %v9119_v46  ;;  %v9129_v36 = vpop.permute.xlu1 %5745  ;;  %v12700_v4 = vld [vmem:[#allocation197_spill] sm:$0xff]  ;;  %v12717_v44 = vld [vmem:[#allocation194_spill] sm:$0xff] }
 0x1a9   : > { %6020 = vrot.lane.b32.xlu0 %v12687_v34, %s6814_s12  ;;  %v9132_v10 = vsel %vm2264_vm8, %v2258_v47, %v5732_v60  ;;  %v9135_v54 = vsel %vm2264_vm8, %v2259_v18, %v5733_v16  ;;  %v5083_v16 = vunpack.i.h.bf16 %v12700_v4  ;;  %v5082_v60 = vunpack.i.l.bf16 %v12700_v4  ;;  %v12701_v47 = vld [vmem:[#allocation198_spill] sm:$0xff]  ;;  %v12709_v4 = vld [vmem:[#allocation7_spill] sm:$0xff] }
 0x1aa   : > { %12688 = vst [vmem:[#allocation172_spill] sm:$0xff] %v9132_v10  ;;  %12689 = vst [vmem:[#allocation41_spill] sm:$0xff] %v9135_v54  ;;  %v5741_v26 = vpop.permute.xlu0 %5740  ;;  %v5073_v18 = vunpack.i.h.bf16 %v12701_v47  ;;  %v5072_v24 = vunpack.i.l.bf16 %v12701_v47  ;;  %v5088_v34 = vunpack.i.h.bf16 %v12702_v33 }
 0x1ab   : > { %6035 = vrot.lane.b32.xlu1 %v12690_v52, %s6811_s30  ;;  %v5743_v9 = vunpack.i.h.bf16 %v5741_v26  ;;  %v5742_v31 = vunpack.i.l.bf16 %v5741_v26  ;;  %v12703_v26 = vld [vmem:[#allocation68_spill] sm:$0xff] }
 0x1ac   : > { %v2045_v47 = vsel %vm2044_vm2, %v12709_v4, %v5072_v24 }
 0x1ad   : > { %6030 = vrot.lane.b32.xlu0 %v12692_v38, %s6814_s12  ;;  %v9145_v20 = vpop.permute.xlu1 %5755  ;;  %v9148_v42 = vsel %vm2264_vm8, %v2262_v61, %v5742_v31  ;;  %v9151_v58 = vsel %vm2264_vm8, %v2263_v3, %v5743_v9  ;;  %v5087_v9 = vunpack.i.l.bf16 %v12702_v33  ;;  %v12704_v31 = vld [vmem:[#allocation200_spill] sm:$0xff]  ;;  %v12705_v3 = vld [vmem:[#allocation103_spill] sm:$0xff] }
 0x1ae   : > { %12693 = vst [vmem:[#allocation175_spill] sm:$0xff] %v9148_v42  ;;  %12694 = vst [vmem:[#allocation42_spill] sm:$0xff] %v9151_v58  ;;  %v5078_v61 = vunpack.i.h.bf16 %v12704_v31  ;;  %v12706_v38 = vld [vmem:[#allocation4_spill] sm:$0xff]  ;;  %v12710_v33 = vld [vmem:[#allocation3_spill] sm:$0xff] }
 0x1af   : > { %v9153_v1 = vpop.permute.xlu0 %5750  ;;  %6045 = vrot.lane.b32.xlu1 %v12695_v59, %s6811_s30  ;;  %v9190_v59 = vsel %vm2044_vm2, %v12706_v38, %v5083_v16  ;;  %v12711_v58 = vld [vmem:[#allocation184_spill] sm:$0xff]  ;;  %v12712_v38 = vld [vmem:[#allocation2_spill] sm:$0xff]  ;;  %v12716_v42 = vld [vmem:[#allocation203_spill] sm:$0xff] }
 0x1b0   : > { %v5108_v46 = vunpack.i.h.bf16 %v12716_v42 }
 0x1b1   : > { %6040 = vrot.lane.b32.xlu0 %v12696_v43, %s6814_s12  ;;  %v9159_v53 = vpop.permute.xlu1 %5765  ;;  %v12707_v43 = vld [vmem:[#allocation5_spill] sm:$0xff] }
 0x1b2   : > { %v9252_v5 = vsel %vm2044_vm2, %v12729_v41, %v5108_v46  ;;  %v12736_v46 = vld [vmem:[#allocation85_spill] sm:$0xff] }
 0x1b3   : > { %v9161_v45 = vpop.permute.xlu0 %5760  ;;  %6055 = vrot.lane.b32.xlu1 %v12697_v6, %s6811_s30  ;;  %v9194_v6 = vsel %vm2044_vm2, %v12707_v43, %v5082_v60  ;;  %v9211_v60 = vsel %vm2044_vm2, %v12712_v38, %v5087_v9  ;;  %v12713_v43 = vld [vmem:[#allocation6_spill] sm:$0xff]  ;;  %v5107_v9 = vunpack.i.l.bf16 %v12716_v42  ;;  %v12718_v38 = vld [vmem:[#allocation204_spill] sm:$0xff] }
 0x1b4   : > { %v5103_v54 = vunpack.i.h.bf16 %v12718_v38 }
 0x1b5   : > { %6050 = vrot.lane.b32.xlu0 %v12698_v23, %s6814_s12  ;;  %v9167_v51 = vpop.permute.xlu1 %5775  ;;  %v12708_v23 = vld [vmem:[#allocation8_spill] sm:$0xff] }
 0x1b7   : > { %v9169_v12 = vpop.permute.xlu0 %5770  ;;  %6065 = vrot.lane.b32.xlu1 %v12699_v29, %s6814_s12  ;;  %v2046_v29 = vsel %vm2044_vm2, %v12708_v23, %v5073_v18  ;;  %v2048_v18 = vsel %vm2044_vm2, %v12713_v43, %v5078_v61  ;;  %v12714_v23 = vld [vmem:[#allocation201_spill] sm:$0xff]  ;;  %v5102_v61 = vunpack.i.l.bf16 %v12718_v38  ;;  %v12719_v43 = vld [vmem:[#allocation206_spill] sm:$0xff] }
 0x1b8   : > { %v5098_v24 = vunpack.i.h.bf16 %v12714_v23  ;;  %v5097_v4 = vunpack.i.l.bf16 %v12714_v23  ;;  %v5168_v10 = vunpack.i.h.bf16 %v12719_v43  ;;  %v12720_v23 = vld [vmem:[#allocation9_spill] sm:$0xff] }
 0x1b9   : > { %6060 = vrot.lane.b32.xlu0 %v12703_v26, %s6814_s12  ;;  %v9180_v52 = vpop.permute.xlu1 %5785  ;;  %v9202_v26 = vsel %vm2044_vm2, %v12710_v33, %v5088_v34  ;;  %v12715_v34 = vld [vmem:[#allocation202_spill] sm:$0xff] }
 0x1ba   : > { %v5093_v33 = vunpack.i.h.bf16 %v12715_v34  ;;  %v9242_v38 = vsel %vm2044_vm2, %v12725_v35, %v5097_v4  ;;  %v12731_v35 = vld [vmem:[#allocation193_spill] sm:$0xff]  ;;  %v12732_v4 = vld [vmem:[#allocation23_spill] sm:$0xff] }
 0x1bb   : > { %v9184_v19 = vpop.permute.xlu0 %5780  ;;  %6075 = vrot.lane.b32.xlu1 %v12705_v3, %s6814_s12  ;;  %v5077_v3 = vunpack.i.l.bf16 %v12704_v31  ;;  %v5092_v31 = vunpack.i.l.bf16 %v12715_v34  ;;  %v5167_v34 = vunpack.i.l.bf16 %v12719_v43  ;;  %v9260_v0 = vsel %vm2044_vm2, %v12732_v4, %v5107_v9 }
 0x1bd   : > { %6070 = vrot.lane.b32.xlu0 %v12711_v58, %s6814_s12  ;;  %v9207_v16 = vpop.permute.xlu1 %5795  ;;  %v2047_v50 = vsel %vm2044_vm2, %v12720_v23, %v5077_v3  ;;  %v12726_v3 = vld [vmem:[#allocation17_spill] sm:$0xff]  ;;  %v12727_v23 = vld [vmem:[#allocation18_spill] sm:$0xff] }
 0x1be   : > { %v5207_v43 = vunpack.i.l.bf16 %v12726_v3  ;;  %v2054_v62 = vsel %vm2044_vm2, %v12727_v23, %v5093_v33  ;;  %v12734_v33 = vld [vmem:[#allocation28_spill] sm:$0xff]  ;;  %v9276_v23 = vsel %vm2044_vm2, %v12736_v46, %v5167_v34  ;;  %v5208_v4 = vunpack.i.h.bf16 %v12726_v3  ;;  %v12741_v34 = vld [vmem:[#allocation10_spill] sm:$0xff] }
 0x1bf   : > { %v9220_v58 = vpop.permute.xlu0 %5790  ;;  %6085 = vrot.lane.b32.xlu1 %v12717_v44, %s6814_s12  ;;  %v12724_v44 = vld [vmem:[#allocation16_spill] sm:$0xff]  ;;  %v5218_v46 = vunpack.i.h.bf16 %v12741_v34 }
 0x1c0   : > { %v9238_v42 = vsel %vm2044_vm2, %v12724_v44, %v5098_v24  ;;  %v12733_v44 = vld [vmem:[#allocation29_spill] sm:$0xff] }
 0x1c1   : > { %6080 = vrot.lane.b32.xlu0 %v12722_v55, %s6814_s12  ;;  %v9234_v32 = vpop.permute.xlu1 %5805  ;;  %v2053_v55 = vsel %vm2044_vm2, %v12728_v21, %v5092_v31  ;;  %v9264_v30 = vsel %vm2044_vm2, %v12733_v44, %v5103_v54  ;;  %v9268_v21 = vsel %vm2044_vm2, %v12734_v33, %v5102_v61  ;;  %v12735_v31 = vld [vmem:[#allocation83_spill] sm:$0xff]  ;;  %v12738_v54 = vld [vmem:[#allocation190_spill] sm:$0xff]  ;;  %v305_v61 = vld [vmem:[%s6863_s23 + $0x13c] sm:$0x1]  ;;  %s6815_s23 = smov 40  }
 0x1c2   : > { %12723 = vst [vmem:[#allocation69_spill] sm:$0xff] %v9234_v32  ;;  %v9272_v41 = vsel %vm2044_vm2, %v12735_v31, %v5168_v10  ;;  %v12740_v33 = vld [vmem:[#allocation91_spill] sm:$0xff]  ;;  %v9293_v31 = vsel %vm2099_vm3, %v2045_v47, %v5207_v43  ;;  %v12747_v43 = vld [vmem:[#allocation141_spill] sm:$0xff]  ;;  %v385_v63 = vunpack.c.l.bf16 %v305_v61 }
 0x1c3   : > { %v9254_v24 = vpop.permute.xlu0 %5800  ;;  %6095 = vrot.lane.b32.xlu1 %v12731_v35, %s6814_s12  ;;  %v12737_v35 = vld [vmem:[#allocation93_spill] sm:$0xff]  ;;  %v9290_v10 = vsel %vm2044_vm2, %v12740_v33, %v5162_v37  ;;  %v5228_v37 = vunpack.i.h.bf16 %v12743_v28  ;;  %v12746_v33 = vld [vmem:[#allocation154_spill] sm:$0xff]  ;;  %v742_v11 = vrot.slane %v12747_v43, 2 }
 0x1c4   : > { %12730 = vst [vmem:[#allocation48_spill] sm:$0xff] %v9254_v24  ;;  %v9280_v9 = vsel %vm2044_vm2, %v12737_v35, %v5163_v40  ;;  %v5217_v40 = vunpack.i.l.bf16 %v12741_v34  ;;  %v12742_v35 = vld [vmem:[#allocation12_spill] sm:$0xff]  ;;  %v741_v47 = vrot.slane %v12746_v33, 2  ;;  %v9308_v34 = vsel %vm2099_vm3, %v2046_v29, %v5208_v4 }
 0x1c5   : > { %6090 = vrot.lane.b32.xlu0 %v12738_v54, %s6814_s12  ;;  %v9285_v44 = vpop.permute.xlu1 %5815  ;;  %v5213_v56 = vunpack.i.h.bf16 %v12742_v35  ;;  %v5212_v3 = vunpack.i.l.bf16 %v12742_v35  ;;  %v5227_v54 = vunpack.i.l.bf16 %v12743_v28  ;;  %v5222_v35 = vunpack.i.l.bf16 %v12748_v57 }
 0x1c6   : > { %12739 = vst [vmem:[#allocation52_spill] sm:$0xff] %v9285_v44  ;;  %v9322_v28 = vsel %vm2099_vm3, %v9194_v6, %v5217_v40  ;;  %v734_v29 = vrot.slane %v12746_v33, 1  ;;  %v735_v4 = vrot.slane %v12747_v43, 1  ;;  %v9338_v40 = vsel %vm2099_vm3, %v2054_v62, %v5228_v37  ;;  %v12755_v43 = vld [vmem:[#allocation146_spill] sm:$0xff]  ;;  %v12759_v37 = vld [vmem:[#allocation64_spill] sm:$0xff]  ;;  %v12766_v44 = vld [vmem:[#allocation75_spill] sm:$0xff] }
 0x1c7   : > { %v9300_v17 = vpop.permute.xlu0 %5810  ;;  %6105 = vrot.lane.b32.xlu1 %v12745_v13, %s6814_s12  ;;  %v9318_v13 = vsel %vm2099_vm3, %v9190_v59, %v5218_v46  ;;  %v2102_v61 = vsel %vm2099_vm3, %v2047_v50, %v5212_v3  ;;  %v2103_v57 = vsel %vm2099_vm3, %v2048_v18, %v5213_v56  ;;  %v12752_v59 = vld [vmem:[#allocation195_spill] sm:$0xff]  ;;  %v12753_v46 = vld [vmem:[#allocation112_spill] sm:$0xff]  ;;  %v743_v33 = vsel %vm585_vm1, %v741_v47, %v742_v11  ;;  %v12760_v47 = vld [vmem:[#allocation61_spill] sm:$0xff] }
 0x1c8   : > { %12744 = vst [vmem:[#allocation53_spill] sm:$0xff] %v9300_v17  ;;  %v12754_v17 = vld [vmem:[#allocation110_spill] sm:$0xff]  ;;  %v744_v50 = vrot.slane %v12755_v43, 2  ;;  %v746_v3 = vrot.slane %v385_v63, 2  ;;  %v9344_v56 = vsel %vm2099_vm3, %v9202_v26, %v5223_v39  ;;  %v9348_v18 = vsel %vm2099_vm3, %v9211_v60, %v5222_v35 }
 0x1c9   : > { %6100 = vrot.lane.b32.xlu0 %v12749_v25, %s6814_s12  ;;  %v9314_v48 = vpop.permute.xlu1 %5825  ;;  %v9329_v25 = vsel %vm2099_vm3, %v2053_v55, %v5227_v54  ;;  %v6124_v6 = vpack.i.bf16 %v12754_v17, %v12753_v46  ;;  %v12756_v55 = vld [vmem:[#allocation25_spill] sm:$0xff]  ;;  %v737_v39 = vrot.slane %v12755_v43, 1  ;;  %v739_v26 = vrot.slane %v385_v63, 1 }
 0x1ca   : > { %12750 = vst [vmem:[#allocation213_spill] sm:$0xff] %v9314_v48  ;;  %v5238_v54 = vunpack.i.h.bf16 %v12756_v55  ;;  %v12757_v17 = vld [vmem:[#allocation137_spill] sm:$0xff]  ;;  %v5237_v46 = vunpack.i.l.bf16 %v12756_v55  ;;  %v5233_v60 = vunpack.i.h.bf16 %v12761_v22  ;;  %v5232_v35 = vunpack.i.l.bf16 %v12761_v22  ;;  %v12765_v55 = vld [vmem:[#allocation55_spill] sm:$0xff] }
 0x1cb   : > { %v9331_v48 = vpop.permute.xlu0 %5820  ;;  %6115 = vrot.lane.b32.xlu1 %v12752_v59, %s6814_s12  ;;  %v6119_v59 = vpack.i.bf16 %v12760_v47, %v12759_v37  ;;  %v5242_v37 = vunpack.i.l.bf16 %v12762_v8  ;;  %v5297_v47 = vunpack.i.l.bf16 %v12765_v55  ;;  %v747_v63 = vsel %vm585_vm1, %v744_v50, %v746_v3 }
 0x1cc   : > { %12751 = vst [vmem:[#allocation192_spill] sm:$0xff] %v9331_v48  ;;  %v736_v48 = vsel %vm458_vm0, %v734_v29, %v735_v4  ;;  %v745_v29 = vsel %vm585_vm1, %v742_v11, %v744_v50  ;;  %v5298_v43 = vunpack.i.h.bf16 %v12765_v55  ;;  %v5303_v22 = vunpack.i.h.bf16 %v12766_v44 }
 0x1cd   : > { %6110 = vrot.lane.b32.xlu0 %v12757_v17, %s6811_s30  ;;  %v9353_v62 = vpop.permute.xlu1 %5835  ;;  %v12764_v17 = vld [vmem:[#allocation123_spill] sm:$0xff]  ;;  %v5302_v24 = vunpack.i.l.bf16 %v12766_v44  ;;  %v738_v11 = vsel %vm458_vm0, %v735_v4, %v737_v39  ;;  %v740_v50 = vsel %vm458_vm0, %v737_v39, %v739_v26  ;;  %v2112_v3 = vsel %vm2099_vm3, %v9268_v21, %v5237_v46 }
 0x1ce   : > { %12758 = vst [vmem:[#allocation189_spill] sm:$0xff] %v9353_v62  ;;  %v6134_v62 = vpack.i.bf16 %v743_v33, %v12764_v17  ;;  %v12768_v17 = vld [vmem:[#allocation86_spill] sm:$0xff]  ;;  %v2113_v44 = vsel %vm2099_vm3, %v9264_v30, %v5238_v54  ;;  %v2115_v4 = vsel %vm2099_vm3, %v9252_v5, %v5243_v15  ;;  %v2114_v21 = vsel %vm2099_vm3, %v9260_v0, %v5242_v37 }
 0x1cf   : > { %v9363_v2 = vpop.permute.xlu0 %5830  ;;  %6125 = vrot.lane.b32.xlu1 %v6124_v6, %s6814_s12  ;;  %v12767_v6 = vld [vmem:[#allocation76_spill] sm:$0xff]  ;;  %v5348_v8 = vunpack.i.h.bf16 %v12768_v17  ;;  %v5347_v32 = vunpack.i.l.bf16 %v12768_v17  ;;  %v2136_v30 = vsel %vm2099_vm3, %v9290_v10, %v5297_v47  ;;  %v12770_v54 = vld [vmem:[#allocation98_spill] sm:$0xff]  ;;  %v2139_v15 = vsel %vm2099_vm3, %v9272_v41, %v5303_v22  ;;  %v12772_v10 = vld [vmem:[#allocation105_spill] sm:$0xff] }
 0x1d0   : > { %12763 = vst [vmem:[#allocation13_spill] sm:$0xff] %v9363_v2  ;;  %v6129_v33 = vpack.i.bf16 %v736_v48, %v12767_v6  ;;  %v6144_v48 = vpack.i.bf16 %v747_v63, %v745_v29  ;;  %v2110_v6 = vsel %vm2099_vm3, %v9242_v38, %v5232_v35  ;;  %v5343_v46 = vunpack.i.h.bf16 %v12770_v54  ;;  %v12773_v35 = vld [vmem:[#allocation97_spill] sm:$0xff]  ;;  %v12777_v22 = vld [vmem:[#allocation120_spill] sm:$0xff] }
 0x1d1   : > { %6120 = vrot.lane.b32.xlu0 %v6119_v59, %s6811_s30  ;;  %v9375_v2 = vpop.permute.xlu1 %5845  ;;  %v2111_v59 = vsel %vm2099_vm3, %v9238_v42, %v5233_v60  ;;  %v2137_v42 = vsel %vm2099_vm3, %v9280_v9, %v5298_v43  ;;  %v6139_v38 = vpack.i.bf16 %v740_v50, %v738_v11  ;;  %v2138_v5 = vsel %vm2099_vm3, %v9276_v23, %v5302_v24  ;;  %v12775_v41 = vld [vmem:[#allocation113_spill] sm:$0xff]  ;;  %v12776_v23 = vld [vmem:[#allocation106_spill] sm:$0xff]  ;;  %v12779_v11 = vld [vmem:[#allocation131_spill] sm:$0xff] }
 0x1d2   : > { %v9411_v0 = vsel %vm2154_vm4, %v2102_v61, %v5347_v32  ;;  %v9414_v9 = vsel %vm2154_vm4, %v2103_v57, %v5348_v8  ;;  %v5358_v26 = vunpack.i.h.bf16 %v12772_v10  ;;  %v5357_v60 = vunpack.i.l.bf16 %v12772_v10 }
 0x1d3   : > { %v9388_v55 = vpop.permute.xlu0 %5840  ;;  %6135 = vrot.lane.b32.xlu1 %v6134_v62, %s6814_s12  ;;  %v5342_v62 = vunpack.i.l.bf16 %v12770_v54  ;;  %v5353_v37 = vunpack.i.h.bf16 %v12773_v35  ;;  %v5352_v47 = vunpack.i.l.bf16 %v12773_v35  ;;  %v5368_v24 = vunpack.i.h.bf16 %v12775_v41  ;;  %v12780_v54 = vld [vmem:[#allocation124_spill] sm:$0xff] }
 0x1d4   : > { %12769 = vst [vmem:[#allocation14_spill] sm:$0xff] %v9388_v55  ;;  %v5367_v32 = vunpack.i.l.bf16 %v12775_v41  ;;  %v5363_v61 = vunpack.i.h.bf16 %v12776_v23  ;;  %v5362_v57 = vunpack.i.l.bf16 %v12776_v23  ;;  %v2156_v43 = vsel %vm2154_vm4, %v9308_v34, %v5343_v46 }
 0x1d5   : > { %6130 = vrot.lane.b32.xlu0 %v6129_v33, %s6811_s30  ;;  %v9404_v39 = vpop.permute.xlu1 %5855  ;;  %v2155_v63 = vsel %vm2154_vm4, %v9293_v31, %v5342_v62  ;;  %v5378_v33 = vunpack.i.h.bf16 %v12777_v22  ;;  %v5377_v17 = vunpack.i.l.bf16 %v12777_v22  ;;  %v5373_v50 = vunpack.i.h.bf16 %v12779_v11 }
 0x1d6   : > { %12771 = vst [vmem:[#allocation101_spill] sm:$0xff] %v9404_v39  ;;  %v5438_v10 = vunpack.i.h.bf16 %v12780_v54  ;;  %v5437_v35 = vunpack.i.l.bf16 %v12780_v54  ;;  %v2161_v31 = vsel %vm2154_vm4, %v9348_v18, %v5357_v60  ;;  %v2162_v34 = vsel %vm2154_vm4, %v9344_v56, %v5358_v26 }
 0x1d7   : > { %v9420_v29 = vpop.permute.xlu0 %5850  ;;  %6145 = vrot.lane.b32.xlu1 %v6144_v48, %s6814_s12  ;;  %v5372_v48 = vunpack.i.l.bf16 %v12779_v11  ;;  %v2160_v46 = vsel %vm2154_vm4, %v9318_v13, %v5353_v37  ;;  %v2159_v62 = vsel %vm2154_vm4, %v9322_v28, %v5352_v47  ;;  %v2165_v41 = vsel %vm2154_vm4, %v2110_v6, %v5367_v32  ;;  %v12782_v13 = vld [vmem:[#allocation116_spill] sm:$0xff]  ;;  %v12785_v32 = vld [vmem:[#allocation134_spill] sm:$0xff]  ;;  %v12788_v11 = vld [vmem:[#allocation135_spill] sm:$0xff] }
 0x1d8   : > { %12774 = vst [vmem:[#allocation84_spill] sm:$0xff] %v9420_v29  ;;  %v2166_v23 = vsel %vm2154_vm4, %v2111_v59, %v5368_v24  ;;  %v2163_v22 = vsel %vm2154_vm4, %v9329_v25, %v5362_v57  ;;  %v2164_v18 = vsel %vm2154_vm4, %v9338_v40, %v5363_v61  ;;  %v2169_v56 = vsel %vm2154_vm4, %v2114_v21, %v5377_v17  ;;  %v12784_v24 = vld [vmem:[#allocation128_spill] sm:$0xff] }
 0x1d9   : > { %6140 = vrot.lane.b32.xlu0 %v6139_v38, %s6811_s30  ;;  %v9434_v8 = vpop.permute.xlu1 %5865  ;;  %v2170_v26 = vsel %vm2154_vm4, %v2115_v4, %v5378_v33  ;;  %v5433_v60 = vunpack.i.h.bf16 %v12782_v13  ;;  %v5432_v28 = vunpack.i.l.bf16 %v12782_v13  ;;  %v2167_v6 = vsel %vm2154_vm4, %v2112_v3, %v5372_v48  ;;  %v12787_v33 = vld [vmem:[#allocation127_spill] sm:$0xff]  ;;  %v12789_v48 = vld [vmem:[#allocation136_spill] sm:$0xff]  ;;  %s6817_s30 = smov 56  }
 0x1da   : > { %12778 = vst [vmem:[#allocation79_spill] sm:$0xff] %v9434_v8  ;;  %v2168_v59 = vsel %vm2154_vm4, %v2113_v44, %v5373_v50  ;;  %v2193_v47 = vsel %vm2154_vm4, %v2138_v5, %v5437_v35  ;;  %v2194_v25 = vsel %vm2154_vm4, %v2139_v15, %v5438_v10  ;;  %v5478_v40 = vunpack.i.h.bf16 %v12784_v24  ;;  %v12790_v13 = vld [vmem:[#allocation140_spill] sm:$0xff] }
 0x1db   : > { %v9448_v38 = vpop.permute.xlu0 %5860  ;;  %v5477_v21 = vunpack.i.l.bf16 %v12784_v24  ;;  %v5488_v4 = vunpack.i.h.bf16 %v12785_v32  ;;  %v5487_v61 = vunpack.i.l.bf16 %v12785_v32  ;;  %v5483_v17 = vunpack.i.h.bf16 %v12787_v33  ;;  %v12800_v29 = vld [vmem:[#allocation160_spill] sm:$0xff] }
 0x1dc   : > { %12781 = vst [vmem:[#allocation107_spill] sm:$0xff] %v9448_v38  ;;  %v5482_v3 = vunpack.i.l.bf16 %v12787_v33  ;;  %v5498_v44 = vunpack.i.h.bf16 %v12788_v11  ;;  %v5497_v5 = vunpack.i.l.bf16 %v12788_v11  ;;  %v2191_v15 = vsel %vm2154_vm4, %v2136_v30, %v5432_v28 }
 0x1dd   : > { %v9460_v37 = vpop.permute.xlu1 %5875  ;;  %v2192_v50 = vsel %vm2154_vm4, %v2137_v42, %v5433_v60  ;;  %v5493_v54 = vunpack.i.h.bf16 %v12789_v48  ;;  %v5492_v10 = vunpack.i.l.bf16 %v12789_v48  ;;  %v5508_v24 = vunpack.i.h.bf16 %v12790_v13 }
 0x1de   : > { %12783 = vst [vmem:[#allocation102_spill] sm:$0xff] %v9460_v37  ;;  %v5507_v32 = vunpack.i.l.bf16 %v12790_v13  ;;  %v12791_v37 = vld [vmem:[#allocation143_spill] sm:$0xff]  ;;  %v2210_v11 = vsel %vm2209_vm7, %v2155_v63, %v5477_v21  ;;  %v2211_v30 = vsel %vm2209_vm7, %v2156_v43, %v5478_v40  ;;  %v2214_v42 = vsel %vm2209_vm7, %v2159_v62, %v5487_v61  ;;  %v12792_v40 = vld [vmem:[#allocation148_spill] sm:$0xff]  ;;  %v12794_v61 = vld [vmem:[#allocation138_spill] sm:$0xff] }
 0x1df   : > { %v9470_v57 = vpop.permute.xlu0 %5870  ;;  %v5503_v33 = vunpack.i.h.bf16 %v12791_v37  ;;  %v2215_v60 = vsel %vm2209_vm7, %v2160_v46, %v5488_v4  ;;  %v2212_v48 = vsel %vm2209_vm7, %v9411_v0, %v5482_v3  ;;  %v2213_v13 = vsel %vm2209_vm7, %v9414_v9, %v5483_v17 }
 0x1e0   : > { %12786 = vst [vmem:[#allocation114_spill] sm:$0xff] %v9470_v57  ;;  %v5502_v57 = vunpack.i.l.bf16 %v12791_v37  ;;  %v2218_v8 = vsel %vm2209_vm7, %v2163_v22, %v5497_v5  ;;  %v2219_v37 = vsel %vm2209_vm7, %v2164_v18, %v5498_v44  ;;  %v2216_v63 = vsel %vm2209_vm7, %v2161_v31, %v5492_v10  ;;  %v12793_v18 = vld [vmem:[#allocation142_spill] sm:$0xff]  ;;  %v12795_v5 = vld [vmem:[#allocation139_spill] sm:$0xff] }
 0x1e1   : > { %v9480_v35 = vpop.permute.xlu1 %5885  ;;  %v2217_v43 = vsel %vm2209_vm7, %v2162_v34, %v5493_v54  ;;  %v5513_v62 = vunpack.i.h.bf16 %v12792_v40  ;;  %v5512_v46 = vunpack.i.l.bf16 %v12792_v40  ;;  %v9505_v4 = vsel %vm2209_vm7, %v2167_v6, %v5507_v32 }
 0x1e2   : > { %v9508_v0 = vsel %vm2209_vm7, %v2168_v59, %v5508_v24  ;;  %v2220_v9 = vsel %vm2209_vm7, %v2165_v41, %v5502_v57  ;;  %v2221_v22 = vsel %vm2209_vm7, %v2166_v23, %v5503_v33  ;;  %v5568_v31 = vunpack.i.h.bf16 %v12793_v18  ;;  %v12796_v59 = vld [vmem:[#allocation149_spill] sm:$0xff]  ;;  %v12797_v24 = vld [vmem:[#allocation144_spill] sm:$0xff] }
 0x1e3   : > { %v9490_v28 = vpop.permute.xlu0 %5880  ;;  %v5567_v34 = vunpack.i.l.bf16 %v12793_v18  ;;  %v5573_v17 = vunpack.i.h.bf16 %v12794_v61  ;;  %v5572_v3 = vunpack.i.l.bf16 %v12794_v61  ;;  %v5618_v6 = vunpack.i.h.bf16 %v12795_v5  ;;  %v12799_v18 = vld [vmem:[#allocation152_spill] sm:$0xff] }
 0x1e4   : > { %v5617_v54 = vunpack.i.l.bf16 %v12795_v5  ;;  %v5613_v10 = vunpack.i.h.bf16 %v12796_v59  ;;  %v5612_v41 = vunpack.i.l.bf16 %v12796_v59  ;;  %v2224_v23 = vsel %vm2209_vm7, %v2169_v56, %v5512_v46 }
 0x1e5   : > { %v9502_v21 = vpop.permute.xlu1 %5895  ;;  %v2225_v57 = vsel %vm2209_vm7, %v2170_v26, %v5513_v62  ;;  %v5628_v32 = vunpack.i.h.bf16 %v12797_v24  ;;  %v5627_v33 = vunpack.i.l.bf16 %v12797_v24  ;;  %v5623_v61 = vunpack.i.h.bf16 %v12799_v18 }
 0x1e6   : > { %v5622_v38 = vunpack.i.l.bf16 %v12799_v18  ;;  %v5638_v5 = vunpack.i.h.bf16 %v12800_v29  ;;  %v5637_v39 = vunpack.i.l.bf16 %v12800_v29  ;;  %v2246_v59 = vsel %vm2209_vm7, %v2191_v15, %v5567_v34 }
 0x1e7   : > { %v9516_v44 = vpop.permute.xlu0 %5890  ;;  %v2247_v56 = vsel %vm2209_vm7, %v2192_v50, %v5568_v31  ;;  %v2248_v26 = vsel %vm2209_vm7, %v2193_v47, %v5572_v3  ;;  %v2249_v62 = vsel %vm2209_vm7, %v2194_v25, %v5573_v17  ;;  %v2267_v24 = vsel %vm2264_vm8, %v2212_v48, %v5617_v54  ;;  %v12801_v50 = vld [vmem:[#allocation155_spill] sm:$0xff]  ;;  %v12803_v17 = vld [vmem:[#allocation158_spill] sm:$0xff] }
 0x1e8   : > { %v2265_v18 = vsel %vm2264_vm8, %v2210_v11, %v5612_v41  ;;  %v2266_v55 = vsel %vm2264_vm8, %v2211_v30, %v5613_v10  ;;  %v9543_v29 = vsel %vm2264_vm8, %v2216_v63, %v5627_v33  ;;  %v9546_v15 = vsel %vm2264_vm8, %v2217_v43, %v5628_v32  ;;  %v12802_v63 = vld [vmem:[#allocation151_spill] sm:$0xff] }
 0x1e9   : > { %v9526_v40 = vpop.permute.xlu1 %5905  ;;  %v5633_v47 = vunpack.i.h.bf16 %v12801_v50  ;;  %v5632_v25 = vunpack.i.l.bf16 %v12801_v50  ;;  %v2269_v48 = vsel %vm2264_vm8, %v2214_v42, %v5622_v38  ;;  %v9555_v11 = vsel %vm2264_vm8, %v2220_v9, %v5637_v39 }
 0x1ea   : > { %12798 = vst [vmem:[#allocation99_spill] sm:$0xff] %v9526_v40  ;;  %v2268_v40 = vsel %vm2264_vm8, %v2213_v13, %v5618_v6  ;;  %v2270_v13 = vsel %vm2264_vm8, %v2215_v60, %v5623_v61  ;;  %v9558_v30 = vsel %vm2264_vm8, %v2221_v22, %v5638_v5  ;;  %v5648_v43 = vunpack.i.h.bf16 %v12802_v63 }
 0x1eb   : > { %v9536_v46 = vpop.permute.xlu0 %5900  ;;  %v5647_v34 = vunpack.i.l.bf16 %v12802_v63  ;;  %v5643_v3 = vunpack.i.h.bf16 %v12803_v17  ;;  %v5642_v6 = vunpack.i.l.bf16 %v12803_v17  ;;  %v5708_v38 = vunpack.i.h.bf16 %v9035_v7 }
 0x1ec   : > { %v5707_v39 = vunpack.i.l.bf16 %v9035_v7  ;;  %v5703_v42 = vunpack.i.h.bf16 %v9045_v27  ;;  %v5702_v60 = vunpack.i.l.bf16 %v9045_v27  ;;  %v2273_v9 = vsel %vm2264_vm8, %v2218_v8, %v5632_v25 }
 0x1ed   : > { %v9550_v31 = vpop.permute.xlu1 %5915  ;;  %v2274_v22 = vsel %vm2264_vm8, %v2219_v37, %v5633_v47  ;;  %v5748_v10 = vunpack.i.h.bf16 %v9129_v36  ;;  %v5747_v41 = vunpack.i.l.bf16 %v9129_v36  ;;  %v5758_v33 = vunpack.i.h.bf16 %v9145_v20 }
 0x1ee   : > { %v5757_v61 = vunpack.i.l.bf16 %v9145_v20  ;;  %v5753_v7 = vunpack.i.h.bf16 %v9153_v1  ;;  %v5752_v5 = vunpack.i.l.bf16 %v9153_v1  ;;  %v2279_v27 = vsel %vm2264_vm8, %v2224_v23, %v5647_v34 }
 0x1ef   : > { %v9564_v54 = vpop.permute.xlu0 %5910  ;;  %v9582_v8 = vsel %vm2264_vm8, %v2225_v57, %v5648_v43  ;;  %v2277_v37 = vsel %vm2264_vm8, %v9505_v4, %v5642_v6  ;;  %v2278_v36 = vsel %vm2264_vm8, %v9508_v0, %v5643_v3  ;;  %v9591_v20 = vsel %vm2264_vm8, %v2248_v26, %v5707_v39 }
 0x1f0   : > { %v9594_v47 = vsel %vm2264_vm8, %v2249_v62, %v5708_v38  ;;  %v9597_v1 = vsel %vm2264_vm8, %v2246_v59, %v5702_v60  ;;  %v9600_v23 = vsel %vm2264_vm8, %v2247_v56, %v5703_v42  ;;  %v2320_v57 = vsel %vm2319_vm9, %v2265_v18, %v5747_v41 }
 0x1f1   : > { %v9574_v32 = vpop.permute.xlu1 %5925  ;;  %v2321_v4 = vsel %vm2319_vm9, %v2266_v55, %v5748_v10  ;;  %v5883_v0 = vunpack.i.h.bf16 %v9490_v28  ;;  %v5882_v25 = vunpack.i.l.bf16 %v9490_v28  ;;  %v9609_v26 = vsel %vm2319_vm9, %v2269_v48, %v5757_v61 }
 0x1f2   : > { %v9612_v62 = vsel %vm2319_vm9, %v2270_v13, %v5758_v33  ;;  %v2322_v59 = vsel %vm2319_vm9, %v2267_v24, %v5752_v5  ;;  %v2323_v56 = vsel %vm2319_vm9, %v2268_v40, %v5753_v7  ;;  %v5768_v18 = vunpack.i.h.bf16 %v9159_v53 }
 0x1f3   : > { %v9588_v50 = vpop.permute.xlu0 %5920  ;;  %v5767_v55 = vunpack.i.l.bf16 %v9159_v53  ;;  %v5763_v43 = vunpack.i.h.bf16 %v9161_v45  ;;  %v5762_v28 = vunpack.i.l.bf16 %v9161_v45  ;;  %v5778_v17 = vunpack.i.h.bf16 %v9167_v51 }
 0x1f4   : > { %v5777_v48 = vunpack.i.l.bf16 %v9167_v51  ;;  %v5773_v6 = vunpack.i.h.bf16 %v9169_v12  ;;  %v5772_v24 = vunpack.i.l.bf16 %v9169_v12  ;;  %v2375_v40 = vsel %vm2374_vm10, %v2320_v57, %v5882_v25 }
 0x1f5   : > { %v9606_v63 = vpop.permute.xlu1 %5935  ;;  %v2376_v38 = vsel %vm2374_vm10, %v2321_v4, %v5883_v0  ;;  %v5788_v39 = vunpack.i.h.bf16 %v9180_v52  ;;  %v5787_v45 = vunpack.i.l.bf16 %v9180_v52  ;;  %v5782_v60 = vunpack.i.l.bf16 %v9184_v19 }
 0x1f6   : > { %v5888_v10 = vunpack.i.h.bf16 %v9480_v35  ;;  %v5887_v12 = vunpack.i.l.bf16 %v9480_v35  ;;  %v9636_v61 = vsel %vm2319_vm9, %v2273_v9, %v5767_v55  ;;  %v9639_v7 = vsel %vm2319_vm9, %v2274_v22, %v5768_v18 }
 0x1f7   : > { %v5931_v34 = vpop.permute.xlu0 %5930  ;;  %v9643_v57 = vsel %vm2319_vm9, %v9543_v29, %v5762_v28  ;;  %v9647_v4 = vsel %vm2319_vm9, %v9546_v15, %v5763_v43  ;;  %v9650_v35 = vsel %vm2319_vm9, %v2277_v37, %v5777_v48  ;;  %v5783_v0 = vunpack.i.h.bf16 %v9184_v19 }
 0x1f8   : > { %v5933_v3 = vunpack.i.h.bf16 %v5931_v34  ;;  %v5932_v13 = vunpack.i.l.bf16 %v5931_v34  ;;  %v9657_v22 = vsel %vm2319_vm9, %v2278_v36, %v5778_v17  ;;  %v9661_v29 = vsel %vm2319_vm9, %v9555_v11, %v5772_v24 }
 0x1f9   : > { %v9626_v53 = vpop.permute.xlu1 %5945  ;;  %v9665_v15 = vsel %vm2319_vm9, %v9558_v30, %v5773_v6  ;;  %v9669_v37 = vsel %vm2319_vm9, %v8928_v14, %v5787_v45  ;;  %v12804_v19 = vmov 0.0   ;;  %v9675_v25 = vsel %vm2319_vm9, %v8931_v49, %v5788_v39  ;;  %v12807_v6 = vld [vmem:[#allocation52_spill] sm:$0xff] }
 0x1fa   : > { %v2430_v42 = vsel %vm2429_vm11, %v2375_v40, %v5932_v13  ;;  %v2431_v51 = vsel %vm2429_vm11, %v2376_v38, %v5933_v3  ;;  %v9678_v36 = vsel %vm2319_vm9, %v2279_v27, %v5782_v60  ;;  %v2377_v11 = vsel %vm2374_vm10, %v2322_v59, %v5887_v12  ;;  %v12805_v59 = vld [vmem:[#allocation69_spill] sm:$0xff]  ;;  %v12806_v3 = vld [vmem:[#allocation48_spill] sm:$0xff] }
 0x1fb   : > { %v5941_v41 = vpop.permute.xlu0 %5940  ;;  %v2484_v33 = vpack.c.bf16 %v2431_v51, %v2430_v42  ;;  %v2378_v18 = vsel %vm2374_vm10, %v2323_v56, %v5888_v10  ;;  %v5798_v55 = vunpack.i.h.bf16 %v9207_v16  ;;  %v5797_v14 = vunpack.i.l.bf16 %v9207_v16  ;;  %v12808_v45 = vld [vmem:[#allocation180_spill] sm:$0xff]  ;;  %v12809_v51 = vld [vmem:[#allocation185_spill] sm:$0xff] }
 0x1fc   : > { %v5943_v5 = vunpack.i.h.bf16 %v5941_v41  ;;  %v5942_v52 = vunpack.i.l.bf16 %v5941_v41  ;;  %v9688_v49 = vsel %vm2319_vm9, %v9582_v8, %v5783_v0  ;;  %v5793_v27 = vunpack.i.h.bf16 %v9220_v58  ;;  %v12810_v41 = vld [vmem:[#allocation166_spill] sm:$0xff] }
 0x1fd   : > { %4890 = vmatmul.mubr.msk.bf16.vlgmr.msra.gmra.mxu0 %vm2538_vm12, %v2484_v33  ;;  %v9654_v9 = vpop.permute.xlu1 %5955  ;;  %v5792_v34 = vunpack.i.l.bf16 %v9220_v58  ;;  %v5808_v17 = vunpack.i.h.bf16 %v12805_v59  ;;  %v5807_v48 = vunpack.i.l.bf16 %v12805_v59  ;;  %v5803_v16 = vunpack.i.h.bf16 %v12806_v3 }
 0x1fe   : > { %4893 = vmatprep.mubr.msk.bf16.mxu0 %vm6813_vm6, %v12804_v19  ;;  %v2432_v43 = vsel %vm2429_vm11, %v2377_v11, %v5942_v52  ;;  %v2433_v28 = vsel %vm2429_vm11, %v2378_v18, %v5943_v5  ;;  %v5802_v13 = vunpack.i.l.bf16 %v12806_v3  ;;  %v5818_v24 = vunpack.i.h.bf16 %v12807_v6  ;;  %v12811_v5 = vld [vmem:[#allocation181_spill] sm:$0xff]  ;;  %v12817_v3 = vld [vmem:[#allocation208_spill] sm:$0xff] }
 0x1ff   : > { %v5951_v30 = vpop.permute.xlu0 %5950  ;;  %v5817_v40 = vunpack.i.l.bf16 %v12807_v6  ;;  %v5893_v8 = vunpack.i.h.bf16 %v9516_v44  ;;  %v5892_v38 = vunpack.i.l.bf16 %v9516_v44  ;;  %v2485_v58 = vpack.c.bf16 %v2433_v28, %v2432_v43  ;;  %v12812_v52 = vld [vmem:[#allocation53_spill] sm:$0xff]  ;;  %v12815_v28 = vld [vmem:[#allocation178_spill] sm:$0xff] }
 0x200   : > { %v9706_v42 = vsel %vm2319_vm9, %v12808_v45, %v5797_v14  ;;  %v9710_v60 = vsel %vm2319_vm9, %v12809_v51, %v5798_v55  ;;  %v5953_v10 = vunpack.i.h.bf16 %v5951_v30  ;;  %v5952_v12 = vunpack.i.l.bf16 %v5951_v30  ;;  %v12813_v55 = vld [vmem:[#allocation183_spill] sm:$0xff]  ;;  %v12814_v30 = vld [vmem:[#allocation186_spill] sm:$0xff] }
 0x201   : > { %v9693_v56 = vpop.permute.xlu1 %5965  ;;  %v9714_v33 = vsel %vm2319_vm9, %v12810_v41, %v5792_v34  ;;  %v9718_v44 = vsel %vm2319_vm9, %v12811_v5, %v5793_v27  ;;  %v5813_v0 = vunpack.i.h.bf16 %v12812_v52  ;;  %v5812_v11 = vunpack.i.l.bf16 %v12812_v52  ;;  %v12816_v34 = vld [vmem:[#allocation174_spill] sm:$0xff] }
 0x202   : > { %v9727_v14 = vsel %vm2319_vm9, %v12813_v55, %v5807_v48  ;;  %v9731_v43 = vsel %vm2319_vm9, %v12814_v30, %v5808_v17  ;;  %v9735_v27 = vsel %vm2319_vm9, %v12815_v28, %v5802_v13  ;;  %v9739_v59 = vsel %vm2319_vm9, %v12816_v34, %v5803_v16  ;;  %v12819_v48 = vld [vmem:[#allocation157_spill] sm:$0xff]  ;;  %v12822_v52 = vld [vmem:[#allocation182_spill] sm:$0xff]  ;;  %v12824_v55 = vld [vmem:[#allocation179_spill] sm:$0xff] }
 0x203   : > { %v9702_v39 = vpop.permute.xlu0 %5960  ;;  %v9745_v6 = vsel %vm2319_vm9, %v12817_v3, %v5817_v40  ;;  %v2379_v17 = vsel %vm2374_vm10, %v9609_v26, %v5892_v38  ;;  %v2380_v13 = vsel %vm2374_vm10, %v9612_v62, %v5893_v8  ;;  %v12821_v16 = vld [vmem:[#allocation213_spill] sm:$0xff]  ;;  %v9767_v26 = vsel %vm2319_vm9, %v12824_v55, %v5813_v0  ;;  %v12826_v38 = vld [vmem:[#allocation192_spill] sm:$0xff] }
 0x204   : > { %12818 = vst [vmem:[#allocation117_spill] sm:$0xff] %v9745_v6  ;;  %v5828_v51 = vunpack.i.h.bf16 %v12821_v16  ;;  %v5827_v41 = vunpack.i.l.bf16 %v12821_v16  ;;  %v2434_v5 = vsel %vm2429_vm11, %v2379_v17, %v5952_v12  ;;  %v2435_v40 = vsel %vm2429_vm11, %v2380_v13, %v5953_v10  ;;  %12825 = vst [vmem:[#allocation126_spill] sm:$0xff] %v9767_v26  ;;  %v12827_v28 = vld [vmem:[#allocation189_spill] sm:$0xff]  ;;  %v12833_v6 = vld [vmem:[#allocation108_spill] sm:$0xff] }
 0x205   : > { %4894 = vmatmul.mubr.msk.bf16.gmra.mxu0 %vm2538_vm12, %v2485_v58  ;;  %v9723_v18 = vpop.permute.xlu1 %5975  ;;  %v9749_v58 = vsel %vm2319_vm9, %v12819_v48, %v5818_v24  ;;  %v9763_v24 = vsel %vm2319_vm9, %v12822_v52, %v5812_v11  ;;  %v5823_v62 = vunpack.i.h.bf16 %v12826_v38  ;;  %v5822_v8 = vunpack.i.l.bf16 %v12826_v38  ;;  %v12828_v3 = vld [vmem:[#allocation13_spill] sm:$0xff]  ;;  %v12829_v52 = vld [vmem:[#allocation171_spill] sm:$0xff]  ;;  %v12831_v38 = vld [vmem:[#allocation164_spill] sm:$0xff] }
 0x206   : > { %4897 = vmatprep.mubr.msk.bf16.mxu0 %vm6813_vm6, %v12804_v19  ;;  %12820 = vst [vmem:[#allocation119_spill] sm:$0xff] %v9749_v58  ;;  %12823 = vst [vmem:[#allocation70_spill] sm:$0xff] %v9763_v24  ;;  %v5838_v34 = vunpack.i.h.bf16 %v12827_v28  ;;  %v5837_v12 = vunpack.i.l.bf16 %v12827_v28  ;;  %v5833_v10 = vunpack.i.h.bf16 %v12828_v3  ;;  %v5832_v48 = vunpack.i.l.bf16 %v12828_v3 }
 0x207   : > { %v9755_v45 = vpop.permute.xlu0 %5970  ;;  %v5847_v11 = vunpack.i.l.bf16 %v9375_v2  ;;  %v5898_v17 = vunpack.i.h.bf16 %v9502_v21  ;;  %v5897_v0 = vunpack.i.l.bf16 %v9502_v21  ;;  %v2486_v16 = vpack.c.bf16 %v2435_v40, %v2434_v5  ;;  %v12834_v21 = vld [vmem:[#allocation188_spill] sm:$0xff] }
 0x208   : > { %v9784_v55 = vsel %vm2319_vm9, %v12829_v52, %v5827_v41  ;;  %v9788_v28 = vsel %vm2319_vm9, %v12831_v38, %v5828_v51  ;;  %v5963_v58 = vunpack.i.h.bf16 %v9702_v39  ;;  %v5962_v3 = vunpack.i.l.bf16 %v9702_v39  ;;  %v12835_v41 = vld [vmem:[#allocation14_spill] sm:$0xff] }
 0x209   : > { %v9771_v30 = vpop.permute.xlu1 %5985  ;;  %12830 = vst [vmem:[#allocation121_spill] sm:$0xff] %v9784_v55  ;;  %12832 = vst [vmem:[#allocation87_spill] sm:$0xff] %v9788_v28  ;;  %v9794_v26 = vsel %vm2319_vm9, %v12833_v6, %v5822_v8  ;;  %v9798_v24 = vsel %vm2319_vm9, %v12834_v21, %v5823_v62  ;;  %v5848_v5 = vunpack.i.h.bf16 %v9375_v2  ;;  %v5842_v40 = vunpack.i.l.bf16 %v12835_v41  ;;  %v12836_v6 = vld [vmem:[#allocation161_spill] sm:$0xff]  ;;  %v12838_v8 = vld [vmem:[#allocation35_spill] sm:$0xff] }
 0x20a   : > { %v9807_v52 = vsel %vm2319_vm9, %v9597_v1, %v5837_v12  ;;  %v9811_v39 = vsel %vm2319_vm9, %v9600_v23, %v5838_v34  ;;  %v9815_v62 = vsel %vm2319_vm9, %v12836_v6, %v5832_v48  ;;  %v9819_v2 = vsel %vm2319_vm9, %v12838_v8, %v5833_v10  ;;  %v12841_v48 = vld [vmem:[#allocation101_spill] sm:$0xff] }
 0x20b   : > { %v9780_v13 = vpop.permute.xlu0 %5980  ;;  %12837 = vst [vmem:[#allocation90_spill] sm:$0xff] %v9815_v62  ;;  %12839 = vst [vmem:[#allocation89_spill] sm:$0xff] %v9819_v2  ;;  %v5843_v1 = vunpack.i.h.bf16 %v12835_v41  ;;  %v2381_v23 = vsel %vm2374_vm10, %v9643_v57, %v5897_v0  ;;  %v2382_v34 = vsel %vm2374_vm10, %v9647_v4, %v5898_v17  ;;  %v5858_v10 = vunpack.i.h.bf16 %v12841_v48  ;;  %v12843_v0 = vld [vmem:[#allocation84_spill] sm:$0xff]  ;;  %v12845_v2 = vld [vmem:[#allocation99_spill] sm:$0xff] }
 0x20c   : > { %v5857_v21 = vunpack.i.l.bf16 %v12841_v48  ;;  %v2436_v6 = vsel %vm2429_vm11, %v2381_v23, %v5962_v3  ;;  %v2437_v8 = vsel %vm2429_vm11, %v2382_v34, %v5963_v58  ;;  %v9844_v57 = vsel %vm2319_vm9, %v9591_v20, %v5842_v40 }
 0x20d   : > { %4898 = vmatmul.mubr.msk.bf16.gmra.mxu0 %vm2538_vm12, %v2486_v16  ;;  %v9803_v51 = vpop.permute.xlu1 %5995  ;;  %v12840_v16 = vld [vmem:[#allocation163_spill] sm:$0xff]  ;;  %v5853_v4 = vunpack.i.h.bf16 %v12843_v0  ;;  %v5852_v17 = vunpack.i.l.bf16 %v12843_v0  ;;  %v5908_v48 = vunpack.i.h.bf16 %v12845_v2  ;;  %v5907_v3 = vunpack.i.l.bf16 %v12845_v2  ;;  %v12846_v0 = vld [vmem:[#allocation177_spill] sm:$0xff]  ;;  %v12847_v2 = vld [vmem:[#allocation170_spill] sm:$0xff] }
 0x20e   : > { %4901 = vmatprep.mubr.msk.bf16.mxu0 %vm6813_vm6, %v12804_v19  ;;  %v9825_v38 = vsel %vm2319_vm9, %v12840_v16, %v5847_v11  ;;  %v12842_v11 = vld [vmem:[#allocation167_spill] sm:$0xff]  ;;  %v5903_v58 = vunpack.i.h.bf16 %v9536_v46  ;;  %v5902_v23 = vunpack.i.l.bf16 %v9536_v46  ;;  %v5918_v20 = vunpack.i.h.bf16 %v9550_v31 }
 0x20f   : > { %v9832_v12 = vpop.permute.xlu0 %5990  ;;  %v9840_v16 = vsel %vm2319_vm9, %v12842_v11, %v5848_v5  ;;  %v9856_v5 = vsel %vm2319_vm9, %v9594_v47, %v5843_v1  ;;  %v5917_v40 = vunpack.i.l.bf16 %v9550_v31  ;;  %v2487_v11 = vpack.c.bf16 %v2437_v8, %v2436_v6  ;;  %v12848_v1 = vld [vmem:[#allocation211_spill] sm:$0xff]  ;;  %v12849_v31 = vld [vmem:[#allocation33_spill] sm:$0xff] }
 0x210   : > { %v9864_v62 = vsel %vm2319_vm9, %v12846_v0, %v5857_v21  ;;  %v5973_v46 = vunpack.i.h.bf16 %v9755_v45  ;;  %v5972_v47 = vunpack.i.l.bf16 %v9755_v45  ;;  %v9874_v28 = vsel %vm2319_vm9, %v12848_v1, %v5852_v17 }
 0x211   : > { %v9848_v41 = vpop.permute.xlu1 %6005  ;;  %v9878_v55 = vsel %vm2319_vm9, %v12849_v31, %v5853_v4  ;;  %v5923_v6 = vunpack.i.h.bf16 %v9588_v50  ;;  %v5922_v21 = vunpack.i.l.bf16 %v9588_v50  ;;  %v2385_v8 = vsel %vm2374_vm10, %v9661_v29, %v5907_v3 }
 0x212   : > { %12844 = vst [vmem:[#allocation72_spill] sm:$0xff] %v9848_v41  ;;  %v9868_v41 = vsel %vm2319_vm9, %v12847_v2, %v5858_v10  ;;  %v2386_v45 = vsel %vm2374_vm10, %v9665_v15, %v5908_v48  ;;  %v2383_v17 = vsel %vm2374_vm10, %v9636_v61, %v5902_v23  ;;  %v2384_v4 = vsel %vm2374_vm10, %v9639_v7, %v5903_v58 }
 0x213   : > { %v9860_v34 = vpop.permute.xlu0 %6000  ;;  %v9897_v50 = vsel %vm2374_vm10, %v9678_v36, %v5917_v40  ;;  %v5913_v29 = vunpack.i.h.bf16 %v9564_v54  ;;  %v5912_v15 = vunpack.i.l.bf16 %v9564_v54  ;;  %v2438_v61 = vsel %vm2429_vm11, %v2383_v17, %v5972_v47 }
 0x214   : > { %v2439_v7 = vsel %vm2429_vm11, %v2384_v4, %v5973_v46  ;;  %v5928_v23 = vunpack.i.h.bf16 %v9574_v32  ;;  %v5927_v36 = vunpack.i.l.bf16 %v9574_v32  ;;  %v2391_v40 = vsel %vm2374_vm10, %v9669_v37, %v5922_v21 }
 0x215   : > { %4902 = vmatmul.mubr.msk.bf16.gmra.mxu0 %vm2538_vm12, %v2487_v11  ;;  %v9883_v10 = vpop.permute.xlu1 %6015  ;;  %v9901_v11 = vsel %vm2374_vm10, %v9688_v49, %v5918_v20  ;;  %v2392_v49 = vsel %vm2374_vm10, %v9675_v25, %v5923_v6  ;;  %v5938_v54 = vunpack.i.h.bf16 %v9606_v63  ;;  %v5937_v0 = vunpack.i.l.bf16 %v9606_v63 }
 0x216   : > { %4905 = vmatprep.mubr.msk.bf16.mxu0 %vm6813_vm6, %v12804_v19  ;;  %v5948_v32 = vunpack.i.h.bf16 %v9626_v53  ;;  %v5947_v47 = vunpack.i.l.bf16 %v9626_v53  ;;  %v2488_v1 = vpack.c.bf16 %v2439_v7, %v2438_v61  ;;  %v5983_v31 = vunpack.i.h.bf16 %v9780_v13 }
 0x217   : > { %v6011_v48 = vpop.permute.xlu0 %6010  ;;  %v5982_v6 = vunpack.i.l.bf16 %v9780_v13  ;;  %v2387_v17 = vsel %vm2374_vm10, %v9650_v35, %v5912_v15  ;;  %v2393_v4 = vsel %vm2374_vm10, %v9714_v33, %v5927_v36  ;;  %v2394_v53 = vsel %vm2374_vm10, %v9718_v44, %v5928_v23 }
 0x218   : > { %v6013_v3 = vunpack.i.h.bf16 %v6011_v48  ;;  %v6012_v58 = vunpack.i.l.bf16 %v6011_v48  ;;  %v5957_v48 = vunpack.i.l.bf16 %v9654_v9  ;;  %v2388_v13 = vsel %vm2374_vm10, %v9657_v22, %v5913_v29 }
 0x219   : > { %v9913_v20 = vpop.permute.xlu1 %6025  ;;  %v2395_v7 = vsel %vm2374_vm10, %v9706_v42, %v5937_v0  ;;  %v2396_v44 = vsel %vm2374_vm10, %v9710_v60, %v5938_v54  ;;  %v2397_v15 = vsel %vm2374_vm10, %v9735_v27, %v5947_v47  ;;  %v2398_v22 = vsel %vm2374_vm10, %v9739_v59, %v5948_v32 }
 0x21a   : > { %v9918_v2 = vsel %vm2429_vm11, %v2391_v40, %v6012_v58  ;;  %v9921_v46 = vsel %vm2429_vm11, %v2392_v49, %v6013_v3  ;;  %v2440_v3 = vsel %vm2429_vm11, %v2385_v8, %v5982_v6  ;;  %v2441_v58 = vsel %vm2429_vm11, %v2386_v45, %v5983_v31 }
 0x21b   : > { %v6021_v37 = vpop.permute.xlu0 %6020  ;;  %v2492_v25 = vpack.c.bf16 %v9921_v46, %v9918_v2  ;;  %v5958_v40 = vunpack.i.h.bf16 %v9654_v9  ;;  %v2399_v60 = vsel %vm2374_vm10, %v9727_v14, %v5957_v48  ;;  %v5968_v27 = vunpack.i.h.bf16 %v9693_v56 }
 0x21c   : > { %v6023_v63 = vunpack.i.h.bf16 %v6021_v37  ;;  %v6022_v21 = vunpack.i.l.bf16 %v6021_v37  ;;  %v5967_v49 = vunpack.i.l.bf16 %v9693_v56  ;;  %v5993_v54 = vunpack.i.h.bf16 %v9832_v12 }
 0x21d   : > { %4906 = vmatmul.mubr.msk.bf16.gmra.mxu0 %vm2538_vm12, %v2488_v1  ;;  %v9937_v61 = vpop.permute.xlu1 %6035  ;;  %v5992_v0 = vunpack.i.l.bf16 %v9832_v12  ;;  %v5978_v9 = vunpack.i.h.bf16 %v9723_v18  ;;  %v5977_v14 = vunpack.i.l.bf16 %v9723_v18  ;;  %v2489_v47 = vpack.c.bf16 %v2441_v58, %v2440_v3  ;;  %v12853_v58 = vld [vmem:[#allocation119_spill] sm:$0xff] }
 0x21e   : > { %v9944_v35 = vsel %vm2429_vm11, %v2393_v4, %v6022_v21  ;;  %v9947_v33 = vsel %vm2429_vm11, %v2394_v53, %v6023_v63  ;;  %4909 = vmatprep.mubr.msk.bf16.mxu0 %vm6813_vm6, %v12804_v19  ;;  %v5988_v37 = vunpack.i.h.bf16 %v9771_v30  ;;  %v5987_v1 = vunpack.i.l.bf16 %v9771_v30  ;;  %v12850_v63 = vld [vmem:[#allocation70_spill] sm:$0xff] }
 0x21f   : > { %v6031_v29 = vpop.permute.xlu0 %6030  ;;  %v2493_v42 = vpack.c.bf16 %v9947_v33, %v9944_v35  ;;  %v2400_v6 = vsel %vm2374_vm10, %v9731_v43, %v5958_v40  ;;  %v2401_v21 = vsel %vm2374_vm10, %v12850_v63, %v5967_v49  ;;  %v12851_v4 = vld [vmem:[#allocation126_spill] sm:$0xff]  ;;  %v6017_v53 = vunpack.i.l.bf16 %v9883_v10 }
 0x220   : > { %v6033_v23 = vunpack.i.h.bf16 %v6031_v29  ;;  %v6032_v36 = vunpack.i.l.bf16 %v6031_v29  ;;  %v2402_v18 = vsel %vm2374_vm10, %v12851_v4, %v5968_v27  ;;  %v2443_v30 = vsel %vm2429_vm11, %v2388_v13, %v5993_v54  ;;  %v12852_v29 = vld [vmem:[#allocation117_spill] sm:$0xff] }
 0x221   : > { %v9966_v59 = vpop.permute.xlu1 %6045  ;;  %v2403_v3 = vsel %vm2374_vm10, %v12852_v29, %v5977_v14  ;;  %v6003_v49 = vunpack.i.h.bf16 %v9860_v34  ;;  %v6002_v54 = vunpack.i.l.bf16 %v9860_v34  ;;  %v6027_v34 = vunpack.i.l.bf16 %v9913_v20 }
 0x222   : > { %v9971_v8 = vsel %vm2429_vm11, %v2395_v7, %v6032_v36  ;;  %v9974_v45 = vsel %vm2429_vm11, %v2396_v44, %v6033_v23  ;;  %v2442_v7 = vsel %vm2429_vm11, %v2387_v17, %v5992_v0  ;;  %v2404_v23 = vsel %vm2374_vm10, %v12853_v58, %v5978_v9 }
 0x223   : > { %v6041_v32 = vpop.permute.xlu0 %6040  ;;  %v2494_v56 = vpack.c.bf16 %v9974_v45, %v9971_v8  ;;  %v6018_v36 = vunpack.i.h.bf16 %v9883_v10  ;;  %v2411_v10 = vsel %vm2374_vm10, %v9807_v52, %v6017_v53  ;;  %v2490_v9 = vpack.c.bf16 %v2443_v30, %v2442_v7 }
 0x224   : > { %v6043_v12 = vunpack.i.h.bf16 %v6041_v32  ;;  %v6042_v31 = vunpack.i.l.bf16 %v6041_v32  ;;  %v5998_v63 = vunpack.i.h.bf16 %v9803_v51  ;;  %v2444_v4 = vsel %vm2429_vm11, %v9897_v50, %v6002_v54 }
 0x225   : > { %4910 = vmatmul.mubr.msk.bf16.gmra.mxu0 %vm2538_vm12, %v2489_v47  ;;  %v9990_v48 = vpop.permute.xlu1 %6055  ;;  %v2412_v47 = vsel %vm2374_vm10, %v9811_v39, %v6018_v36  ;;  %v2445_v39 = vsel %vm2429_vm11, %v9901_v11, %v6003_v49  ;;  %v5997_v50 = vunpack.i.l.bf16 %v9803_v51  ;;  %v6038_v36 = vunpack.i.h.bf16 %v9937_v61  ;;  %v12857_v51 = vld [vmem:[#allocation107_spill] sm:$0xff] }
 0x226   : > { %v9995_v44 = vsel %vm2429_vm11, %v2397_v15, %v6042_v31  ;;  %v9998_v43 = vsel %vm2429_vm11, %v2398_v22, %v6043_v12  ;;  %4913 = vmatprep.mubr.msk.bf16.mxu0 %vm6813_vm6, %v12804_v19  ;;  %v10011_v15 = vsel %vm2374_vm10, %v9794_v26, %v5987_v1  ;;  %v10015_v22 = vsel %vm2374_vm10, %v9798_v24, %v5988_v37 }
 0x227   : > { %v6051_v17 = vpop.permute.xlu0 %6050  ;;  %v2495_v13 = vpack.c.bf16 %v9998_v43, %v9995_v44  ;;  %v6028_v37 = vunpack.i.h.bf16 %v9913_v20  ;;  %v6037_v11 = vunpack.i.l.bf16 %v9937_v61  ;;  %v6047_v54 = vunpack.i.l.bf16 %v9966_v59 }
 0x228   : > { %v6053_v40 = vunpack.i.h.bf16 %v6051_v17  ;;  %v6052_v27 = vunpack.i.l.bf16 %v6051_v17  ;;  %v3063_v45 = vrot.slane %v12804_v19, 1  ;;  %vm4211_vm2 = vcmask 457728  }
 0x229   : > { %v6066_v0 = vpop.permute.xlu1 %6065  ;;  %vm4244_vm4 = vcmask 523264  }
 0x22a   : > { %v10022_v14 = vsel %vm2429_vm11, %v2399_v60, %v6052_v27  ;;  %v10025_v26 = vsel %vm2429_vm11, %v2400_v6, %v6053_v40  ;;  %v6068_v32 = vunpack.i.h.bf16 %v6066_v0  ;;  %v6067_v24 = vunpack.i.l.bf16 %v6066_v0 }
 0x22b   : > { %v6061_v1 = vpop.permute.xlu0 %6060  ;;  %v2496_v52 = vpack.c.bf16 %v10025_v26, %v10022_v14  ;;  %v2414_v40 = vsel %vm2374_vm10, %v9856_v5, %v6028_v37  ;;  %v2416_v37 = vsel %vm2374_vm10, %v9840_v16, %v6038_v36  ;;  %v6057_v36 = vunpack.i.l.bf16 %v9990_v48 }
 0x22c   : > { %v2466_v12 = vsel %vm2429_vm11, %v2411_v10, %v6067_v24  ;;  %v2467_v60 = vsel %vm2429_vm11, %v2412_v47, %v6068_v32  ;;  %v6063_v31 = vunpack.i.h.bf16 %v6061_v1  ;;  %v6062_v6 = vunpack.i.l.bf16 %v6061_v1 }
 0x22d   : > { %4914 = vmatmul.mubr.msk.bf16.gmra.mxu0 %vm2538_vm12, %v2490_v9  ;;  %v6076_v20 = vpop.permute.xlu1 %6075  ;;  %v2502_v53 = vpack.c.bf16 %v2467_v60, %v2466_v12  ;;  %v2491_v9 = vpack.c.bf16 %v2445_v39, %v2444_v4  ;;  %v2415_v47 = vsel %vm2374_vm10, %v9825_v38, %v6037_v11  ;;  %v2417_v38 = vsel %vm2374_vm10, %v9874_v28, %v6047_v54 }
 0x22e   : > { %v10042_v7 = vsel %vm2429_vm11, %v2401_v21, %v6062_v6  ;;  %v10045_v30 = vsel %vm2429_vm11, %v2402_v18, %v6063_v31  ;;  %v6078_v29 = vunpack.i.h.bf16 %v6076_v20  ;;  %v6077_v58 = vunpack.i.l.bf16 %v6076_v20  ;;  %4917 = vmatprep.mubr.msk.bf16.mxu0 %vm6813_vm6, %v12804_v19  ;;  %v12854_v6 = vld [vmem:[#allocation121_spill] sm:$0xff] }
 0x22f   : > { %v6071_v17 = vpop.permute.xlu0 %6070  ;;  %4962 = vmatmul.mubr.msk.bf16.vlgmr.msra.gmra.mxu1 %vm2538_vm12, %v2502_v53  ;;  %v2497_v21 = vpack.c.bf16 %v10045_v30, %v10042_v7  ;;  %v2413_v18 = vsel %vm2374_vm10, %v9844_v57, %v6027_v34  ;;  %v6048_v34 = vunpack.i.h.bf16 %v9966_v59  ;;  %v2407_v4 = vsel %vm2374_vm10, %v12854_v6, %v5997_v50  ;;  %v10277_v7 = vld [vmem:[%s11589_s2] ss:$0 sm:$0xff] }
 0x230   : > { %v6073_v27 = vunpack.i.h.bf16 %v6071_v17  ;;  %v6072_v49 = vunpack.i.l.bf16 %v6071_v17  ;;  %4965 = vmatprep.mubr.msk.bf16.mxu1 %vm6813_vm6, %v12804_v19  ;;  %v2468_v61 = vsel %vm2429_vm11, %v2413_v18, %v6077_v58  ;;  %v2469_v10 = vsel %vm2429_vm11, %v2414_v40, %v6078_v29 }
 0x231   : > { %v6086_v0 = vpop.permute.xlu1 %6085  ;;  %v2503_v59 = vpack.c.bf16 %v2469_v10, %v2468_v61  ;;  %v2418_v28 = vsel %vm2374_vm10, %v9878_v55, %v6048_v34  ;;  %v6058_v50 = vunpack.i.h.bf16 %v9990_v48  ;;  %v12855_v55 = vld [vmem:[#allocation87_spill] sm:$0xff]  ;;  %v5862_v6 = vunpack.i.l.bf16 %v12857_v51 }
 0x232   : > { %v10065_v32 = vsel %vm2429_vm11, %v2403_v3, %v6072_v49  ;;  %v10068_v57 = vsel %vm2429_vm11, %v2404_v23, %v6073_v27  ;;  %v6088_v5 = vunpack.i.h.bf16 %v6086_v0  ;;  %v6087_v24 = vunpack.i.l.bf16 %v6086_v0  ;;  %v12856_v27 = vld [vmem:[#allocation72_spill] sm:$0xff] }
 0x233   : > { %v6081_v1 = vpop.permute.xlu0 %6080  ;;  %v2498_v12 = vpack.c.bf16 %v10068_v57, %v10065_v32  ;;  %v2408_v48 = vsel %vm2374_vm10, %v12855_v55, %v5998_v63  ;;  %v6008_v49 = vunpack.i.h.bf16 %v12856_v27  ;;  %v6007_v54 = vunpack.i.l.bf16 %v12856_v27  ;;  %v12862_v55 = vld [vmem:[#allocation57_spill] sm:$0xff] }
 0x234   : > { %v2470_v3 = vsel %vm2429_vm11, %v2415_v47, %v6087_v24  ;;  %v2471_v60 = vsel %vm2429_vm11, %v2416_v37, %v6088_v5  ;;  %v6083_v23 = vunpack.i.h.bf16 %v6081_v1  ;;  %v6082_v31 = vunpack.i.l.bf16 %v6081_v1 }
 0x235   : > { %4918 = vmatmul.mubr.msk.bf16.gmra.mxu0 %vm2538_vm12, %v2491_v9  ;;  %v6096_v16 = vpop.permute.xlu1 %6095  ;;  %v2504_v39 = vpack.c.bf16 %v2471_v60, %v2470_v3  ;;  %v5863_v47 = vunpack.i.h.bf16 %v12857_v51  ;;  %v2419_v63 = vsel %vm2374_vm10, %v9864_v62, %v6057_v36  ;;  %v2420_v37 = vsel %vm2374_vm10, %v9868_v41, %v6058_v50 }
 0x236   : > { %v10086_v20 = vsel %vm2429_vm11, %v10011_v15, %v6082_v31  ;;  %v10090_v53 = vsel %vm2429_vm11, %v10015_v22, %v6083_v23  ;;  %v6098_v29 = vunpack.i.h.bf16 %v6096_v16  ;;  %v6097_v58 = vunpack.i.l.bf16 %v6096_v16  ;;  %4921 = vmatprep.mubr.msk.bf16.mxu0 %vm6813_vm6, %v12804_v19 }
 0x237   : > { %v6091_v11 = vpop.permute.xlu0 %6090  ;;  %4966 = vmatmul.mubr.msk.bf16.gmra.mxu1 %vm2538_vm12, %v2503_v59  ;;  %v2499_v15 = vpack.c.bf16 %v10090_v53, %v10086_v20 }
 0x238   : > { %v10102_v22 = vsel %vm2429_vm11, %v2417_v38, %v6097_v58  ;;  %v10105_v17 = vsel %vm2429_vm11, %v2418_v28, %v6098_v29  ;;  %v6093_v18 = vunpack.i.h.bf16 %v6091_v11  ;;  %v6092_v40 = vunpack.i.l.bf16 %v6091_v11  ;;  %4969 = vmatprep.mubr.msk.bf16.mxu1 %vm6813_vm6, %v12804_v19  ;;  %v12859_v38 = vld [vmem:[#allocation89_spill] sm:$0xff]  ;;  %v12860_v11 = vld [vmem:[#allocation79_spill] sm:$0xff] }
 0x239   : > { %v6106_v61 = vpop.permute.xlu1 %6105  ;;  %v2505_v10 = vpack.c.bf16 %v10105_v17, %v10102_v22  ;;  %v2410_v41 = vsel %vm2374_vm10, %v12859_v38, %v6008_v49  ;;  %v5868_v22 = vunpack.i.h.bf16 %v12860_v11  ;;  %v5867_v17 = vunpack.i.l.bf16 %v12860_v11 }
 0x23a   : > { %v10118_v0 = vsel %vm2429_vm11, %v2407_v4, %v6092_v40  ;;  %v10121_v9 = vsel %vm2429_vm11, %v2408_v48, %v6093_v18  ;;  %v6108_v5 = vunpack.i.h.bf16 %v6106_v61  ;;  %v6107_v24 = vunpack.i.l.bf16 %v6106_v61  ;;  %v12858_v4 = vld [vmem:[#allocation90_spill] sm:$0xff]  ;;  %v12861_v18 = vld [vmem:[#allocation212_spill] sm:$0xff] }
 0x23b   : > { %v6101_v34 = vpop.permute.xlu0 %6100  ;;  %v2500_v1 = vpack.c.bf16 %v10121_v9, %v10118_v0  ;;  %v2409_v62 = vsel %vm2374_vm10, %v12858_v4, %v6007_v54  ;;  %v2366_v40 = vsel %vm2319_vm9, %v12861_v18, %v5862_v6  ;;  %v2367_v48 = vsel %vm2319_vm9, %v12862_v55, %v5863_v47  ;;  %v12864_v6 = vld [vmem:[#allocation41_spill] sm:$0xff]  ;;  %v12865_v4 = vld [vmem:[#allocation114_spill] sm:$0xff] }
 0x23c   : > { %v10131_v3 = vsel %vm2429_vm11, %v2419_v63, %v6107_v24  ;;  %v10134_v60 = vsel %vm2429_vm11, %v2420_v37, %v6108_v5  ;;  %v6103_v23 = vunpack.i.h.bf16 %v6101_v34  ;;  %v6102_v31 = vunpack.i.l.bf16 %v6101_v34 }
 0x23d   : > { %4922 = vmatmul.mubr.msk.bf16.gmra.mxu0 %vm2538_vm12, %v2492_v25  ;;  %v6116_v16 = vpop.permute.xlu1 %6115  ;;  %v2506_v59 = vpack.c.bf16 %v10134_v60, %v10131_v3  ;;  %v2369_v47 = vsel %vm2319_vm9, %v12864_v6, %v5868_v22  ;;  %v5872_v38 = vunpack.i.l.bf16 %v12865_v4  ;;  %v12866_v22 = vld [vmem:[#allocation102_spill] sm:$0xff] }
 0x23e   : > { %v10148_v29 = vsel %vm2429_vm11, %v2409_v62, %v6102_v31  ;;  %v10151_v58 = vsel %vm2429_vm11, %v2410_v41, %v6103_v23  ;;  %4925 = vmatprep.mubr.msk.bf16.mxu0 %vm6813_vm6, %v12804_v19  ;;  %v6118_v50 = vunpack.i.h.bf16 %v6116_v16  ;;  %v6117_v36 = vunpack.i.l.bf16 %v6116_v16  ;;  %v12863_v23 = vld [vmem:[#allocation172_spill] sm:$0xff] }
 0x23f   : > { %v6111_v28 = vpop.permute.xlu0 %6110  ;;  %4970 = vmatmul.mubr.msk.bf16.gmra.mxu1 %vm2538_vm12, %v2504_v39  ;;  %v2501_v2 = vpack.c.bf16 %v10151_v58, %v10148_v29  ;;  %v2368_v31 = vsel %vm2319_vm9, %v12863_v23, %v5867_v17  ;;  %v5873_v62 = vunpack.i.h.bf16 %v12865_v4  ;;  %v5878_v17 = vunpack.i.h.bf16 %v12866_v22 }
 0x240   : > { %v6113_v46 = vunpack.i.h.bf16 %v6111_v28  ;;  %v6112_v25 = vunpack.i.l.bf16 %v6111_v28  ;;  %4973 = vmatprep.mubr.msk.bf16.mxu1 %vm6813_vm6, %v12804_v19  ;;  %v5877_v18 = vunpack.i.l.bf16 %v12866_v22 }
 0x241   : > { %v6126_v27 = vpop.permute.xlu1 %6125 }
 0x242   : > { %v2421_v39 = vsel %vm2374_vm10, %v2366_v40, %v6112_v25  ;;  %v2422_v49 = vsel %vm2374_vm10, %v2367_v48, %v6113_v46  ;;  %v6128_v24 = vunpack.i.h.bf16 %v6126_v27  ;;  %v6127_v51 = vunpack.i.l.bf16 %v6126_v27  ;;  %v12867_v40 = vld [vmem:[#allocation39_spill] sm:$0xff]  ;;  %v12868_v48 = vld [vmem:[#allocation169_spill] sm:$0xff] }
 0x243   : > { %v2476_v54 = vsel %vm2429_vm11, %v2421_v39, %v6117_v36  ;;  %v2477_v61 = vsel %vm2429_vm11, %v2422_v49, %v6118_v50  ;;  %v6121_v5 = vpop.permute.xlu0 %6120  ;;  %v2370_v55 = vsel %vm2319_vm9, %v12867_v40, %v5872_v38  ;;  %v2371_v27 = vsel %vm2319_vm9, %v12868_v48, %v5873_v62 }
 0x244   : > { %v6123_v63 = vunpack.i.h.bf16 %v6121_v5  ;;  %v6122_v37 = vunpack.i.l.bf16 %v6121_v5  ;;  %v2507_v34 = vpack.c.bf16 %v2477_v61, %v2476_v54 }
 0x245   : > { %4926 = vmatmul.mubr.msk.bf16.gmra.mxu0 %vm2538_vm12, %v2493_v42  ;;  %v6136_v41 = vpop.permute.xlu1 %6135 }
 0x246   : > { %v2423_v16 = vsel %vm2374_vm10, %v2368_v31, %v6122_v37  ;;  %v2424_v28 = vsel %vm2374_vm10, %v2369_v47, %v6123_v63  ;;  %4929 = vmatprep.mubr.msk.bf16.mxu0 %vm6813_vm6, %v12804_v19  ;;  %v6138_v25 = vunpack.i.h.bf16 %v6136_v41  ;;  %v6137_v11 = vunpack.i.l.bf16 %v6136_v41  ;;  %v12869_v31 = vld [vmem:[#allocation175_spill] sm:$0xff]  ;;  %v12870_v47 = vld [vmem:[#allocation42_spill] sm:$0xff] }
 0x247   : > { %v2478_v50 = vsel %vm2429_vm11, %v2423_v16, %v6127_v51  ;;  %v2479_v36 = vsel %vm2429_vm11, %v2424_v28, %v6128_v24  ;;  %v6131_v46 = vpop.permute.xlu0 %6130  ;;  %4974 = vmatmul.mubr.msk.bf16.gmra.mxu1 %vm2538_vm12, %v2505_v10  ;;  %v2372_v6 = vsel %vm2319_vm9, %v12869_v31, %v5877_v18  ;;  %v2373_v4 = vsel %vm2319_vm9, %v12870_v47, %v5878_v17 }
 0x248   : > { %v6133_v35 = vunpack.i.h.bf16 %v6131_v46  ;;  %v6132_v33 = vunpack.i.l.bf16 %v6131_v46  ;;  %4977 = vmatprep.mubr.msk.bf16.mxu1 %vm6813_vm6, %v12804_v19  ;;  %v2508_v42 = vpack.c.bf16 %v2479_v36, %v2478_v50 }
 0x249   : > { %v6146_v39 = vpop.permute.xlu1 %6145 }
 0x24a   : > { %v2425_v49 = vsel %vm2374_vm10, %v2370_v55, %v6132_v33  ;;  %v2426_v10 = vsel %vm2374_vm10, %v2371_v27, %v6133_v35  ;;  %v6148_v24 = vunpack.i.h.bf16 %v6146_v39  ;;  %v6147_v51 = vunpack.i.l.bf16 %v6146_v39 }
 0x24b   : > { %v2480_v54 = vsel %vm2429_vm11, %v2425_v49, %v6137_v11  ;;  %v2481_v61 = vsel %vm2429_vm11, %v2426_v10, %v6138_v25  ;;  %v6141_v5 = vpop.permute.xlu0 %6140 }
 0x24c   : > { %v6143_v63 = vunpack.i.h.bf16 %v6141_v5  ;;  %v6142_v37 = vunpack.i.l.bf16 %v6141_v5  ;;  %v2509_v23 = vpack.c.bf16 %v2481_v61, %v2480_v54 }
 0x24d   : > { %4930 = vmatmul.mubr.msk.bf16.gmra.mxu0 %vm2538_vm12, %v2494_v56  ;;  %v10238_v56 = vpack.i.bf16 %v3063_v45, %v3063_v45 }
 0x24e   : > { %v2427_v62 = vsel %vm2374_vm10, %v2372_v6, %v6142_v37  ;;  %v2428_v38 = vsel %vm2374_vm10, %v2373_v4, %v6143_v63  ;;  %4933 = vmatprep.mubr.msk.bf16.mxu0 %vm6813_vm6, %v12804_v19 }
 0x24f   : > { %v2482_v41 = vsel %vm2429_vm11, %v2427_v62, %v6147_v51  ;;  %v2483_v16 = vsel %vm2429_vm11, %v2428_v38, %v6148_v24  ;;  %4978 = vmatmul.mubr.msk.bf16.gmra.mxu1 %vm2538_vm12, %v2506_v59  ;;  %12871 = vst [vmem:[#allocation27_spill] sm:$0xff] %v10238_v56  ;;  %6150 = vrot.lane.b32.xlu0 %v10238_v56, %s6806_s25 }
 0x250   : > { %4981 = vmatprep.mubr.msk.bf16.mxu1 %vm6813_vm6, %v12804_v19  ;;  %v2510_v8 = vpack.c.bf16 %v2483_v16, %v2482_v41 }
 0x255   : > { %4934 = vmatmul.mubr.msk.bf16.gmra.mxu0 %vm2538_vm12, %v2495_v13 }
 0x256   : > { %4937 = vmatprep.mubr.msk.bf16.mxu0 %vm6813_vm6, %v12804_v19 }
 0x257   : > { %4982 = vmatmul.mubr.msk.bf16.gmra.mxu1 %vm2538_vm12, %v2507_v34 }
 0x258   : > { %4985 = vmatprep.mubr.msk.bf16.mxu1 %vm6813_vm6, %v12804_v19 }
 0x25d   : > { %4938 = vmatmul.mubr.msk.bf16.gmra.mxu0 %vm2538_vm12, %v2496_v52 }
 0x25e   : > { %4941 = vmatprep.mubr.msk.bf16.mxu0 %vm6813_vm6, %v12804_v19 }
 0x25f   : > { %4986 = vmatmul.mubr.msk.bf16.gmra.mxu1 %vm2538_vm12, %v2508_v42 }
 0x260   : > { %4989 = vmatprep.mubr.msk.bf16.mxu1 %vm6813_vm6, %v12804_v19 }
 0x265   : > { %4942 = vmatmul.mubr.msk.bf16.gmra.mxu0 %vm2538_vm12, %v2497_v21  ;;  %v2927_v21 = vlaneseq }
 0x266   : > { %4945 = vmatprep.mubr.msk.bf16.mxu0 %vm6813_vm6, %v12804_v19 }
 0x267   : > { %4990 = vmatmul.mubr.msk.bf16.gmra.mxu1 %vm2538_vm12, %v2509_v23 }
 0x268   : > { %4993 = vmatprep.mubr.msk.bf16.mxu1 %vm6813_vm6, %v12804_v19 }
 0x26d   : > { %4946 = vmatmul.mubr.msk.bf16.gmra.mxu0 %vm2538_vm12, %v2498_v12  ;;  %v10280_v12 = vshrl.u32 %v2927_v21, 7 }
 0x26e   : > { %4949 = vmatprep.mubr.msk.bf16.mxu0 %vm6813_vm6, %v12804_v19 }
 0x26f   : > { %4994 = vmatmul.mubr.msk.bf16.gmra.mxu1 %vm2538_vm12, %v2510_v8  ;;  %v10284_v0 = vadd.s32 16, %v10280_v12  ;;  %vm2931_vm13 = vcmp.ge.s32.totalorder %v10280_v12, 1 }
 0x271   : > { %vm2942_vm14 = vcmp.le.s32.totalorder %v10284_v0, 16 }
 0x275   : > { %4950 = vmatmul.mubr.msk.bf16.gmra.mxu0 %vm2538_vm12, %v2499_v15 }
 0x276   : > { %4953 = vmatprep.mubr.msk.bf16.mxu0 %vm6813_vm6, %v12804_v19 }
 0x27d   : > { %4954 = vmatmul.mubr.msk.bf16.gmra.mxu0 %vm2538_vm12, %v2500_v1 }
 0x27e   : > { %4957 = vmatprep.mubr.msk.bf16.mxu0 %vm6813_vm6, %v12804_v19 }
 0x285   : > { %4958 = vmatmul.mubr.msk.bf16.gmra.mxu0 %vm2538_vm12, %v2501_v2 }
 0x2bd   : > { %v2658_v44 = vpop.f32.mrf.mxu0 }
 0x2bf   : > { %v4891_v43 = vpop.f32.mrf.mxu0 }
 0x2c1   : > { %v2661_v13 = vpop.f32.mrf.mxu0 }
 0x2c3   : > { %v4892_v14 = vpop.f32.mrf.mxu0 }
 0x2c5   : > { %v2666_v26 = vpop.f32.mrf.mxu0 }
 0x2c7   : > { %v4895_v52 = vpop.f32.mrf.mxu0 }
 0x2c9   : > { %v2669_v30 = vpop.f32.mrf.mxu0 }
 0x2ca   : > { %v2670_v57 = vadd.f32 %v10277_v7, %v2669_v30 }
 0x2cb   : > { %v4896_v32 = vpop.f32.mrf.mxu0 }
 0x2cc   : > { %v2876_v9 = vmax.f32 %v2670_v57, 0.0 }
 0x2cd   : > { %v2674_v20 = vpop.f32.mrf.mxu0 }
 0x2ce   : > { %v2675_v53 = vadd.f32 %v10277_v7, %v2674_v20  ;;  %v10293_v29 = vsel %vm2931_vm13, %v2876_v9, 0.0 }
 0x2cf   : > { %v4899_v15 = vpop.f32.mrf.mxu0  ;;  %v3068_v36 = vrot.slane %v10293_v29, 1  ;;  %v3148_v35 = vrot.slane %v10293_v29, 2 }
 0x2d0   : > { %v10287_v1 = vmax.f32 %v2675_v53, 0.0 }
 0x2d1   : > { %v2677_v3 = vpop.f32.mrf.mxu0 }
 0x2d2   : > { %v2678_v60 = vadd.f32 %v10277_v7, %v2677_v3  ;;  %v3069_v2 = vrot.slane %v10287_v1, 1  ;;  %v3149_v28 = vrot.slane %v10287_v1, 2 }
 0x2d3   : > { %v4900_v59 = vpop.f32.mrf.mxu0 }
 0x2d4   : > { %v2878_v58 = vmax.f32 %v2678_v60, 0.0  ;;  %v3070_v22 = vsel %vm458_vm0, %v3068_v36, %v3069_v2  ;;  %v3150_v48 = vsel %vm585_vm1, %v3148_v35, %v3149_v28 }
 0x2d5   : > { %v2682_v34 = vpop.f32.mrf.mxu0 }
 0x2d6   : > { %v2966_v50 = vsel %vm2942_vm14, %v2878_v58, 0.0  ;;  %v2683_v33 = vadd.f32 %v10277_v7, %v2682_v34 }
 0x2d7   : > { %v3071_v46 = vrot.slane %v2966_v50, 1  ;;  %v3151_v25 = vrot.slane %v2966_v50, 2  ;;  %v4903_v11 = vpop.f32.mrf.mxu0 }
 0x2d8   : > { %v2879_v49 = vmax.f32 %v2683_v33, 0.0 }
 0x2d9   : > { %v2685_v42 = vpop.f32.mrf.mxu0  ;;  %v3072_v17 = vsel %vm458_vm0, %v3069_v2, %v3071_v46  ;;  %v3152_v18 = vsel %vm585_vm1, %v3149_v28, %v3151_v25 }
 0x2da   : > { %v2686_v40 = vadd.f32 %v10277_v7, %v2685_v42  ;;  %v10306_v55 = vpack.i.bf16 %v3072_v17, %v3070_v22  ;;  %v10309_v39 = vpack.i.bf16 %v3152_v18, %v3150_v48  ;;  %v10318_v24 = vsel %vm2931_vm13, %v2879_v49, 0.0 }
 0x2db   : > { %v4904_v27 = vpop.f32.mrf.mxu0  ;;  %v3073_v6 = vrot.slane %v10318_v24, 1  ;;  %v3153_v38 = vrot.slane %v10318_v24, 2 }
 0x2dc   : > { %12872 = vst [vmem:[#allocation104_spill] sm:$0xff] %v10306_v55  ;;  %6155 = vrot.lane.b32.xlu1 %v10306_v55, %s6806_s25  ;;  %v10313_v10 = vmax.f32 %v2686_v40, 0.0 }
 0x2dd   : > { %v2690_v54 = vpop.f32.mrf.mxu0 }
 0x2de   : > { %v2691_v61 = vadd.f32 %v10277_v7, %v2690_v54  ;;  %v3074_v63 = vrot.slane %v10313_v10, 1  ;;  %v3154_v31 = vrot.slane %v10313_v10, 2 }
 0x2df   : > { %v4907_v5 = vpop.f32.mrf.mxu0 }
 0x2e0   : > { %v2881_v51 = vmax.f32 %v2691_v61, 0.0  ;;  %v3075_v44 = vsel %vm458_vm0, %v3073_v6, %v3074_v63  ;;  %v3155_v14 = vsel %vm585_vm1, %v3153_v38, %v3154_v31 }
 0x2e1   : > { %v2693_v37 = vpop.f32.mrf.mxu0 }
 0x2e2   : > { %v2969_v23 = vsel %vm2942_vm14, %v2881_v51, 0.0  ;;  %v2694_v41 = vadd.f32 %v10277_v7, %v2693_v37 }
 0x2e3   : > { %v3076_v47 = vrot.slane %v2969_v23, 1  ;;  %v3156_v4 = vrot.slane %v2969_v23, 2  ;;  %v4908_v62 = vpop.f32.mrf.mxu0 }
 0x2e4   : > { %v2882_v30 = vmax.f32 %v2694_v41, 0.0 }
 0x2e5   : > { %v3077_v16 = vsel %vm458_vm0, %v3074_v63, %v3076_v47  ;;  %v3157_v8 = vsel %vm585_vm1, %v3154_v31, %v3156_v4  ;;  %v2698_v45 = vpop.f32.mrf.mxu0 }
 0x2e6   : > { %v2699_v43 = vadd.f32 %v10277_v7, %v2698_v45  ;;  %v10331_v13 = vpack.i.bf16 %v3077_v16, %v3075_v44  ;;  %v10334_v52 = vpack.i.bf16 %v3157_v8, %v3155_v14  ;;  %v10343_v53 = vsel %vm2931_vm13, %v2882_v30, 0.0 }
 0x2e7   : > { %v4911_v26 = vpop.f32.mrf.mxu0  ;;  %v3078_v59 = vrot.slane %v10343_v53, 1  ;;  %v3158_v46 = vrot.slane %v10343_v53, 2 }
 0x2e8   : > { %12873 = vst [vmem:[#allocation31_spill] sm:$0xff] %v10331_v13  ;;  %6160 = vrot.lane.b32.xlu0 %v10331_v13, %s6806_s25  ;;  %v10338_v21 = vmax.f32 %v2699_v43, 0.0 }
 0x2e9   : > { %v2701_v32 = vpop.f32.mrf.mxu0 }
 0x2ea   : > { %v2702_v57 = vadd.f32 %v10277_v7, %v2701_v32  ;;  %v3079_v9 = vrot.slane %v10338_v21, 1  ;;  %v3159_v2 = vrot.slane %v10338_v21, 2 }
 0x2eb   : > { %v4912_v20 = vpop.f32.mrf.mxu0 }
 0x2ec   : > { %v2884_v15 = vmax.f32 %v2702_v57, 0.0  ;;  %v3080_v42 = vsel %vm458_vm0, %v3078_v59, %v3079_v9  ;;  %v3160_v48 = vsel %vm585_vm1, %v3158_v46, %v3159_v2 }
 0x2ed   : > { %v2706_v3 = vpop.f32.mrf.mxu0 }
 0x2ee   : > { %v2972_v60 = vsel %vm2942_vm14, %v2884_v15, 0.0  ;;  %v2707_v36 = vadd.f32 %v10277_v7, %v2706_v3 }
 0x2ef   : > { %v3081_v58 = vrot.slane %v2972_v60, 1  ;;  %v3161_v34 = vrot.slane %v2972_v60, 2  ;;  %v4915_v28 = vpop.f32.mrf.mxu0  ;;  %v2802_v50 = vpop.f32.mrf.mxu1 }
 0x2f0   : > { %v2885_v27 = vmax.f32 %v2707_v36, 0.0  ;;  %v2803_v47 = vadd.f32 %v10277_v7, %v2802_v50 }
 0x2f1   : > { %v3082_v25 = vsel %vm458_vm0, %v3079_v9, %v3081_v58  ;;  %v3162_v11 = vsel %vm585_vm1, %v3159_v2, %v3161_v34  ;;  %v2709_v35 = vpop.f32.mrf.mxu0  ;;  %v4963_v33 = vpop.f32.mrf.mxu1 }
 0x2f2   : > { %v2710_v22 = vadd.f32 %v10277_v7, %v2709_v35  ;;  %v10356_v17 = vpack.i.bf16 %v3082_v25, %v3080_v42  ;;  %v10361_v49 = vpack.i.bf16 %v3162_v11, %v3160_v48  ;;  %v10368_v23 = vsel %vm2931_vm13, %v2885_v27, 0.0 }
 0x2f3   : > { %v4916_v18 = vpop.f32.mrf.mxu0  ;;  %v2805_v40 = vpop.f32.mrf.mxu1  ;;  %v3083_v8 = vrot.slane %v10368_v23, 1  ;;  %v2909_v32 = vmax.f32 %v2803_v47, 0.0  ;;  %v3163_v50 = vrot.slane %v10368_v23, 2 }
 0x2f4   : > { %12874 = vst [vmem:[#allocation32_spill] sm:$0xff] %v10356_v17  ;;  %6165 = vrot.lane.b32.xlu1 %v10356_v17, %s6806_s25  ;;  %v10363_v54 = vmax.f32 %v2710_v22, 0.0  ;;  %v2806_v44 = vadd.f32 %v10277_v7, %v2805_v40 }
 0x2f5   : > { %v2714_v61 = vpop.f32.mrf.mxu0  ;;  %v4964_v5 = vpop.f32.mrf.mxu1  ;;  %v10394_v25 = vsel %vm2931_vm13, %v2909_v32, 0.0 }
 0x2f6   : > { %v2715_v51 = vadd.f32 %v10277_v7, %v2714_v61  ;;  %v3084_v4 = vrot.slane %v10363_v54, 1  ;;  %v3164_v3 = vrot.slane %v10363_v54, 2  ;;  %v10386_v2 = vmax.f32 %v2806_v44, 0.0  ;;  %12877 = vst [vmem:[#allocation22_spill] sm:$0xff] %v10394_v25 }
 0x2f7   : > { %v4919_v63 = vpop.f32.mrf.mxu0  ;;  %v2810_v37 = vpop.f32.mrf.mxu1  ;;  %v3123_v5 = vrot.slane %v10394_v25, 1 }
 0x2f8   : > { %v2887_v31 = vmax.f32 %v2715_v51, 0.0  ;;  %v2811_v6 = vadd.f32 %v10277_v7, %v2810_v37  ;;  %v3085_v9 = vsel %vm458_vm0, %v3083_v8, %v3084_v4  ;;  %12876 = vst [vmem:[#allocation118_spill] sm:$0xff] %v10386_v2  ;;  %v3165_v18 = vsel %vm585_vm1, %v3163_v50, %v3164_v3 }
 0x2f9   : > { %v2717_v62 = vpop.f32.mrf.mxu0  ;;  %v4967_v38 = vpop.f32.mrf.mxu1  ;;  %v3124_v40 = vrot.slane %v10386_v2, 1  ;;  %v3143_v37 = vrot.slane %v12804_v19, 2 }
 0x2fa   : > { %v2975_v41 = vsel %vm2942_vm14, %v2887_v31, 0.0  ;;  %v2911_v16 = vmax.f32 %v2811_v6, 0.0  ;;  %v2718_v30 = vadd.f32 %v10277_v7, %v2717_v62  ;;  %v3203_v38 = vrot.slane %v10394_v25, 2 }
 0x2fb   : > { %v3086_v45 = vrot.slane %v2975_v41, 1  ;;  %v4920_v43 = vpop.f32.mrf.mxu0  ;;  %v2813_v14 = vpop.f32.mrf.mxu1  ;;  %v3166_v26 = vrot.slane %v2975_v41, 2  ;;  %v3204_v41 = vrot.slane %v10386_v2, 2 }
 0x2fc   : > { %v2999_v60 = vsel %vm2942_vm14, %v2911_v16, 0.0  ;;  %v2888_v46 = vmax.f32 %v2718_v30, 0.0  ;;  %v2814_v6 = vadd.f32 %v10277_v7, %v2813_v14  ;;  %v3125_v14 = vsel %vm458_vm0, %v3123_v5, %v3124_v40 }
 0x2fd   : > { %v3087_v57 = vsel %vm458_vm0, %v3084_v4, %v3086_v45  ;;  %v2722_v20 = vpop.f32.mrf.mxu0  ;;  %v4968_v15 = vpop.f32.mrf.mxu1  ;;  %v3167_v36 = vsel %vm585_vm1, %v3164_v3, %v3166_v26  ;;  %v3126_v11 = vrot.slane %v2999_v60, 1  ;;  %v3206_v30 = vrot.slane %v2999_v60, 2 }
 0x2fe   : > { %v2723_v59 = vadd.f32 %v10277_v7, %v2722_v20  ;;  %v10384_v58 = vpack.i.bf16 %v3087_v57, %v3085_v9  ;;  %v10401_v61 = vpack.i.bf16 %v3167_v36, %v3165_v18  ;;  %v10406_v51 = vsel %vm2931_vm13, %v2888_v46, 0.0 }
 0x2ff   : > { %v4923_v34 = vpop.f32.mrf.mxu0  ;;  %v2818_v28 = vpop.f32.mrf.mxu1  ;;  %v3127_v31 = vsel %vm458_vm0, %v3124_v40, %v3126_v11  ;;  %v3088_v45 = vrot.slane %v10406_v51, 1  ;;  %v2912_v15 = vmax.f32 %v2814_v6, 0.0  ;;  %v3205_v18 = vsel %vm585_vm1, %v3203_v38, %v3204_v41 }
 0x300   : > { %12875 = vst [vmem:[#allocation129_spill] sm:$0xff] %v10384_v58  ;;  %6170 = vrot.lane.b32.xlu0 %v10384_v58, %s6806_s25  ;;  %v10396_v35 = vmax.f32 %v2723_v59, 0.0  ;;  %v10420_v20 = vpack.i.bf16 %v3127_v31, %v3125_v14  ;;  %v2819_v3 = vadd.f32 %v10277_v7, %v2818_v28  ;;  %v3168_v40 = vrot.slane %v10406_v51, 2 }
 0x301   : > { %v2725_v33 = vpop.f32.mrf.mxu0  ;;  %v4971_v42 = vpop.f32.mrf.mxu1  ;;  %v3207_v28 = vsel %vm585_vm1, %v3204_v41, %v3206_v30  ;;  %v10439_v5 = vsel %vm2931_vm13, %v2912_v15, 0.0 }
 0x302   : > { %v2726_v22 = vadd.f32 %v10277_v7, %v2725_v33  ;;  %v3089_v47 = vrot.slane %v10396_v35, 1  ;;  %12878 = vst [vmem:[#allocation36_spill] sm:$0xff] %v10420_v20  ;;  %v3169_v36 = vrot.slane %v10396_v35, 2  ;;  %12880 = vst [vmem:[#allocation44_spill] sm:$0xff] %v10439_v5 }
 0x303   : > { %v4924_v48 = vpop.f32.mrf.mxu0  ;;  %v2821_v27 = vpop.f32.mrf.mxu1 }
 0x304   : > { %v2890_v63 = vmax.f32 %v2726_v22, 0.0  ;;  %v2822_v8 = vadd.f32 %v10277_v7, %v2821_v27  ;;  %v3090_v50 = vsel %vm458_vm0, %v3088_v45, %v3089_v47  ;;  %v10429_v22 = vpack.i.bf16 %v3143_v37, %v3143_v37 }
 0x305   : > { %v2730_v4 = vpop.f32.mrf.mxu0  ;;  %v4972_v62 = vpop.f32.mrf.mxu1  ;;  %v3170_v38 = vsel %vm585_vm1, %v3168_v40, %v3169_v36 }
 0x306   : > { %v2978_v16 = vsel %vm2942_vm14, %v2890_v63, 0.0  ;;  %v2731_v57 = vadd.f32 %v10277_v7, %v2730_v4  ;;  %v2914_v46 = vmax.f32 %v2822_v8, 0.0  ;;  %v10441_v63 = vmax.f32 %v2819_v3, 0.0 }
 0x307   : > { %v3091_v44 = vrot.slane %v2978_v16, 1  ;;  %v4927_v43 = vpop.f32.mrf.mxu0  ;;  %v2826_v26 = vpop.f32.mrf.mxu1  ;;  %v3171_v32 = vrot.slane %v2978_v16, 2  ;;  %v3208_v3 = vrot.slane %v10439_v5, 2 }
 0x308   : > { %v2891_v27 = vmax.f32 %v2731_v57, 0.0  ;;  %12881 = vst [vmem:[#allocation34_spill] sm:$0xff] %v10441_v63  ;;  %v2827_v4 = vadd.f32 %v10277_v7, %v2826_v26  ;;  %v3129_v26 = vrot.slane %v10441_v63, 1 }
 0x309   : > { %v3092_v9 = vsel %vm458_vm0, %v3089_v47, %v3091_v44  ;;  %v2733_v59 = vpop.f32.mrf.mxu0  ;;  %v4975_v34 = vpop.f32.mrf.mxu1  ;;  %v3172_v48 = vsel %vm585_vm1, %v3169_v36, %v3171_v32  ;;  %v3002_v47 = vsel %vm2942_vm14, %v2914_v46, 0.0  ;;  %v3128_v44 = vrot.slane %v10439_v5, 1 }
 0x30a   : > { %v2734_v11 = vadd.f32 %v10277_v7, %v2733_v59  ;;  %v10427_v60 = vpack.i.bf16 %v3092_v9, %v3090_v50  ;;  %v10451_v45 = vpack.i.bf16 %v3172_v48, %v3170_v38  ;;  %v10456_v43 = vsel %vm2931_vm13, %v2891_v27, 0.0 }
 0x30b   : > { %v4928_v33 = vpop.f32.mrf.mxu0  ;;  %v2829_v42 = vpop.f32.mrf.mxu1  ;;  %12883 = vst [vmem:[#allocation56_spill] sm:$0xff] %v10456_v43  ;;  %v3209_v32 = vrot.slane %v10441_v63, 2  ;;  %v3131_v59 = vrot.slane %v3002_v47, 1  ;;  %v2915_v34 = vmax.f32 %v2827_v4, 0.0  ;;  %v3093_v36 = vrot.slane %v10456_v43, 1 }
 0x30c   : > { %12879 = vst [vmem:[#allocation43_spill] sm:$0xff] %v10427_v60  ;;  %6175 = vrot.lane.b32.xlu1 %v10427_v60, %s6806_s25  ;;  %v10443_v37 = vmax.f32 %v2734_v11, 0.0  ;;  %v2830_v41 = vadd.f32 %v10277_v7, %v2829_v42  ;;  %v3211_v46 = vrot.slane %v3002_v47, 2 }
 0x30d   : > { %v2738_v31 = vpop.f32.mrf.mxu0  ;;  %v4976_v6 = vpop.f32.mrf.mxu1  ;;  %v10475_v47 = vsel %vm585_vm1, %v3208_v3, %v3209_v32 }
 0x30e   : > { %12882 = vst [vmem:[#allocation47_spill] sm:$0xff] %v10443_v37  ;;  %v2739_v62 = vadd.f32 %v10277_v7, %v2738_v31  ;;  %v3094_v57 = vrot.slane %v10443_v37, 1  ;;  %v10466_v33 = vmax.f32 %v2830_v41, 0.0  ;;  %v10469_v6 = vpack.i.bf16 %v3207_v28, %v3205_v18 }
 0x30f   : > { %v4931_v16 = vpop.f32.mrf.mxu0  ;;  %v2834_v8 = vpop.f32.mrf.mxu1  ;;  %v10479_v41 = vsel %vm2931_vm13, %v2915_v34, 0.0 }
 0x310   : > { %v2893_v14 = vmax.f32 %v2739_v62, 0.0  ;;  %v2835_v30 = vadd.f32 %v10277_v7, %v2834_v8  ;;  %12884 = vst [vmem:[#allocation49_spill] sm:$0xff] %v10466_v33  ;;  %v3095_v16 = vsel %vm458_vm0, %v3093_v36, %v3094_v57  ;;  %v3130_v8 = vsel %vm458_vm0, %v3128_v44, %v3129_v26  ;;  %12885 = vst [vmem:[#allocation58_spill] sm:$0xff] %v10479_v41 }
 0x311   : > { %v2741_v15 = vpop.f32.mrf.mxu0  ;;  %v4979_v9 = vpop.f32.mrf.mxu1  ;;  %v3134_v44 = vrot.slane %v10466_v33, 1 }
 0x312   : > { %v2981_v50 = vsel %vm2942_vm14, %v2893_v14, 0.0  ;;  %v2742_v27 = vadd.f32 %v10277_v7, %v2741_v15  ;;  %v2917_v31 = vmax.f32 %v2835_v30, 0.0  ;;  %v3174_v14 = vrot.slane %v10443_v37, 2 }
 0x313   : > { %v3096_v11 = vrot.slane %v2981_v50, 1  ;;  %v4932_v42 = vpop.f32.mrf.mxu0  ;;  %v2837_v40 = vpop.f32.mrf.mxu1  ;;  %v3176_v48 = vrot.slane %v2981_v50, 2  ;;  %v3173_v30 = vrot.slane %v10456_v43, 2  ;;  %v3132_v15 = vsel %vm458_vm0, %v3129_v26, %v3131_v59 }
 0x314   : > { %v2894_v50 = vmax.f32 %v2742_v27, 0.0  ;;  %v3005_v36 = vsel %vm2942_vm14, %v2917_v31, 0.0  ;;  %v3133_v26 = vrot.slane %v10479_v41, 1  ;;  %v10504_v31 = vpack.i.bf16 %v3132_v15, %v3130_v8 }
 0x315   : > { %v3097_v62 = vsel %vm458_vm0, %v3094_v57, %v3096_v11  ;;  %v2746_v4 = vpop.f32.mrf.mxu0  ;;  %v4980_v38 = vpop.f32.mrf.mxu1  ;;  %v10488_v57 = vsel %vm585_vm1, %v3209_v32, %v3211_v46  ;;  %v3177_v34 = vsel %vm585_vm1, %v3174_v14, %v3176_v48  ;;  %v2838_v11 = vadd.f32 %v10277_v7, %v2837_v40 }
 0x316   : > { %v2747_v18 = vadd.f32 %v10277_v7, %v2746_v4  ;;  %v10483_v28 = vpack.i.bf16 %v3097_v62, %v3095_v16  ;;  %v3214_v32 = vrot.slane %v10466_v33, 2  ;;  %v3213_v48 = vrot.slane %v10479_v41, 2  ;;  %12888 = vst [vmem:[#allocation63_spill] sm:$0xff] %v10504_v31 }
 0x317   : > { %v4935_v9 = vpop.f32.mrf.mxu0  ;;  %v2842_v3 = vpop.f32.mrf.mxu1  ;;  %v3175_v40 = vsel %vm585_vm1, %v3173_v30, %v3174_v14  ;;  %v3136_v4 = vrot.slane %v3005_v36, 1 }
 0x318   : > { %12886 = vst [vmem:[#allocation60_spill] sm:$0xff] %v10483_v28  ;;  %6180 = vrot.lane.b32.xlu0 %v10483_v28, %s6806_s25  ;;  %v10499_v59 = vmax.f32 %v2747_v18, 0.0  ;;  %v2843_v42 = vadd.f32 %v10277_v7, %v2842_v3  ;;  %v3135_v9 = vsel %vm458_vm0, %v3133_v26, %v3134_v44  ;;  %v10508_v56 = vpack.i.bf16 %v3177_v34, %v3175_v40 }
 0x319   : > { %v2749_v46 = vpop.f32.mrf.mxu0  ;;  %v4983_v62 = vpop.f32.mrf.mxu1  ;;  %v10512_v18 = vsel %vm2931_vm13, %v2894_v50, 0.0  ;;  %v2918_v3 = vmax.f32 %v2838_v11, 0.0  ;;  %v3216_v26 = vrot.slane %v3005_v36, 2 }
 0x31a   : > { %12887 = vst [vmem:[#allocation62_spill] sm:$0xff] %v10499_v59  ;;  %v2750_v27 = vadd.f32 %v10277_v7, %v2749_v46  ;;  %12889 = vst [vmem:[#allocation50_spill] sm:$0xff] %v10512_v18  ;;  %v3099_v8 = vrot.slane %v10499_v59, 1  ;;  %v10516_v15 = vmax.f32 %v2843_v42, 0.0  ;;  %v10519_v46 = vsel %vm585_vm1, %v3213_v48, %v3214_v32 }
 0x31b   : > { %v4936_v38 = vpop.f32.mrf.mxu0  ;;  %v2845_v16 = vpop.f32.mrf.mxu1  ;;  %v3098_v11 = vrot.slane %v10512_v18, 1  ;;  %v3179_v48 = vrot.slane %v10499_v59, 2 }
 0x31c   : > { %v2896_v62 = vmax.f32 %v2750_v27, 0.0  ;;  %v2846_v19 = vadd.f32 %v10277_v7, %v2845_v16  ;;  %12890 = vst [vmem:[#allocation66_spill] sm:$0xff] %v10516_v15  ;;  %v3137_v27 = vsel %vm458_vm0, %v3134_v44, %v3136_v4 }
 0x31d   : > { %v2754_v14 = vpop.f32.mrf.mxu0  ;;  %v4984_v30 = vpop.f32.mrf.mxu1  ;;  %v3100_v4 = vsel %vm458_vm0, %v3098_v11, %v3099_v8  ;;  %v10556_v13 = vpack.i.bf16 %v3137_v27, %v3135_v9 }
 0x31e   : > { %v2984_v34 = vsel %vm2942_vm14, %v2896_v62, 0.0  ;;  %v2755_v50 = vadd.f32 %v10277_v7, %v2754_v14  ;;  %v2920_v40 = vmax.f32 %v2846_v19, 0.0  ;;  %v10528_v30 = vsel %vm2931_vm13, %v2918_v3, 0.0 }
 0x31f   : > { %v3101_v38 = vrot.slane %v2984_v34, 1  ;;  %v4939_v16 = vpop.f32.mrf.mxu0  ;;  %v2850_v42 = vpop.f32.mrf.mxu1  ;;  %12891 = vst [vmem:[#allocation73_spill] sm:$0xff] %v10528_v30  ;;  %v3181_v36 = vrot.slane %v2984_v34, 2  ;;  %v3139_v14 = vrot.slane %v10516_v15, 1  ;;  %v3178_v34 = vrot.slane %v10512_v18, 2 }
 0x320   : > { %v2897_v28 = vmax.f32 %v2755_v50, 0.0  ;;  %v3008_v19 = vsel %vm2942_vm14, %v2920_v40, 0.0  ;;  %v3219_v16 = vrot.slane %v10516_v15, 2  ;;  %v2851_v58 = vadd.f32 %v10277_v7, %v2850_v42 }
 0x321   : > { %v3102_v62 = vsel %vm458_vm0, %v3099_v8, %v3101_v38  ;;  %v2757_v60 = vpop.f32.mrf.mxu0  ;;  %v4987_v44 = vpop.f32.mrf.mxu1  ;;  %v10543_v50 = vsel %vm585_vm1, %v3214_v32, %v3216_v26  ;;  %v3138_v40 = vrot.slane %v10528_v30, 1  ;;  %v3141_v42 = vrot.slane %v3008_v19, 1 }
 0x322   : > { %v2758_v3 = vadd.f32 %v10277_v7, %v2757_v60  ;;  %v10539_v17 = vpack.i.bf16 %v3102_v62, %v3100_v4  ;;  %v10548_v38 = vsel %vm2931_vm13, %v2897_v28, 0.0  ;;  %v3218_v44 = vrot.slane %v10528_v30, 2 }
 0x323   : > { %12893 = vst [vmem:[#allocation65_spill] sm:$0xff] %v10548_v38  ;;  %v4940_v8 = vpop.f32.mrf.mxu0  ;;  %v2853_v11 = vpop.f32.mrf.mxu1  ;;  %v3182_v60 = vsel %vm585_vm1, %v3179_v48, %v3181_v36  ;;  %v3221_v62 = vrot.slane %v3008_v19, 2  ;;  %v3140_v28 = vsel %vm458_vm0, %v3138_v40, %v3139_v14  ;;  %v3103_v55 = vrot.slane %v10548_v38, 1 }
 0x324   : > { %12892 = vst [vmem:[#allocation77_spill] sm:$0xff] %v10539_v17  ;;  %6185 = vrot.lane.b32.xlu1 %v10539_v17, %s6806_s25  ;;  %v10554_v4 = vmax.f32 %v2758_v3, 0.0  ;;  %v3180_v8 = vsel %vm585_vm1, %v3178_v34, %v3179_v48  ;;  %v2921_v15 = vmax.f32 %v2851_v58, 0.0  ;;  %v3220_v19 = vsel %vm585_vm1, %v3218_v44, %v3219_v16 }
 0x325   : > { %v2762_v32 = vpop.f32.mrf.mxu0  ;;  %v4988_v26 = vpop.f32.mrf.mxu1  ;;  %v3183_v30 = vrot.slane %v10548_v38, 2  ;;  %v10564_v33 = vpack.i.bf16 %v3182_v60, %v3180_v8  ;;  %v3142_v9 = vsel %vm458_vm0, %v3139_v14, %v3141_v42  ;;  %v3222_v27 = vsel %vm585_vm1, %v3219_v16, %v3221_v62 }
 0x326   : > { %12894 = vst [vmem:[#allocation80_spill] sm:$0xff] %v10554_v4  ;;  %v2763_v36 = vadd.f32 %v10277_v7, %v2762_v32  ;;  %v3104_v48 = vrot.slane %v10554_v4, 1  ;;  %v3184_v34 = vrot.slane %v10554_v4, 2  ;;  %v2854_v44 = vadd.f32 %v10277_v7, %v2853_v11 }
 0x327   : > { %v4943_v17 = vpop.f32.mrf.mxu0  ;;  %v2858_v3 = vpop.f32.mrf.mxu1 }
 0x328   : > { %v2899_v40 = vmax.f32 %v2763_v36, 0.0  ;;  %6200 = vrot.lane.b32.xlu1 %v10504_v31, %s6806_s25  ;;  %v2859_v58 = vadd.f32 %v10277_v7, %v2858_v3  ;;  %v3009_v36 = vsel %vm2931_vm13, %v2921_v15, 0.0  ;;  %v10581_v31 = vpack.i.bf16 %v10488_v57, %v10475_v47 }
 0x329   : > { %v2765_v17 = vpop.f32.mrf.mxu0  ;;  %v4991_v32 = vpop.f32.mrf.mxu1  ;;  %v3226_v47 = vrot.slane %v3009_v36, 1 }
 0x32a   : > { %v2987_v60 = vsel %vm2942_vm14, %v2899_v40, 0.0  ;;  %v2766_v14 = vadd.f32 %v10277_v7, %v2765_v17  ;;  %v2923_v16 = vmax.f32 %v2859_v58, 0.0  ;;  %v2922_v40 = vmax.f32 %v2854_v44, 0.0 }
 0x32b   : > { %v3106_v42 = vrot.slane %v2987_v60, 1  ;;  %v3186_v62 = vrot.slane %v2987_v60, 2  ;;  %v4944_v26 = vpop.f32.mrf.mxu0  ;;  %v2861_v8 = vpop.f32.mrf.mxu1  ;;  %v3105_v58 = vsel %vm458_vm0, %v3103_v55, %v3104_v48 }
 0x32c   : > { %v2900_v3 = vmax.f32 %v2766_v14, 0.0  ;;  %v3011_v60 = vsel %vm2942_vm14, %v2923_v16, 0.0  ;;  %v3185_v14 = vsel %vm585_vm1, %v3183_v30, %v3184_v34  ;;  %v3227_v55 = vrot.slane %v2922_v40, 1 }
 0x32d   : > { %v3107_v11 = vsel %vm458_vm0, %v3104_v48, %v3106_v42  ;;  %v3187_v32 = vsel %vm585_vm1, %v3184_v34, %v3186_v62  ;;  %v2770_v41 = vpop.f32.mrf.mxu0  ;;  %v4992_v17 = vpop.f32.mrf.mxu1  ;;  %v10604_v30 = vpack.i.bf16 %v10543_v50, %v10519_v46  ;;  %v3231_v34 = vrot.slane %v3009_v36, 2 }
 0x32e   : > { %v2771_v26 = vadd.f32 %v10277_v7, %v2770_v41  ;;  %v10589_v15 = vpack.i.bf16 %v3107_v11, %v3105_v58  ;;  %v10594_v57 = vsel %vm2931_vm13, %v2900_v3, 0.0  ;;  %v10596_v62 = vpack.i.bf16 %v3187_v32, %v3185_v14 }
 0x32f   : > { %12896 = vst [vmem:[#allocation95_spill] sm:$0xff] %v10594_v57  ;;  %v4947_v42 = vpop.f32.mrf.mxu0  ;;  %v2866_v44 = vpop.f32.mrf.mxu1  ;;  %v3229_v41 = vrot.slane %v3011_v60, 1  ;;  %v3232_v3 = vrot.slane %v2922_v40, 2  ;;  %v3234_v11 = vrot.slane %v3011_v60, 2  ;;  %v3108_v32 = vrot.slane %v10594_v57, 1 }
 0x330   : > { %12895 = vst [vmem:[#allocation94_spill] sm:$0xff] %v10589_v15  ;;  %v10598_v8 = vmax.f32 %v2771_v26, 0.0  ;;  %6190 = vrot.lane.b32.xlu0 %v10589_v15, %s6806_s25  ;;  %v10608_v14 = vpack.i.bf16 %v3142_v9, %v3140_v28  ;;  %v3188_v42 = vrot.slane %v10594_v57, 2  ;;  %v10614_v46 = vpack.i.bf16 %v3222_v27, %v3220_v19 }
 0x331   : > { %v2773_v48 = vpop.f32.mrf.mxu0  ;;  %v4995_v16 = vpop.f32.mrf.mxu1  ;;  %v10616_v15 = vpack.i.bf16 %v2922_v40, %v3009_v36  ;;  %v3233_v19 = vsel %vm585_vm1, %v3231_v34, %v3232_v3  ;;  %v3235_v27 = vsel %vm585_vm1, %v3232_v3, %v3234_v11 }
 0x332   : > { %12897 = vst [vmem:[#allocation205_spill] sm:$0xff] %v10598_v8  ;;  %v2774_v17 = vadd.f32 %v10277_v7, %v2773_v48  ;;  %v3109_v16 = vrot.slane %v10598_v8, 1  ;;  %v3228_v48 = vsel %vm458_vm0, %v3226_v47, %v3227_v55  ;;  %v3189_v9 = vrot.slane %v10598_v8, 2 }
 0x333   : > { %v4948_v58 = vpop.f32.mrf.mxu0  ;;  %v2869_v26 = vpop.f32.mrf.mxu1  ;;  %v10630_v40 = vpack.i.bf16 %v3235_v27, %v3233_v19 }
 0x334   : > { %v2902_v44 = vmax.f32 %v2774_v17, 0.0  ;;  %6195 = vrot.lane.b32.xlu0 %v10420_v20, %s6806_s25  ;;  %v3230_v58 = vsel %vm458_vm0, %v3227_v55, %v3229_v41  ;;  %v3190_v34 = vsel %vm585_vm1, %v3188_v42, %v3189_v9 }
 0x335   : > { %v2778_v50 = vpop.f32.mrf.mxu0  ;;  %v4996_v60 = vpop.f32.mrf.mxu1  ;;  %v10623_v17 = vpack.i.bf16 %v3230_v58, %v3228_v48 }
 0x336   : > { %v2990_v28 = vsel %vm2942_vm14, %v2902_v44, 0.0  ;;  %v2779_v36 = vadd.f32 %v10277_v7, %v2778_v50  ;;  %v3110_v44 = vsel %vm458_vm0, %v3108_v32, %v3109_v16 }
 0x337   : > { %v3111_v26 = vrot.slane %v2990_v28, 1  ;;  %v3191_v63 = vrot.slane %v2990_v28, 2  ;;  %v4951_v20 = vpop.f32.mrf.mxu0 }
 0x338   : > { %6205 = vrot.lane.b32.xlu0 %v10556_v13, %s6806_s25  ;;  %v2903_v50 = vmax.f32 %v2779_v36, 0.0 }
 0x339   : > { %v3112_v47 = vsel %vm458_vm0, %v3109_v16, %v3111_v26  ;;  %v3192_v55 = vsel %vm585_vm1, %v3189_v9, %v3191_v63  ;;  %v2781_v41 = vpop.f32.mrf.mxu0 }
 0x33a   : > { %v2782_v20 = vadd.f32 %v10277_v7, %v2781_v41  ;;  %v10636_v60 = vpack.i.bf16 %v3112_v47, %v3110_v44  ;;  %v10639_v11 = vpack.i.bf16 %v3192_v55, %v3190_v34  ;;  %v10650_v58 = vsel %vm2931_vm13, %v2903_v50, 0.0 }
 0x33b   : > { %v4952_v3 = vpop.f32.mrf.mxu0  ;;  %12899 = vst [vmem:[#allocation210_spill] sm:$0xff] %v10650_v58  ;;  %v3113_v27 = vrot.slane %v10650_v58, 1  ;;  %v3193_v41 = vrot.slane %v10650_v58, 2 }
 0x33c   : > { %6220 = vrot.lane.b32.xlu0 %v10429_v22, %s6808_s27  ;;  %6210 = vrot.lane.b32.xlu1 %v10636_v60, %s6806_s25  ;;  %v10645_v63 = vmax.f32 %v2782_v20, 0.0 }
 0x33d   : > { %v2786_v48 = vpop.f32.mrf.mxu0 }
 0x33e   : > { %12898 = vst [vmem:[#allocation209_spill] sm:$0xff] %v10645_v63  ;;  %v2787_v32 = vadd.f32 %v10277_v7, %v2786_v48  ;;  %v3114_v28 = vrot.slane %v10645_v63, 1  ;;  %v3194_v19 = vrot.slane %v10645_v63, 2 }
 0x33f   : > { %v4955_v16 = vpop.f32.mrf.mxu0 }
 0x340   : > { %v2905_v42 = vmax.f32 %v2787_v32, 0.0  ;;  %6215 = vrot.lane.b32.xlu1 %v10608_v14, %s6806_s25  ;;  %v3115_v50 = vsel %vm458_vm0, %v3113_v27, %v3114_v28  ;;  %v3195_v16 = vsel %vm585_vm1, %v3193_v41, %v3194_v19 }
 0x341   : > { %v2789_v9 = vpop.f32.mrf.mxu0 }
 0x342   : > { %v2993_v26 = vsel %vm2942_vm14, %v2905_v42, 0.0  ;;  %v2790_v44 = vadd.f32 %v10277_v7, %v2789_v9 }
 0x343   : > { %v3116_v36 = vrot.slane %v2993_v26, 1  ;;  %v3196_v47 = vrot.slane %v2993_v26, 2  ;;  %v4956_v55 = vpop.f32.mrf.mxu0 }
 0x344   : > { %6225 = vrot.lane.b32.xlu1 %v10309_v39, %s6808_s27  ;;  %v2906_v9 = vmax.f32 %v2790_v44, 0.0 }
 0x345   : > { %v3117_v20 = vsel %vm458_vm0, %v3114_v28, %v3116_v36  ;;  %v3197_v34 = vsel %vm585_vm1, %v3194_v19, %v3196_v47  ;;  %v2794_v3 = vpop.f32.mrf.mxu0 }
 0x346   : > { %v2795_v48 = vadd.f32 %v10277_v7, %v2794_v3  ;;  %v10667_v32 = vpack.i.bf16 %v3117_v20, %v3115_v50  ;;  %v10670_v26 = vpack.i.bf16 %v3197_v34, %v3195_v16  ;;  %v10681_v55 = vsel %vm2931_vm13, %v2906_v9, 0.0 }
 0x347   : > { %v4959_v42 = vpop.f32.mrf.mxu0  ;;  %12901 = vst [vmem:[#allocation19_spill] sm:$0xff] %v10681_v55  ;;  %v3198_v12 = vrot.slane %v10681_v55, 2 }
 0x348   : > { %6240 = vrot.lane.b32.xlu1 %v10361_v49, %s6808_s27  ;;  %6230 = vrot.lane.b32.xlu0 %v10667_v32, %s6806_s25  ;;  %v10676_v36 = vmax.f32 %v2795_v48, 0.0 }
 0x349   : > { %v2797_v47 = vpop.f32.mrf.mxu0 }
 0x34a   : > { %12900 = vst [vmem:[#allocation30_spill] sm:$0xff] %v10676_v36  ;;  %v2798_v28 = vadd.f32 %v10277_v7, %v2797_v47  ;;  %v3119_v41 = vrot.slane %v10676_v36, 1  ;;  %v3199_v44 = vrot.slane %v10676_v36, 2  ;;  %v3118_v7 = vrot.slane %v10681_v55, 1 }
 0x34b   : > { %v4960_v27 = vpop.f32.mrf.mxu0  ;;  %v6309_v47 = vpack.i.bf16 %v10287_v1, %v10293_v29 }
 0x34c   : > { %v2908_v19 = vmax.f32 %v2798_v28, 0.0  ;;  %6250 = vrot.lane.b32.xlu1 %v10451_v45, %s6808_s27  ;;  %6235 = vrot.lane.b32.xlu0 %v10334_v52, %s6808_s27  ;;  %v3120_v16 = vsel %vm458_vm0, %v3118_v7, %v3119_v41  ;;  %v3200_v0 = vsel %vm585_vm1, %v3198_v12, %v3199_v44  ;;  %v6314_v28 = vpack.i.bf16 %v10313_v10, %v10318_v24 }
 0x34d   : > { %v6319_v27 = vpack.i.bf16 %v10338_v21, %v10343_v53  ;;  %v10758_v7 = vpack.i.bf16 %v10554_v4, %v10548_v38  ;;  %v10766_v12 = vpack.i.bf16 %v10598_v8, %v10594_v57 }
 0x34e   : > { %v2996_v20 = vsel %vm2942_vm14, %v2908_v19, 0.0  ;;  %v10735_v19 = vpack.i.bf16 %v10363_v54, %v10368_v23 }
 0x34f   : > { %v3121_v34 = vrot.slane %v2996_v20, 1  ;;  %v3201_v3 = vrot.slane %v2996_v20, 2  ;;  %v10754_v20 = vpack.i.bf16 %v10499_v59, %v10512_v18 }
 0x350   : > { %6260 = vrot.lane.b32.xlu1 %v10564_v33, %s6808_s27  ;;  %6245 = vrot.lane.b32.xlu0 %v10401_v61, %s6808_s27 }
 0x351   : > { %v3122_v50 = vsel %vm458_vm0, %v3119_v41, %v3121_v34  ;;  %v3202_v48 = vsel %vm585_vm1, %v3199_v44, %v3201_v3  ;;  %v10742_v41 = vpack.i.bf16 %v10396_v35, %v10406_v51  ;;  %v10746_v44 = vpack.i.bf16 %v10443_v37, %v10456_v43 }
 0x352   : > { %v10701_v42 = vpack.i.bf16 %v3122_v50, %v3120_v16  ;;  %v10703_v9 = vpack.i.bf16 %v3202_v48, %v3200_v0  ;;  %v10770_v34 = vpack.i.bf16 %v10645_v63, %v10650_v58  ;;  %v10778_v3 = vpack.i.bf16 %v10676_v36, %v10681_v55  ;;  %v6792_v48 = vld [vmem:[%s11590_s3 + $0x20] ss:$0 sps:$4 sm:$0xff]   ;;  %v12904_v55 = vld [vmem:[#allocation49_spill] sm:$0xff]  ;;  %v12908_v63 = vld [vmem:[#allocation31_spill] sm:$0xff] }
 0x353   : > { %v10782_v50 = vpack.i.bf16 %v10386_v2, %v10394_v25  ;;  %v12902_v16 = vld [vmem:[#allocation34_spill] sm:$0xff]  ;;  %5045 = vmatprep.subr.msk.bf16.mxu1 %vm4385_vm15, %v6792_v48  ;;  %v4387_v25 = vsel %vm4385_vm15, %v6792_v48, 0  ;;  %v6793_v2 = vld [vmem:[%s11590_s3 + $0x18] sm:$0xff]   ;;  %v12907_v48 = vld [vmem:[#allocation104_spill] sm:$0xff]  ;;  %vm4145_vm0 = vcmask 326656   ;;  %vm4178_vm1 = vcmask 392192  }
 0x354   : > { %6255 = vrot.lane.b32.xlu0 %v10508_v56, %s6808_s27  ;;  %6270 = vrot.lane.b32.xlu1 %v10701_v42, %s6806_s25  ;;  %v10793_v0 = vpack.i.bf16 %v12902_v16, %v10439_v5  ;;  %v12905_v58 = vld [vmem:[#allocation73_spill] sm:$0xff]  ;;  %v12906_v5 = vld [vmem:[#allocation66_spill] sm:$0xff] }
 0x355   : > { %4998 = vmatpush3.bf16.msra.mxu1 %v4387_v25  ;;  %v10808_v16 = vpack.i.bf16 %v12906_v5, %v12905_v58  ;;  %v6794_v25 = vld [vmem:[%s11590_s3 + $0x10] sm:$0xff]   ;;  %v6795_v58 = vld [vmem:[%s11590_s3 + $0x8] sm:$0xff]  }
 0x356   : > { %4999 = vmatprep.subr.bf16.mxu1 %v6793_v2 }
 0x358   : > { %6265 = vrot.lane.b32.xlu0 %v10596_v62, %s6808_s27  ;;  %6275 = vrot.lane.b32.xlu1 %v10639_v11, %s6808_s27 }
 0x359   : > { %5000 = vmatpush3.bf16.msra.mxu1 %v6793_v2  ;;  %v6796_v2 = vld [vmem:[%s11590_s3] sm:$0xff]  }
 0x35a   : > { %5001 = vmatprep.subr.bf16.mxu1 %v6794_v25 }
 0x35c   : > { %6280 = vrot.lane.b32.xlu0 %v10670_v26, %s6808_s27  ;;  %6285 = vrot.lane.b32.xlu1 %v10703_v9, %s6808_s27 }
 0x35d   : > { %5002 = vmatpush3.bf16.msra.mxu1 %v6794_v25  ;;  %v12910_v25 = vld [vmem:[#allocation129_spill] sm:$0xff] }
 0x35e   : > { %5003 = vmatprep.subr.bf16.mxu1 %v6795_v58 }
 0x360   : > { %6290 = vrot.lane.b32.xlu0 %v10469_v6, %s6808_s27  ;;  %6295 = vrot.lane.b32.xlu1 %v10581_v31, %s6808_s27 }
 0x361   : > { %5004 = vmatpush3.bf16.msra.mxu1 %v6795_v58  ;;  %v10839_v58 = vpop.permute.xlu1 %6155 }
 0x362   : > { %5005 = vmatprep.subr.bf16.mxu1 %v6796_v2 }
 0x364   : > { %6300 = vrot.lane.b32.xlu0 %v10604_v30, %s6808_s27  ;;  %6305 = vrot.lane.b32.xlu1 %v10614_v46, %s6808_s27 }
 0x365   : > { %5006 = vmatpush3.bf16.msra.mxu1 %v6796_v2 }
 0x368   : > { %6310 = vrot.lane.b32.xlu0 %v6309_v47, %s6810_s29  ;;  %6315 = vrot.lane.b32.xlu1 %v6314_v28, %s6810_s29  ;;  %v12903_v47 = vld [vmem:[#allocation58_spill] sm:$0xff] }
 0x369   : > { %v10797_v36 = vpack.i.bf16 %v12904_v55, %v12903_v47 }
 0x36c   : > { %6320 = vrot.lane.b32.xlu0 %v6319_v27, %s6810_s29  ;;  %6325 = vrot.lane.b32.xlu1 %v10735_v19, %s6810_s29 }
 0x370   : > { %6330 = vrot.lane.b32.xlu0 %v10742_v41, %s6810_s29  ;;  %6335 = vrot.lane.b32.xlu1 %v10746_v44, %s6810_s29 }
 0x374   : > { %6340 = vrot.lane.b32.xlu0 %v10754_v20, %s6810_s29  ;;  %6345 = vrot.lane.b32.xlu1 %v10758_v7, %s6810_s29 }
 0x378   : > { %6350 = vrot.lane.b32.xlu0 %v10766_v12, %s6810_s29  ;;  %6355 = vrot.lane.b32.xlu1 %v10770_v34, %s6810_s29 }
 0x37c   : > { %6360 = vrot.lane.b32.xlu0 %v10778_v3, %s6810_s29  ;;  %6365 = vrot.lane.b32.xlu1 %v10782_v50, %s6810_s29 }
 0x380   : > { %6370 = vrot.lane.b32.xlu0 %v10793_v0, %s6810_s29  ;;  %6375 = vrot.lane.b32.xlu1 %v10797_v36, %s6810_s29 }
 0x384   : > { %6380 = vrot.lane.b32.xlu0 %v10808_v16, %s6810_s29  ;;  %6385 = vrot.lane.b32.xlu1 %v12907_v48, %s6814_s12  ;;  %v12909_v48 = vld [vmem:[#allocation32_spill] sm:$0xff] }
 0x388   : > { %6390 = vrot.lane.b32.xlu0 %v12908_v63, %s6814_s12  ;;  %6395 = vrot.lane.b32.xlu1 %v10309_v39, %s6815_s23  ;;  %v10833_v39 = vpop.permute.xlu0 %6150 }
 0x38c   : > { %6400 = vrot.lane.b32.xlu0 %v10334_v52, %s6815_s23  ;;  %6405 = vrot.lane.b32.xlu1 %v6314_v28, %s6816_s26  ;;  %v10841_v28 = vpop.permute.xlu0 %6160 }
 0x390   : > { %6410 = vrot.lane.b32.xlu0 %v6319_v27, %s6816_s26  ;;  %6415 = vrot.lane.b32.xlu1 %v12908_v63, %s6817_s30  ;;  %v10847_v63 = vpop.permute.xlu1 %6165  ;;  %v10849_v27 = vpop.permute.xlu0 %6170 }
 0x394   : > { %6420 = vrot.lane.b32.xlu0 %v12909_v48, %s6817_s30  ;;  %6425 = vrot.lane.b32.xlu1 %v10334_v52, %s6818_s6  ;;  %v10855_v52 = vpop.permute.xlu1 %6175  ;;  %v10857_v2 = vpop.permute.xlu0 %6180 }
 0x398   : > { %6430 = vrot.lane.b32.xlu0 %v10361_v49, %s6818_s6  ;;  %6435 = vrot.lane.b32.xlu1 %v12909_v48, %s6814_s12  ;;  %v10863_v48 = vpop.permute.xlu1 %6185 }
 0x39c   : > { %6440 = vrot.lane.b32.xlu0 %v12910_v25, %s6814_s12  ;;  %6445 = vrot.lane.b32.xlu1 %v10361_v49, %s6815_s23  ;;  %v12912_v49 = vld [vmem:[#allocation43_spill] sm:$0xff]  ;;  %v10875_v57 = vpop.permute.xlu1 %6200 }
 0x39d   : > { %12913 = vst [vmem:[#allocation26_spill] sm:$0xff] %v10875_v57 }
 0x3a0   : > { %6450 = vrot.lane.b32.xlu0 %v10401_v61, %s6815_s23  ;;  %6455 = vrot.lane.b32.xlu1 %v10735_v19, %s6816_s26 }
 0x3a2   : > { %v10865_v5 = vpop.permute.xlu0 %6190 }
 0x3a3   : > { %12911 = vst [vmem:[#allocation40_spill] sm:$0xff] %v10865_v5 }
 0x3a4   : > { %6460 = vrot.lane.b32.xlu0 %v10742_v41, %s6816_s26  ;;  %6465 = vrot.lane.b32.xlu1 %v12910_v25, %s6817_s30  ;;  %v12916_v25 = vld [vmem:[#allocation60_spill] sm:$0xff] }
 0x3a6   : > { %v10877_v8 = vpop.permute.xlu0 %6195 }
 0x3a7   : > { %12914 = vst [vmem:[#allocation51_spill] sm:$0xff] %v10877_v8 }
 0x3a8   : > { %6470 = vrot.lane.b32.xlu0 %v12912_v49, %s6817_s30  ;;  %6475 = vrot.lane.b32.xlu1 %v10401_v61, %s6818_s6 }
 0x3aa   : > { %v10885_v41 = vpop.permute.xlu0 %6205 }
 0x3ac   : > { %6480 = vrot.lane.b32.xlu0 %v10451_v45, %s6818_s6  ;;  %6485 = vrot.lane.b32.xlu1 %v12912_v49, %s6814_s12 }
 0x3ae   : > { %v10883_v19 = vpop.permute.xlu1 %6210  ;;  %v10897_v8 = vpop.permute.xlu0 %6220 }
 0x3af   : > { %12915 = vst [vmem:[#allocation37_spill] sm:$0xff] %v10883_v19 }
 0x3b0   : > { %6490 = vrot.lane.b32.xlu0 %v12916_v25, %s6814_s12  ;;  %6495 = vrot.lane.b32.xlu1 %v10451_v45, %s6815_s23 }
 0x3b2   : > { %v10891_v61 = vpop.permute.xlu1 %6215 }
 0x3b3   : > { %12917 = vst [vmem:[#allocation59_spill] sm:$0xff] %v10891_v61  ;;  %v12919_v61 = vld [vmem:[#allocation77_spill] sm:$0xff] }
 0x3b4   : > { %6500 = vrot.lane.b32.xlu0 %v10508_v56, %s6815_s23  ;;  %6505 = vrot.lane.b32.xlu1 %v10746_v44, %s6816_s26 }
 0x3b6   : > { %v10899_v49 = vpop.permute.xlu1 %6225 }
 0x3b8   : > { %6510 = vrot.lane.b32.xlu0 %v10754_v20, %s6816_s26  ;;  %6515 = vrot.lane.b32.xlu1 %v12916_v25, %s6817_s30 }
 0x3ba   : > { %v10905_v57 = vpop.permute.xlu1 %6240  ;;  %v10907_v45 = vpop.permute.xlu0 %6230 }
 0x3bb   : > { %12918 = vst [vmem:[#allocation45_spill] sm:$0xff] %v10907_v45  ;;  %v12920_v45 = vld [vmem:[#allocation94_spill] sm:$0xff] }
 0x3bc   : > { %6520 = vrot.lane.b32.xlu0 %v12919_v61, %s6817_s30  ;;  %6525 = vrot.lane.b32.xlu1 %v10508_v56, %s6818_s6 }
 0x3be   : > { %v10913_v44 = vpop.permute.xlu1 %6250  ;;  %v10915_v38 = vpop.permute.xlu0 %6235 }
 0x3c0   : > { %6530 = vrot.lane.b32.xlu0 %v10564_v33, %s6818_s6  ;;  %6535 = vrot.lane.b32.xlu1 %v12919_v61, %s6814_s12 }
 0x3c2   : > { %v10921_v20 = vpop.permute.xlu1 %6260  ;;  %v10923_v25 = vpop.permute.xlu0 %6245 }
 0x3c4   : > { %6540 = vrot.lane.b32.xlu0 %v12920_v45, %s6814_s12  ;;  %6545 = vrot.lane.b32.xlu1 %v10564_v33, %s6815_s23 }
 0x3c6   : > { %v10929_v56 = vpop.permute.xlu0 %6255  ;;  %v10931_v4 = vpop.permute.xlu1 %6270 }
 0x3c7   : > { %12921 = vst [vmem:[#allocation71_spill] sm:$0xff] %v10929_v56  ;;  %12922 = vst [vmem:[#allocation54_spill] sm:$0xff] %v10931_v4 }
 0x3c8   : > { %6550 = vrot.lane.b32.xlu0 %v10596_v62, %s6815_s23  ;;  %6555 = vrot.lane.b32.xlu1 %v10758_v7, %s6816_s26 }
 0x3ca   : > { %v10937_v61 = vpop.permute.xlu0 %6265  ;;  %v10939_v19 = vpop.permute.xlu1 %6275 }
 0x3cb   : > { %12923 = vst [vmem:[#allocation67_spill] sm:$0xff] %v10937_v61  ;;  %12924 = vst [vmem:[#allocation147_spill] sm:$0xff] %v10939_v19  ;;  %v6207_v61 = vunpack.i.l.bf16 %v10885_v41 }
 0x3cc   : > { %6560 = vrot.lane.b32.xlu0 %v10766_v12, %s6816_s26  ;;  %6565 = vrot.lane.b32.xlu1 %v12920_v45, %s6817_s30 }
 0x3ce   : > { %v10945_v33 = vpop.permute.xlu0 %6280  ;;  %v10947_v5 = vpop.permute.xlu1 %6285 }
 0x3cf   : > { %12925 = vst [vmem:[#allocation82_spill] sm:$0xff] %v10945_v33  ;;  %12926 = vst [vmem:[#allocation145_spill] sm:$0xff] %v10947_v5  ;;  %v12934_v33 = vld [vmem:[#allocation36_spill] sm:$0xff] }
 0x3d0   : > { %6570 = vrot.lane.b32.xlu0 %v10636_v60, %s6817_s30  ;;  %6575 = vrot.lane.b32.xlu1 %v10596_v62, %s6818_s6 }
 0x3d2   : > { %v10953_v7 = vpop.permute.xlu0 %6290  ;;  %v10955_v4 = vpop.permute.xlu1 %6295 }
 0x3d3   : > { %12927 = vst [vmem:[#allocation78_spill] sm:$0xff] %v10953_v7  ;;  %12928 = vst [vmem:[#allocation153_spill] sm:$0xff] %v10955_v4 }
 0x3d4   : > { %6580 = vrot.lane.b32.xlu0 %v10639_v11, %s6818_s6  ;;  %6585 = vrot.lane.b32.xlu1 %v10636_v60, %s6814_s12 }
 0x3d6   : > { %v6301_v12 = vpop.permute.xlu0 %6300  ;;  %v10961_v45 = vpop.permute.xlu1 %6305 }
 0x3d7   : > { %12929 = vst [vmem:[#allocation92_spill] sm:$0xff] %v10961_v45  ;;  %v6303_v18 = vunpack.i.h.bf16 %v6301_v12 }
 0x3d8   : > { %6590 = vrot.lane.b32.xlu0 %v10667_v32, %s6814_s12  ;;  %6595 = vrot.lane.b32.xlu1 %v10639_v11, %s6815_s23 }
 0x3da   : > { %v10967_v62 = vpop.permute.xlu0 %6310  ;;  %v10969_v7 = vpop.permute.xlu1 %6315 }
 0x3dc   : > { %6600 = vrot.lane.b32.xlu0 %v10670_v26, %s6815_s23  ;;  %6605 = vrot.lane.b32.xlu1 %v10770_v34, %s6816_s26 }
 0x3de   : > { %v10975_v60 = vpop.permute.xlu0 %6320  ;;  %v10977_v4 = vpop.permute.xlu1 %6325 }
 0x3e0   : > { %6610 = vrot.lane.b32.xlu0 %v10778_v3, %s6816_s26  ;;  %6615 = vrot.lane.b32.xlu1 %v10667_v32, %s6817_s30 }
 0x3e2   : > { %v10983_v11 = vpop.permute.xlu0 %6330  ;;  %v10985_v45 = vpop.permute.xlu1 %6335 }
 0x3e4   : > { %6620 = vrot.lane.b32.xlu0 %v10701_v42, %s6817_s30  ;;  %6625 = vrot.lane.b32.xlu1 %v10670_v26, %s6818_s6 }
 0x3e6   : > { %v10991_v34 = vpop.permute.xlu0 %6340  ;;  %v10993_v5 = vpop.permute.xlu1 %6345 }
 0x3e7   : > { %12930 = vst [vmem:[#allocation150_spill] sm:$0xff] %v10991_v34  ;;  %12931 = vst [vmem:[#allocation88_spill] sm:$0xff] %v10993_v5 }
 0x3e8   : > { %6630 = vrot.lane.b32.xlu0 %v10703_v9, %s6818_s6  ;;  %6635 = vrot.lane.b32.xlu1 %v10701_v42, %s6814_s12 }
 0x3ea   : > { %v10999_v32 = vpop.permute.xlu0 %6350  ;;  %v11001_v3 = vpop.permute.xlu1 %6355 }
 0x3eb   : > { %12932 = vst [vmem:[#allocation159_spill] sm:$0xff] %v10999_v32  ;;  %12933 = vst [vmem:[#allocation109_spill] sm:$0xff] %v11001_v3  ;;  %v6208_v3 = vunpack.i.h.bf16 %v10885_v41  ;;  %v6153_v41 = vunpack.i.h.bf16 %v10833_v39 }
 0x3ec   : > { %6640 = vrot.lane.b32.xlu0 %v12934_v33, %s6814_s12  ;;  %6645 = vrot.lane.b32.xlu1 %v10703_v9, %s6815_s23  ;;  %v6302_v9 = vunpack.i.l.bf16 %v6301_v12  ;;  %v6152_v12 = vunpack.i.l.bf16 %v10833_v39 }
 0x3ee   : > { %v11007_v26 = vpop.permute.xlu0 %6360  ;;  %v11009_v19 = vpop.permute.xlu1 %6365 }
 0x3ef   : > { %12935 = vst [vmem:[#allocation156_spill] sm:$0xff] %v11007_v26  ;;  %12936 = vst [vmem:[#allocation100_spill] sm:$0xff] %v11009_v19 }
 0x3f0   : > { %6650 = vrot.lane.b32.xlu0 %v10469_v6, %s6815_s23  ;;  %6655 = vrot.lane.b32.xlu1 %v10782_v50, %s6816_s26  ;;  %v4046_v50 = vsel %vm2099_vm3, %v12904_v55, %v6208_v3  ;;  %v6158_v55 = vunpack.i.h.bf16 %v10839_v58  ;;  %v4017_v3 = vsel %vm2099_vm3, 0.0, %v6152_v12  ;;  %v6313_v12 = vunpack.i.h.bf16 %v10967_v62 }
 0x3f1   : > { %v4078_v5 = vsel %vm2209_vm7, %v4046_v50, %v6303_v18 }
 0x3f2   : > { %v11015_v42 = vpop.permute.xlu0 %6370  ;;  %v11017_v32 = vpop.permute.xlu1 %6375 }
 0x3f3   : > { %12937 = vst [vmem:[#allocation165_spill] sm:$0xff] %v11015_v42  ;;  %12938 = vst [vmem:[#allocation115_spill] sm:$0xff] %v11017_v32  ;;  %v4045_v32 = vsel %vm2099_vm3, %v12903_v47, %v6207_v61  ;;  %v6157_v47 = vunpack.i.l.bf16 %v10839_v58  ;;  %v6222_v58 = vunpack.i.l.bf16 %v10897_v8 }
 0x3f4   : > { %6660 = vrot.lane.b32.xlu0 %v10793_v0, %s6816_s26  ;;  %6665 = vrot.lane.b32.xlu1 %v12934_v33, %s6817_s30  ;;  %v4077_v0 = vsel %vm2209_vm7, %v4045_v32, %v6302_v9  ;;  %v12939_v33 = vld [vmem:[#allocation63_spill] sm:$0xff]  ;;  %v4018_v32 = vsel %vm2099_vm3, 0.0, %v6153_v41  ;;  %v6227_v9 = vunpack.i.l.bf16 %v10899_v49 }
 0x3f6   : > { %v6381_v19 = vpop.permute.xlu0 %6380  ;;  %v6386_v26 = vpop.permute.xlu1 %6385 }
 0x3f7   : > { %v6383_v42 = vunpack.i.h.bf16 %v6381_v19  ;;  %v6382_v59 = vunpack.i.l.bf16 %v6381_v19 }
 0x3f8   : > { %6670 = vrot.lane.b32.xlu0 %v12939_v33, %s6817_s30  ;;  %6675 = vrot.lane.b32.xlu1 %v10469_v6, %s6818_s6  ;;  %v4019_v6 = vsel %vm2099_vm3, %v10293_v29, %v6157_v47  ;;  %v6317_v29 = vunpack.i.l.bf16 %v10969_v7 }
 0x3f9   : > { %v11040_v19 = vsel %vm2319_vm9, %v4078_v5, %v6383_v42  ;;  %v11043_v61 = vsel %vm2319_vm9, %v4077_v0, %v6382_v59  ;;  %v4020_v5 = vsel %vm2099_vm3, %v10287_v1, %v6158_v55  ;;  %v6223_v59 = vunpack.i.h.bf16 %v10897_v8 }
 0x3fa   : > { %12940 = vst [vmem:[#allocation162_spill] sm:$0xff] %v11040_v19  ;;  %12941 = vst [vmem:[#allocation111_spill] sm:$0xff] %v11043_v61  ;;  %v11045_v39 = vpop.permute.xlu0 %6390  ;;  %v6396_v18 = vpop.permute.xlu1 %6395  ;;  %v6228_v42 = vunpack.i.h.bf16 %v10899_v49  ;;  %v6312_v0 = vunpack.i.l.bf16 %v10967_v62  ;;  %v6318_v1 = vunpack.i.h.bf16 %v10969_v7  ;;  %v6387_v55 = vunpack.i.l.bf16 %v6386_v26 }
 0x3fb   : > { %v4050_v8 = vsel %vm2209_vm7, %v4018_v32, %v6223_v59  ;;  %v4049_v49 = vsel %vm2209_vm7, %v4017_v3, %v6222_v58  ;;  %v6398_v47 = vunpack.i.h.bf16 %v6396_v18  ;;  %v6397_v62 = vunpack.i.l.bf16 %v6396_v18 }
 0x3fc   : > { %6680 = vrot.lane.b32.xlu0 %v10581_v31, %s6818_s6  ;;  %6685 = vrot.lane.b32.xlu1 %v12939_v33, %s6814_s12  ;;  %v6388_v33 = vunpack.i.h.bf16 %v6386_v26  ;;  %v4052_v61 = vsel %vm2209_vm7, %v4020_v5, %v6228_v42  ;;  %v4051_v7 = vsel %vm2209_vm7, %v4019_v6, %v6227_v9  ;;  %v4082_v43 = vsel %vm2319_vm9, %v4050_v8, %v6313_v12 }
 0x3fd   : > { %v4084_v37 = vsel %vm2319_vm9, %v4052_v61, %v6318_v1  ;;  %v4083_v32 = vsel %vm2319_vm9, %v4051_v7, %v6317_v29  ;;  %v6393_v6 = vunpack.i.h.bf16 %v11045_v39  ;;  %v6392_v58 = vunpack.i.l.bf16 %v11045_v39 }
 0x3fe   : > { %v6401_v50 = vpop.permute.xlu0 %6400  ;;  %v6406_v41 = vpop.permute.xlu1 %6405  ;;  %v4114_v3 = vsel %vm2429_vm11, %v4082_v43, %v6388_v33 }
 0x3ff   : > { %v6408_v19 = vunpack.i.h.bf16 %v6406_v41  ;;  %v6407_v26 = vunpack.i.l.bf16 %v6406_v41  ;;  %v4147_v42 = vsel %vm4145_vm0, %v4114_v3, %v6398_v47  ;;  %v6403_v9 = vunpack.i.h.bf16 %v6401_v50 }
 0x400   : > { %6690 = vrot.lane.b32.xlu0 %v10556_v13, %s6814_s12  ;;  %6695 = vrot.lane.b32.xlu1 %v10581_v31, %s6815_s23  ;;  %v4081_v31 = vsel %vm2319_vm9, %v4049_v49, %v6312_v0  ;;  %v6402_v43 = vunpack.i.l.bf16 %v6401_v50  ;;  %v4116_v50 = vsel %vm2429_vm11, %v4084_v37, %v6393_v6  ;;  %v6162_v6 = vunpack.i.l.bf16 %v10841_v28 }
 0x401   : > { %v4113_v18 = vsel %vm2429_vm11, %v4081_v31, %v6387_v55  ;;  %v4149_v7 = vsel %vm4145_vm0, %v4116_v50, %v6403_v9  ;;  %v6167_v9 = vunpack.i.l.bf16 %v10847_v63 }
 0x402   : > { %v6411_v34 = vpop.permute.xlu0 %6410  ;;  %v6416_v56 = vpop.permute.xlu1 %6415  ;;  %v4146_v61 = vsel %vm4145_vm0, %v4113_v18, %v6397_v62 }
 0x403   : > { %v6418_v59 = vunpack.i.h.bf16 %v6416_v56  ;;  %v6417_v5 = vunpack.i.l.bf16 %v6416_v56  ;;  %v4179_v41 = vsel %vm4178_vm1, %v4146_v61, %v6407_v26  ;;  %v4180_v56 = vsel %vm4178_vm1, %v4147_v42, %v6408_v19 }
 0x404   : > { %6700 = vrot.lane.b32.xlu0 %v10604_v30, %s6815_s23  ;;  %6705 = vrot.lane.b32.xlu1 %v10797_v36, %s6816_s26  ;;  %v6413_v1 = vunpack.i.h.bf16 %v6411_v34  ;;  %v6412_v29 = vunpack.i.l.bf16 %v6411_v34  ;;  %v4115_v19 = vsel %vm2429_vm11, %v4083_v32, %v6392_v58  ;;  %v6168_v42 = vunpack.i.h.bf16 %v10847_v63 }
 0x405   : > { %v4212_v55 = vsel %vm4211_vm2, %v4179_v41, %v6417_v5  ;;  %v4213_v39 = vsel %vm4211_vm2, %v4180_v56, %v6418_v59  ;;  %v4148_v62 = vsel %vm4145_vm0, %v4115_v19, %v6402_v43  ;;  %v6163_v5 = vunpack.i.h.bf16 %v10841_v28 }
 0x406   : > { %v6421_v12 = vpop.permute.xlu0 %6420  ;;  %v6426_v0 = vpop.permute.xlu1 %6425  ;;  %v4021_v28 = vsel %vm2099_vm3, %v10318_v24, %v6162_v6  ;;  %v6242_v63 = vunpack.i.l.bf16 %v10905_v57  ;;  %v6323_v24 = vunpack.i.h.bf16 %v10975_v60 }
 0x407   : > { %v6428_v33 = vunpack.i.h.bf16 %v6426_v0  ;;  %v6427_v36 = vunpack.i.l.bf16 %v6426_v0  ;;  %v6423_v8 = vunpack.i.h.bf16 %v6421_v12  ;;  %v6422_v49 = vunpack.i.l.bf16 %v6421_v12 }
 0x408   : > { %6710 = vrot.lane.b32.xlu0 %v10808_v16, %s6816_s26  ;;  %6715 = vrot.lane.b32.xlu1 %v10556_v13, %s6817_s30  ;;  %v4181_v16 = vsel %vm4178_vm1, %v4148_v62, %v6412_v29  ;;  %v4182_v13 = vsel %vm4178_vm1, %v4149_v7, %v6413_v1  ;;  %v6243_v12 = vunpack.i.h.bf16 %v10905_v57  ;;  %v4024_v0 = vsel %vm2099_vm3, %v10338_v21, %v6168_v42 }
 0x409   : > { %v4245_v34 = vsel %vm4244_vm4, %v4212_v55, %v6427_v36  ;;  %v4246_v47 = vsel %vm4244_vm4, %v4213_v39, %v6428_v33  ;;  %v4214_v37 = vsel %vm4211_vm2, %v4181_v16, %v6422_v49  ;;  %v4215_v59 = vsel %vm4211_vm2, %v4182_v13, %v6423_v8 }
 0x40a   : > { %v4277_v26 = vpack.c.bf16 %v4246_v47, %v4245_v34  ;;  %v6431_v31 = vpop.permute.xlu0 %6430  ;;  %v6436_v3 = vpop.permute.xlu1 %6435  ;;  %v4023_v1 = vsel %vm2099_vm3, %v10343_v53, %v6167_v9  ;;  %v6238_v29 = vunpack.i.h.bf16 %v10915_v38  ;;  %v6237_v33 = vunpack.i.l.bf16 %v10915_v38 }
 0x40b   : > { %v6433_v18 = vunpack.i.h.bf16 %v6431_v31  ;;  %v6432_v32 = vunpack.i.l.bf16 %v6431_v31  ;;  %v6322_v55 = vunpack.i.l.bf16 %v10975_v60  ;;  %v6328_v57 = vunpack.i.h.bf16 %v10977_v4 }
 0x40c   : > { %6720 = vrot.lane.b32.xlu0 %v10608_v14, %s6817_s30  ;;  %6725 = vrot.lane.b32.xlu1 %v10604_v30, %s6818_s6  ;;  %v4022_v30 = vsel %vm2099_vm3, %v10313_v10, %v6163_v5  ;;  %v6327_v39 = vunpack.i.l.bf16 %v10977_v4  ;;  %v6438_v8 = vunpack.i.h.bf16 %v6436_v3  ;;  %v6437_v49 = vunpack.i.l.bf16 %v6436_v3 }
 0x40d   : > { %v4247_v58 = vsel %vm4244_vm4, %v4214_v37, %v6432_v32  ;;  %v4248_v61 = vsel %vm4244_vm4, %v4215_v59, %v6433_v18  ;;  %5007 = vmatprep.mubr.msk.bf16.mxu1 %vm4336_vm5, %v4277_v26  ;;  %v4056_v21 = vsel %vm2209_vm7, %v4024_v0, %v6243_v12  ;;  %v4055_v53 = vsel %vm2209_vm7, %v4023_v1, %v6242_v63 }
 0x40e   : > { %v4278_v43 = vpack.c.bf16 %v4248_v61, %v4247_v58  ;;  %v11116_v41 = vpop.permute.xlu0 %6440  ;;  %v6446_v56 = vpop.permute.xlu1 %6445  ;;  %v4054_v60 = vsel %vm2209_vm7, %v4022_v30, %v6238_v29  ;;  %v4053_v50 = vsel %vm2209_vm7, %v4021_v28, %v6237_v33  ;;  %v4088_v26 = vsel %vm2319_vm9, %v4056_v21, %v6328_v57 }
 0x40f   : > { %v6448_v38 = vunpack.i.h.bf16 %v6446_v56  ;;  %v6447_v19 = vunpack.i.l.bf16 %v6446_v56  ;;  %v4085_v7 = vsel %vm2319_vm9, %v4053_v50, %v6322_v55  ;;  %v4087_v31 = vsel %vm2319_vm9, %v4055_v53, %v6327_v39 }
 0x410   : > { %6730 = vrot.lane.b32.xlu0 %v10614_v46, %s6818_s6  ;;  %6735 = vrot.lane.b32.xlu1 %v10616_v15, %s6810_s29  ;;  %v4117_v16 = vsel %vm2429_vm11, %v4085_v7, %v6437_v49  ;;  %v6443_v32 = vunpack.i.h.bf16 %v11116_v41  ;;  %v6442_v37 = vunpack.i.l.bf16 %v11116_v41  ;;  %v12942_v1 = vmov 0.0  }
 0x411   : > { %5008 = vmatmul.mubr.msk.bf16.vlgmr.msra.gmra.mxu1 %vm4336_vm5, %v4278_v43  ;;  %v4150_v59 = vsel %vm4145_vm0, %v4117_v16, %v6447_v19 }
 0x412   : > { %v6451_v10 = vpop.permute.xlu0 %6450  ;;  %v6456_v36 = vpop.permute.xlu1 %6455  ;;  %v4119_v29 = vsel %vm2429_vm11, %v4087_v31, %v6442_v37  ;;  %v4120_v33 = vsel %vm2429_vm11, %v4088_v26, %v6443_v32  ;;  %v6178_v26 = vunpack.i.h.bf16 %v10855_v52  ;;  %v6253_v31 = vunpack.i.h.bf16 %v10913_v44 }
 0x413   : > { %v6458_v34 = vunpack.i.h.bf16 %v6456_v36  ;;  %v6457_v4 = vunpack.i.l.bf16 %v6456_v36  ;;  %v6453_v6 = vunpack.i.h.bf16 %v6451_v10  ;;  %v6452_v58 = vunpack.i.l.bf16 %v6451_v10 }
 0x414   : > { %6740 = vrot.lane.b32.xlu0 %v10608_v14, %s6814_s12  ;;  %6745 = vrot.lane.b32.xlu1 %v10623_v17, %s6814_s12  ;;  %v4086_v14 = vsel %vm2319_vm9, %v4054_v60, %v6323_v24  ;;  %v12943_v60 = vld [vmem:[#allocation27_spill] sm:$0xff]  ;;  %v6332_v32 = vunpack.i.l.bf16 %v10983_v11  ;;  %v6337_v37 = vunpack.i.l.bf16 %v10985_v45 }
 0x415   : > { %v4118_v3 = vsel %vm2429_vm11, %v4086_v14, %v6438_v8  ;;  %v4183_v61 = vsel %vm4178_vm1, %v4150_v59, %v6457_v4  ;;  %v4152_v24 = vsel %vm4145_vm0, %v4119_v29, %v6452_v58  ;;  %v4153_v55 = vsel %vm4145_vm0, %v4120_v33, %v6453_v6 }
 0x416   : > { %v6461_v47 = vpop.permute.xlu0 %6460  ;;  %v6466_v62 = vpop.permute.xlu1 %6465  ;;  %v4151_v5 = vsel %vm4145_vm0, %v4118_v3, %v6448_v38  ;;  %v6173_v4 = vunpack.i.h.bf16 %v10849_v27  ;;  %v6252_v3 = vunpack.i.l.bf16 %v10913_v44  ;;  %v6338_v44 = vunpack.i.h.bf16 %v10985_v45 }
 0x417   : > { %v6468_v13 = vunpack.i.h.bf16 %v6466_v62  ;;  %v6467_v18 = vunpack.i.l.bf16 %v6466_v62  ;;  %v4184_v42 = vsel %vm4178_vm1, %v4151_v5, %v6458_v34  ;;  %v6462_v56 = vunpack.i.l.bf16 %v6461_v47 }
 0x418   : > { %6750 = vrot.lane.b32.xlu0 %v10614_v46, %s6815_s23  ;;  %6755 = vrot.lane.b32.xlu1 %v10630_v40, %s6815_s23  ;;  %v6463_v46 = vunpack.i.h.bf16 %v6461_v47  ;;  %v6172_v47 = vunpack.i.l.bf16 %v10849_v27  ;;  %v4026_v27 = vsel %vm2099_vm3, %v10363_v54, %v6173_v4  ;;  %v4028_v54 = vsel %vm2099_vm3, %v10396_v35, %v6178_v26 }
 0x419   : > { %v4216_v12 = vsel %vm4211_vm2, %v4183_v61, %v6467_v18  ;;  %v4217_v41 = vsel %vm4211_vm2, %v4184_v42, %v6468_v13  ;;  %v6247_v13 = vunpack.i.l.bf16 %v10923_v25 }
 0x41a   : > { %v6471_v9 = vpop.permute.xlu0 %6470  ;;  %v6476_v43 = vpop.permute.xlu1 %6475  ;;  %v4186_v49 = vsel %vm4178_vm1, %v4153_v55, %v6463_v46  ;;  %v4025_v16 = vsel %vm2099_vm3, %v10368_v23, %v6172_v47 }
 0x41b   : > { %v6478_v30 = vunpack.i.h.bf16 %v6476_v43  ;;  %v6477_v28 = vunpack.i.l.bf16 %v6476_v43  ;;  %v6473_v63 = vunpack.i.h.bf16 %v6471_v9  ;;  %v6472_v0 = vunpack.i.l.bf16 %v6471_v9 }
 0x41c   : > { %6760 = vrot.lane.b32.xlu0 %v10616_v15, %s6816_s26  ;;  %6765 = vrot.lane.b32.xlu1 %v12942_v1, %s6816_s26  ;;  %v4185_v15 = vsel %vm4178_vm1, %v4152_v24, %v6462_v56  ;;  %v4057_v42 = vsel %vm2209_vm7, %v4025_v16, %v6247_v13 }
 0x41d   : > { %v4249_v10 = vsel %vm4244_vm4, %v4216_v12, %v6477_v28  ;;  %v4250_v36 = vsel %vm4244_vm4, %v4217_v41, %v6478_v30  ;;  %v4218_v38 = vsel %vm4211_vm2, %v4185_v15, %v6472_v0  ;;  %v4219_v19 = vsel %vm4211_vm2, %v4186_v49, %v6473_v63 }
 0x41e   : > { %v4279_v57 = vpack.c.bf16 %v4250_v36, %v4249_v10  ;;  %v6481_v39 = vpop.permute.xlu0 %6480  ;;  %v6486_v8 = vpop.permute.xlu1 %6485  ;;  %v4089_v35 = vsel %vm2319_vm9, %v4057_v42, %v6332_v32  ;;  %v6182_v32 = vunpack.i.l.bf16 %v10857_v2 }
 0x41f   : > { %v6483_v21 = vunpack.i.h.bf16 %v6481_v39  ;;  %v6482_v53 = vunpack.i.l.bf16 %v6481_v39  ;;  %v6488_v59 = vunpack.i.h.bf16 %v6486_v8  ;;  %v6487_v5 = vunpack.i.l.bf16 %v6486_v8 }
 0x420   : > { %6770 = vrot.lane.b32.xlu0 %v10623_v17, %s6817_s30  ;;  %6775 = vrot.lane.b32.xlu1 %v12943_v60, %s6817_s30  ;;  %v6177_v17 = vunpack.i.l.bf16 %v10855_v52  ;;  %v6248_v52 = vunpack.i.h.bf16 %v10923_v25  ;;  %v4060_v25 = vsel %vm2209_vm7, %v4028_v54, %v6253_v31 }
 0x421   : > { %v4251_v50 = vsel %vm4244_vm4, %v4218_v38, %v6482_v53  ;;  %v4252_v34 = vsel %vm4244_vm4, %v4219_v19, %v6483_v21  ;;  %5011 = vmatprep.mubr.msk.bf16.mxu1 %vm4336_vm5, %v4279_v57  ;;  %v4092_v56 = vsel %vm2319_vm9, %v4060_v25, %v6338_v44  ;;  %v4121_v12 = vsel %vm2429_vm11, %v4089_v35, %v6487_v5 }
 0x422   : > { %v4280_v62 = vpack.c.bf16 %v4252_v34, %v4251_v50  ;;  %v6491_v7 = vpop.permute.xlu0 %6490  ;;  %v6496_v14 = vpop.permute.xlu1 %6495  ;;  %v4027_v23 = vsel %vm2099_vm3, %v10406_v51, %v6177_v17  ;;  %v6263_v5 = vunpack.i.h.bf16 %v10921_v20  ;;  %v6262_v25 = vunpack.i.l.bf16 %v10921_v20 }
 0x423   : > { %v4059_v6 = vsel %vm2209_vm7, %v4027_v23, %v6252_v3  ;;  %v6498_v58 = vunpack.i.h.bf16 %v6496_v14  ;;  %v6497_v61 = vunpack.i.l.bf16 %v6496_v14  ;;  %v6493_v0 = vunpack.i.h.bf16 %v6491_v7 }
 0x424   : > { %6780 = vrot.lane.b32.xlu0 %v10630_v40, %s6818_s6  ;;  %6785 = vrot.lane.b32.xlu1 %v10429_v22, %s6818_s6  ;;  %v6333_v22 = vunpack.i.h.bf16 %v10983_v11  ;;  %v4058_v11 = vsel %vm2209_vm7, %v4026_v27, %v6248_v52  ;;  %v4091_v30 = vsel %vm2319_vm9, %v4059_v6, %v6337_v37  ;;  %v6492_v1 = vunpack.i.l.bf16 %v6491_v7  ;;  %v12944_v6 = vld [vmem:[#allocation47_spill] sm:$0xff] }
 0x425   : > { %5012 = vmatmul.mubr.msk.bf16.gmra.mxu1 %vm4336_vm5, %v4280_v62  ;;  %v4154_v29 = vsel %vm4145_vm0, %v4121_v12, %v6497_v61  ;;  %v4124_v34 = vsel %vm2429_vm11, %v4092_v56, %v6493_v0  ;;  %v6188_v23 = vunpack.i.h.bf16 %v10863_v48  ;;  %v12945_v61 = vld [vmem:[#allocation56_spill] sm:$0xff]  ;;  %v12950_v12 = vld [vmem:[#allocation50_spill] sm:$0xff] }
 0x426   : > { %v6501_v40 = vpop.permute.xlu0 %6500  ;;  %v6506_v18 = vpop.permute.xlu1 %6505  ;;  %v4090_v51 = vsel %vm2319_vm9, %v4058_v11, %v6333_v22  ;;  %v4123_v50 = vsel %vm2429_vm11, %v4091_v30, %v6492_v1  ;;  %v6183_v22 = vunpack.i.h.bf16 %v10857_v2  ;;  %v4029_v11 = vsel %vm2099_vm3, %v12945_v61, %v6182_v32  ;;  %v12946_v2 = vld [vmem:[#allocation71_spill] sm:$0xff]  ;;  %v12949_v30 = vld [vmem:[#allocation62_spill] sm:$0xff] }
 0x427   : > { %v6508_v9 = vunpack.i.h.bf16 %v6506_v18  ;;  %v6507_v45 = vunpack.i.l.bf16 %v6506_v18  ;;  %v4122_v28 = vsel %vm2429_vm11, %v4090_v51, %v6488_v59  ;;  %v6503_v10 = vunpack.i.h.bf16 %v6501_v40  ;;  %v12948_v51 = vld [vmem:[#allocation88_spill] sm:$0xff] }
 0x428   : > { %v4155_v33 = vsel %vm4145_vm0, %v4122_v28, %v6498_v58  ;;  %v6502_v36 = vunpack.i.l.bf16 %v6501_v40  ;;  %v6187_v59 = vunpack.i.l.bf16 %v10863_v48  ;;  %v4030_v58 = vsel %vm2099_vm3, %v12944_v6, %v6183_v22 }
 0x429   : > { %v4187_v24 = vsel %vm4178_vm1, %v4154_v29, %v6507_v45  ;;  %v4188_v55 = vsel %vm4178_vm1, %v4155_v33, %v6508_v9  ;;  %v4157_v7 = vsel %vm4145_vm0, %v4124_v34, %v6503_v10  ;;  %v6258_v42 = vunpack.i.h.bf16 %v12946_v2 }
 0x42a   : > { %v6511_v43 = vpop.permute.xlu0 %6510  ;;  %v6516_v46 = vpop.permute.xlu1 %6515  ;;  %v4156_v62 = vsel %vm4145_vm0, %v4123_v50, %v6502_v36  ;;  %v6257_v9 = vunpack.i.l.bf16 %v12946_v2  ;;  %v6348_v56 = vunpack.i.h.bf16 %v12948_v51  ;;  %v6347_v20 = vunpack.i.l.bf16 %v12948_v51 }
 0x42b   : > { %v6518_v41 = vunpack.i.h.bf16 %v6516_v46  ;;  %v6517_v63 = vunpack.i.l.bf16 %v6516_v46  ;;  %v6513_v8 = vunpack.i.h.bf16 %v6511_v43  ;;  %v6512_v15 = vunpack.i.l.bf16 %v6511_v43  ;;  %v12947_v46 = vld [vmem:[#allocation150_spill] sm:$0xff] }
 0x42c   : > { %v6343_v48 = vunpack.i.h.bf16 %v12947_v46  ;;  %v6342_v35 = vunpack.i.l.bf16 %v12947_v46  ;;  %v4032_v28 = vsel %vm2099_vm3, %v12949_v30, %v6188_v23  ;;  %v4062_v36 = vsel %vm2209_vm7, %v4030_v58, %v6258_v42 }
 0x42d   : > { %v4220_v53 = vsel %vm4211_vm2, %v4187_v24, %v6517_v63  ;;  %v4221_v38 = vsel %vm4211_vm2, %v4188_v55, %v6518_v41  ;;  %v4189_v31 = vsel %vm4178_vm1, %v4156_v62, %v6512_v15  ;;  %v4190_v3 = vsel %vm4178_vm1, %v4157_v7, %v6513_v8 }
 0x42e   : > { %v6521_v57 = vpop.permute.xlu0 %6520  ;;  %v6526_v39 = vpop.permute.xlu1 %6525  ;;  %v4031_v41 = vsel %vm2099_vm3, %v12950_v12, %v6187_v59  ;;  %v4064_v1 = vsel %vm2209_vm7, %v4032_v28, %v6263_v5  ;;  %v4061_v24 = vsel %vm2209_vm7, %v4029_v11, %v6257_v9  ;;  %v12952_v28 = vld [vmem:[#allocation37_spill] sm:$0xff] }
 0x42f   : > { %v6528_v49 = vunpack.i.h.bf16 %v6526_v39  ;;  %v6527_v21 = vunpack.i.l.bf16 %v6526_v39  ;;  %v6523_v19 = vunpack.i.h.bf16 %v6521_v57  ;;  %v6522_v60 = vunpack.i.l.bf16 %v6521_v57 }
 0x430   : > { %v4063_v29 = vsel %vm2209_vm7, %v4031_v41, %v6262_v25  ;;  %v4093_v15 = vsel %vm2319_vm9, %v4061_v24, %v6342_v35  ;;  %v6213_v12 = vunpack.i.h.bf16 %v12952_v28  ;;  %v6212_v41 = vunpack.i.l.bf16 %v12952_v28  ;;  %v12956_v24 = vld [vmem:[#allocation147_spill] sm:$0xff] }
 0x431   : > { %v4253_v4 = vsel %vm4244_vm4, %v4220_v53, %v6527_v21  ;;  %v4254_v47 = vsel %vm4244_vm4, %v4221_v38, %v6528_v49  ;;  %v4222_v52 = vsel %vm4211_vm2, %v4189_v31, %v6522_v60  ;;  %v4223_v13 = vsel %vm4211_vm2, %v4190_v3, %v6523_v19 }
 0x432   : > { %v4281_v14 = vpack.c.bf16 %v4254_v47, %v4253_v4  ;;  %v6531_v26 = vpop.permute.xlu0 %6530  ;;  %v6536_v17 = vpop.permute.xlu1 %6535  ;;  %v4094_v49 = vsel %vm2319_vm9, %v4062_v36, %v6343_v48  ;;  %v4096_v21 = vsel %vm2319_vm9, %v4064_v1, %v6348_v56  ;;  %v4095_v53 = vsel %vm2319_vm9, %v4063_v29, %v6347_v20  ;;  %v12951_v48 = vld [vmem:[#allocation40_spill] sm:$0xff] }
 0x433   : > { %v6533_v27 = vunpack.i.h.bf16 %v6531_v26  ;;  %v6532_v16 = vunpack.i.l.bf16 %v6531_v26  ;;  %v6538_v63 = vunpack.i.h.bf16 %v6536_v17  ;;  %v6537_v0 = vunpack.i.l.bf16 %v6536_v17  ;;  %v12954_v29 = vld [vmem:[#allocation80_spill] sm:$0xff] }
 0x434   : > { %5015 = vmatprep.mubr.msk.bf16.mxu1 %vm4336_vm5, %v4281_v14  ;;  %v6193_v35 = vunpack.i.h.bf16 %v12951_v48  ;;  %v6192_v51 = vunpack.i.l.bf16 %v12951_v48 }
 0x435   : > { %v4255_v40 = vsel %vm4244_vm4, %v4222_v52, %v6532_v16  ;;  %v4256_v18 = vsel %vm4244_vm4, %v4223_v13, %v6533_v27  ;;  %v4126_v38 = vsel %vm2429_vm11, %v4094_v49, %v6538_v63  ;;  %v4125_v19 = vsel %vm2429_vm11, %v4093_v15, %v6537_v0  ;;  %v12953_v63 = vld [vmem:[#allocation67_spill] sm:$0xff] }
 0x436   : > { %v4282_v44 = vpack.c.bf16 %v4256_v18, %v4255_v40  ;;  %v6541_v37 = vpop.permute.xlu0 %6540  ;;  %v6546_v54 = vpop.permute.xlu1 %6545  ;;  %v6268_v0 = vunpack.i.h.bf16 %v12953_v63  ;;  %v6267_v1 = vunpack.i.l.bf16 %v12953_v63  ;;  %v12957_v15 = vld [vmem:[#allocation159_spill] sm:$0xff] }
 0x437   : > { %v6548_v33 = vunpack.i.h.bf16 %v6546_v54  ;;  %v6547_v10 = vunpack.i.l.bf16 %v6546_v54  ;;  %v6543_v34 = vunpack.i.h.bf16 %v6541_v37  ;;  %v6542_v4 = vunpack.i.l.bf16 %v6541_v37 }
 0x438   : > { %5016 = vmatmul.mubr.msk.bf16.gmra.mxu1 %vm4336_vm5, %v4282_v44  ;;  %v6353_v49 = vunpack.i.h.bf16 %v12957_v15 }
 0x439   : > { %v4158_v47 = vsel %vm4145_vm0, %v4125_v19, %v6547_v10  ;;  %v4159_v62 = vsel %vm4145_vm0, %v4126_v38, %v6548_v33  ;;  %v4127_v44 = vsel %vm2429_vm11, %v4095_v53, %v6542_v4  ;;  %v4128_v37 = vsel %vm2429_vm11, %v4096_v21, %v6543_v34  ;;  %v12955_v10 = vld [vmem:[#allocation65_spill] sm:$0xff]  ;;  %v12960_v34 = vld [vmem:[#allocation95_spill] sm:$0xff] }
 0x43a   : > { %v6551_v45 = vpop.permute.xlu0 %6550  ;;  %v6556_v43 = vpop.permute.xlu1 %6555  ;;  %v4034_v33 = vsel %vm2099_vm3, %v12954_v29, %v6193_v35  ;;  %v4033_v36 = vsel %vm2099_vm3, %v12955_v10, %v6192_v51  ;;  %v6352_v21 = vunpack.i.l.bf16 %v12957_v15  ;;  %v12958_v53 = vld [vmem:[#allocation109_spill] sm:$0xff]  ;;  %v4035_v4 = vsel %vm2099_vm3, %v12960_v34, %v6212_v41 }
 0x43b   : > { %v6558_v55 = vunpack.i.h.bf16 %v6556_v43  ;;  %v6557_v57 = vunpack.i.l.bf16 %v6556_v43  ;;  %v6553_v7 = vunpack.i.h.bf16 %v6551_v45  ;;  %v6552_v14 = vunpack.i.l.bf16 %v6551_v45 }
 0x43c   : > { %v6358_v38 = vunpack.i.h.bf16 %v12958_v53  ;;  %v6357_v19 = vunpack.i.l.bf16 %v12958_v53 }
 0x43d   : > { %v4191_v26 = vsel %vm4178_vm1, %v4158_v47, %v6557_v57  ;;  %v4192_v17 = vsel %vm4178_vm1, %v4159_v62, %v6558_v55  ;;  %v4160_v59 = vsel %vm4145_vm0, %v4127_v44, %v6552_v14  ;;  %v4161_v5 = vsel %vm4145_vm0, %v4128_v37, %v6553_v7 }
 0x43e   : > { %v6561_v39 = vpop.permute.xlu0 %6560  ;;  %v6566_v8 = vpop.permute.xlu1 %6565  ;;  %v6278_v55 = vunpack.i.h.bf16 %v12956_v24  ;;  %v6277_v57 = vunpack.i.l.bf16 %v12956_v24  ;;  %v4066_v7 = vsel %vm2209_vm7, %v4034_v33, %v6268_v0  ;;  %v4065_v14 = vsel %vm2209_vm7, %v4033_v36, %v6267_v1 }
 0x43f   : > { %v6568_v60 = vunpack.i.h.bf16 %v6566_v8  ;;  %v6567_v50 = vunpack.i.l.bf16 %v6566_v8  ;;  %v6563_v27 = vunpack.i.h.bf16 %v6561_v39  ;;  %v6562_v16 = vunpack.i.l.bf16 %v6561_v39 }
 0x441   : > { %v4224_v40 = vsel %vm4211_vm2, %v4191_v26, %v6567_v50  ;;  %v4225_v18 = vsel %vm4211_vm2, %v4192_v17, %v6568_v60  ;;  %v4193_v61 = vsel %vm4178_vm1, %v4160_v59, %v6562_v16  ;;  %v4194_v11 = vsel %vm4178_vm1, %v4161_v5, %v6563_v27  ;;  %v12959_v60 = vld [vmem:[#allocation205_spill] sm:$0xff] }
 0x442   : > { %v6571_v31 = vpop.permute.xlu0 %6570  ;;  %v6576_v3 = vpop.permute.xlu1 %6575  ;;  %v4036_v50 = vsel %vm2099_vm3, %v12959_v60, %v6213_v12 }
 0x443   : > { %v6578_v52 = vunpack.i.h.bf16 %v6576_v3  ;;  %v6577_v13 = vunpack.i.l.bf16 %v6576_v3  ;;  %v6573_v22 = vunpack.i.h.bf16 %v6571_v31  ;;  %v6572_v32 = vunpack.i.l.bf16 %v6571_v31 }
 0x444   : > { %v4068_v31 = vsel %vm2209_vm7, %v4036_v50, %v6278_v55  ;;  %v4067_v3 = vsel %vm2209_vm7, %v4035_v4, %v6277_v57  ;;  %v12962_v50 = vld [vmem:[#allocation54_spill] sm:$0xff] }
 0x445   : > { %v4257_v54 = vsel %vm4244_vm4, %v4224_v40, %v6577_v13  ;;  %v4258_v23 = vsel %vm4244_vm4, %v4225_v18, %v6578_v52  ;;  %v4226_v9 = vsel %vm4211_vm2, %v4193_v61, %v6572_v32  ;;  %v4227_v45 = vsel %vm4211_vm2, %v4194_v11, %v6573_v22 }
 0x446   : > { %v4283_v25 = vpack.c.bf16 %v4258_v23, %v4257_v54  ;;  %v6581_v6 = vpop.permute.xlu0 %6580  ;;  %v6586_v58 = vpop.permute.xlu1 %6585  ;;  %v4097_v40 = vsel %vm2319_vm9, %v4065_v14, %v6352_v21  ;;  %v4098_v18 = vsel %vm2319_vm9, %v4066_v7, %v6353_v49  ;;  %v4099_v22 = vsel %vm2319_vm9, %v4067_v3, %v6357_v19  ;;  %v12961_v49 = vld [vmem:[#allocation45_spill] sm:$0xff] }
 0x447   : > { %v6583_v2 = vunpack.i.h.bf16 %v6581_v6  ;;  %v6582_v42 = vunpack.i.l.bf16 %v6581_v6  ;;  %v6588_v47 = vunpack.i.h.bf16 %v6586_v58  ;;  %v6587_v62 = vunpack.i.l.bf16 %v6586_v58  ;;  %v12964_v14 = vld [vmem:[#allocation209_spill] sm:$0xff] }
 0x448   : > { %5019 = vmatprep.mubr.msk.bf16.mxu1 %vm4336_vm5, %v4283_v25  ;;  %v4100_v32 = vsel %vm2319_vm9, %v4068_v31, %v6358_v38  ;;  %v6233_v21 = vunpack.i.h.bf16 %v12961_v49  ;;  %v6232_v53 = vunpack.i.l.bf16 %v12961_v49  ;;  %v6273_v34 = vunpack.i.h.bf16 %v12962_v50  ;;  %v12966_v3 = vld [vmem:[#allocation145_spill] sm:$0xff] }
 0x449   : > { %v4259_v43 = vsel %vm4244_vm4, %v4226_v9, %v6582_v42  ;;  %v4260_v46 = vsel %vm4244_vm4, %v4227_v45, %v6583_v2  ;;  %v4130_v44 = vsel %vm2429_vm11, %v4098_v18, %v6588_v47  ;;  %v4129_v37 = vsel %vm2429_vm11, %v4097_v40, %v6587_v62  ;;  %v12963_v47 = vld [vmem:[#allocation82_spill] sm:$0xff]  ;;  %v12967_v40 = vld [vmem:[#allocation156_spill] sm:$0xff] }
 0x44a   : > { %v4284_v56 = vpack.c.bf16 %v4260_v46, %v4259_v43  ;;  %v6591_v20 = vpop.permute.xlu0 %6590  ;;  %v6596_v30 = vpop.permute.xlu1 %6595  ;;  %v6272_v4 = vunpack.i.l.bf16 %v12962_v50  ;;  %v6283_v62 = vunpack.i.h.bf16 %v12963_v47  ;;  %v6282_v7 = vunpack.i.l.bf16 %v12963_v47 }
 0x44b   : > { %v6598_v26 = vunpack.i.h.bf16 %v6596_v30  ;;  %v6597_v17 = vunpack.i.l.bf16 %v6596_v30  ;;  %v6593_v59 = vunpack.i.h.bf16 %v6591_v20  ;;  %v6592_v5 = vunpack.i.l.bf16 %v6591_v20 }
 0x44c   : > { %5020 = vmatmul.mubr.msk.bf16.gmra.mxu1 %vm4336_vm5, %v4284_v56  ;;  %v6363_v18 = vunpack.i.h.bf16 %v12967_v40 }
 0x44d   : > { %v4162_v25 = vsel %vm4145_vm0, %v4129_v37, %v6597_v17  ;;  %v4163_v6 = vsel %vm4145_vm0, %v4130_v44, %v6598_v26  ;;  %v4131_v30 = vsel %vm2429_vm11, %v4099_v22, %v6592_v5  ;;  %v4132_v28 = vsel %vm2429_vm11, %v4100_v32, %v6593_v59  ;;  %v12965_v17 = vld [vmem:[#allocation210_spill] sm:$0xff]  ;;  %v12968_v32 = vld [vmem:[#allocation100_spill] sm:$0xff]  ;;  %v12970_v59 = vld [vmem:[#allocation19_spill] sm:$0xff] }
 0x44e   : > { %v6601_v39 = vpop.permute.xlu0 %6600  ;;  %v6606_v8 = vpop.permute.xlu1 %6605  ;;  %v4038_v26 = vsel %vm2099_vm3, %v12964_v14, %v6233_v21  ;;  %v4037_v31 = vsel %vm2099_vm3, %v12965_v17, %v6232_v53  ;;  %v6362_v22 = vunpack.i.l.bf16 %v12967_v40  ;;  %v6368_v44 = vunpack.i.h.bf16 %v12968_v32 }
 0x44f   : > { %v6608_v27 = vunpack.i.h.bf16 %v6606_v8  ;;  %v6607_v16 = vunpack.i.l.bf16 %v6606_v8  ;;  %v6603_v58 = vunpack.i.h.bf16 %v6601_v39  ;;  %v6602_v61 = vunpack.i.l.bf16 %v6601_v39 }
 0x450   : > { %v6367_v37 = vunpack.i.l.bf16 %v12968_v32  ;;  %v4039_v5 = vsel %vm2099_vm3, %v12970_v59, %v6272_v4 }
 0x451   : > { %v4195_v11 = vsel %vm4178_vm1, %v4162_v25, %v6607_v16  ;;  %v4196_v2 = vsel %vm4178_vm1, %v4163_v6, %v6608_v27  ;;  %v4164_v63 = vsel %vm4145_vm0, %v4131_v30, %v6602_v61  ;;  %v4165_v0 = vsel %vm4145_vm0, %v4132_v28, %v6603_v58 }
 0x452   : > { %v6611_v52 = vpop.permute.xlu0 %6610  ;;  %v6616_v13 = vpop.permute.xlu1 %6615  ;;  %v6288_v27 = vunpack.i.h.bf16 %v12966_v3  ;;  %v6287_v16 = vunpack.i.l.bf16 %v12966_v3  ;;  %v4069_v58 = vsel %vm2209_vm7, %v4037_v31, %v6282_v7  ;;  %v4070_v61 = vsel %vm2209_vm7, %v4038_v26, %v6283_v62 }
 0x453   : > { %v6618_v54 = vunpack.i.h.bf16 %v6616_v13  ;;  %v6617_v23 = vunpack.i.l.bf16 %v6616_v13  ;;  %v6613_v45 = vunpack.i.h.bf16 %v6611_v52  ;;  %v6612_v43 = vunpack.i.l.bf16 %v6611_v52 }
 0x455   : > { %v4228_v35 = vsel %vm4211_vm2, %v4195_v11, %v6617_v23  ;;  %v4229_v51 = vsel %vm4211_vm2, %v4196_v2, %v6618_v54  ;;  %v4197_v10 = vsel %vm4178_vm1, %v4164_v63, %v6612_v43  ;;  %v4198_v36 = vsel %vm4178_vm1, %v4165_v0, %v6613_v45  ;;  %v12969_v54 = vld [vmem:[#allocation30_spill] sm:$0xff] }
 0x456   : > { %v6621_v42 = vpop.permute.xlu0 %6620  ;;  %v6626_v9 = vpop.permute.xlu1 %6625  ;;  %v4040_v23 = vsel %vm2099_vm3, %v12969_v54, %v6273_v34 }
 0x457   : > { %v6628_v46 = vunpack.i.h.bf16 %v6626_v9  ;;  %v6627_v48 = vunpack.i.l.bf16 %v6626_v9  ;;  %v6623_v56 = vunpack.i.h.bf16 %v6621_v42  ;;  %v6622_v20 = vunpack.i.l.bf16 %v6621_v42 }
 0x458   : > { %v4071_v42 = vsel %vm2209_vm7, %v4039_v5, %v6287_v16  ;;  %v4072_v9 = vsel %vm2209_vm7, %v4040_v23, %v6288_v27  ;;  %v12972_v23 = vld [vmem:[#allocation51_spill] sm:$0xff] }
 0x459   : > { %v4261_v12 = vsel %vm4244_vm4, %v4228_v35, %v6627_v48  ;;  %v4262_v41 = vsel %vm4244_vm4, %v4229_v51, %v6628_v46  ;;  %v4230_v57 = vsel %vm4211_vm2, %v4197_v10, %v6622_v20  ;;  %v4231_v39 = vsel %vm4211_vm2, %v4198_v36, %v6623_v56 }
 0x45a   : > { %v4285_v1 = vpack.c.bf16 %v4262_v41, %v4261_v12  ;;  %v6631_v29 = vpop.permute.xlu0 %6630  ;;  %v6636_v33 = vpop.permute.xlu1 %6635  ;;  %v4102_v35 = vsel %vm2319_vm9, %v4070_v61, %v6363_v18  ;;  %v4101_v51 = vsel %vm2319_vm9, %v4069_v58, %v6362_v22  ;;  %v4103_v56 = vsel %vm2319_vm9, %v4071_v42, %v6367_v37  ;;  %v12971_v18 = vld [vmem:[#allocation26_spill] sm:$0xff] }
 0x45b   : > { %v6633_v24 = vunpack.i.h.bf16 %v6631_v29  ;;  %v6632_v55 = vunpack.i.l.bf16 %v6631_v29  ;;  %v6638_v25 = vunpack.i.h.bf16 %v6636_v33  ;;  %v6637_v6 = vunpack.i.l.bf16 %v6636_v33  ;;  %v12974_v61 = vld [vmem:[#allocation34_spill] sm:$0xff] }
 0x45c   : > { %5023 = vmatprep.mubr.msk.bf16.mxu1 %vm4336_vm5, %v4285_v1  ;;  %v4104_v20 = vsel %vm2319_vm9, %v4072_v9, %v6368_v44  ;;  %v6203_v22 = vunpack.i.h.bf16 %v12971_v18  ;;  %v6202_v32 = vunpack.i.l.bf16 %v12971_v18  ;;  %v6198_v59 = vunpack.i.h.bf16 %v12972_v23  ;;  %v12976_v9 = vld [vmem:[#allocation153_spill] sm:$0xff] }
 0x45d   : > { %v4263_v8 = vsel %vm4244_vm4, %v4230_v57, %v6632_v55  ;;  %v4264_v15 = vsel %vm4244_vm4, %v4231_v39, %v6633_v24  ;;  %v4134_v30 = vsel %vm2429_vm11, %v4102_v35, %v6638_v25  ;;  %v4133_v28 = vsel %vm2429_vm11, %v4101_v51, %v6637_v6  ;;  %v12973_v25 = vld [vmem:[#allocation78_spill] sm:$0xff]  ;;  %v12977_v35 = vld [vmem:[#allocation165_spill] sm:$0xff] }
 0x45e   : > { %v4286_v38 = vpack.c.bf16 %v4264_v15, %v4263_v8  ;;  %v6641_v19 = vpop.permute.xlu0 %6640  ;;  %v6646_v60 = vpop.permute.xlu1 %6645  ;;  %v6197_v5 = vunpack.i.l.bf16 %v12972_v23  ;;  %v6293_v6 = vunpack.i.h.bf16 %v12973_v25  ;;  %v6292_v58 = vunpack.i.l.bf16 %v12973_v25 }
 0x45f   : > { %v6648_v11 = vunpack.i.h.bf16 %v6646_v60  ;;  %v6647_v2 = vunpack.i.l.bf16 %v6646_v60  ;;  %v6643_v63 = vunpack.i.h.bf16 %v6641_v19  ;;  %v6642_v0 = vunpack.i.l.bf16 %v6641_v19 }
 0x460   : > { %5024 = vmatmul.mubr.msk.bf16.gmra.mxu1 %vm4336_vm5, %v4286_v38  ;;  %v6373_v51 = vunpack.i.h.bf16 %v12977_v35 }
 0x461   : > { %v4166_v1 = vsel %vm4145_vm0, %v4133_v28, %v6647_v2  ;;  %v4167_v29 = vsel %vm4145_vm0, %v4134_v30, %v6648_v11  ;;  %v4135_v60 = vsel %vm2429_vm11, %v4103_v56, %v6642_v0  ;;  %v4136_v50 = vsel %vm2429_vm11, %v4104_v20, %v6643_v63  ;;  %v12975_v2 = vld [vmem:[#allocation44_spill] sm:$0xff]  ;;  %v12978_v20 = vld [vmem:[#allocation115_spill] sm:$0xff]  ;;  %v12980_v63 = vld [vmem:[#allocation22_spill] sm:$0xff] }
 0x462   : > { %v6651_v52 = vpop.permute.xlu0 %6650  ;;  %v6656_v13 = vpop.permute.xlu1 %6655  ;;  %v4044_v11 = vsel %vm2099_vm3, %v12974_v61, %v6203_v22  ;;  %v4043_v42 = vsel %vm2099_vm3, %v12975_v2, %v6202_v32  ;;  %v6372_v56 = vunpack.i.l.bf16 %v12977_v35  ;;  %v6378_v30 = vunpack.i.h.bf16 %v12978_v20 }
 0x463   : > { %v6658_v45 = vunpack.i.h.bf16 %v6656_v13  ;;  %v6657_v43 = vunpack.i.l.bf16 %v6656_v13  ;;  %v6653_v33 = vunpack.i.h.bf16 %v6651_v52  ;;  %v6652_v10 = vunpack.i.l.bf16 %v6651_v52 }
 0x464   : > { %v6377_v28 = vunpack.i.l.bf16 %v12978_v20  ;;  %v4041_v0 = vsel %vm2099_vm3, %v12980_v63, %v6197_v5 }
 0x465   : > { %v4199_v36 = vsel %vm4178_vm1, %v4166_v1, %v6657_v43  ;;  %v4200_v24 = vsel %vm4178_vm1, %v4167_v29, %v6658_v45  ;;  %v4168_v47 = vsel %vm4145_vm0, %v4135_v60, %v6652_v10  ;;  %v4169_v62 = vsel %vm4145_vm0, %v4136_v50, %v6653_v33 }
 0x466   : > { %v6661_v46 = vpop.permute.xlu0 %6660  ;;  %v6666_v48 = vpop.permute.xlu1 %6665  ;;  %v6298_v45 = vunpack.i.h.bf16 %v12976_v9  ;;  %v6297_v43 = vunpack.i.l.bf16 %v12976_v9  ;;  %v4073_v10 = vsel %vm2209_vm7, %v4041_v0, %v6292_v58 }
 0x467   : > { %v6668_v12 = vunpack.i.h.bf16 %v6666_v48  ;;  %v6667_v41 = vunpack.i.l.bf16 %v6666_v48  ;;  %v6663_v39 = vunpack.i.h.bf16 %v6661_v46  ;;  %v6662_v8 = vunpack.i.l.bf16 %v6661_v46 }
 0x469   : > { %v4232_v21 = vsel %vm4211_vm2, %v4199_v36, %v6667_v41  ;;  %v4233_v53 = vsel %vm4211_vm2, %v4200_v24, %v6668_v12  ;;  %v4201_v17 = vsel %vm4178_vm1, %v4168_v47, %v6662_v8  ;;  %v4202_v31 = vsel %vm4178_vm1, %v4169_v62, %v6663_v39  ;;  %v12979_v12 = vld [vmem:[#allocation118_spill] sm:$0xff] }
 0x46a   : > { %v6671_v55 = vpop.permute.xlu0 %6670  ;;  %v6676_v57 = vpop.permute.xlu1 %6675  ;;  %v4042_v41 = vsel %vm2099_vm3, %v12979_v12, %v6198_v59 }
 0x46b   : > { %v6678_v15 = vunpack.i.h.bf16 %v6676_v57  ;;  %v6677_v49 = vunpack.i.l.bf16 %v6676_v57  ;;  %v6673_v38 = vunpack.i.h.bf16 %v6671_v55  ;;  %v6672_v19 = vunpack.i.l.bf16 %v6671_v55 }
 0x46c   : > { %v4074_v33 = vsel %vm2209_vm7, %v4042_v41, %v6293_v6  ;;  %v4076_v55 = vsel %vm2209_vm7, %v4044_v11, %v6298_v45  ;;  %v4075_v57 = vsel %vm2209_vm7, %v4043_v42, %v6297_v43  ;;  %v12982_v41 = vld [vmem:[#allocation92_spill] sm:$0xff] }
 0x46d   : > { %v4265_v34 = vsel %vm4244_vm4, %v4232_v21, %v6677_v49  ;;  %v4266_v4 = vsel %vm4244_vm4, %v4233_v53, %v6678_v15  ;;  %v4234_v16 = vsel %vm4211_vm2, %v4201_v17, %v6672_v19  ;;  %v4235_v52 = vsel %vm4211_vm2, %v4202_v31, %v6673_v38 }
 0x46e   : > { %v4287_v7 = vpack.c.bf16 %v4266_v4, %v4265_v34  ;;  %v6681_v14 = vpop.permute.xlu0 %6680  ;;  %v6686_v26 = vpop.permute.xlu1 %6685  ;;  %v4106_v21 = vsel %vm2319_vm9, %v4074_v33, %v6373_v51  ;;  %v4105_v53 = vsel %vm2319_vm9, %v4073_v10, %v6372_v56  ;;  %v4107_v38 = vsel %vm2319_vm9, %v4075_v57, %v6377_v28 }
 0x46f   : > { %v6683_v3 = vunpack.i.h.bf16 %v6681_v14  ;;  %v6682_v27 = vunpack.i.l.bf16 %v6681_v14  ;;  %v6688_v1 = vunpack.i.h.bf16 %v6686_v26  ;;  %v6687_v29 = vunpack.i.l.bf16 %v6686_v26 }
 0x470   : > { %5027 = vmatprep.mubr.msk.bf16.mxu1 %vm4336_vm5, %v4287_v7  ;;  %v4108_v19 = vsel %vm2319_vm9, %v4076_v55, %v6378_v30  ;;  %v12981_v30 = vld [vmem:[#allocation59_spill] sm:$0xff]  ;;  %v6308_v63 = vunpack.i.h.bf16 %v12982_v41  ;;  %v6307_v0 = vunpack.i.l.bf16 %v12982_v41  ;;  %v12984_v55 = vld [vmem:[#allocation73_spill] sm:$0xff] }
 0x471   : > { %v4267_v13 = vsel %vm4244_vm4, %v4234_v16, %v6682_v27  ;;  %v4268_v40 = vsel %vm4244_vm4, %v4235_v52, %v6683_v3  ;;  %v4138_v60 = vsel %vm2429_vm11, %v4106_v21, %v6688_v1  ;;  %v4137_v50 = vsel %vm2429_vm11, %v4105_v53, %v6687_v29 }
 0x472   : > { %v4288_v44 = vpack.c.bf16 %v4268_v40, %v4267_v13  ;;  %v6691_v37 = vpop.permute.xlu0 %6690  ;;  %v6696_v54 = vpop.permute.xlu1 %6695  ;;  %v6218_v28 = vunpack.i.h.bf16 %v12981_v30  ;;  %v6217_v12 = vunpack.i.l.bf16 %v12981_v30 }
 0x473   : > { %v6698_v36 = vunpack.i.h.bf16 %v6696_v54  ;;  %v6697_v24 = vunpack.i.l.bf16 %v6696_v54  ;;  %v6693_v47 = vunpack.i.h.bf16 %v6691_v37  ;;  %v6692_v62 = vunpack.i.l.bf16 %v6691_v37 }
 0x474   : > { %5028 = vmatmul.mubr.msk.bf16.gmra.mxu1 %vm4336_vm5, %v4288_v44  ;;  %v4047_v57 = vsel %vm2099_vm3, %v12984_v55, %v6217_v12 }
 0x475   : > { %v4170_v7 = vsel %vm4145_vm0, %v4137_v50, %v6697_v24  ;;  %v4171_v14 = vsel %vm4145_vm0, %v4138_v60, %v6698_v36  ;;  %v4139_v54 = vsel %vm2429_vm11, %v4107_v38, %v6692_v62  ;;  %v4140_v23 = vsel %vm2429_vm11, %v4108_v19, %v6693_v47  ;;  %v12983_v36 = vld [vmem:[#allocation66_spill] sm:$0xff] }
 0x476   : > { %v6701_v46 = vpop.permute.xlu0 %6700  ;;  %v6706_v48 = vpop.permute.xlu1 %6705  ;;  %v4048_v24 = vsel %vm2099_vm3, %v12983_v36, %v6218_v28 }
 0x477   : > { %v6708_v39 = vunpack.i.h.bf16 %v6706_v48  ;;  %v6707_v8 = vunpack.i.l.bf16 %v6706_v48  ;;  %v6703_v26 = vunpack.i.h.bf16 %v6701_v46  ;;  %v6702_v17 = vunpack.i.l.bf16 %v6701_v46 }
 0x479   : > { %v4203_v31 = vsel %vm4178_vm1, %v4170_v7, %v6707_v8  ;;  %v4204_v3 = vsel %vm4178_vm1, %v4171_v14, %v6708_v39  ;;  %v4172_v25 = vsel %vm4145_vm0, %v4139_v54, %v6702_v17  ;;  %v4173_v6 = vsel %vm4145_vm0, %v4140_v23, %v6703_v26 }
 0x47a   : > { %v6711_v15 = vpop.permute.xlu0 %6710  ;;  %v6716_v49 = vpop.permute.xlu1 %6715  ;;  %v4080_v39 = vsel %vm2209_vm7, %v4048_v24, %v6308_v63  ;;  %v4079_v8 = vsel %vm2209_vm7, %v4047_v57, %v6307_v0  ;;  %v11480_v63 = vld [vmem:[%s11591_s4] ss:$0 sm:$0xff] }
 0x47b   : > { %v6718_v34 = vunpack.i.h.bf16 %v6716_v49  ;;  %v6717_v4 = vunpack.i.l.bf16 %v6716_v49  ;;  %v6713_v52 = vunpack.i.h.bf16 %v6711_v15  ;;  %v6712_v13 = vunpack.i.l.bf16 %v6711_v15 }
 0x47d   : > { %v4236_v22 = vsel %vm4211_vm2, %v4203_v31, %v6717_v4  ;;  %v4237_v32 = vsel %vm4211_vm2, %v4204_v3, %v6718_v34  ;;  %v4205_v2 = vsel %vm4178_vm1, %v4172_v25, %v6712_v13  ;;  %v4206_v42 = vsel %vm4178_vm1, %v4173_v6, %v6713_v52  ;;  %v12986_v52 = vld [vmem:[#allocation111_spill] sm:$0xff] }
 0x47e   : > { %v6721_v27 = vpop.permute.xlu0 %6720  ;;  %v6726_v16 = vpop.permute.xlu1 %6725 }
 0x47f   : > { %v6728_v40 = vunpack.i.h.bf16 %v6726_v16  ;;  %v6727_v18 = vunpack.i.l.bf16 %v6726_v16  ;;  %v6723_v44 = vunpack.i.h.bf16 %v6721_v27  ;;  %v6722_v37 = vunpack.i.l.bf16 %v6721_v27  ;;  %v12985_v27 = vld [vmem:[#allocation162_spill] sm:$0xff] }
 0x481   : > { %v4269_v59 = vsel %vm4244_vm4, %v4236_v22, %v6727_v18  ;;  %v4270_v5 = vsel %vm4244_vm4, %v4237_v32, %v6728_v40  ;;  %v4238_v43 = vsel %vm4211_vm2, %v4205_v2, %v6722_v37  ;;  %v4239_v46 = vsel %vm4211_vm2, %v4206_v42, %v6723_v44 }
 0x482   : > { %v4289_v58 = vpack.c.bf16 %v4270_v5, %v4269_v59  ;;  %v6731_v61 = vpop.permute.xlu0 %6730  ;;  %v6736_v11 = vpop.permute.xlu1 %6735 }
 0x483   : > { %v6733_v9 = vunpack.i.h.bf16 %v6731_v61  ;;  %v6732_v45 = vunpack.i.l.bf16 %v6731_v61  ;;  %v6738_v33 = vunpack.i.h.bf16 %v6736_v11  ;;  %v6737_v10 = vunpack.i.l.bf16 %v6736_v11 }
 0x484   : > { %5031 = vmatprep.mubr.msk.bf16.mxu1 %vm4336_vm5, %v4289_v58 }
 0x485   : > { %v4271_v48 = vsel %vm4244_vm4, %v4238_v43, %v6732_v45  ;;  %v4272_v35 = vsel %vm4244_vm4, %v4239_v46, %v6733_v9  ;;  %v4111_v60 = vsel %vm2319_vm9, %v4079_v8, %v6737_v10  ;;  %v4112_v50 = vsel %vm2319_vm9, %v4080_v39, %v6738_v33 }
 0x486   : > { %v4290_v51 = vpack.c.bf16 %v4272_v35, %v4271_v48  ;;  %v6741_v56 = vpop.permute.xlu0 %6740  ;;  %v6746_v20 = vpop.permute.xlu1 %6745 }
 0x487   : > { %v6743_v21 = vunpack.i.h.bf16 %v6741_v56  ;;  %v6742_v53 = vunpack.i.l.bf16 %v6741_v56  ;;  %v6748_v38 = vunpack.i.h.bf16 %v6746_v20  ;;  %v6747_v19 = vunpack.i.l.bf16 %v6746_v20 }
 0x488   : > { %5032 = vmatmul.mubr.msk.bf16.gmra.mxu1 %vm4336_vm5, %v4290_v51 }
 0x489   : > { %v4142_v16 = vsel %vm2429_vm11, %v12985_v27, %v6743_v21  ;;  %v4141_v13 = vsel %vm2429_vm11, %v12986_v52, %v6742_v53  ;;  %v4143_v40 = vsel %vm2429_vm11, %v4111_v60, %v6747_v19  ;;  %v4144_v18 = vsel %vm2429_vm11, %v4112_v50, %v6748_v38 }
 0x48a   : > { %v6751_v1 = vpop.permute.xlu0 %6750  ;;  %v6756_v29 = vpop.permute.xlu1 %6755 }
 0x48b   : > { %v6753_v34 = vunpack.i.h.bf16 %v6751_v1  ;;  %v6752_v4 = vunpack.i.l.bf16 %v6751_v1  ;;  %v6758_v47 = vunpack.i.h.bf16 %v6756_v29  ;;  %v6757_v62 = vunpack.i.l.bf16 %v6756_v29 }
 0x48d   : > { %v4174_v54 = vsel %vm4145_vm0, %v4141_v13, %v6752_v4  ;;  %v4175_v23 = vsel %vm4145_vm0, %v4142_v16, %v6753_v34  ;;  %v4176_v59 = vsel %vm4145_vm0, %v4143_v40, %v6757_v62  ;;  %v4177_v5 = vsel %vm4145_vm0, %v4144_v18, %v6758_v47 }
 0x48e   : > { %v6761_v15 = vpop.permute.xlu0 %6760  ;;  %v6766_v49 = vpop.permute.xlu1 %6765 }
 0x48f   : > { %v6763_v7 = vunpack.i.h.bf16 %v6761_v15  ;;  %v6762_v14 = vunpack.i.l.bf16 %v6761_v15  ;;  %v6768_v26 = vunpack.i.h.bf16 %v6766_v49  ;;  %v6767_v17 = vunpack.i.l.bf16 %v6766_v49 }
 0x491   : > { %v4207_v25 = vsel %vm4178_vm1, %v4174_v54, %v6762_v14  ;;  %v4208_v6 = vsel %vm4178_vm1, %v4175_v23, %v6763_v7  ;;  %v4209_v58 = vsel %vm4178_vm1, %v4176_v59, %v6767_v17  ;;  %v4210_v61 = vsel %vm4178_vm1, %v4177_v5, %v6768_v26 }
 0x492   : > { %v6771_v31 = vpop.permute.xlu0 %6770  ;;  %v6776_v3 = vpop.permute.xlu1 %6775 }
 0x493   : > { %v6773_v22 = vunpack.i.h.bf16 %v6771_v31  ;;  %v6772_v32 = vunpack.i.l.bf16 %v6771_v31  ;;  %v6778_v44 = vunpack.i.h.bf16 %v6776_v3  ;;  %v6777_v37 = vunpack.i.l.bf16 %v6776_v3 }
 0x495   : > { %v4240_v46 = vsel %vm4211_vm2, %v4207_v25, %v6772_v32  ;;  %v4241_v48 = vsel %vm4211_vm2, %v4208_v6, %v6773_v22  ;;  %v4242_v35 = vsel %vm4211_vm2, %v4209_v58, %v6777_v37  ;;  %v4243_v51 = vsel %vm4211_vm2, %v4210_v61, %v6778_v44 }
 0x496   : > { %v6781_v11 = vpop.permute.xlu0 %6780  ;;  %v6786_v2 = vpop.permute.xlu1 %6785 }
 0x497   : > { %v6783_v42 = vunpack.i.h.bf16 %v6781_v11  ;;  %v6782_v9 = vunpack.i.l.bf16 %v6781_v11  ;;  %v6788_v45 = vunpack.i.h.bf16 %v6786_v2  ;;  %v6787_v43 = vunpack.i.l.bf16 %v6786_v2 }
 0x499   : > { %v4273_v56 = vsel %vm4244_vm4, %v4240_v46, %v6782_v9  ;;  %v4274_v20 = vsel %vm4244_vm4, %v4241_v48, %v6783_v42  ;;  %v4275_v30 = vsel %vm4244_vm4, %v4242_v35, %v6787_v43  ;;  %v4276_v28 = vsel %vm4244_vm4, %v4243_v51, %v6788_v45 }
 0x49a   : > { %v4291_v12 = vpack.c.bf16 %v4274_v20, %v4273_v56  ;;  %v4292_v41 = vpack.c.bf16 %v4276_v28, %v4275_v30 }
 0x49c   : > { %5035 = vmatprep.mubr.msk.bf16.mxu1 %vm4336_vm5, %v4291_v12 }
 0x49d   : > { %5036 = vmatmul.mubr.msk.bf16.gmra.mxu1 %vm4336_vm5, %v4292_v41 }
 0x4d1   : > { %v5009_v0 = vpop.f32.mrf.mxu1 }
 0x4d2   : > { %v4432_v1 = vadd.f32 %v5009_v0, %v11480_v63 }
 0x4d3   : > { %v4423_v29 = vpop.f32.mrf.mxu1 }
 0x4d4   : > { %v4552_v33 = vmax.f32 %v4432_v1, 0.0  ;;  %v4424_v10 = vadd.f32 %v11480_v63, %v4423_v29 }
 0x4d5   : > { %v5010_v36 = vpop.f32.mrf.mxu1 }
 0x4d6   : > { %4584 = vst.msk [vmem:[%s11487_s11 + $0x10] sm:$0xff] %vm2099_vm3, %v4552_v33  ;;  %v4550_v24 = vmax.f32 %v4424_v10, 0.0  ;;  %v4435_v55 = vadd.f32 %v5010_v36, %v11480_v63 }
 0x4d7   : > { %v4426_v57 = vpop.f32.mrf.mxu1 }
 0x4d8   : > { %4582 = vst.msk [vmem:[%s11487_s11] sm:$0xff] %vm2099_vm3, %v4550_v24  ;;  %v4553_v39 = vmax.f32 %v4435_v55, 0.0  ;;  %v4427_v8 = vadd.f32 %v11480_v63, %v4426_v57 }
 0x4da   : > { %4585 = vst.msk [vmem:[%s11487_s11 + $0x18] sm:$0xff] %vm2099_vm3, %v4553_v39  ;;  %v4551_v15 = vmax.f32 %v4427_v8, 0.0 }
 0x4dc   : > { %4583 = vst.msk [vmem:[%s11487_s11 + $0x8] sm:$0xff] %vm2099_vm3, %v4551_v15 }
 0x4e5   : > { %v5013_v49 = vpop.f32.mrf.mxu1 }
 0x4e6   : > { %v4448_v21 = vadd.f32 %v5013_v49, %v11480_v63 }
 0x4e7   : > { %v4439_v53 = vpop.f32.mrf.mxu1 }
 0x4e8   : > { %v4556_v38 = vmax.f32 %v4448_v21, 0.0  ;;  %v4440_v19 = vadd.f32 %v11480_v63, %v4439_v53 }
 0x4e9   : > { %v5014_v60 = vpop.f32.mrf.mxu1 }
 0x4ea   : > { %4588 = vst.msk [vmem:[%s11487_s11 + $0x30] sm:$0xff] %vm2099_vm3, %v4556_v38  ;;  %v4554_v50 = vmax.f32 %v4440_v19, 0.0  ;;  %v4451_v34 = vadd.f32 %v5014_v60, %v11480_v63 }
 0x4eb   : > { %v4442_v4 = vpop.f32.mrf.mxu1 }
 0x4ec   : > { %4586 = vst.msk [vmem:[%s11487_s11 + $0x20] sm:$0xff] %vm2099_vm3, %v4554_v50  ;;  %v4557_v47 = vmax.f32 %v4451_v34, 0.0  ;;  %v4443_v62 = vadd.f32 %v11480_v63, %v4442_v4 }
 0x4ee   : > { %4589 = vst.msk [vmem:[%s11487_s11 + $0x38] sm:$0xff] %vm2099_vm3, %v4557_v47  ;;  %v4555_v7 = vmax.f32 %v4443_v62, 0.0 }
 0x4f0   : > { %4587 = vst.msk [vmem:[%s11487_s11 + $0x28] sm:$0xff] %vm2099_vm3, %v4555_v7 }
 0x4f8   : > { %v5017_v14 = vpop.f32.mrf.mxu1 }
 0x4f9   : > { %v4464_v26 = vadd.f32 %v5017_v14, %v11480_v63 }
 0x4fa   : > { %v4455_v17 = vpop.f32.mrf.mxu1 }
 0x4fb   : > { %v4560_v31 = vmax.f32 %v4464_v26, 0.0  ;;  %v4456_v3 = vadd.f32 %v11480_v63, %v4455_v17 }
 0x4fc   : > { %v5018_v27 = vpop.f32.mrf.mxu1 }
 0x4fd   : > { %4592 = vst.msk [vmem:[%s11487_s11 + $0x50] sm:$0xff] %vm2099_vm3, %v4560_v31  ;;  %v4558_v16 = vmax.f32 %v4456_v3, 0.0  ;;  %v4467_v52 = vadd.f32 %v5018_v27, %v11480_v63 }
 0x4fe   : > { %v4458_v13 = vpop.f32.mrf.mxu1 }
 0x4ff   : > { %4590 = vst.msk [vmem:[%s11487_s11 + $0x40] sm:$0xff] %vm2099_vm3, %v4558_v16  ;;  %v4561_v40 = vmax.f32 %v4467_v52, 0.0  ;;  %v4459_v18 = vadd.f32 %v11480_v63, %v4458_v13 }
 0x501   : > { %4593 = vst.msk [vmem:[%s11487_s11 + $0x58] sm:$0xff] %vm2099_vm3, %v4561_v40  ;;  %v4559_v22 = vmax.f32 %v4459_v18, 0.0 }
 0x503   : > { %4591 = vst.msk [vmem:[%s11487_s11 + $0x48] sm:$0xff] %vm2099_vm3, %v4559_v22 }
 0x50c   : > { %v5021_v32 = vpop.f32.mrf.mxu1 }
 0x50d   : > { %v4480_v44 = vadd.f32 %v5021_v32, %v11480_v63 }
 0x50e   : > { %v4471_v37 = vpop.f32.mrf.mxu1 }
 0x50f   : > { %v4564_v54 = vmax.f32 %v4480_v44, 0.0  ;;  %v4472_v23 = vadd.f32 %v11480_v63, %v4471_v37 }
 0x510   : > { %v5022_v59 = vpop.f32.mrf.mxu1 }
 0x511   : > { %4596 = vst.msk [vmem:[%s11487_s11 + $0x70] sm:$0xff] %vm2099_vm3, %v4564_v54  ;;  %v4562_v5 = vmax.f32 %v4472_v23, 0.0  ;;  %v4483_v25 = vadd.f32 %v5022_v59, %v11480_v63 }
 0x512   : > { %v4474_v6 = vpop.f32.mrf.mxu1 }
 0x513   : > { %4594 = vst.msk [vmem:[%s11487_s11 + $0x60] sm:$0xff] %vm2099_vm3, %v4562_v5  ;;  %v4565_v58 = vmax.f32 %v4483_v25, 0.0  ;;  %v4475_v61 = vadd.f32 %v11480_v63, %v4474_v6 }
 0x515   : > { %4597 = vst.msk [vmem:[%s11487_s11 + $0x78] sm:$0xff] %vm2099_vm3, %v4565_v58  ;;  %v4563_v11 = vmax.f32 %v4475_v61, 0.0 }
 0x517   : > { %4595 = vst.msk [vmem:[%s11487_s11 + $0x68] sm:$0xff] %vm2099_vm3, %v4563_v11 }
 0x520   : > { %v5025_v2 = vpop.f32.mrf.mxu1 }
 0x521   : > { %v4496_v42 = vadd.f32 %v5025_v2, %v11480_v63 }
 0x522   : > { %v4487_v9 = vpop.f32.mrf.mxu1 }
 0x523   : > { %v4568_v45 = vmax.f32 %v4496_v42, 0.0  ;;  %v4488_v43 = vadd.f32 %v11480_v63, %v4487_v9 }
 0x524   : > { %v5026_v46 = vpop.f32.mrf.mxu1 }
 0x525   : > { %4600 = vst.msk [vmem:[%s11487_s11 + $0x90] sm:$0xff] %vm2099_vm3, %v4568_v45  ;;  %v4566_v48 = vmax.f32 %v4488_v43, 0.0  ;;  %v4499_v35 = vadd.f32 %v5026_v46, %v11480_v63 }
 0x526   : > { %v4490_v51 = vpop.f32.mrf.mxu1 }
 0x527   : > { %4598 = vst.msk [vmem:[%s11487_s11 + $0x80] sm:$0xff] %vm2099_vm3, %v4566_v48  ;;  %v4569_v56 = vmax.f32 %v4499_v35, 0.0  ;;  %v4491_v20 = vadd.f32 %v11480_v63, %v4490_v51 }
 0x529   : > { %4601 = vst.msk [vmem:[%s11487_s11 + $0x98] sm:$0xff] %vm2099_vm3, %v4569_v56  ;;  %v4567_v30 = vmax.f32 %v4491_v20, 0.0 }
 0x52b   : > { %4599 = vst.msk [vmem:[%s11487_s11 + $0x88] sm:$0xff] %vm2099_vm3, %v4567_v30 }
 0x534   : > { %v5029_v28 = vpop.f32.mrf.mxu1 }
 0x535   : > { %v4512_v12 = vadd.f32 %v5029_v28, %v11480_v63 }
 0x536   : > { %v4503_v41 = vpop.f32.mrf.mxu1 }
 0x537   : > { %v4572_v0 = vmax.f32 %v4512_v12, 0.0  ;;  %v4504_v1 = vadd.f32 %v11480_v63, %v4503_v41 }
 0x538   : > { %v5030_v29 = vpop.f32.mrf.mxu1 }
 0x539   : > { %4604 = vst.msk [vmem:[%s11487_s11 + $0xb0] sm:$0xff] %vm2099_vm3, %v4572_v0  ;;  %v4570_v33 = vmax.f32 %v4504_v1, 0.0  ;;  %v4515_v10 = vadd.f32 %v5030_v29, %v11480_v63 }
 0x53a   : > { %v4506_v36 = vpop.f32.mrf.mxu1 }
 0x53b   : > { %4602 = vst.msk [vmem:[%s11487_s11 + $0xa0] sm:$0xff] %vm2099_vm3, %v4570_v33  ;;  %v4573_v24 = vmax.f32 %v4515_v10, 0.0  ;;  %v4507_v55 = vadd.f32 %v11480_v63, %v4506_v36 }
 0x53d   : > { %4605 = vst.msk [vmem:[%s11487_s11 + $0xb8] sm:$0xff] %vm2099_vm3, %v4573_v24  ;;  %v4571_v57 = vmax.f32 %v4507_v55, 0.0 }
 0x53f   : > { %4603 = vst.msk [vmem:[%s11487_s11 + $0xa8] sm:$0xff] %vm2099_vm3, %v4571_v57 }
 0x548   : > { %v5033_v39 = vpop.f32.mrf.mxu1 }
 0x549   : > { %v4528_v8 = vadd.f32 %v5033_v39, %v11480_v63 }
 0x54a   : > { %v4519_v15 = vpop.f32.mrf.mxu1 }
 0x54b   : > { %v4576_v49 = vmax.f32 %v4528_v8, 0.0  ;;  %v4520_v21 = vadd.f32 %v11480_v63, %v4519_v15 }
 0x54c   : > { %v5034_v53 = vpop.f32.mrf.mxu1 }
 0x54d   : > { %4608 = vst.msk [vmem:[%s11487_s11 + $0xd0] sm:$0xff] %vm2099_vm3, %v4576_v49  ;;  %v4574_v38 = vmax.f32 %v4520_v21, 0.0  ;;  %v4531_v19 = vadd.f32 %v5034_v53, %v11480_v63 }
 0x54e   : > { %v4522_v60 = vpop.f32.mrf.mxu1 }
 0x54f   : > { %4606 = vst.msk [vmem:[%s11487_s11 + $0xc0] sm:$0xff] %vm2099_vm3, %v4574_v38  ;;  %v4577_v50 = vmax.f32 %v4531_v19, 0.0  ;;  %v4523_v34 = vadd.f32 %v11480_v63, %v4522_v60 }
 0x551   : > { %4609 = vst.msk [vmem:[%s11487_s11 + $0xd8] sm:$0xff] %vm2099_vm3, %v4577_v50  ;;  %v4575_v4 = vmax.f32 %v4523_v34, 0.0 }
 0x553   : > { %4607 = vst.msk [vmem:[%s11487_s11 + $0xc8] sm:$0xff] %vm2099_vm3, %v4575_v4 }
 0x55d   : > { %v5037_v47 = vpop.f32.mrf.mxu1 }
 0x55e   : > { %v4544_v62 = vadd.f32 %v5037_v47, %v11480_v63 }
 0x55f   : > { %v4535_v7 = vpop.f32.mrf.mxu1 }
 0x560   : > { %v4580_v14 = vmax.f32 %v4544_v62, 0.0  ;;  %v4536_v26 = vadd.f32 %v11480_v63, %v4535_v7 }
 0x561   : > { %v5038_v17 = vpop.f32.mrf.mxu1 }
 0x562   : > { %4612 = vst.msk [vmem:[%s11487_s11 + $0xf0] sm:$0xff] %vm2099_vm3, %v4580_v14  ;;  %v4578_v31 = vmax.f32 %v4536_v26, 0.0  ;;  %v4547_v3 = vadd.f32 %v5038_v17, %v11480_v63 }
 0x563   : > { %v4538_v27 = vpop.f32.mrf.mxu1 }
 0x564   : > { %4610 = vst.msk [vmem:[%s11487_s11 + $0xe0] sm:$0xff] %vm2099_vm3, %v4578_v31  ;;  %v4581_v16 = vmax.f32 %v4547_v3, 0.0  ;;  %v4539_v52 = vadd.f32 %v11480_v63, %v4538_v27 }
 0x566   : > { %4613 = vst.msk [vmem:[%s11487_s11 + $0xf8] sm:$0xff] %vm2099_vm3, %v4581_v16  ;;  %v4579_v13 = vmax.f32 %v4539_v52, 0.0 }
 0x568   : > { %4611 = vst.msk [vmem:[%s11487_s11 + $0xe8] sm:$0xff] %vm2099_vm3, %v4579_v13 }
 0x569 PF: > { %s15_s18 = sadd.s32 1, %s6803_s18  }
 0x56a   : > { %p12_p4 = scmp.ge.s32.totalorder %s15_s18, 4  }
 0x56c   :  { %14 = sbr.rel (!%p12_p4) target bundleno = 1 (0x1), region = 70 }

</bundles_post_ra>
